<compile_context>
chip_gen: v5e
topology: v5e:2x2
jax: 0.10.0
libtpu: 0.0.40
codegen_flags: <defaults>
</compile_context>

<pallas_src>
from functools import partial

import jax
import jax.numpy as jnp
import numpy as np
from jax.experimental import pallas as pl
from jax.experimental.pallas import tpu as pltpu

# ---- FastSpeech defaults: fft_conv1d_kernel=(9,1), fft_conv1d_padding=(4,0) ----
K1, PAD1 = 9, 4
K2, PAD2 = 1, 0


def _ffn_kernel(xb_ref, xt_ref, w1_ref, b1_ref, w2_ref, b2_ref, out_ref):
    # xb_ref  : (1, tile_t, d_in)      f32  body rows of the halo window
    # xt_ref  : (1, 1, K1-1, d_in)     f32  halo tail (first K1-1 rows of next tile)
    # w1_ref  : (K1*d_in, d_hid)       bf16 conv1 weights, im2col (tap-major) layout
    # b1_ref  : (1, d_hid)             f32
    # w2_ref  : (d_hid, d_in)          bf16 conv2 (k=1) weights
    # b2_ref  : (1, d_in)              f32
    # out_ref : (1, tile_t, d_in)      f32
    tile_t = out_ref.shape[1]

    xb = xb_ref[0]       # (tile_t, d_in)  f32
    xt = xt_ref[0, 0]    # (K1-1,  d_in)   f32

    # Full halo window (tile_t + K1 - 1, d_in); the concat offset (tile_t) is
    # 8-aligned, so this is a cheap sublane-aligned placement.
    xh = jnp.concatenate([xb, xt], axis=0)
    xh_bf = xh.astype(jnp.bfloat16)          # cast once, only for the MXU path

    # Conv1d(d_in -> d_hid, k=9, pad=4) as a single im2col matmul:
    # lanes ordered tap-major (k*d_in + c), matching w1_ref's layout.
    xcol = jnp.concatenate([xh_bf[k:k + tile_t, :] for k in range(K1)], axis=1)
    h = jnp.dot(xcol, w1_ref[...], preferred_element_type=jnp.float32) + b1_ref[...]

    # Bias + ReLU in f32 on the VPU (v5e has no bf16 VALU).
    h = jnp.maximum(h, 0.0)

    # Conv1d(d_hid -> d_in, k=1) == dense matmul over channels; feed MXU in bf16.
    out = jnp.dot(h.astype(jnp.bfloat16), w2_ref[...],
                  preferred_element_type=jnp.float32) + b2_ref[...]

    # Exact f32 residual: original x rows are halo rows [PAD1 : PAD1 + tile_t].
    res = jnp.concatenate([xb[PAD1:, :], xt[:PAD1, :]], axis=0)

    # TODO(synk): dropout is identity here (eval mode); training-mode dropout
    # would need pltpu.prng_seed + pltpu.prng_random_bits masking.
    out_ref[0] = (out + res).astype(out_ref.dtype)


def prepare_params(w1, b1, w2, b2):
    """One-time per-model layout prep (hoisted out of the per-call path).

    w1: (d_hid, d_in, K1)  PyTorch Conv1d weight layout
    b1: (d_hid,)
    w2: (d_in, d_hid, K2=1)
    b2: (d_in,)
    """
    d_hid, d_in, k1 = w1.shape
    assert k1 == K1 and w2.shape[2] == K2
    # im2col weight: W[k*d_in + c, o] = w1[o, c, k]
    w1c = jnp.transpose(w1, (2, 1, 0)).reshape(K1 * d_in, d_hid).astype(jnp.bfloat16)
    w2c = jnp.transpose(w2[:, :, 0], (1, 0)).astype(jnp.bfloat16)     # (d_hid, d_in)
    b1r = b1.reshape(1, d_hid).astype(jnp.float32)
    b2r = b2.reshape(1, d_in).astype(jnp.float32)
    return w1c, b1r, w2c, b2r


@partial(jax.jit,
         static_argnames=("tile_t", "vmem_limit_bytes", "single_buffer_weights"))
def _ffn_apply(x, w1c, b1r, w2c, b2r, *, tile_t, vmem_limit_bytes,
               single_buffer_weights):
    B, T, d_in = x.shape
    d_hid = w1c.shape[1]
    assert w1c.shape[0] == K1 * d_in
    assert tile_t % 8 == 0, "tile_t must be a multiple of 8 (sublane granularity)"
    assert d_in % 128 == 0 and d_hid % 128 == 0, (
        "d_in and d_hid must be multiples of 128 (lane-dense stores / MXU tiles); "
        "pad channels for non-aligned configs")

    n_t = pl.cdiv(T, tile_t)
    t_pad = n_t * tile_t

    # ---- glue: one zero-pad pass over x (no duplicated halo copy) ------------
    # x_full row i corresponds to original x row i - PAD1 (zero outside [0, T)).
    x_full = jnp.pad(x, ((0, 0), (PAD1, (K1 - 1 - PAD1) + (t_pad - T)), (0, 0)))
    x_body = x_full[:, :t_pad, :]                          # (B, t_pad, d_in) f32
    # Halo tail for tile t = rows [(t+1)*tile_t, (t+1)*tile_t + K1-1) of x_full.
    tail_idx = (np.arange(1, n_t + 1)[:, None] * tile_t
                + np.arange(K1 - 1)[None, :]).reshape(-1)
    x_tail = x_full[:, tail_idx, :].reshape(B, n_t, K1 - 1, d_in)

    wmode = {"pipeline_mode": pl.Buffered(1)} if single_buffer_weights else {}

    out = pl.pallas_call(
        _ffn_kernel,
        out_shape=jax.ShapeDtypeStruct((B, t_pad, d_in), x.dtype),
        grid_spec=pltpu.PrefetchScalarGridSpec(
            num_scalar_prefetch=0,
            grid=(B, n_t),
            in_specs=[
                pl.BlockSpec((1, tile_t, d_in), lambda b, t: (b, t, 0)),
                pl.BlockSpec((1, 1, K1 - 1, d_in), lambda b, t: (b, t, 0, 0)),
                pl.BlockSpec((K1 * d_in, d_hid), lambda b, t: (0, 0), **wmode),
                pl.BlockSpec((1, d_hid), lambda b, t: (0, 0), **wmode),
                pl.BlockSpec((d_hid, d_in), lambda b, t: (0, 0), **wmode),
                pl.BlockSpec((1, d_in), lambda b, t: (0, 0), **wmode),
            ],
            out_specs=pl.BlockSpec((1, tile_t, d_in), lambda b, t: (b, t, 0)),
        ),
        compiler_params=pltpu.CompilerParams(
            dimension_semantics=("parallel", "parallel"),
            vmem_limit_bytes=vmem_limit_bytes),
    )(x_body, x_tail, w1c, b1r, w2c, b2r)

    return out[:, :T, :]


def positionwise_feed_forward(x, params, *, tile_t=256,
                              vmem_limit_bytes=48 * 1024 * 1024):
    """x: (B, T, d_in) f32; params = prepare_params(w1, b1, w2, b2).

    tile_t (multiple of 8): 256-512 on v7x (64 MiB VMEM), 512-1024 on v5e/v6e
    (128 MiB VMEM; raise vmem_limit_bytes to 64-96 MiB for tile_t >= 512).
    For B == 1 keep tile_t <= T/2 so both v7x TensorCores get grid work.
    """
    try:
        return _ffn_apply(x, *params, tile_t=tile_t,
                          vmem_limit_bytes=vmem_limit_bytes,
                          single_buffer_weights=True)
    except Exception:
        # Fallback for jax versions that reject pl.Buffered(buffer_count=1).
        return _ffn_apply(x, *params, tile_t=tile_t,
                          vmem_limit_bytes=vmem_limit_bytes,
                          single_buffer_weights=False)


def _reference(x, w1, b1, w2, b2):
    # Pure-JAX f32 reference mirroring the PyTorch forward (eval mode).
    B, T, d_in = x.shape
    x_pad = jnp.pad(x, ((0, 0), (PAD1, PAD1), (0, 0)))
    h = sum(jnp.einsum("btc,hc->bth", x_pad[:, k:k + T, :], w1[:, :, k])
            for k in range(K1)) + b1
    h = jnp.maximum(h, 0.0)
    out = jnp.einsum("bth,oh->bto", h, w2[:, :, 0]) + b2
    return out + x


if __name__ == "__main__":
    # Small but lane-aligned demo shapes (d_in, d_hid multiples of 128 -> dense
    # stores + MXU-friendly contractions).  Production FastSpeech is
    # d_in=256, d_hid=1024, which is also aligned.
    B, T, d_in, d_hid = 2, 256, 128, 256

    key = jax.random.PRNGKey(0)
    kx, kw1, kb1, kw2, kb2 = jax.random.split(key, 5)

    x = jax.random.normal(kx, (B, T, d_in), dtype=jnp.float32)

    # Deterministic param init, matching PyTorch Conv1d defaults (uniform bound).
    bound1 = 1.0 / np.sqrt(d_in * K1)
    w1 = jax.random.uniform(kw1, (d_hid, d_in, K1), jnp.float32, -bound1, bound1)
    b1 = jax.random.uniform(kb1, (d_hid,), jnp.float32, -bound1, bound1)
    bound2 = 1.0 / np.sqrt(d_hid * K2)
    w2 = jax.random.uniform(kw2, (d_in, d_hid, K2), jnp.float32, -bound2, bound2)
    b2 = jax.random.uniform(kb2, (d_in,), jnp.float32, -bound2, bound2)

    params = prepare_params(w1, b1, w2, b2)     # one-time layout prep
    # tile_t=128 here so the demo exercises halo handling across multiple tiles.
    out = positionwise_feed_forward(x, params, tile_t=128)
    out = jax.block_until_ready(out)

    ref = _reference(x, w1, b1, w2, b2)
    # Tolerance accounts for bf16 MXU inputs (f32 accumulation, f32 residual).
    np.testing.assert_allclose(np.asarray(out), np.asarray(ref),
                               rtol=3e-2, atol=3e-2)

    print("KERNEL_OK")
</pallas_src>

<mosaic_0001>
module attributes {stable_mosaic.version = 11 : i64} {
  func.func @_ffn_kernel(%arg0: i32, %arg1: i32, %arg2: memref<1x128x128xf32, #tpu.memory_space<vmem>>, %arg3: memref<1x1x8x128xf32, #tpu.memory_space<vmem>>, %arg4: memref<1152x256xbf16, #tpu.memory_space<vmem>>, %arg5: memref<1x256xf32, #tpu.memory_space<vmem>>, %arg6: memref<256x128xbf16, #tpu.memory_space<vmem>>, %arg7: memref<1x128xf32, #tpu.memory_space<vmem>>, %arg8: memref<1x128x128xf32, #tpu.memory_space<vmem>>) attributes {dimension_semantics = [#tpu.dimension_semantics<parallel>, #tpu.dimension_semantics<parallel>], iteration_bounds = array<i64: 2, 2>, scalar_prefetch = 0 : i64, scratch_operands = 0 : i64, tpu.core_type = #tpu.core_type<tc>, window_params = [{transform_indices = @transform_0, window_bounds = array<i64: 1, 128, 128>}, {transform_indices = @transform_1, window_bounds = array<i64: 1, 1, 8, 128>}, {pipeline_mode = #tpu.pipeline_mode<synchronous>, transform_indices = @transform_2, window_bounds = array<i64: 1152, 256>}, {pipeline_mode = #tpu.pipeline_mode<synchronous>, transform_indices = @transform_3, window_bounds = array<i64: 1, 256>}, {pipeline_mode = #tpu.pipeline_mode<synchronous>, transform_indices = @transform_4, window_bounds = array<i64: 256, 128>}, {pipeline_mode = #tpu.pipeline_mode<synchronous>, transform_indices = @transform_5, window_bounds = array<i64: 1, 128>}, {transform_indices = @transform_6, window_bounds = array<i64: 1, 128, 128>}]} {
    %c0 = arith.constant 0 : index
    %c0_0 = arith.constant 0 : index
    %c0_1 = arith.constant 0 : index
    %0 = vector.load %arg2[%c0, %c0_0, %c0_1] : memref<1x128x128xf32, #tpu.memory_space<vmem>>, vector<1x128x128xf32>
    %1 = vector.shape_cast %0 : vector<1x128x128xf32> to vector<128x128xf32>
    %c0_2 = arith.constant 0 : index
    %c0_3 = arith.constant 0 : index
    %c0_4 = arith.constant 0 : index
    %c0_5 = arith.constant 0 : index
    %2 = vector.load %arg3[%c0_2, %c0_3, %c0_4, %c0_5] : memref<1x1x8x128xf32, #tpu.memory_space<vmem>>, vector<1x1x8x128xf32>
    %3 = vector.shape_cast %2 : vector<1x1x8x128xf32> to vector<8x128xf32>
    %4 = tpu.concatenate %1, %3 in 0 : vector<128x128xf32>, vector<8x128xf32> -> vector<136x128xf32>
    %5 = arith.truncf %4 : vector<136x128xf32> to vector<136x128xbf16>
    %6 = vector.extract_strided_slice %5 {offsets = [0, 0], sizes = [128, 128], strides = [1, 1]} : vector<136x128xbf16> to vector<128x128xbf16>
    %7 = vector.extract_strided_slice %5 {offsets = [1, 0], sizes = [128, 128], strides = [1, 1]} : vector<136x128xbf16> to vector<128x128xbf16>
    %8 = vector.extract_strided_slice %5 {offsets = [2, 0], sizes = [128, 128], strides = [1, 1]} : vector<136x128xbf16> to vector<128x128xbf16>
    %9 = vector.extract_strided_slice %5 {offsets = [3, 0], sizes = [128, 128], strides = [1, 1]} : vector<136x128xbf16> to vector<128x128xbf16>
    %10 = vector.extract_strided_slice %5 {offsets = [4, 0], sizes = [128, 128], strides = [1, 1]} : vector<136x128xbf16> to vector<128x128xbf16>
    %11 = vector.extract_strided_slice %5 {offsets = [5, 0], sizes = [128, 128], strides = [1, 1]} : vector<136x128xbf16> to vector<128x128xbf16>
    %12 = vector.extract_strided_slice %5 {offsets = [6, 0], sizes = [128, 128], strides = [1, 1]} : vector<136x128xbf16> to vector<128x128xbf16>
    %13 = vector.extract_strided_slice %5 {offsets = [7, 0], sizes = [128, 128], strides = [1, 1]} : vector<136x128xbf16> to vector<128x128xbf16>
    %14 = vector.extract_strided_slice %5 {offsets = [8, 0], sizes = [128, 128], strides = [1, 1]} : vector<136x128xbf16> to vector<128x128xbf16>
    %15 = tpu.concatenate %6, %7, %8, %9, %10, %11, %12, %13, %14 in 1 : vector<128x128xbf16>, vector<128x128xbf16>, vector<128x128xbf16>, vector<128x128xbf16>, vector<128x128xbf16>, vector<128x128xbf16>, vector<128x128xbf16>, vector<128x128xbf16>, vector<128x128xbf16> -> vector<128x1152xbf16>
    %c0_6 = arith.constant 0 : index
    %c0_7 = arith.constant 0 : index
    %16 = vector.load %arg4[%c0_6, %c0_7] : memref<1152x256xbf16, #tpu.memory_space<vmem>>, vector<1152x256xbf16>
    %cst = arith.constant dense<0.000000e+00> : vector<128x256xf32>
    %17 = tpu.matmul %15, %16, %cst {dimension_numbers = #tpu.dot_dimension_numbers<[1], [0], [0], [1], [0, 0, 1, 1], [], []>} : vector<128x1152xbf16>, vector<1152x256xbf16>, vector<128x256xf32> -> vector<128x256xf32>
    %c0_8 = arith.constant 0 : index
    %c0_9 = arith.constant 0 : index
    %18 = vector.load %arg5[%c0_8, %c0_9] : memref<1x256xf32, #tpu.memory_space<vmem>>, vector<1x256xf32>
    %19 = vector.broadcast %18 : vector<1x256xf32> to vector<128x256xf32>
    %20 = arith.addf %17, %19 : vector<128x256xf32>
    %cst_10 = arith.constant 0.000000e+00 : f32
    %21 = vector.broadcast %cst_10 : f32 to vector<128x256xf32>
    %22 = arith.maximumf %20, %21 : vector<128x256xf32>
    %23 = arith.truncf %22 : vector<128x256xf32> to vector<128x256xbf16>
    %c0_11 = arith.constant 0 : index
    %c0_12 = arith.constant 0 : index
    %24 = vector.load %arg6[%c0_11, %c0_12] : memref<256x128xbf16, #tpu.memory_space<vmem>>, vector<256x128xbf16>
    %cst_13 = arith.constant dense<0.000000e+00> : vector<128x128xf32>
    %25 = tpu.matmul %23, %24, %cst_13 {dimension_numbers = #tpu.dot_dimension_numbers<[1], [0], [0], [1], [0, 0, 1, 1], [], []>} : vector<128x256xbf16>, vector<256x128xbf16>, vector<128x128xf32> -> vector<128x128xf32>
    %c0_14 = arith.constant 0 : index
    %c0_15 = arith.constant 0 : index
    %26 = vector.load %arg7[%c0_14, %c0_15] : memref<1x128xf32, #tpu.memory_space<vmem>>, vector<1x128xf32>
    %27 = vector.broadcast %26 : vector<1x128xf32> to vector<128x128xf32>
    %28 = arith.addf %25, %27 : vector<128x128xf32>
    %29 = vector.extract_strided_slice %1 {offsets = [4, 0], sizes = [124, 128], strides = [1, 1]} : vector<128x128xf32> to vector<124x128xf32>
    %30 = vector.extract_strided_slice %3 {offsets = [0, 0], sizes = [4, 128], strides = [1, 1]} : vector<8x128xf32> to vector<4x128xf32>
    %31 = tpu.concatenate %29, %30 in 0 : vector<124x128xf32>, vector<4x128xf32> -> vector<128x128xf32>
    %32 = arith.addf %28, %31 : vector<128x128xf32>
    %c0_16 = arith.constant 0 : index
    %c0_17 = arith.constant 0 : index
    %c0_18 = arith.constant 0 : index
    %33 = vector.load %arg8[%c0_16, %c0_17, %c0_18] : memref<1x128x128xf32, #tpu.memory_space<vmem>>, vector<1x128x128xf32>
    %34 = vector.shape_cast %33 : vector<1x128x128xf32> to vector<128x128xf32>
    %35 = vector.shape_cast %32 : vector<128x128xf32> to vector<1x128x128xf32>
    tpu.vector_store %arg8[%c0_16, %c0_17, %c0_18], %35 {strides = array<i32>} : memref<1x128x128xf32, #tpu.memory_space<vmem>>, vector<1x128x128xf32>,
    return
  }
  func.func @transform_0(%arg0: i32, %arg1: i32) -> (i32, i32, i32) {
    %c0_i32 = arith.constant 0 : i32
    %c0_i32_0 = arith.constant 0 : i32
    return %arg0, %arg1, %c0_i32 : i32, i32, i32
  }
  func.func @transform_1(%arg0: i32, %arg1: i32) -> (i32, i32, i32, i32) {
    %c0_i32 = arith.constant 0 : i32
    %c0_i32_0 = arith.constant 0 : i32
    %c0_i32_1 = arith.constant 0 : i32
    return %arg0, %arg1, %c0_i32, %c0_i32_0 : i32, i32, i32, i32
  }
  func.func @transform_2(%arg0: i32, %arg1: i32) -> (i32, i32) {
    %c0_i32 = arith.constant 0 : i32
    %c0_i32_0 = arith.constant 0 : i32
    %c0_i32_1 = arith.constant 0 : i32
    return %c0_i32, %c0_i32_0 : i32, i32
  }
  func.func @transform_3(%arg0: i32, %arg1: i32) -> (i32, i32) {
    %c0_i32 = arith.constant 0 : i32
    %c0_i32_0 = arith.constant 0 : i32
    %c0_i32_1 = arith.constant 0 : i32
    return %c0_i32, %c0_i32_0 : i32, i32
  }
  func.func @transform_4(%arg0: i32, %arg1: i32) -> (i32, i32) {
    %c0_i32 = arith.constant 0 : i32
    %c0_i32_0 = arith.constant 0 : i32
    %c0_i32_1 = arith.constant 0 : i32
    return %c0_i32, %c0_i32_0 : i32, i32
  }
  func.func @transform_5(%arg0: i32, %arg1: i32) -> (i32, i32) {
    %c0_i32 = arith.constant 0 : i32
    %c0_i32_0 = arith.constant 0 : i32
    %c0_i32_1 = arith.constant 0 : i32
    return %c0_i32, %c0_i32_0 : i32, i32
  }
  func.func @transform_6(%arg0: i32, %arg1: i32) -> (i32, i32, i32) {
    %c0_i32 = arith.constant 0 : i32
    %c0_i32_0 = arith.constant 0 : i32
    return %arg0, %arg1, %c0_i32 : i32, i32, i32
  }
}

module attributes {stable_mosaic.version = 11 : i64} {
  func.func @_ffn_kernel(%arg0: i32, %arg1: i32, %arg2: memref<1x128x128xf32, #tpu.memory_space<vmem>>, %arg3: memref<1x1x8x128xf32, #tpu.memory_space<vmem>>, %arg4: memref<1152x256xbf16, #tpu.memory_space<vmem>>, %arg5: memref<1x256xf32, #tpu.memory_space<vmem>>, %arg6: memref<256x128xbf16, #tpu.memory_space<vmem>>, %arg7: memref<1x128xf32, #tpu.memory_space<vmem>>, %arg8: memref<1x128x128xf32, #tpu.memory_space<vmem>>) attributes {dimension_semantics = [#tpu.dimension_semantics<parallel>, #tpu.dimension_semantics<parallel>], iteration_bounds = array<i64: 2, 2>, scalar_prefetch = 0 : i64, scratch_operands = 0 : i64, tpu.core_type = #tpu.core_type<tc>, window_params = [{transform_indices = @transform_0, window_bounds = array<i64: 1, 128, 128>}, {transform_indices = @transform_1, window_bounds = array<i64: 1, 1, 8, 128>}, {pipeline_mode = #tpu.pipeline_mode<synchronous>, transform_indices = @transform_2, window_bounds = array<i64: 1152, 256>}, {pipeline_mode = #tpu.pipeline_mode<synchronous>, transform_indices = @transform_3, window_bounds = array<i64: 1, 256>}, {pipeline_mode = #tpu.pipeline_mode<synchronous>, transform_indices = @transform_4, window_bounds = array<i64: 256, 128>}, {pipeline_mode = #tpu.pipeline_mode<synchronous>, transform_indices = @transform_5, window_bounds = array<i64: 1, 128>}, {transform_indices = @transform_6, window_bounds = array<i64: 1, 128, 128>}]} {
    %c0 = arith.constant 0 : index
    %c0_0 = arith.constant 0 : index
    %c0_1 = arith.constant 0 : index
    %0 = vector.load %arg2[%c0, %c0_0, %c0_1] : memref<1x128x128xf32, #tpu.memory_space<vmem>>, vector<1x128x128xf32>
    %1 = vector.shape_cast %0 : vector<1x128x128xf32> to vector<128x128xf32>
    %c0_2 = arith.constant 0 : index
    %c0_3 = arith.constant 0 : index
    %c0_4 = arith.constant 0 : index
    %c0_5 = arith.constant 0 : index
    %2 = vector.load %arg3[%c0_2, %c0_3, %c0_4, %c0_5] : memref<1x1x8x128xf32, #tpu.memory_space<vmem>>, vector<1x1x8x128xf32>
    %3 = vector.shape_cast %2 : vector<1x1x8x128xf32> to vector<8x128xf32>
    %4 = tpu.concatenate %1, %3 in 0 : vector<128x128xf32>, vector<8x128xf32> -> vector<136x128xf32>
    %5 = arith.truncf %4 : vector<136x128xf32> to vector<136x128xbf16>
    %6 = vector.extract_strided_slice %5 {offsets = [0, 0], sizes = [128, 128], strides = [1, 1]} : vector<136x128xbf16> to vector<128x128xbf16>
    %7 = vector.extract_strided_slice %5 {offsets = [1, 0], sizes = [128, 128], strides = [1, 1]} : vector<136x128xbf16> to vector<128x128xbf16>
    %8 = vector.extract_strided_slice %5 {offsets = [2, 0], sizes = [128, 128], strides = [1, 1]} : vector<136x128xbf16> to vector<128x128xbf16>
    %9 = vector.extract_strided_slice %5 {offsets = [3, 0], sizes = [128, 128], strides = [1, 1]} : vector<136x128xbf16> to vector<128x128xbf16>
    %10 = vector.extract_strided_slice %5 {offsets = [4, 0], sizes = [128, 128], strides = [1, 1]} : vector<136x128xbf16> to vector<128x128xbf16>
    %11 = vector.extract_strided_slice %5 {offsets = [5, 0], sizes = [128, 128], strides = [1, 1]} : vector<136x128xbf16> to vector<128x128xbf16>
    %12 = vector.extract_strided_slice %5 {offsets = [6, 0], sizes = [128, 128], strides = [1, 1]} : vector<136x128xbf16> to vector<128x128xbf16>
    %13 = vector.extract_strided_slice %5 {offsets = [7, 0], sizes = [128, 128], strides = [1, 1]} : vector<136x128xbf16> to vector<128x128xbf16>
    %14 = vector.extract_strided_slice %5 {offsets = [8, 0], sizes = [128, 128], strides = [1, 1]} : vector<136x128xbf16> to vector<128x128xbf16>
    %15 = tpu.concatenate %6, %7, %8, %9, %10, %11, %12, %13, %14 in 1 : vector<128x128xbf16>, vector<128x128xbf16>, vector<128x128xbf16>, vector<128x128xbf16>, vector<128x128xbf16>, vector<128x128xbf16>, vector<128x128xbf16>, vector<128x128xbf16>, vector<128x128xbf16> -> vector<128x1152xbf16>
    %c0_6 = arith.constant 0 : index
    %c0_7 = arith.constant 0 : index
    %16 = vector.load %arg4[%c0_6, %c0_7] : memref<1152x256xbf16, #tpu.memory_space<vmem>>, vector<1152x256xbf16>
    %cst = arith.constant dense<0.000000e+00> : vector<128x256xf32>
    %17 = tpu.matmul %15, %16, %cst {dimension_numbers = #tpu.dot_dimension_numbers<[1], [0], [0], [1], [0, 0, 1, 1], [], []>} : vector<128x1152xbf16>, vector<1152x256xbf16>, vector<128x256xf32> -> vector<128x256xf32>
    %c0_8 = arith.constant 0 : index
    %c0_9 = arith.constant 0 : index
    %18 = vector.load %arg5[%c0_8, %c0_9] : memref<1x256xf32, #tpu.memory_space<vmem>>, vector<1x256xf32>
    %19 = vector.broadcast %18 : vector<1x256xf32> to vector<128x256xf32>
    %20 = arith.addf %17, %19 : vector<128x256xf32>
    %cst_10 = arith.constant 0.000000e+00 : f32
    %21 = vector.broadcast %cst_10 : f32 to vector<128x256xf32>
    %22 = arith.maximumf %20, %21 : vector<128x256xf32>
    %23 = arith.truncf %22 : vector<128x256xf32> to vector<128x256xbf16>
    %c0_11 = arith.constant 0 : index
    %c0_12 = arith.constant 0 : index
    %24 = vector.load %arg6[%c0_11, %c0_12] : memref<256x128xbf16, #tpu.memory_space<vmem>>, vector<256x128xbf16>
    %cst_13 = arith.constant dense<0.000000e+00> : vector<128x128xf32>
    %25 = tpu.matmul %23, %24, %cst_13 {dimension_numbers = #tpu.dot_dimension_numbers<[1], [0], [0], [1], [0, 0, 1, 1], [], []>} : vector<128x256xbf16>, vector<256x128xbf16>, vector<128x128xf32> -> vector<128x128xf32>
    %c0_14 = arith.constant 0 : index
    %c0_15 = arith.constant 0 : index
    %26 = vector.load %arg7[%c0_14, %c0_15] : memref<1x128xf32, #tpu.memory_space<vmem>>, vector<1x128xf32>
    %27 = vector.broadcast %26 : vector<1x128xf32> to vector<128x128xf32>
    %28 = arith.addf %25, %27 : vector<128x128xf32>
    %29 = vector.extract_strided_slice %1 {offsets = [4, 0], sizes = [124, 128], strides = [1, 1]} : vector<128x128xf32> to vector<124x128xf32>
    %30 = vector.extract_strided_slice %3 {offsets = [0, 0], sizes = [4, 128], strides = [1, 1]} : vector<8x128xf32> to vector<4x128xf32>
    %31 = tpu.concatenate %29, %30 in 0 : vector<124x128xf32>, vector<4x128xf32> -> vector<128x128xf32>
    %32 = arith.addf %28, %31 : vector<128x128xf32>
    %c0_16 = arith.constant 0 : index
    %c0_17 = arith.constant 0 : index
    %c0_18 = arith.constant 0 : index
    %33 = vector.load %arg8[%c0_16, %c0_17, %c0_18] : memref<1x128x128xf32, #tpu.memory_space<vmem>>, vector<1x128x128xf32>
    %34 = vector.shape_cast %33 : vector<1x128x128xf32> to vector<128x128xf32>
    %35 = vector.shape_cast %32 : vector<128x128xf32> to vector<1x128x128xf32>
    tpu.vector_store %arg8[%c0_16, %c0_17, %c0_18], %35 {strides = array<i32>} : memref<1x128x128xf32, #tpu.memory_space<vmem>>, vector<1x128x128xf32>,
    return
  }
  func.func @transform_0(%arg0: i32, %arg1: i32) -> (i32, i32, i32) {
    %c0_i32 = arith.constant 0 : i32
    %c0_i32_0 = arith.constant 0 : i32
    return %arg0, %arg1, %c0_i32 : i32, i32, i32
  }
  func.func @transform_1(%arg0: i32, %arg1: i32) -> (i32, i32, i32, i32) {
    %c0_i32 = arith.constant 0 : i32
    %c0_i32_0 = arith.constant 0 : i32
    %c0_i32_1 = arith.constant 0 : i32
    return %arg0, %arg1, %c0_i32, %c0_i32_0 : i32, i32, i32, i32
  }
  func.func @transform_2(%arg0: i32, %arg1: i32) -> (i32, i32) {
    %c0_i32 = arith.constant 0 : i32
    %c0_i32_0 = arith.constant 0 : i32
    %c0_i32_1 = arith.constant 0 : i32
    return %c0_i32, %c0_i32_0 : i32, i32
  }
  func.func @transform_3(%arg0: i32, %arg1: i32) -> (i32, i32) {
    %c0_i32 = arith.constant 0 : i32
    %c0_i32_0 = arith.constant 0 : i32
    %c0_i32_1 = arith.constant 0 : i32
    return %c0_i32, %c0_i32_0 : i32, i32
  }
  func.func @transform_4(%arg0: i32, %arg1: i32) -> (i32, i32) {
    %c0_i32 = arith.constant 0 : i32
    %c0_i32_0 = arith.constant 0 : i32
    %c0_i32_1 = arith.constant 0 : i32
    return %c0_i32, %c0_i32_0 : i32, i32
  }
  func.func @transform_5(%arg0: i32, %arg1: i32) -> (i32, i32) {
    %c0_i32 = arith.constant 0 : i32
    %c0_i32_0 = arith.constant 0 : i32
    %c0_i32_1 = arith.constant 0 : i32
    return %c0_i32, %c0_i32_0 : i32, i32
  }
  func.func @transform_6(%arg0: i32, %arg1: i32) -> (i32, i32, i32) {
    %c0_i32 = arith.constant 0 : i32
    %c0_i32_0 = arith.constant 0 : i32
    return %arg0, %arg1, %c0_i32 : i32, i32, i32
  }
}

</mosaic_0001>

<bundles_post_ra>
// kernel: _ffn_apply.1
= control target key start
LH: loop header
LB: loop body
LE: loop exit
PB: predicated region body
PF: predicated region fallthrough
CT: control target
= control target key end

     0   :  { %11 = vsyncpa [#allocation3], 0  ;;  %s6024_s0 = inlined_call_operand.vmem [shape: f32[2,256,128], index: 0, kind: input, shape index: {}]   ;;  %s6025_s1 = inlined_call_operand.vmem [shape: f32[2,2,8,128], index: 1, kind: input, shape index: {}]   ;;  %s6026_s2 = inlined_call_operand.vmem [shape: bf16[1152,256], index: 2, kind: input, shape index: {}]   ;;  %s6027_s3 = inlined_call_operand.vmem [shape: f32[1,256], index: 3, kind: input, shape index: {}]   ;;  %s6028_s4 = inlined_call_operand.vmem [shape: bf16[256,128], index: 4, kind: input, shape index: {}]   ;;  %s6029_s5 = inlined_call_operand.vmem [shape: f32[1,128], index: 5, kind: input, shape index: {}]   ;;  %s6030_s6 = inlined_call_operand.hbm [shape: f32[2,256,128], index: 6, kind: output, shape index: {}]  }
   0x1   :  { %13 = vsyncpa [#allocation3 + $0x1], 0  ;;  %s3992_s21 = smov 0   ;;  %s3994_s22 = smov 0  }
   0x2   :  { %s3996_s23 = smov 0   ;;  %s3998_s24 = smov 0  }
   0x3   :  { %s4000_s25 = smov 0   ;;  %s4002_s26 = smov 0  }
   0x4   :  { %s4004_s27 = smov 0   ;;  %s4006_s28 = smov 0  }
   0x5 LB: > { %6089 = sst [smem:[#allocation5_spill]] %s3945_s26  ;;  %s2950_s29 = sadd.s32 4294967295, %s3953_s28   ;;  %s3953_s28 = sphi %s4006_s28, %s19_s28   ;;  %s3949_s27 = sphi %s4004_s27, %s6206_s27   ;;  %s3945_s26 = sphi %s4002_s26, %s6205_s26   ;;  %s3941_s25 = sphi %s4000_s25, %s6204_s25   ;;  %s3937_s24 = sphi %s3998_s24, %s6210_s24   ;;  %s3933_s23 = sphi %s3996_s23, %s6209_s23   ;;  %s3929_s22 = sphi %s3994_s22, %s6208_s22   ;;  %s3925_s21 = sphi %s3992_s21, %s6207_s21  }
   0x6   : > { %6090 = sst [smem:[#allocation6_spill]] %s3949_s27  ;;  %s2951_s30 = sadd.s32 4294967294, %s3953_s28  }
   0x7   : > { %s28_s7 = sadd.s32 1, %s3945_s26  ;;  %s31_s8 = sadd.s32 1, %s3949_s27 }
   0x8   : > { %p29_p0 = scmp.ge.s32.totalorder %s28_s7, 2  ;;  %p190_p1 = scmp.ne.s32.totalorder %s3933_s23, %s3929_s22 }
   0x9   : > { %p191_p2 = scmp.eq.s32.totalorder %s2950_s29, 3  ;;  %p196_p5 = scmp.ne.s32.totalorder %s3929_s22, %s3925_s21 }
   0xa   : > { %s6212_s7 = smov (%p29_p0, %s28_s7), 0  ;;  %s6214_s8 = smov (!%p29_p0, %s31_s8), %s3949_s27 }
   0xb   : > { %6091 = sst [smem:[#allocation7_spill]] %s6212_s7  ;;  %s176_s9 = ssub.s32 %s3945_s26, %s6212_s7 }
   0xc   : > { %p4043_p3 = por %p191_p2, %p190_p1  ;;  %p33_p4 = scmp.ge.s32.totalorder %s6214_s8, 2 }
   0xd   : > { %p197_p6 = scmp.eq.s32.totalorder %s2951_s30, 3  ;;  %p2954_p7 = scmp.ge.s32.totalorder %s3953_s28, 1 }
   0xe   : > { %s6216_s8 = smov (%p33_p4, %s6214_s8), 0  ;;  %p251_p9 = scmp.lt.s32.totalorder %s3953_s28, 5 }
   0xf   : > { %6093 = sst [smem:[#allocation8_spill]] %s6216_s8  ;;  %p4052_p8 = por %p197_p6, %p196_p5 }
  0x10   : > { %s175_s12 = ssub.s32 %s3949_s27, %s6216_s8  ;;  %s180_s13 = sadd.s32 1, %s3933_s23 }
  0x11   : > { %s177_s14 = sor.u32 %s176_s9, %s175_s12  ;;  %p252_p10 = pnand %p2954_p7, %p251_p9 }
  0x12   : > { %p178_p11 = scmp.eq.s32.totalorder %s177_s14, 0 }
  0x13   : > { %255 = sbr.rel (%p252_p10) target bundleno = 977 (0x3d1), region = 44 }
  0x14   : > { %s4061_s15 = scalar_select %p178_p11, %s3933_s23, %s180_s13  }
  0x16   : > { %6095 = sst [smem:[#allocation9_spill]] %s4061_s15 }
  0x18   : > { %v3019_v0 = vld [vmem:[%s6026_s2 + $0x70] sm:$0xf]  ;;  %v3622_v1 = vld [vmem:[%s6026_s2 + $0x74] sm:$0xf0]  ;;  %v3011_v11 = vld [vmem:[%s6026_s2 + $0x60] sm:$0xf] }
  0x19   : > { %v3083_v2 = vld [vmem:[%s6026_s2 + $0xf0] sm:$0xf]  ;;  %v3020_v3 = vor.u32 %v3622_v1, %v3019_v0  ;;  %v3638_v4 = vld [vmem:[%s6026_s2 + $0xf4] sm:$0xf0]  ;;  %v3620_v13 = vld [vmem:[%s6026_s2 + $0x64] sm:$0xf0] }
  0x1a   : > { %v3147_v5 = vld [vmem:[%s6026_s2 + $0x170] sm:$0xf]  ;;  %v3654_v6 = vld [vmem:[%s6026_s2 + $0x174] sm:$0xf0]  ;;  %v3084_v7 = vor.u32 %v3638_v4, %v3083_v2  ;;  %v3075_v14 = vld [vmem:[%s6026_s2 + $0xe0] sm:$0xf]  ;;  %v3012_v16 = vor.u32 %v3620_v13, %v3011_v11 }
  0x1b   : > { %v3148_v8 = vor.u32 %v3654_v6, %v3147_v5  ;;  %v3211_v9 = vld [vmem:[%s6026_s2 + $0x1f0] sm:$0xf]  ;;  %v3670_v10 = vld [vmem:[%s6026_s2 + $0x1f4] sm:$0xf0]  ;;  %1572 = vmatpush.bf16.msra.mxu0 %v3020_v3  ;;  %v3636_v15 = vld [vmem:[%s6026_s2 + $0xe4] sm:$0xf0] }
  0x1c   : > { %v3212_v12 = vor.u32 %v3670_v10, %v3211_v9  ;;  %1621 = vmatpush.bf16.msra.mxu1 %v3084_v7  ;;  %v3076_v17 = vor.u32 %v3636_v15, %v3075_v14  ;;  %v3139_v18 = vld [vmem:[%s6026_s2 + $0x160] sm:$0xf]  ;;  %v3652_v19 = vld [vmem:[%s6026_s2 + $0x164] sm:$0xf0]  ;;  %v3003_v23 = vld [vmem:[%s6026_s2 + $0x50] sm:$0xf] }
  0x1d   : > { %1670 = vmatpush.bf16.msra.mxu2 %v3148_v8  ;;  %v3203_v20 = vld [vmem:[%s6026_s2 + $0x1e0] sm:$0xf]  ;;  %v3140_v21 = vor.u32 %v3652_v19, %v3139_v18  ;;  %v3668_v22 = vld [vmem:[%s6026_s2 + $0x1e4] sm:$0xf0]  ;;  %v3618_v24 = vld [vmem:[%s6026_s2 + $0x54] sm:$0xf0] }
  0x1e   : > { %1719 = vmatpush.bf16.msra.mxu3 %v3212_v12  ;;  %v3204_v25 = vor.u32 %v3668_v22, %v3203_v20  ;;  %v3067_v26 = vld [vmem:[%s6026_s2 + $0xd0] sm:$0xf]  ;;  %v3634_v27 = vld [vmem:[%s6026_s2 + $0xd4] sm:$0xf0]  ;;  %v3004_v29 = vor.u32 %v3618_v24, %v3003_v23  ;;  %v2995_v35 = vld [vmem:[%s6026_s2 + $0x40] sm:$0xf] }
  0x1f   : > { %v3131_v28 = vld [vmem:[%s6026_s2 + $0x150] sm:$0xf]  ;;  %1573 = vmatpush.bf16.msra.mxu0 %v3012_v16  ;;  %v3650_v30 = vld [vmem:[%s6026_s2 + $0x154] sm:$0xf0]  ;;  %v3068_v33 = vor.u32 %v3634_v27, %v3067_v26  ;;  %v3616_v36 = vld [vmem:[%s6026_s2 + $0x44] sm:$0xf0] }
  0x20   : > { %v3195_v31 = vld [vmem:[%s6026_s2 + $0x1d0] sm:$0xf]  ;;  %v3666_v32 = vld [vmem:[%s6026_s2 + $0x1d4] sm:$0xf0]  ;;  %1622 = vmatpush.bf16.msra.mxu1 %v3076_v17  ;;  %v3132_v34 = vor.u32 %v3650_v30, %v3131_v28  ;;  %v3059_v37 = vld [vmem:[%s6026_s2 + $0xc0] sm:$0xf]  ;;  %v2996_v44 = vor.u32 %v3616_v36, %v2995_v35 }
  0x21   : > { %1671 = vmatpush.bf16.msra.mxu2 %v3140_v21  ;;  %v3196_v38 = vor.u32 %v3666_v32, %v3195_v31  ;;  %v3632_v39 = vld [vmem:[%s6026_s2 + $0xc4] sm:$0xf0]  ;;  %v3123_v40 = vld [vmem:[%s6026_s2 + $0x140] sm:$0xf]  ;;  %v2987_v47 = vld [vmem:[%s6026_s2 + $0x30] sm:$0xf] }
  0x22   : > { %1720 = vmatpush.bf16.msra.mxu3 %v3204_v25  ;;  %v3648_v41 = vld [vmem:[%s6026_s2 + $0x144] sm:$0xf0]  ;;  %v3187_v42 = vld [vmem:[%s6026_s2 + $0x1c0] sm:$0xf]  ;;  %v3060_v45 = vor.u32 %v3632_v39, %v3059_v37  ;;  %v3614_v48 = vld [vmem:[%s6026_s2 + $0x34] sm:$0xf0] }
  0x23   : > { %v3664_v43 = vld [vmem:[%s6026_s2 + $0x1c4] sm:$0xf0]  ;;  %1574 = vmatpush.bf16.msra.mxu0 %v3004_v29  ;;  %v3124_v46 = vor.u32 %v3648_v41, %v3123_v40  ;;  %v3051_v49 = vld [vmem:[%s6026_s2 + $0xb0] sm:$0xf]  ;;  %v3630_v51 = vld [vmem:[%s6026_s2 + $0xb4] sm:$0xf0]  ;;  %v2988_v56 = vor.u32 %v3614_v48, %v2987_v47 }
  0x24   : > { %1623 = vmatpush.bf16.msra.mxu1 %v3068_v33  ;;  %v3188_v50 = vor.u32 %v3664_v43, %v3187_v42  ;;  %v3115_v52 = vld [vmem:[%s6026_s2 + $0x130] sm:$0xf]  ;;  %v3646_v53 = vld [vmem:[%s6026_s2 + $0x134] sm:$0xf0]  ;;  %v3052_v57 = vor.u32 %v3630_v51, %v3051_v49  ;;  %v2979_v59 = vld [vmem:[%s6026_s2 + $0x20] sm:$0xf] }
  0x25   : > { %1672 = vmatpush.bf16.msra.mxu2 %v3132_v34  ;;  %v3179_v54 = vld [vmem:[%s6026_s2 + $0x1b0] sm:$0xf]  ;;  %v3662_v55 = vld [vmem:[%s6026_s2 + $0x1b4] sm:$0xf0]  ;;  %v3116_v58 = vor.u32 %v3646_v53, %v3115_v52  ;;  %v3612_v60 = vld [vmem:[%s6026_s2 + $0x24] sm:$0xf0] }
  0x26   : > { %1721 = vmatpush.bf16.msra.mxu3 %v3196_v38  ;;  %v3043_v61 = vld [vmem:[%s6026_s2 + $0xa0] sm:$0xf]  ;;  %v3180_v62 = vor.u32 %v3662_v55, %v3179_v54  ;;  %v3628_v63 = vld [vmem:[%s6026_s2 + $0xa4] sm:$0xf0]  ;;  %v2980_v4 = vor.u32 %v3612_v60, %v2979_v59  ;;  %v2971_v5 = vld [vmem:[%s6026_s2 + $0x10] sm:$0xf] }
  0x27   : > { %1575 = vmatpush.bf16.msra.mxu0 %v2996_v44  ;;  %v3107_v0 = vld [vmem:[%s6026_s2 + $0x120] sm:$0xf]  ;;  %v3644_v1 = vld [vmem:[%s6026_s2 + $0x124] sm:$0xf0]  ;;  %v3610_v6 = vld [vmem:[%s6026_s2 + $0x14] sm:$0xf0]  ;;  %v3044_v8 = vor.u32 %v3628_v63, %v3043_v61 }
  0x28   : > { %1624 = vmatpush.bf16.msra.mxu1 %v3060_v45  ;;  %v3171_v2 = vld [vmem:[%s6026_s2 + $0x1a0] sm:$0xf]  ;;  %v3660_v3 = vld [vmem:[%s6026_s2 + $0x1a4] sm:$0xf0]  ;;  %v3035_v7 = vld [vmem:[%s6026_s2 + $0x90] sm:$0xf]  ;;  %v3108_v9 = vor.u32 %v3644_v1, %v3107_v0  ;;  %v2972_v18 = vor.u32 %v3610_v6, %v2971_v5 }
  0x29   : > { %1673 = vmatpush.bf16.msra.mxu2 %v3124_v46  ;;  %v3626_v10 = vld [vmem:[%s6026_s2 + $0x94] sm:$0xf0]  ;;  %v3099_v11 = vld [vmem:[%s6026_s2 + $0x110] sm:$0xf]  ;;  %v3172_v13 = vor.u32 %v3660_v3, %v3171_v2  ;;  %s4232_s18 = sshll.u32 %s3937_s24, 4  ;;  %p294_p12 = scmp.lt.s32.totalorder %s3941_s25, 1 }
  0x2a   : > { %1722 = vmatpush.bf16.msra.mxu3 %v3188_v50  ;;  %v3642_v12 = vld [vmem:[%s6026_s2 + $0x114] sm:$0xf0]  ;;  %v3163_v14 = vld [vmem:[%s6026_s2 + $0x190] sm:$0xf]  ;;  %v2963_v16 = vld [vmem:[%s6026_s2] sm:$0xf]  ;;  %v3036_v21 = vor.u32 %v3626_v10, %v3035_v7 }
  0x2b   : > { %1576 = vmatpush.bf16.msra.mxu0 %v2988_v56  ;;  %v3658_v15 = vld [vmem:[%s6026_s2 + $0x194] sm:$0xf0]  ;;  %v3608_v17 = vld [vmem:[%s6026_s2 + $0x4] sm:$0xf0]  ;;  %p296_p13 = scmp.lt.s32.totalorder %s4232_s18, 31  ;;  %v3100_v22 = vor.u32 %v3642_v12, %v3099_v11  ;;  %vm474_vm0 = vcmask 1046528  }
  0x2c   : > { %1625 = vmatpush.bf16.msra.mxu1 %v3052_v57  ;;  %v3027_v19 = vld [vmem:[%s6026_s2 + $0x80] sm:$0xf]  ;;  %v3624_v20 = vld [vmem:[%s6026_s2 + $0x84] sm:$0xf0]  ;;  %s4249_s16 = scalar_select %p294_p12, %s3941_s25, 1  ;;  %v3164_v25 = vor.u32 %v3658_v15, %v3163_v14  ;;  %v2964_v30 = vor.u32 %v3608_v17, %v2963_v16  ;;  %vm546_vm3 = vcmask 1045504  }
  0x2d   : > { %1674 = vmatpush.bf16.msra.mxu2 %v3116_v58  ;;  %v3091_v23 = vld [vmem:[%s6026_s2 + $0x100] sm:$0xf]  ;;  %v3640_v24 = vld [vmem:[%s6026_s2 + $0x104] sm:$0xf0]  ;;  %s297_s30 = scalar_select %p296_p13, %s4232_s18, 31  ;;  %v3028_v33 = vor.u32 %v3624_v20, %v3027_v19  ;;  %vm616_vm4 = vcmask 1044480  }
  0x2e   : > { %1723 = vmatpush.bf16.msra.mxu3 %v3180_v62  ;;  %v3155_v26 = vld [vmem:[%s6026_s2 + $0x180] sm:$0xf]  ;;  %s2957_s13 = sshll.u32 %s4249_s16, 5  ;;  %v3656_v27 = vld [vmem:[%s6026_s2 + $0x184] sm:$0xf0]  ;;  %v3092_v34 = vor.u32 %v3640_v24, %v3091_v23  ;;  %p305_p0 = scmp.lt.s32.totalorder %s3937_s24, 1 }
  0x2f   : > { %1577 = vmatpush.bf16.msra.mxu0 %v2980_v4  ;;  %s299_s7 = sadd.s32 %s2957_s13, %s297_s30  ;;  %v3275_v28 = vld [vmem:[%s6026_s2 + $0x270] sm:$0xf]  ;;  %v3686_v29 = vld [vmem:[%s6026_s2 + $0x274] sm:$0xf0]  ;;  %v3267_v35 = vld [vmem:[%s6026_s2 + $0x260] sm:$0xf]  ;;  %v3156_v37 = vor.u32 %v3656_v27, %v3155_v26 }
  0x30   : > { %1626 = vmatpush.bf16.msra.mxu1 %v3044_v8  ;;  %s2958_s29 = sshll.u32 %s299_s7, 3  ;;  %v3339_v31 = vld [vmem:[%s6026_s2 + $0x2f0] sm:$0xf]  ;;  %v3702_v32 = vld [vmem:[%s6026_s2 + $0x2f4] sm:$0xf0]  ;;  %v3276_v41 = vor.u32 %v3686_v29, %v3275_v28  ;;  %s6218_s24 = smov (!%p305_p0, %s3937_s24), 1 }
  0x31   : > { %1675 = vmatpush.bf16.msra.mxu2 %v3108_v9  ;;  %s4280_s30 = scalar_lea.vmem %s6024_s0, %s2958_s29  ;;  %v3684_v36 = vld [vmem:[%s6026_s2 + $0x264] sm:$0xf0]  ;;  %v3340_v46 = vor.u32 %v3702_v32, %v3339_v31  ;;  %v3331_v50 = vld [vmem:[%s6026_s2 + $0x2e0] sm:$0xf]  ;;  %vm397_vm1 = vsmask.f32 7424 }
  0x32   : > { %1724 = vmatpush.bf16.msra.mxu3 %v3172_v13  ;;  %v312_v38 = vld [vmem:[%s4280_s30] sm:$0xff]  ;;  %v313_v39 = vld [vmem:[%s4280_s30 + $0x8] sm:$0xff]  ;;  %v314_v40 = vld [vmem:[%s4280_s30 + $0x10] sm:$0xff]  ;;  %v3268_v58 = vor.u32 %v3684_v36, %v3267_v35  ;;  %vm500_vm2 = vsmask.f32 6400  ;;  %s2959_s20 = sshll.u32 %s4249_s16, 1 }
  0x33   : > { %1578 = vmatpush.bf16.msra.mxu0 %v2972_v18  ;;  %v329_v42 = vpack.c.bf16 %v312_v38, %v312_v38  ;;  %v330_v43 = vpack.c.bf16 %v313_v39, %v313_v39  ;;  %v315_v44 = vld [vmem:[%s4280_s30 + $0x18] sm:$0xff]  ;;  %v331_v45 = vpack.c.bf16 %v314_v40, %v314_v40  ;;  %v316_v47 = vld [vmem:[%s4280_s30 + $0x20] sm:$0xff]  ;;  %v317_v48 = vld [vmem:[%s4280_s30 + $0x28] sm:$0xff]  ;;  %s308_s16 = sadd.s32 %s2959_s20, %s6218_s24  ;;  %vm572_vm5 = vsmask.f32 5376  ;;  %s3603_s14 = sshll.u32 %s3941_s25, 5 }
  0x34   : > { %1627 = vmatpush.bf16.msra.mxu1 %v3036_v21  ;;  %v332_v49 = vpack.c.bf16 %v315_v44, %v315_v44  ;;  %v3700_v51 = vld [vmem:[%s6026_s2 + $0x2e4] sm:$0xf0]  ;;  %v333_v55 = vpack.c.bf16 %v316_v47, %v316_v47  ;;  %v334_v57 = vpack.c.bf16 %v317_v48, %v317_v48  ;;  %v3259_v19 = vld [vmem:[%s6026_s2 + $0x250] sm:$0xf]  ;;  %v3682_v20 = vld [vmem:[%s6026_s2 + $0x254] sm:$0xf0]  ;;  %s2844_s26 = sadd.s32 %s3603_s14, %s4232_s18 }
  0x35   : > { %1676 = vmatpush.bf16.msra.mxu2 %v3100_v22  ;;  %v362_v52 = vunpack.c.l.b16 %v329_v42  ;;  %v4300_v53 = vunpack.c.l.b16 %v330_v43  ;;  %v4302_v54 = vunpack.c.l.b16 %v331_v45  ;;  %v3332_v60 = vor.u32 %v3700_v51, %v3331_v50  ;;  %v3323_v22 = vld [vmem:[%s6026_s2 + $0x2d0] sm:$0xf]  ;;  %v3698_v26 = vld [vmem:[%s6026_s2 + $0x2d4] sm:$0xf0]  ;;  %v3251_v43 = vld [vmem:[%s6026_s2 + $0x240] sm:$0xf] }
  0x36   : > { %1725 = vmatpush.bf16.msra.mxu3 %v3164_v25  ;;  %v4304_v56 = vunpack.c.l.b16 %v332_v49  ;;  %v4321_v1 = vunpack.c.l.b16 %v333_v55  ;;  %v4330_v5 = vunpack.c.l.b16 %v334_v57  ;;  %v3260_v21 = vor.u32 %v3682_v20, %v3259_v19  ;;  %v318_v25 = vld [vmem:[%s4280_s30 + $0x30] sm:$0xff]  ;;  %v319_v27 = vld [vmem:[%s4280_s30 + $0x38] sm:$0xff]  ;;  %v3680_v44 = vld [vmem:[%s6026_s2 + $0x244] sm:$0xf0]  ;;  %s2960_s24 = sshll.u32 %s308_s16, 3  ;;  %s290_s16 = sand.u32 1, %s3929_s22  }
  0x37   : > { %1579 = vmatpush.bf16.msra.mxu0 %v2964_v30  ;;  %v4307_v59 = vpack.c.b16 %v4300_v53, %v362_v52  ;;  %v3324_v28 = vor.u32 %v3698_v26, %v3323_v22  ;;  %v335_v29 = vpack.c.bf16 %v318_v25, %v318_v25  ;;  %v3252_v45 = vor.u32 %v3680_v44, %v3251_v43  ;;  %v3696_v47 = vld [vmem:[%s6026_s2 + $0x2c4] sm:$0xf0]  ;;  %v320_v51 = vld [vmem:[%s4280_s30 + $0x40] sm:$0xff]  ;;  %v3678_v19 = vld [vmem:[%s6026_s2 + $0x234] sm:$0xf0]  ;;  %s4652_s17 = scalar_lea.vmem %s6025_s1, %s2960_s24  ;;  %s2955_s8 = sshll.u32 %s290_s16, 7 }
  0x38   : > { %1628 = vmatpush.bf16.msra.mxu1 %v3028_v33  ;;  %v4311_v61 = vpack.c.b16 %v4304_v56, %v4302_v54  ;;  %v4345_v16 = vpack.c.b16 %v4330_v5, %v4321_v1  ;;  %v336_v33 = vpack.c.bf16 %v319_v27, %v319_v27  ;;  %v321_v52 = vld [vmem:[%s4280_s30 + $0x48] sm:$0xff]  ;;  %v3694_v22 = vld [vmem:[%s6026_s2 + $0x2b4] sm:$0xf0]  ;;  %vm642_vm6 = vsmask.f32 4352  ;;  %s5916_s13 = scalar_lea.vmem [#allocation2], %s2955_s8 }
  0x39   : > { %1677 = vmatpush.bf16.msra.mxu2 %v3092_v34  ;;  %v4315_v62 = vshrl.u32 %v4307_v59, 16  ;;  %v4318_v63 = vshll.u32 %v4307_v59, 16  ;;  %v475_v0 = vrot.slane %v4307_v59, 1  ;;  %v4384_v38 = vunpack.c.l.b16 %v335_v29  ;;  %v323_v29 = vld [vmem:[%s4280_s30 + $0x58] sm:$0xff]  ;;  %s3604_s24 = sshll.u32 %s2844_s26, 3  ;;  %s2833_s19 = scalar_lea.sflag [#allocation3], %s290_s16 }
  0x3a   : > { %1726 = vmatpush.bf16.msra.mxu3 %v3156_v37  ;;  %1580 = vmatmul.bf16.vlgmr.msra.gmra.mxu0 %v4307_v59  ;;  %v4324_v2 = vshll.u32 %v4311_v61, 16  ;;  %v476_v3 = vrot.slane %v4311_v61, 1  ;;  %v4328_v4 = vshrl.u32 %v4311_v61, 16  ;;  %v4365_v23 = vshll.u32 %v4345_v16, 16  ;;  %s2846_s25 = scalar_lea.hbm %s6030_s6, %s3604_s24  ;;  %s3879_s12 = scalar_lea.hbm %s6030_s6, 512 }
  0x3b   : > { %1768 = vmatpush.bf16.msrb.mxu0 %v3276_v41  ;;  %v403_v6 = vrot.slane %v4318_v63, 1  ;;  %v501_v7 = vrot.slane %v4315_v62, 1  ;;  %v502_v8 = vrot.slane %v4318_v63, 2  ;;  %v4368_v24 = vshrl.u32 %v4345_v16, 16  ;;  %s2849_s18 = sshll.u32 %s2846_s25, 4  ;;  %s2850_s18 = int_to_ptr.hbm [resolvable:$true] %s2849_s18 }
  0x3c   : > { %1817 = vmatpush.bf16.msrb.mxu1 %v3340_v46  ;;  %v408_v9 = vrot.slane %v4324_v2, 1  ;;  %v4337_v10 = vsel %vm474_vm0, %v475_v0, %v476_v3  ;;  %v504_v11 = vrot.slane %v4328_v4, 1  ;;  %v505_v12 = vrot.slane %v4324_v2, 2  ;;  %v3315_v46 = vld [vmem:[%s6026_s2 + $0x2c0] sm:$0xf]  ;;  %s3873_s20 = sshra.s32 %s2850_s18, 4  ;;  %s3874_s20 = int_to_ptr.hbm [resolvable:$true] %s3873_s20 }
  0x3d   : > { %v404_v13 = vor.u32 %v403_v6, %v4315_v62  ;;  %1678 = vmatmul.bf16.vlgmr.msra.gmra.mxu2 %v4337_v10  ;;  %v503_v14 = vor.u32 %v502_v8, %v501_v7  ;;  %v478_v30 = vrot.slane %v4345_v16, 1  ;;  %v508_v31 = vrot.slane %v4368_v24, 1  ;;  %p3880_p5 = scmp.lt.s32.totalorder %s3874_s20, %s6030_s6 }
  0x3e   : > { %v506_v15 = vor.u32 %v505_v12, %v504_v11  ;;  %v509_v32 = vrot.slane %v4365_v23, 2  ;;  %v412_v34 = vor.u32 %v4328_v4, %v408_v9  ;;  %v416_v35 = vrot.slane %v4365_v23, 1 }
  0x3f   : > { %1769 = vmatpush.bf16.msrb.mxu0 %v3268_v58  ;;  %v4348_v17 = vsel %vm397_vm1, %v404_v13, %v408_v9  ;;  %v4382_v36 = vsel %vm474_vm0, %v476_v3, %v478_v30  ;;  %v4386_v39 = vunpack.c.l.b16 %v336_v33  ;;  %v3316_v50 = vor.u32 %v3696_v47, %v3315_v46 }
  0x40   : > { %1818 = vmatpush.bf16.msrb.mxu1 %v3332_v60  ;;  %v4352_v18 = vsel %vm500_vm2, %v503_v14, %v506_v15  ;;  %v510_v37 = vor.u32 %v509_v32, %v508_v31  ;;  %v4389_v40 = vsel %vm397_vm1, %v412_v34, %v416_v35  ;;  %v337_v60 = vpack.c.bf16 %v320_v51, %v320_v51 }
  0x41   : > { %1629 = vmatmul.bf16.vlgmr.msra.gmra.mxu1 %v4348_v17  ;;  %6096 = vst [vmem:[#allocation10_spill] sm:$0xff] %v4352_v18  ;;  %1727 = vmatmul.bf16.vlgmr.msra.gmra.mxu3 %v4352_v18  ;;  %v4397_v42 = vpack.c.b16 %v4386_v39, %v4384_v38  ;;  %v338_v0 = vpack.c.bf16 %v321_v52, %v321_v52  ;;  %v324_v52 = vld [vmem:[%s4280_s30 + $0x60] sm:$0xff]  ;;  %vm2748_vm7 = vcmask 1043456  }
  0x42   : > { %v4393_v41 = vsel %vm500_vm2, %v506_v15, %v510_v37  ;;  %v420_v3 = vor.u32 %v4368_v24, %v416_v35  ;;  %v4430_v9 = vunpack.c.l.b16 %v337_v60  ;;  %v3243_v15 = vld [vmem:[%s6026_s2 + $0x230] sm:$0xf]  ;;  %v340_v34 = vpack.c.bf16 %v323_v29, %v323_v29 }
  0x43   : > { %1770 = vmatpush.bf16.msrb.mxu0 %v3260_v21  ;;  %6097 = vst [vmem:[#allocation11_spill] sm:$0xff] %v4393_v41  ;;  %v4414_v48 = vshll.u32 %v4397_v42, 16  ;;  %v4417_v49 = vshrl.u32 %v4397_v42, 16  ;;  %v480_v55 = vrot.slane %v4397_v42, 1  ;;  %v4432_v11 = vunpack.c.l.b16 %v338_v0  ;;  %v3307_v21 = vld [vmem:[%s6026_s2 + $0x2b0] sm:$0xf] }
  0x44   : > { %1819 = vmatpush.bf16.msrb.mxu1 %v3324_v28  ;;  %v3244_v20 = vor.u32 %v3678_v19, %v3243_v15  ;;  %v3308_v27 = vor.u32 %v3694_v22, %v3307_v21  ;;  %v322_v28 = vld [vmem:[%s4280_s30 + $0x50] sm:$0xff]  ;;  %v4478_v46 = vunpack.c.l.b16 %v340_v34  ;;  %v3299_v0 = vld [vmem:[%s6026_s2 + $0x2a0] sm:$0xf]  ;;  %v341_v19 = vpack.c.bf16 %v324_v52, %v324_v52 }
  0x45   : > { %v512_v57 = vrot.slane %v4417_v49, 1  ;;  %v513_v58 = vrot.slane %v4414_v48, 2  ;;  %v424_v6 = vrot.slane %v4414_v48, 1  ;;  %v4428_v7 = vsel %vm474_vm0, %v478_v30, %v480_v55 }
  0x46   : > { %v4443_v14 = vpack.c.b16 %v4432_v11, %v4430_v9  ;;  %v339_v33 = vpack.c.bf16 %v322_v28, %v322_v28  ;;  %6100 = vst [vmem:[#allocation14_spill] sm:$0xff] %v4478_v46  ;;  %v4516_v28 = vunpack.c.l.b16 %v341_v19  ;;  %v3467_v19 = vld [vmem:[%s6026_s2 + $0x3f0] sm:$0xf] }
  0x47   : > { %1771 = vmatpush.bf16.msrb.mxu0 %v3252_v45  ;;  %v514_v8 = vor.u32 %v513_v58, %v512_v57  ;;  %v4435_v12 = vsel %vm397_vm1, %v420_v3, %v424_v6  ;;  %v428_v35 = vor.u32 %v4417_v49, %v424_v6  ;;  %v3235_v57 = vld [vmem:[%s6026_s2 + $0x220] sm:$0xf]  ;;  %v3676_v58 = vld [vmem:[%s6026_s2 + $0x224] sm:$0xf0] }
  0x48   : > { %1820 = vmatpush.bf16.msrb.mxu1 %v3316_v50  ;;  %v4460_v25 = vshll.u32 %v4443_v14, 16  ;;  %v4463_v26 = vshrl.u32 %v4443_v14, 16  ;;  %v482_v30 = vrot.slane %v4443_v14, 1  ;;  %v4476_v45 = vunpack.c.l.b16 %v339_v33  ;;  %v3692_v3 = vld [vmem:[%s6026_s2 + $0x2a4] sm:$0xf0]  ;;  %6102 = vst [vmem:[#allocation16_spill] sm:$0xff] %v4516_v28 }
  0x49   : > { %v4439_v13 = vsel %vm500_vm2, %v510_v37, %v514_v8  ;;  %v3236_v60 = vor.u32 %v3676_v58, %v3235_v57  ;;  %v3300_v15 = vor.u32 %v3692_v3, %v3299_v0  ;;  %v327_v0 = vld [vmem:[%s4280_s30 + $0x78] sm:$0xff] }
  0x4a   : > { %1585 = vmatmul.bf16.gmra.mxu0 %v4311_v61  ;;  %6098 = vst [vmem:[#allocation12_spill] sm:$0xff] %v4439_v13  ;;  %v516_v31 = vrot.slane %v4463_v26, 1  ;;  %v517_v32 = vrot.slane %v4460_v25, 2  ;;  %v432_v37 = vrot.slane %v4460_v25, 1  ;;  %v4474_v43 = vsel %vm474_vm0, %v480_v55, %v482_v30  ;;  %v325_v55 = vld [vmem:[%s4280_s30 + $0x68] sm:$0xff] }
  0x4b   : > { %1772 = vmatpush.bf16.msrb.mxu0 %v3244_v20  ;;  %6099 = vst [vmem:[#allocation13_spill] sm:$0xff] %v4476_v45  ;;  %v4489_v51 = vpack.c.b16 %v4478_v46, %v4476_v45  ;;  %v342_v20 = vpack.c.bf16 %v325_v55, %v325_v55  ;;  %v3718_v55 = vld [vmem:[%s6026_s2 + $0x374] sm:$0xf0] }
  0x4c   : > { %1821 = vmatpush.bf16.msrb.mxu1 %v3308_v27  ;;  %v518_v44 = vor.u32 %v517_v32, %v516_v31  ;;  %v4481_v47 = vsel %vm397_vm1, %v428_v35, %v432_v37  ;;  %v436_v31 = vor.u32 %v4463_v26, %v432_v37 }
  0x4d   : > { %1683 = vmatmul.bf16.gmra.mxu2 %v4382_v36  ;;  %v4508_v6 = vshll.u32 %v4489_v51, 16  ;;  %v6035_v21 = vrot.slane %v4489_v51, 1  ;;  %v4518_v29 = vunpack.c.l.b16 %v342_v20 }
  0x4e   : > { %v4485_v50 = vsel %vm500_vm2, %v514_v8, %v518_v44  ;;  %v4511_v8 = vshrl.u32 %v4489_v51, 16 }
  0x4f   : > { %6101 = vst [vmem:[#allocation15_spill] sm:$0xff] %v4485_v50  ;;  %1773 = vmatpush.bf16.msrb.mxu0 %v3236_v60  ;;  %v521_v27 = vrot.slane %v4508_v6, 2  ;;  %v440_v32 = vrot.slane %v4508_v6, 1  ;;  %v4526_v33 = vsel %vm474_vm0, %v482_v30, %v6035_v21  ;;  %v4532_v35 = vpack.c.b16 %v4518_v29, %v4516_v28  ;;  %v3403_v30 = vld [vmem:[%s6026_s2 + $0x370] sm:$0xf] }
  0x50   : > { %1822 = vmatpush.bf16.msrb.mxu1 %v3300_v15  ;;  %v520_v22 = vrot.slane %v4511_v8, 1  ;;  %6103 = vst [vmem:[#allocation17_spill] sm:$0xff] %v4518_v29  ;;  %v326_v60 = vld [vmem:[%s4280_s30 + $0x70] sm:$0xff]  ;;  %v3404_v3 = vor.u32 %v3718_v55, %v3403_v30  ;;  %v3674_v15 = vld [vmem:[%s6026_s2 + $0x214] sm:$0xf0] }
  0x51   : > { %1634 = vmatmul.bf16.gmra.mxu1 %v4389_v40  ;;  %1732 = vmatmul.bf16.gmra.mxu3 %v4393_v41  ;;  %6104 = vst [vmem:[#allocation18_spill] sm:$0xff] %v4526_v33  ;;  %v4535_v52 = vsel %vm397_vm1, %v436_v31, %v440_v32  ;;  %v4549_v57 = vshll.u32 %v4532_v35, 16  ;;  %v4552_v58 = vshrl.u32 %v4532_v35, 16  ;;  %v3734_v31 = vld [vmem:[%s6026_s2 + $0x3f4] sm:$0xf0] }
  0x52   : > { %v4528_v34 = vor.u32 %v521_v27, %v520_v22  ;;  %6105 = vst [vmem:[#allocation19_spill] sm:$0xff] %v4535_v52  ;;  %1866 = vmatpush.bf16.msrb.mxu2 %v3404_v3  ;;  %v3291_v22 = vld [vmem:[%s6026_s2 + $0x290] sm:$0xf]  ;;  %v3690_v27 = vld [vmem:[%s6026_s2 + $0x294] sm:$0xf0]  ;;  %v3468_v55 = vor.u32 %v3734_v31, %v3467_v19  ;;  %v343_v31 = vpack.c.bf16 %v326_v60, %v326_v60 }
  0x53   : > { %v3292_v30 = vor.u32 %v3690_v27, %v3291_v22  ;;  %v3395_v3 = vld [vmem:[%s6026_s2 + $0x360] sm:$0xf]  ;;  %v3732_v22 = vld [vmem:[%s6026_s2 + $0x3e4] sm:$0xf0]  ;;  %v3387_v19 = vld [vmem:[%s6026_s2 + $0x350] sm:$0xf] }
  0x54   : > { %v4540_v37 = vsel %vm500_vm2, %v518_v44, %v4528_v34  ;;  %v3227_v44 = vld [vmem:[%s6026_s2 + $0x210] sm:$0xf]  ;;  %v3714_v27 = vld [vmem:[%s6026_s2 + $0x354] sm:$0xf0]  ;;  %1915 = vmatpush.bf16.msrb.mxu3 %v3468_v55  ;;  %v524_v60 = vrot.slane %v4552_v58, 1  ;;  %v4614_v55 = vunpack.c.l.b16 %v343_v31 }
  0x55   : > { %6106 = vst [vmem:[#allocation20_spill] sm:$0xff] %v4540_v37  ;;  %v3228_v20 = vor.u32 %v3674_v15, %v3227_v44  ;;  %v3716_v44 = vld [vmem:[%s6026_s2 + $0x364] sm:$0xf0]  ;;  %v3459_v15 = vld [vmem:[%s6026_s2 + $0x3e0] sm:$0xf]  ;;  %1823 = vmatpush.bf16.msrb.mxu1 %v3292_v30 }
  0x56   : > { %v3396_v21 = vor.u32 %v3716_v44, %v3395_v3  ;;  %v3451_v3 = vld [vmem:[%s6026_s2 + $0x3d0] sm:$0xf]  ;;  %v3730_v44 = vld [vmem:[%s6026_s2 + $0x3d4] sm:$0xf0]  ;;  %v3712_v30 = vld [vmem:[%s6026_s2 + $0x344] sm:$0xf0] }
  0x57   : > { %1774 = vmatpush.bf16.msrb.mxu0 %v3228_v20  ;;  %v3388_v20 = vor.u32 %v3714_v27, %v3387_v19  ;;  %6107 = vst [vmem:[#allocation21_spill] sm:$0xff] %v4614_v55  ;;  %v444_v19 = vor.u32 %v4511_v8, %v440_v32  ;;  %v448_v27 = vrot.slane %v4549_v57, 1  ;;  %v3728_v31 = vld [vmem:[%s6026_s2 + $0x3c4] sm:$0xf0] }
  0x58   : > { %1867 = vmatpush.bf16.msrb.mxu2 %v3396_v21  ;;  %v3379_v21 = vld [vmem:[%s6026_s2 + $0x340] sm:$0xf] }
  0x59   : > { %v3380_v32 = vor.u32 %v3712_v30, %v3379_v21  ;;  %v4641_v18 = vsel %vm397_vm1, %v444_v19, %v448_v27  ;;  %v3219_v30 = vld [vmem:[%s6026_s2 + $0x200] sm:$0xf] }
  0x5a   : > { %1590 = vmatmul.bf16.gmra.mxu0 %v4345_v16  ;;  %6112 = vst [vmem:[#allocation24_spill] sm:$0xff] %v4641_v18  ;;  %v328_v19 = vld [vmem:[%s4652_s17] sm:$0xff] }
  0x5c   : > { %1868 = vmatpush.bf16.msrb.mxu2 %v3388_v20 }
  0x5d   : > { %1688 = vmatmul.bf16.gmra.mxu2 %v4428_v7 }
  0x60   : > { %1869 = vmatpush.bf16.msrb.mxu2 %v3380_v32  ;;  %v3435_v32 = vld [vmem:[%s6026_s2 + $0x3b0] sm:$0xf] }
  0x61   : > { %1639 = vmatmul.bf16.gmra.mxu1 %v4435_v12  ;;  %1737 = vmatmul.bf16.gmra.mxu3 %v4439_v13  ;;  %v3443_v13 = vld [vmem:[%s6026_s2 + $0x3c0] sm:$0xf] }
  0x62   : > { %v3444_v41 = vor.u32 %v3728_v31, %v3443_v13  ;;  %v3371_v13 = vld [vmem:[%s6026_s2 + $0x330] sm:$0xf] }
  0x6a   : > { %1595 = vmatmul.bf16.gmra.mxu0 %v4397_v42 }
  0x6d   : > { %1693 = vmatmul.bf16.gmra.mxu2 %v4474_v43 }
  0x71   : > { %1644 = vmatmul.bf16.gmra.mxu1 %v4481_v47  ;;  %1742 = vmatmul.bf16.gmra.mxu3 %v4485_v50  ;;  %v3460_v50 = vor.u32 %v3732_v22, %v3459_v15  ;;  %v3452_v22 = vor.u32 %v3730_v44, %v3451_v3 }
  0x73   : > { %1916 = vmatpush.bf16.msrb.mxu3 %v3460_v50  ;;  %v6110_v50 = vrot.slane %v4489_v51, 1 }
  0x77   : > { %1917 = vmatpush.bf16.msrb.mxu3 %v3452_v22  ;;  %v3672_v22 = vld [vmem:[%s6026_s2 + $0x204] sm:$0xf0] }
  0x78   : > { %v3220_v31 = vor.u32 %v3672_v22, %v3219_v30  ;;  %v3363_v30 = vld [vmem:[%s6026_s2 + $0x320] sm:$0xf]  ;;  %v3708_v22 = vld [vmem:[%s6026_s2 + $0x324] sm:$0xf0] }
  0x7a   : > { %1600 = vmatmul.bf16.gmra.mxu0 %v4443_v14 }
  0x7b   : > { %1918 = vmatpush.bf16.msrb.mxu3 %v3444_v41  ;;  %v3688_v41 = vld [vmem:[%s6026_s2 + $0x284] sm:$0xf0]  ;;  %1775 = vmatpush.bf16.msrb.mxu0 %v3220_v31 }
  0x7d   : > { %1698 = vmatmul.bf16.gmra.mxu2 %v4526_v33 }
  0x81   : > { %1649 = vmatmul.bf16.gmra.mxu1 %v4535_v52  ;;  %1747 = vmatmul.bf16.gmra.mxu3 %v4540_v37  ;;  %v344_v37 = vpack.c.bf16 %v327_v0, %v327_v0  ;;  %v525_v0 = vrot.slane %v4549_v57, 2 }
  0x83   : > { %v4616_v15 = vunpack.c.l.b16 %v344_v37  ;;  %v6109_v37 = vrot.slane %v4532_v35, 1  ;;  %v4634_v44 = vor.u32 %v525_v0, %v524_v60  ;;  %v3710_v60 = vld [vmem:[%s6026_s2 + $0x334] sm:$0xf0] }
  0x84   : > { %v3372_v0 = vor.u32 %v3710_v60, %v3371_v13  ;;  %v3726_v60 = vld [vmem:[%s6026_s2 + $0x3b4] sm:$0xf0] }
  0x85   : > { %6108 = vst [vmem:[#allocation22_spill] sm:$0xff] %v4616_v15  ;;  %v4632_v3 = vsel %vm474_vm0, %v6110_v50, %v6109_v37  ;;  %v4638_v20 = vpack.c.b16 %v4616_v15, %v4614_v55  ;;  %v4647_v37 = vsel %vm500_vm2, %v4528_v34, %v4634_v44  ;;  %v3283_v50 = vld [vmem:[%s6026_s2 + $0x280] sm:$0xf]  ;;  %v3364_v15 = vor.u32 %v3708_v22, %v3363_v30  ;;  %v3706_v55 = vld [vmem:[%s6026_s2 + $0x314] sm:$0xf0] }
  0x86   : > { %6111 = vst [vmem:[#allocation23_spill] sm:$0xff] %v4632_v3  ;;  %1870 = vmatpush.bf16.msrb.mxu2 %v3372_v0  ;;  %v3284_v13 = vor.u32 %v3688_v41, %v3283_v50  ;;  %v3427_v0 = vld [vmem:[%s6026_s2 + $0x3a0] sm:$0xf]  ;;  %v3724_v50 = vld [vmem:[%s6026_s2 + $0x3a4] sm:$0xf0]  ;;  %v345_v22 = vpack.c.bf16 %v328_v19, %v328_v19  ;;  %v6114_v19 = vrot.slane %v4532_v35, 1 }
  0x87   : > { %6113 = vst [vmem:[#allocation25_spill] sm:$0xff] %v4647_v37  ;;  %v4662_v34 = vshll.u32 %v4638_v20, 16  ;;  %v4665_v21 = vshrl.u32 %v4638_v20, 16  ;;  %v3355_v41 = vld [vmem:[%s6026_s2 + $0x310] sm:$0xf]  ;;  %v488_v31 = vrot.slane %v4638_v20, 1 }
  0x88   : > { %1824 = vmatpush.bf16.msrb.mxu1 %v3284_v13  ;;  %v3356_v29 = vor.u32 %v3706_v55, %v3355_v41  ;;  %v3722_v13 = vld [vmem:[%s6026_s2 + $0x394] sm:$0xf0]  ;;  %v4722_v41 = vunpack.c.l.b16 %v345_v22  ;;  %v3531_v22 = vld [vmem:[%s6026_s2 + $0x470] sm:$0xf] }
  0x89   : > { %v529_v30 = vrot.slane %v4662_v34, 2  ;;  %v4720_v55 = vsel %vm474_vm0, %v6114_v19, %v488_v31 }
  0x8a   : > { %1605 = vmatmul.bf16.gmra.mxu0 %v4489_v51  ;;  %1871 = vmatpush.bf16.msrb.mxu2 %v3364_v15  ;;  %6115 = vst [vmem:[#allocation26_spill] sm:$0xff] %v4720_v55 }
  0x8b   : > { %6116 = vst [vmem:[#allocation27_spill] sm:$0xff] %v4722_v41 }
  0x8d   : > { %1703 = vmatmul.bf16.gmra.mxu2 %v4632_v3  ;;  %v3419_v3 = vld [vmem:[%s6026_s2 + $0x390] sm:$0xf] }
  0x8e   : > { %1872 = vmatpush.bf16.msrb.mxu2 %v3356_v29 }
  0x91   : > { %1654 = vmatmul.bf16.gmra.mxu1 %v4641_v18  ;;  %1752 = vmatmul.bf16.gmra.mxu3 %v4647_v37  ;;  %v3436_v37 = vor.u32 %v3726_v60, %v3435_v32  ;;  %v3428_v32 = vor.u32 %v3724_v50, %v3427_v0  ;;  %v528_v60 = vrot.slane %v4665_v21, 1  ;;  %v456_v0 = vrot.slane %v4662_v34, 1  ;;  %v3347_v18 = vld [vmem:[%s6026_s2 + $0x300] sm:$0xf] }
  0x92   : > { %v3420_v50 = vor.u32 %v3722_v13, %v3419_v3  ;;  %v3411_v3 = vld [vmem:[%s6026_s2 + $0x380] sm:$0xf]  ;;  %v3750_v13 = vld [vmem:[%s6026_s2 + $0x474] sm:$0xf0] }
  0x93   : > { %1919 = vmatpush.bf16.msrb.mxu3 %v3436_v37  ;;  %v452_v37 = vor.u32 %v4552_v58, %v448_v27  ;;  %v530_v15 = vor.u32 %v529_v30, %v528_v60  ;;  %v3704_v27 = vld [vmem:[%s6026_s2 + $0x304] sm:$0xf0] }
  0x94   : > { %v3348_v28 = vor.u32 %v3704_v27, %v3347_v18  ;;  %v4746_v18 = vpack.c.b16 %v4722_v41, %v4722_v41 }
  0x95   : > { %v4737_v60 = vsel %vm397_vm1, %v452_v37, %v456_v0  ;;  %v4742_v29 = vsel %vm500_vm2, %v4634_v44, %v530_v15  ;;  %v3532_v44 = vor.u32 %v3750_v13, %v3531_v22  ;;  %v3621_v37 = vld [vmem:[%s6026_s2 + $0x74] sm:$0xf]  ;;  %v460_v13 = vor.u32 %v4665_v21, %v456_v0  ;;  %v846_v0 = vld [vmem:[%s6027_s3] sm:$0x3] }
  0x96   : > { %6117 = vst [vmem:[#allocation28_spill] sm:$0xff] %v4737_v60  ;;  %1873 = vmatpush.bf16.msrb.mxu2 %v3348_v28  ;;  %v3021_v28 = vld [vmem:[%s6026_s2 + $0x78] sm:$0xf0]  ;;  %v4766_v19 = vshrl.u32 %v4746_v18, 16 }
  0x97   : > { %1920 = vmatpush.bf16.msrb.mxu3 %v3428_v32  ;;  %v3720_v32 = vld [vmem:[%s6026_s2 + $0x384] sm:$0xf0]  ;;  %6118 = vst [vmem:[#allocation29_spill] sm:$0xff] %v4742_v29  ;;  %v3024_v27 = vor.u32 %v3621_v37, %v3021_v28  ;;  %1964 = vmatpush.bf16.msra.mxu0 %v3532_v44  ;;  %v547_v37 = vrot.slane %v4307_v59, 2  ;;  %v3619_v28 = vld [vmem:[%s6026_s2 + $0x64] sm:$0xf] }
  0x98   : > { %v3412_v30 = vor.u32 %v3720_v32, %v3411_v3  ;;  %v490_v3 = vrot.slane %v4746_v18, 1  ;;  %v534_v32 = vrot.slane %v4766_v19, 1 }
  0x99   : > { %2013 = vmatpush.bf16.msra.mxu1 %v3024_v27  ;;  %v3013_v27 = vld [vmem:[%s6026_s2 + $0x68] sm:$0xf0] }
  0x9a   : > { %1610 = vmatmul.bf16.gmra.mxu0 %v4532_v35  ;;  %v4775_v41 = vsel %vm474_vm0, %v488_v31, %v490_v3  ;;  %v3523_v31 = vld [vmem:[%s6026_s2 + $0x460] sm:$0xf]  ;;  %v3016_v3 = vor.u32 %v3619_v28, %v3013_v27  ;;  %v646_v27 = vrot.slane %v4328_v4, 3 }
  0x9b   : > { %1921 = vmatpush.bf16.msrb.mxu3 %v3420_v50  ;;  %v4763_v50 = vshll.u32 %v4746_v18, 16  ;;  %6119 = vst [vmem:[#allocation30_spill] sm:$0xff] %v4775_v41 }
  0x9d   : > { %1708 = vmatmul.bf16.gmra.mxu2 %v4720_v55  ;;  %v535_v22 = vrot.slane %v4763_v50, 2  ;;  %2014 = vmatpush.bf16.msra.mxu1 %v3016_v3 }
  0x9f   : > { %1922 = vmatpush.bf16.msrb.mxu3 %v3412_v30  ;;  %v536_v55 = vor.u32 %v535_v22, %v534_v32  ;;  %v4803_v32 = vperm.slane %v846_v0, 0  ;;  %v573_v22 = vrot.slane %v4315_v62, 2  ;;  %v643_v0 = vrot.slane %v4315_v62, 3 }
  0xa1   : > { %1659 = vmatmul.bf16.gmra.mxu1 %v4737_v60  ;;  %1757 = vmatmul.bf16.gmra.mxu3 %v4742_v29  ;;  %v464_v29 = vrot.slane %v4763_v50, 1  ;;  %v4782_v44 = vsel %vm500_vm2, %v530_v15, %v536_v55  ;;  %v548_v55 = vrot.slane %v4311_v61, 2  ;;  %v647_v60 = vrot.slane %v4324_v2, 4 }
  0xa2   : > { %6121 = vst [vmem:[#allocation32_spill] sm:$0xff] %v4782_v44 }
  0xa3   : > { %v4778_v30 = vsel %vm397_vm1, %v460_v13, %v464_v29  ;;  %v3748_v29 = vld [vmem:[%s6026_s2 + $0x464] sm:$0xf0]  ;;  %v574_v13 = vrot.slane %v4318_v63, 3  ;;  %v648_v45 = vor.u32 %v647_v60, %v646_v27  ;;  %v3746_v60 = vld [vmem:[%s6026_s2 + $0x454] sm:$0xf0] }
  0xa4   : > { %6120 = vst [vmem:[#allocation31_spill] sm:$0xff] %v4778_v30  ;;  %v3524_v15 = vor.u32 %v3748_v29, %v3523_v31  ;;  %v4809_v31 = vsel %vm546_vm3, %v547_v37, %v548_v55  ;;  %v577_v29 = vrot.slane %v4324_v2, 3 }
  0xa5   : > { %6122 = vst [vmem:[#allocation33_spill] sm:$0xff] %v4809_v31  ;;  %v575_v37 = vor.u32 %v574_v13, %v573_v22 }
  0xa6   : > { %1965 = vmatpush.bf16.msra.mxu0 %v3524_v15  ;;  %v644_v15 = vrot.slane %v4318_v63, 4 }
  0xa8   : > { %v645_v52 = vor.u32 %v644_v15, %v643_v0  ;;  %v550_v0 = vrot.slane %v4345_v16, 2 }
  0xaa   : > { %1615 = vmatmul.bf16.gmra.mxu0 %v4638_v20 }
  0xad   : > { %1713 = vmatmul.bf16.gmra.mxu2 %v4775_v41  ;;  %v617_v41 = vrot.slane %v4307_v59, 3 }
  0xb1   : > { %1664 = vmatmul.bf16.gmra.mxu1 %v4778_v30  ;;  %1762 = vmatmul.bf16.gmra.mxu3 %v4782_v44  ;;  %v576_v44 = vrot.slane %v4328_v4, 2  ;;  %v618_v30 = vrot.slane %v4311_v61, 3  ;;  %v4828_v4 = vsel %vm642_vm6, %v645_v52, %v648_v45  ;;  %v3005_v52 = vld [vmem:[%s6026_s2 + $0x58] sm:$0xf0] }
  0xb2   : > { %6125 = vst [vmem:[#allocation36_spill] sm:$0xff] %v4828_v4 }
  0xb3   : > { %v578_v3 = vor.u32 %v577_v29, %v576_v44  ;;  %v4821_v33 = vsel %vm616_vm4, %v617_v41, %v618_v30  ;;  %v3515_v41 = vld [vmem:[%s6026_s2 + $0x450] sm:$0xf] }
  0xb4   : > { %6123 = vst [vmem:[#allocation34_spill] sm:$0xff] %v4821_v33  ;;  %v3516_v29 = vor.u32 %v3746_v60, %v3515_v41  ;;  %v620_v41 = vrot.slane %v4345_v16, 3 }
  0xb5   : > { %v4824_v63 = vsel %vm572_vm5, %v575_v37, %v578_v3 }
  0xb6   : > { %6124 = vst [vmem:[#allocation35_spill] sm:$0xff] %v4824_v63  ;;  %1966 = vmatpush.bf16.msra.mxu0 %v3516_v29  ;;  %v651_v29 = vrot.slane %v4365_v23, 4 }
  0xb7   : > { %v1581_v28 = vpop.f32.mrf.mxu0 }
  0xb8   : > { %v1582_v46 = vadd.f32 %v1581_v28, %v4803_v32 }
  0xba   : > { %1776 = vmatmul.bf16.vlgmr.msrb.gmra.mxu0 %v4809_v31 }
  0xbd   : > { %1874 = vmatmul.bf16.vlgmr.msrb.gmra.mxu2 %v4821_v33  ;;  %v4852_v33 = vsel %vm546_vm3, %v548_v55, %v550_v0 }
  0xbe   : > { %v1630_v62 = vpop.f32.mrf.mxu1  ;;  %6126 = vst [vmem:[#allocation37_spill] sm:$0xff] %v4852_v33 }
  0xbf   : > { %v1631_v2 = vadd.f32 %v1630_v62, %v1582_v46  ;;  %v1583_v22 = vpop.f32.mrf.mxu0  ;;  %v3617_v46 = vld [vmem:[%s6026_s2 + $0x54] sm:$0xf] }
  0xc0   : > { %v1679_v44 = vpop.f32.mrf.mxu2  ;;  %v1584_v28 = vadd.f32 %v1583_v22, %v4803_v32  ;;  %v3008_v15 = vor.u32 %v3617_v46, %v3005_v52  ;;  %v650_v22 = vrot.slane %v4368_v24, 3 }
  0xc1   : > { %1825 = vmatmul.bf16.vlgmr.msrb.gmra.mxu1 %v4824_v63  ;;  %1923 = vmatmul.bf16.vlgmr.msrb.gmra.mxu3 %v4828_v4  ;;  %v1680_v13 = vadd.f32 %v1679_v44, %v1631_v2  ;;  %v580_v2 = vrot.slane %v4368_v24, 2  ;;  %v581_v44 = vrot.slane %v4365_v23, 3 }
  0xc2   : > { %2015 = vmatpush.bf16.msra.mxu1 %v3008_v15  ;;  %v652_v31 = vor.u32 %v651_v29, %v650_v22  ;;  %v2997_v22 = vld [vmem:[%s6026_s2 + $0x48] sm:$0xf0] }
  0xc4   : > { %v1728_v27 = vpop.f32.mrf.mxu3  ;;  %v4868_v24 = vsel %vm642_vm6, %v648_v45, %v652_v31  ;;  %v3615_v45 = vld [vmem:[%s6026_s2 + $0x44] sm:$0xf] }
  0xc5   : > { %v4846_v62 = vadd.f32 %v1728_v27, %v1680_v13  ;;  %v582_v13 = vor.u32 %v581_v44, %v580_v2  ;;  %v4859_v27 = vsel %vm616_vm4, %v618_v30, %v620_v41  ;;  %6129 = vst [vmem:[#allocation40_spill] sm:$0xff] %v4868_v24  ;;  %v3507_v30 = vld [vmem:[%s6026_s2 + $0x440] sm:$0xf]  ;;  %v3744_v44 = vld [vmem:[%s6026_s2 + $0x444] sm:$0xf0] }
  0xc6   : > { %v1632_v37 = vpop.f32.mrf.mxu1  ;;  %6127 = vst [vmem:[#allocation38_spill] sm:$0xff] %v4859_v27 }
  0xc7   : > { %v1633_v60 = vadd.f32 %v1632_v37, %v1584_v28  ;;  %v1586_v4 = vpop.f32.mrf.mxu0  ;;  %v4864_v55 = vsel %vm572_vm5, %v578_v3, %v582_v13 }
  0xc8   : > { %v1681_v46 = vpop.f32.mrf.mxu2  ;;  %v1587_v15 = vadd.f32 %v1586_v4, %v4803_v32  ;;  %6128 = vst [vmem:[#allocation39_spill] sm:$0xff] %v4864_v55 }
  0xc9   : > { %v1682_v52 = vadd.f32 %v1681_v46, %v1633_v60  ;;  %v3508_v60 = vor.u32 %v3744_v44, %v3507_v30  ;;  %v552_v46 = vrot.slane %v4397_v42, 2  ;;  %v622_v30 = vrot.slane %v4397_v42, 3 }
  0xca   : > { %1781 = vmatmul.bf16.gmra.mxu0 %v4852_v33 }
  0xcb   : > { %1967 = vmatpush.bf16.msra.mxu0 %v3508_v60  ;;  %v655_v60 = vrot.slane %v4414_v48, 4 }
  0xcc   : > { %v1730_v28 = vpop.f32.mrf.mxu3 }
  0xcd   : > { %v4861_v63 = vadd.f32 %v1730_v28, %v1682_v52  ;;  %1879 = vmatmul.bf16.gmra.mxu2 %v4859_v27  ;;  %v3000_v52 = vor.u32 %v3615_v45, %v2997_v22  ;;  %v4892_v27 = vsel %vm546_vm3, %v550_v0, %v552_v46 }
  0xce   : > { %v1635_v37 = vpop.f32.mrf.mxu1  ;;  %6130 = vst [vmem:[#allocation41_spill] sm:$0xff] %v4892_v27 }
  0xcf   : > { %v1636_v23 = vadd.f32 %v1635_v37, %v1587_v15  ;;  %v1588_v2 = vpop.f32.mrf.mxu0  ;;  %2016 = vmatpush.bf16.msra.mxu1 %v3000_v52 }
  0xd0   : > { %v1684_v4 = vpop.f32.mrf.mxu2  ;;  %v1589_v29 = vadd.f32 %v1588_v2, %v4803_v32  ;;  %v654_v2 = vrot.slane %v4417_v49, 3 }
  0xd1   : > { %1830 = vmatmul.bf16.gmra.mxu1 %v4864_v55  ;;  %1928 = vmatmul.bf16.gmra.mxu3 %v4868_v24  ;;  %v1685_v3 = vadd.f32 %v1684_v4, %v1636_v23  ;;  %v584_v23 = vrot.slane %v4417_v49, 2  ;;  %v585_v4 = vrot.slane %v4414_v48, 3 }
  0xd2   : > { %v656_v33 = vor.u32 %v655_v60, %v654_v2  ;;  %v2989_v2 = vld [vmem:[%s6026_s2 + $0x38] sm:$0xf0] }
  0xd4   : > { %v1733_v15 = vpop.f32.mrf.mxu3  ;;  %v4908_v49 = vsel %vm642_vm6, %v652_v31, %v656_v33  ;;  %v3613_v31 = vld [vmem:[%s6026_s2 + $0x34] sm:$0xf] }
  0xd5   : > { %v4886_v37 = vadd.f32 %v1733_v15, %v1685_v3  ;;  %v586_v3 = vor.u32 %v585_v4, %v584_v23  ;;  %v4899_v15 = vsel %vm616_vm4, %v620_v41, %v622_v30  ;;  %6133 = vst [vmem:[#allocation44_spill] sm:$0xff] %v4908_v49  ;;  %v3499_v41 = vld [vmem:[%s6026_s2 + $0x430] sm:$0xf]  ;;  %v3742_v4 = vld [vmem:[%s6026_s2 + $0x434] sm:$0xf0] }
  0xd6   : > { %v1637_v28 = vpop.f32.mrf.mxu1  ;;  %6131 = vst [vmem:[#allocation42_spill] sm:$0xff] %v4899_v15 }
  0xd7   : > { %v1638_v44 = vadd.f32 %v1637_v28, %v1589_v29  ;;  %v1591_v24 = vpop.f32.mrf.mxu0  ;;  %v4904_v0 = vsel %vm572_vm5, %v582_v13, %v586_v3 }
  0xd8   : > { %v1686_v45 = vpop.f32.mrf.mxu2  ;;  %v1592_v52 = vadd.f32 %v1591_v24, %v4803_v32  ;;  %6132 = vst [vmem:[#allocation43_spill] sm:$0xff] %v4904_v0 }
  0xd9   : > { %v1687_v22 = vadd.f32 %v1686_v45, %v1638_v44  ;;  %v3500_v44 = vor.u32 %v3742_v4, %v3499_v41  ;;  %v554_v45 = vrot.slane %v4443_v14, 2  ;;  %v624_v41 = vrot.slane %v4443_v14, 3 }
  0xda   : > { %1786 = vmatmul.bf16.gmra.mxu0 %v4892_v27 }
  0xdb   : > { %1968 = vmatpush.bf16.msra.mxu0 %v3500_v44  ;;  %v659_v44 = vrot.slane %v4460_v25, 4 }
  0xdc   : > { %v1735_v29 = vpop.f32.mrf.mxu3 }
  0xdd   : > { %v4901_v55 = vadd.f32 %v1735_v29, %v1687_v22  ;;  %1884 = vmatmul.bf16.gmra.mxu2 %v4899_v15  ;;  %v2992_v22 = vor.u32 %v3613_v31, %v2989_v2  ;;  %v4932_v15 = vsel %vm546_vm3, %v552_v46, %v554_v45 }
  0xde   : > { %v1640_v28 = vpop.f32.mrf.mxu1 }
  0xdf   : > { %v1641_v48 = vadd.f32 %v1640_v28, %v1592_v52  ;;  %v1593_v23 = vpop.f32.mrf.mxu0  ;;  %2017 = vmatpush.bf16.msra.mxu1 %v2992_v22 }
  0xe0   : > { %v1689_v24 = vpop.f32.mrf.mxu2  ;;  %v1594_v60 = vadd.f32 %v1593_v23, %v4803_v32  ;;  %v658_v23 = vrot.slane %v4463_v26, 3 }
  0xe1   : > { %1835 = vmatmul.bf16.gmra.mxu1 %v4904_v0  ;;  %1933 = vmatmul.bf16.gmra.mxu3 %v4908_v49  ;;  %v1690_v13 = vadd.f32 %v1689_v24, %v1641_v48  ;;  %v588_v48 = vrot.slane %v4463_v26, 2  ;;  %v589_v24 = vrot.slane %v4460_v25, 3 }
  0xe2   : > { %v660_v27 = vor.u32 %v659_v44, %v658_v23  ;;  %v2981_v23 = vld [vmem:[%s6026_s2 + $0x28] sm:$0xf0] }
  0xe4   : > { %v1738_v52 = vpop.f32.mrf.mxu3  ;;  %v4948_v26 = vsel %vm642_vm6, %v656_v33, %v660_v27  ;;  %v3611_v33 = vld [vmem:[%s6026_s2 + $0x24] sm:$0xf] }
  0xe5   : > { %v4926_v28 = vadd.f32 %v1738_v52, %v1690_v13  ;;  %v590_v13 = vor.u32 %v589_v24, %v588_v48  ;;  %v4939_v52 = vsel %vm616_vm4, %v622_v30, %v624_v41  ;;  %6135 = vst [vmem:[#allocation46_spill] sm:$0xff] %v4948_v26  ;;  %v3491_v30 = vld [vmem:[%s6026_s2 + $0x420] sm:$0xf]  ;;  %v3740_v24 = vld [vmem:[%s6026_s2 + $0x424] sm:$0xf0] }
  0xe6   : > { %v1642_v29 = vpop.f32.mrf.mxu1  ;;  %6134 = vst [vmem:[#allocation45_spill] sm:$0xff] %v4939_v52 }
  0xe7   : > { %v1643_v4 = vadd.f32 %v1642_v29, %v1594_v60  ;;  %v1596_v49 = vpop.f32.mrf.mxu0  ;;  %v4944_v46 = vsel %vm572_vm5, %v586_v3, %v590_v13 }
  0xe8   : > { %v1691_v31 = vpop.f32.mrf.mxu2  ;;  %v1597_v22 = vadd.f32 %v1596_v49, %v4803_v32 }
  0xe9   : > { %v1692_v2 = vadd.f32 %v1691_v31, %v1643_v4  ;;  %v3492_v4 = vor.u32 %v3740_v24, %v3491_v30  ;;  %v6072_v31 = vrot.slane %v4489_v51, 2  ;;  %v6073_v30 = vrot.slane %v4489_v51, 3 }
  0xea   : > { %1791 = vmatmul.bf16.gmra.mxu0 %v4932_v15 }
  0xeb   : > { %1969 = vmatpush.bf16.msra.mxu0 %v3492_v4  ;;  %v662_v4 = vrot.slane %v4511_v8, 3 }
  0xec   : > { %v1740_v60 = vpop.f32.mrf.mxu3 }
  0xed   : > { %v4941_v0 = vadd.f32 %v1740_v60, %v1692_v2  ;;  %1889 = vmatmul.bf16.gmra.mxu2 %v4939_v52  ;;  %v2984_v2 = vor.u32 %v3611_v33, %v2981_v23  ;;  %v663_v33 = vrot.slane %v4508_v6, 4  ;;  %v667_v52 = vrot.slane %v4549_v57, 4 }
  0xee   : > { %v1645_v29 = vpop.f32.mrf.mxu1 }
  0xef   : > { %v1646_v25 = vadd.f32 %v1645_v29, %v1597_v22  ;;  %v1598_v48 = vpop.f32.mrf.mxu0  ;;  %2018 = vmatpush.bf16.msra.mxu1 %v2984_v2 }
  0xf0   : > { %v1694_v49 = vpop.f32.mrf.mxu2  ;;  %v1599_v44 = vadd.f32 %v1598_v48, %v4803_v32  ;;  %v4974_v48 = vsel %vm546_vm3, %v554_v45, %v6072_v31 }
  0xf1   : > { %1840 = vmatmul.bf16.gmra.mxu1 %v4944_v46  ;;  %1938 = vmatmul.bf16.gmra.mxu3 %v4948_v26  ;;  %v1695_v3 = vadd.f32 %v1694_v49, %v1646_v25  ;;  %v592_v25 = vrot.slane %v4511_v8, 2  ;;  %v593_v49 = vrot.slane %v4508_v6, 3  ;;  %6136 = vst [vmem:[#allocation47_spill] sm:$0xff] %v4974_v48 }
  0xf3   : > { %v4979_v2 = vor.u32 %v593_v49, %v592_v25 }
  0xf4   : > { %v1743_v22 = vpop.f32.mrf.mxu3 }
  0xf5   : > { %v4966_v29 = vadd.f32 %v1743_v22, %v1695_v3  ;;  %v4993_v6 = vsel %vm572_vm5, %v590_v13, %v4979_v2 }
  0xf6   : > { %v1647_v60 = vpop.f32.mrf.mxu1  ;;  %6138 = vst [vmem:[#allocation49_spill] sm:$0xff] %v4993_v6 }
  0xf7   : > { %v1648_v24 = vadd.f32 %v1647_v60, %v1599_v44  ;;  %v1601_v26 = vpop.f32.mrf.mxu0  ;;  %v4985_v44 = vsel %vm616_vm4, %v624_v41, %v6073_v30  ;;  %v4987_v60 = vor.u32 %v663_v33, %v662_v4  ;;  %v3637_v41 = vld [vmem:[%s6026_s2 + $0xf4] sm:$0xf]  ;;  %v6080_v30 = vrot.slane %v4532_v35, 2 }
  0xf8   : > { %v1696_v23 = vpop.f32.mrf.mxu2  ;;  %v1602_v22 = vadd.f32 %v1601_v26, %v4803_v32  ;;  %6137 = vst [vmem:[#allocation48_spill] sm:$0xff] %v4985_v44  ;;  %v3653_v33 = vld [vmem:[%s6026_s2 + $0x174] sm:$0xf] }
  0xf9   : > { %v1697_v3 = vadd.f32 %v1696_v23, %v1648_v24  ;;  %v4998_v26 = vsel %vm642_vm6, %v660_v27, %v4987_v60  ;;  %v3085_v24 = vld [vmem:[%s6026_s2 + $0xf8] sm:$0xf0]  ;;  %v3738_v27 = vld [vmem:[%s6026_s2 + $0x414] sm:$0xf0] }
  0xfa   : > { %1796 = vmatmul.bf16.gmra.mxu0 %v4974_v48  ;;  %6139 = vst [vmem:[#allocation50_spill] sm:$0xff] %v4998_v26  ;;  %v3088_v4 = vor.u32 %v3637_v41, %v3085_v24  ;;  %v3149_v41 = vld [vmem:[%s6026_s2 + $0x178] sm:$0xf0]  ;;  %v596_v48 = vrot.slane %v4552_v58, 2 }
  0xfc   : > { %v1745_v45 = vpop.f32.mrf.mxu3  ;;  %2062 = vmatpush.bf16.msra.mxu2 %v3088_v4  ;;  %v3141_v4 = vld [vmem:[%s6026_s2 + $0x168] sm:$0xf0] }
  0xfd   : > { %v4989_v8 = vadd.f32 %v1745_v45, %v1697_v3  ;;  %1894 = vmatmul.bf16.gmra.mxu2 %v4985_v44  ;;  %v2973_v45 = vld [vmem:[%s6026_s2 + $0x18] sm:$0xf0] }
  0xfe   : > { %v1650_v31 = vpop.f32.mrf.mxu1 }
  0xff   : > { %v1651_v25 = vadd.f32 %v1650_v31, %v1602_v22  ;;  %v1603_v49 = vpop.f32.mrf.mxu0  ;;  %v3483_v31 = vld [vmem:[%s6026_s2 + $0x410] sm:$0xf]  ;;  %v3609_v22 = vld [vmem:[%s6026_s2 + $0x14] sm:$0xf] }
 0x100   : > { %v1699_v13 = vpop.f32.mrf.mxu2  ;;  %v3484_v3 = vor.u32 %v3738_v27, %v3483_v31  ;;  %v1604_v24 = vadd.f32 %v1603_v49, %v4803_v32  ;;  %v3077_v31 = vld [vmem:[%s6026_s2 + $0xe8] sm:$0xf0]  ;;  %v3651_v49 = vld [vmem:[%s6026_s2 + $0x164] sm:$0xf] }
 0x101   : > { %1845 = vmatmul.bf16.gmra.mxu1 %v4993_v6  ;;  %1943 = vmatmul.bf16.gmra.mxu3 %v4998_v26  ;;  %v1700_v23 = vadd.f32 %v1699_v13, %v1651_v25  ;;  %v2976_v26 = vor.u32 %v3609_v22, %v2973_v45  ;;  %v3152_v25 = vor.u32 %v3653_v33, %v3149_v41  ;;  %v3635_v13 = vld [vmem:[%s6026_s2 + $0xe4] sm:$0xf]  ;;  %v597_v45 = vrot.slane %v4549_v57, 3  ;;  %v3133_v57 = vld [vmem:[%s6026_s2 + $0x158] sm:$0xf0] }
 0x102   : > { %1970 = vmatpush.bf16.msra.mxu0 %v3484_v3  ;;  %v3080_v27 = vor.u32 %v3635_v13, %v3077_v31  ;;  %v6079_v3 = vrot.slane %v4532_v35, 3  ;;  %v3144_v41 = vor.u32 %v3651_v49, %v3141_v4  ;;  %v666_v6 = vrot.slane %v4552_v58, 3  ;;  %v3649_v4 = vld [vmem:[%s6026_s2 + $0x154] sm:$0xf] }
 0x103   : > { %2019 = vmatpush.bf16.msra.mxu1 %v2976_v26  ;;  %2111 = vmatpush.bf16.msra.mxu3 %v3152_v25  ;;  %v6140_v26 = vrot.slane %v4489_v51, 2 }
 0x104   : > { %v1748_v44 = vpop.f32.mrf.mxu3  ;;  %2063 = vmatpush.bf16.msra.mxu2 %v3080_v27  ;;  %v5067_v27 = vor.u32 %v597_v45, %v596_v48  ;;  %v3061_v48 = vld [vmem:[%s6026_s2 + $0xc8] sm:$0xf0] }
 0x105   : > { %v5041_v22 = vadd.f32 %v1748_v44, %v1700_v23  ;;  %v5050_v25 = vsel %vm546_vm3, %v6140_v26, %v6080_v30  ;;  %v3633_v44 = vld [vmem:[%s6026_s2 + $0xd4] sm:$0xf]  ;;  %v3069_v23 = vld [vmem:[%s6026_s2 + $0xd8] sm:$0xf0] }
 0x106   : > { %v1652_v33 = vpop.f32.mrf.mxu1  ;;  %6141 = vst [vmem:[#allocation51_spill] sm:$0xff] %v5050_v25 }
 0x107   : > { %v1653_v13 = vadd.f32 %v1652_v33, %v1604_v24  ;;  %v1606_v31 = vpop.f32.mrf.mxu0  ;;  %v3072_v24 = vor.u32 %v3633_v44, %v3069_v23  ;;  %2112 = vmatpush.bf16.msra.mxu3 %v3144_v41  ;;  %v3136_v33 = vor.u32 %v3649_v4, %v3133_v57  ;;  %v6142_v41 = vrot.slane %v4489_v51, 3 }
 0x108   : > { %v1701_v49 = vpop.f32.mrf.mxu2  ;;  %v1607_v26 = vadd.f32 %v1606_v31, %v4803_v32  ;;  %v5077_v23 = vor.u32 %v667_v52, %v666_v6  ;;  %v3125_v52 = vld [vmem:[%s6026_s2 + $0x148] sm:$0xf0]  ;;  %v5096_v4 = vsel %vm572_vm5, %v4979_v2, %v5067_v27  ;;  %v3053_v2 = vld [vmem:[%s6026_s2 + $0xb8] sm:$0xf0] }
 0x109   : > { %v1702_v58 = vadd.f32 %v1701_v49, %v1653_v13  ;;  %v5075_v44 = vsel %vm616_vm4, %v6142_v41, %v6079_v3  ;;  %2064 = vmatpush.bf16.msra.mxu2 %v3072_v24  ;;  %v3631_v13 = vld [vmem:[%s6026_s2 + $0xc4] sm:$0xf]  ;;  %6144 = vst [vmem:[#allocation53_spill] sm:$0xff] %v5096_v4 }
 0x10a   : > { %1801 = vmatmul.bf16.gmra.mxu0 %v5050_v25  ;;  %6143 = vst [vmem:[#allocation52_spill] sm:$0xff] %v5075_v44  ;;  %v3064_v45 = vor.u32 %v3631_v13, %v3061_v48  ;;  %v3647_v49 = vld [vmem:[%s6026_s2 + $0x144] sm:$0xf]  ;;  %v5102_v41 = vsel %vm642_vm6, %v4987_v60, %v5077_v23  ;;  %v3475_v60 = vld [vmem:[%s6026_s2 + $0x400] sm:$0xf] }
 0x10b   : > { %2113 = vmatpush.bf16.msra.mxu3 %v3136_v33  ;;  %v3128_v57 = vor.u32 %v3647_v49, %v3125_v52  ;;  %6145 = vst [vmem:[#allocation54_spill] sm:$0xff] %v5102_v41 }
 0x10c   : > { %v1750_v31 = vpop.f32.mrf.mxu3 }
 0x10d   : > { %v5091_v24 = vadd.f32 %v1750_v31, %v1702_v58  ;;  %1899 = vmatmul.bf16.gmra.mxu2 %v5075_v44  ;;  %v3629_v58 = vld [vmem:[%s6026_s2 + $0xb4] sm:$0xf]  ;;  %v601_v44 = vrot.slane %v4662_v34, 3 }
 0x10e   : > { %v1655_v6 = vpop.f32.mrf.mxu1  ;;  %2065 = vmatpush.bf16.msra.mxu2 %v3064_v45  ;;  %v3056_v48 = vor.u32 %v3629_v58, %v3053_v2  ;;  %v3736_v45 = vld [vmem:[%s6026_s2 + $0x404] sm:$0xf0]  ;;  %v3645_v58 = vld [vmem:[%s6026_s2 + $0x134] sm:$0xf] }
 0x10f   : > { %v1656_v33 = vadd.f32 %v1655_v6, %v1607_v26  ;;  %v1608_v13 = vpop.f32.mrf.mxu0  ;;  %2114 = vmatpush.bf16.msra.mxu3 %v3128_v57  ;;  %v3476_v52 = vor.u32 %v3736_v45, %v3475_v60  ;;  %v3607_v6 = vld [vmem:[%s6026_s2 + $0x4] sm:$0xf]  ;;  %v2965_v57 = vld [vmem:[%s6026_s2 + $0x8] sm:$0xf0] }
 0x110   : > { %v1704_v31 = vpop.f32.mrf.mxu2  ;;  %v1609_v2 = vadd.f32 %v1608_v13, %v4803_v32  ;;  %v2968_v3 = vor.u32 %v3607_v6, %v2965_v57  ;;  %v3045_v60 = vld [vmem:[%s6026_s2 + $0xa8] sm:$0xf0]  ;;  %v600_v13 = vrot.slane %v4665_v21, 2 }
 0x111   : > { %1850 = vmatmul.bf16.gmra.mxu1 %v5096_v4  ;;  %1948 = vmatmul.bf16.gmra.mxu3 %v5102_v41  ;;  %v1705_v49 = vadd.f32 %v1704_v31, %v1656_v33  ;;  %v3117_v33 = vld [vmem:[%s6026_s2 + $0x138] sm:$0xf0]  ;;  %v3627_v31 = vld [vmem:[%s6026_s2 + $0xa4] sm:$0xf]  ;;  %v3109_v6 = vld [vmem:[%s6026_s2 + $0x128] sm:$0xf0] }
 0x112   : > { %2066 = vmatpush.bf16.msra.mxu2 %v3056_v48  ;;  %1971 = vmatpush.bf16.msra.mxu0 %v3476_v52  ;;  %v3120_v45 = vor.u32 %v3645_v58, %v3117_v33  ;;  %v3048_v30 = vor.u32 %v3627_v31, %v3045_v60  ;;  %v3643_v48 = vld [vmem:[%s6026_s2 + $0x124] sm:$0xf]  ;;  %v6085_v52 = vrot.slane %v4638_v20, 3  ;;  %v6147_v60 = vrot.slane %v4532_v35, 2 }
 0x113   : > { %2020 = vmatpush.bf16.msra.mxu1 %v2968_v3  ;;  %v3112_v58 = vor.u32 %v3643_v48, %v3109_v6  ;;  %v6146_v3 = vrot.slane %v4638_v20, 2  ;;  %v670_v4 = vrot.slane %v4665_v21, 3  ;;  %v3641_v6 = vld [vmem:[%s6026_s2 + $0x114] sm:$0xf]  ;;  %v3101_v21 = vld [vmem:[%s6026_s2 + $0x118] sm:$0xf0] }
 0x114   : > { %v1753_v26 = vpop.f32.mrf.mxu3  ;;  %2115 = vmatpush.bf16.msra.mxu3 %v3120_v45 }
 0x115   : > { %v5145_v41 = vadd.f32 %v1753_v26, %v1705_v49  ;;  %v5154_v25 = vsel %vm546_vm3, %v6147_v60, %v6146_v3  ;;  %v671_v26 = vrot.slane %v4662_v34, 4  ;;  %v3625_v49 = vld [vmem:[%s6026_s2 + $0x94] sm:$0xf]  ;;  %v6149_v60 = vrot.slane %v4532_v35, 3 }
 0x116   : > { %v1657_v57 = vpop.f32.mrf.mxu1  ;;  %6148 = vst [vmem:[#allocation55_spill] sm:$0xff] %v5154_v25  ;;  %2067 = vmatpush.bf16.msra.mxu2 %v3048_v30  ;;  %v602_v30 = vor.u32 %v601_v44, %v600_v13  ;;  %v3029_v44 = vld [vmem:[%s6026_s2 + $0x88] sm:$0xf0] }
 0x117   : > { %v1658_v33 = vadd.f32 %v1657_v57, %v1609_v2  ;;  %v1611_v31 = vpop.f32.mrf.mxu0  ;;  %v3037_v2 = vld [vmem:[%s6026_s2 + $0x98] sm:$0xf0]  ;;  %v3104_v57 = vor.u32 %v3641_v6, %v3101_v21 }
 0x118   : > { %v3040_v45 = vor.u32 %v3625_v49, %v3037_v2  ;;  %v1706_v48 = vpop.f32.mrf.mxu2  ;;  %2116 = vmatpush.bf16.msra.mxu3 %v3112_v58  ;;  %v1612_v3 = vadd.f32 %v1611_v31, %v4803_v32  ;;  %v5177_v49 = vsel %vm616_vm4, %v6149_v60, %v6085_v52  ;;  %v672_v2 = vor.u32 %v671_v26, %v670_v4  ;;  %v3639_v31 = vld [vmem:[%s6026_s2 + $0x104] sm:$0xf] }
 0x119   : > { %v1707_v34 = vadd.f32 %v1706_v48, %v1658_v33  ;;  %6150 = vst [vmem:[#allocation56_spill] sm:$0xff] %v5177_v49  ;;  %v3623_v33 = vld [vmem:[%s6026_s2 + $0x84] sm:$0xf]  ;;  %v3093_v48 = vld [vmem:[%s6026_s2 + $0x108] sm:$0xf0] }
 0x11a   : > { %1806 = vmatmul.bf16.gmra.mxu0 %v5154_v25  ;;  %2068 = vmatpush.bf16.msra.mxu2 %v3040_v45  ;;  %v3032_v13 = vor.u32 %v3623_v33, %v3029_v44  ;;  %v5195_v45 = vsel %vm572_vm5, %v5067_v27, %v602_v30  ;;  %v5200_v21 = vsel %vm642_vm6, %v5077_v23, %v672_v2  ;;  %v3213_v27 = vld [vmem:[%s6026_s2 + $0x1f8] sm:$0xf0]  ;;  %v3685_v23 = vld [vmem:[%s6026_s2 + $0x274] sm:$0xf] }
 0x11b   : > { %6151 = vst [vmem:[#allocation57_spill] sm:$0xff] %v5200_v21  ;;  %v3096_v33 = vor.u32 %v3639_v31, %v3093_v48  ;;  %v562_v31 = vrot.slane %v4746_v18, 2 }
 0x11c   : > { %v1755_v58 = vpop.f32.mrf.mxu3  ;;  %2117 = vmatpush.bf16.msra.mxu3 %v3104_v57 }
 0x11d   : > { %v5191_v26 = vadd.f32 %v1755_v58, %v1707_v34  ;;  %1904 = vmatmul.bf16.gmra.mxu2 %v5177_v49  ;;  %v3669_v34 = vld [vmem:[%s6026_s2 + $0x1f4] sm:$0xf] }
 0x11e   : > { %v1660_v4 = vpop.f32.mrf.mxu1  ;;  %2069 = vmatpush.bf16.msra.mxu2 %v3032_v13  ;;  %v3277_v13 = vld [vmem:[%s6026_s2 + $0x278] sm:$0xf0] }
 0x11f   : > { %v1661_v6 = vadd.f32 %v1660_v4, %v1612_v3  ;;  %v1613_v60 = vpop.f32.mrf.mxu0  ;;  %v3216_v3 = vor.u32 %v3669_v34, %v3213_v27  ;;  %v3280_v48 = vor.u32 %v3685_v23, %v3277_v13  ;;  %v605_v34 = vrot.slane %v4763_v50, 3 }
 0x120   : > { %v1709_v44 = vpop.f32.mrf.mxu2  ;;  %v1614_v58 = vadd.f32 %v1613_v60, %v4803_v32  ;;  %2118 = vmatpush.bf16.msra.mxu3 %v3096_v33  ;;  %v632_v27 = vrot.slane %v4746_v18, 3  ;;  %v6152_v60 = vrot.slane %v4638_v20, 2  ;;  %v674_v33 = vrot.slane %v4766_v19, 3 }
 0x121   : > { %1855 = vmatmul.bf16.gmra.mxu1 %v5195_v45  ;;  %1953 = vmatmul.bf16.gmra.mxu3 %v5200_v21  ;;  %v1710_v57 = vadd.f32 %v1709_v44, %v1661_v6  ;;  %v604_v44 = vrot.slane %v4766_v19, 2  ;;  %v6153_v18 = vrot.slane %v4638_v20, 3 }
 0x122   : > { %2160 = vmatpush.bf16.msrb.mxu0 %v3216_v3  ;;  %2209 = vmatpush.bf16.msrb.mxu1 %v3280_v48  ;;  %v5226_v25 = vsel %vm546_vm3, %v6152_v60, %v562_v31  ;;  %v675_v3 = vrot.slane %v4763_v50, 4 }
 0x123   : > { %v606_v13 = vor.u32 %v605_v34, %v604_v44  ;;  %v3667_v34 = vld [vmem:[%s6026_s2 + $0x1e4] sm:$0xf] }
 0x124   : > { %v1758_v4 = vpop.f32.mrf.mxu3 }
 0x125   : > { %v5218_v6 = vadd.f32 %v1758_v4, %v1710_v57  ;;  %v5240_v19 = vsel %vm572_vm5, %v602_v30, %v606_v13 }
 0x126   : > { %v1662_v52 = vpop.f32.mrf.mxu1 }
 0x127   : > { %v1663_v21 = vadd.f32 %v1662_v52, %v1614_v58  ;;  %v1616_v49 = vpop.f32.mrf.mxu0  ;;  %v5235_v52 = vsel %vm616_vm4, %v6153_v18, %v632_v27  ;;  %v676_v58 = vor.u32 %v675_v3, %v674_v33  ;;  %v3205_v27 = vld [vmem:[%s6026_s2 + $0x1e8] sm:$0xf0] }
 0x128   : > { %v1711_v23 = vpop.f32.mrf.mxu2  ;;  %v1617_v48 = vadd.f32 %v1616_v49, %v4803_v32  ;;  %v3208_v33 = vor.u32 %v3667_v34, %v3205_v27  ;;  %v3269_v3 = vld [vmem:[%s6026_s2 + $0x268] sm:$0xf0] }
 0x129   : > { %v1712_v57 = vadd.f32 %v1711_v23, %v1663_v21  ;;  %v5244_v21 = vsel %vm642_vm6, %v672_v2, %v676_v58  ;;  %v3683_v2 = vld [vmem:[%s6026_s2 + $0x264] sm:$0xf]  ;;  %v5265_v58 = vpack.c.b16 %v4302_v54, %v4300_v53  ;;  %v3665_v54 = vld [vmem:[%s6026_s2 + $0x1d4] sm:$0xf] }
 0x12a   : > { %1811 = vmatmul.bf16.gmra.mxu0 %v5226_v25 }
 0x12b   : > { %2161 = vmatpush.bf16.msrb.mxu0 %v3208_v33 }
 0x12c   : > { %v1760_v4 = vpop.f32.mrf.mxu3 }
 0x12d   : > { %v5237_v60 = vadd.f32 %v1760_v4, %v1712_v57  ;;  %1909 = vmatmul.bf16.gmra.mxu2 %v5235_v52  ;;  %v3272_v57 = vor.u32 %v3683_v2, %v3269_v3 }
 0x12e   : > { %v1665_v31 = vpop.f32.mrf.mxu1 }
 0x12f   : > { %v1666_v50 = vadd.f32 %v1665_v31, %v1617_v48  ;;  %v1618_v49 = vpop.f32.mrf.mxu0  ;;  %2210 = vmatpush.bf16.msrb.mxu1 %v3272_v57 }
 0x130   : > { %v1714_v44 = vpop.f32.mrf.mxu2  ;;  %v1619_v23 = vadd.f32 %v1618_v49, %v4803_v32 }
 0x131   : > { %1860 = vmatmul.bf16.gmra.mxu1 %v5240_v19  ;;  %1958 = vmatmul.bf16.gmra.mxu3 %v5244_v21  ;;  %v1715_v30 = vadd.f32 %v1714_v44, %v1666_v50 }
 0x134   : > { %v1763_v13 = vpop.f32.mrf.mxu3 }
 0x135   : > { %v5261_v18 = vadd.f32 %v1763_v13, %v1715_v30 }
 0x136   : > { %v1667_v48 = vpop.f32.mrf.mxu1 }
 0x137   : > { %v1668_v4 = vadd.f32 %v1667_v48, %v1619_v23  ;;  %v1777_v31 = vpop.f32.mrf.mxu0 }
 0x138   : > { %v1778_v50 = vadd.f32 %v1777_v31, %v4846_v62  ;;  %v1716_v44 = vpop.f32.mrf.mxu2  ;;  %v3197_v62 = vld [vmem:[%s6026_s2 + $0x1d8] sm:$0xf0] }
 0x139   : > { %v1717_v34 = vadd.f32 %v1716_v44, %v1668_v4  ;;  %v3200_v23 = vor.u32 %v3665_v54, %v3197_v62 }
 0x13a   : > { %1972 = vmatmul.bf16.vlgmr.msra.gmra.mxu0 %v5265_v58 }
 0x13b   : > { %2162 = vmatpush.bf16.msrb.mxu0 %v3200_v23 }
 0x13c   : > { %v1765_v32 = vpop.f32.mrf.mxu3 }
 0x13d   : > { %v5269_v49 = vadd.f32 %v1765_v32, %v1717_v34  ;;  %2070 = vmatmul.bf16.vlgmr.msra.gmra.mxu2 %v4348_v17  ;;  %v3681_v17 = vld [vmem:[%s6026_s2 + $0x254] sm:$0xf] }
 0x13e   : > { %v1826_v27 = vpop.f32.mrf.mxu1 }
 0x13f   : > { %v1827_v30 = vadd.f32 %v1826_v27, %v1778_v50  ;;  %v1779_v33 = vpop.f32.mrf.mxu0 }
 0x140   : > { %v1780_v2 = vadd.f32 %v1779_v33, %v4861_v63  ;;  %v1875_v53 = vpop.f32.mrf.mxu2 }
 0x141   : > { %2021 = vmatmul.bf16.vlgmr.msra.gmra.mxu1 %v4307_v59  ;;  %2119 = vmatmul.bf16.vlgmr.msra.gmra.mxu3 %v4337_v10  ;;  %v1876_v3 = vadd.f32 %v1875_v53, %v1827_v30  ;;  %v3261_v59 = vld [vmem:[%s6026_s2 + $0x258] sm:$0xf0]  ;;  %v5291_v10 = vpack.c.b16 %v4321_v1, %v4304_v56  ;;  %v3663_v1 = vld [vmem:[%s6026_s2 + $0x1c4] sm:$0xf] }
 0x142   : > { %v3264_v63 = vor.u32 %v3681_v17, %v3261_v59 }
 0x144   : > { %v1924_v57 = vpop.f32.mrf.mxu3  ;;  %2211 = vmatpush.bf16.msrb.mxu1 %v3264_v63 }
 0x145   : > { %v5287_v48 = vadd.f32 %v1924_v57, %v1876_v3 }
 0x146   : > { %v1828_v13 = vpop.f32.mrf.mxu1 }
 0x147   : > { %v1829_v4 = vadd.f32 %v1828_v13, %v1780_v2  ;;  %v1782_v31 = vpop.f32.mrf.mxu0 }
 0x148   : > { %v1783_v50 = vadd.f32 %v1782_v31, %v4886_v37  ;;  %v1877_v44 = vpop.f32.mrf.mxu2  ;;  %v3189_v37 = vld [vmem:[%s6026_s2 + $0x1c8] sm:$0xf0] }
 0x149   : > { %v1878_v34 = vadd.f32 %v1877_v44, %v1829_v4  ;;  %v3192_v62 = vor.u32 %v3663_v1, %v3189_v37 }
 0x14a   : > { %1977 = vmatmul.bf16.gmra.mxu0 %v5291_v10 }
 0x14b   : > { %2163 = vmatpush.bf16.msrb.mxu0 %v3192_v62 }
 0x14c   : > { %v1926_v32 = vpop.f32.mrf.mxu3 }
 0x14d   : > { %v5295_v30 = vadd.f32 %v1926_v32, %v1878_v34  ;;  %2075 = vmatmul.bf16.gmra.mxu2 %v4389_v40  ;;  %v3679_v40 = vld [vmem:[%s6026_s2 + $0x244] sm:$0xf] }
 0x14e   : > { %v1831_v27 = vpop.f32.mrf.mxu1 }
 0x14f   : > { %v1832_v33 = vadd.f32 %v1831_v27, %v1783_v50  ;;  %v1784_v53 = vpop.f32.mrf.mxu0 }
 0x150   : > { %v1785_v54 = vadd.f32 %v1784_v53, %v4901_v55  ;;  %v1880_v56 = vpop.f32.mrf.mxu2 }
 0x151   : > { %2026 = vmatmul.bf16.gmra.mxu1 %v4311_v61  ;;  %2124 = vmatmul.bf16.gmra.mxu3 %v4382_v36  ;;  %v1881_v2 = vadd.f32 %v1880_v56, %v1832_v33  ;;  %v3253_v61 = vld [vmem:[%s6026_s2 + $0x248] sm:$0xf0]  ;;  %v5317_v36 = vpack.c.b16 %v4384_v38, %v4330_v5  ;;  %v3661_v38 = vld [vmem:[%s6026_s2 + $0x1b4] sm:$0xf] }
 0x152   : > { %v3256_v55 = vor.u32 %v3679_v40, %v3253_v61 }
 0x154   : > { %v1929_v3 = vpop.f32.mrf.mxu3  ;;  %2212 = vmatpush.bf16.msrb.mxu1 %v3256_v55 }
 0x155   : > { %v5313_v17 = vadd.f32 %v1929_v3, %v1881_v2 }
 0x156   : > { %v1833_v23 = vpop.f32.mrf.mxu1 }
 0x157   : > { %v1834_v59 = vadd.f32 %v1833_v23, %v1785_v54  ;;  %v1787_v63 = vpop.f32.mrf.mxu0 }
 0x158   : > { %v1788_v57 = vadd.f32 %v1787_v63, %v4926_v28  ;;  %v1882_v13 = vpop.f32.mrf.mxu2  ;;  %v3181_v28 = vld [vmem:[%s6026_s2 + $0x1b8] sm:$0xf0] }
 0x159   : > { %v1883_v4 = vadd.f32 %v1882_v13, %v1834_v59  ;;  %v3184_v53 = vor.u32 %v3661_v38, %v3181_v28 }
 0x15a   : > { %1982 = vmatmul.bf16.gmra.mxu0 %v5317_v36 }
 0x15b   : > { %2164 = vmatpush.bf16.msrb.mxu0 %v3184_v53 }
 0x15c   : > { %v1931_v31 = vpop.f32.mrf.mxu3 }
 0x15d   : > { %v5321_v44 = vadd.f32 %v1931_v31, %v1883_v4  ;;  %2080 = vmatmul.bf16.gmra.mxu2 %v4435_v12  ;;  %v3677_v12 = vld [vmem:[%s6026_s2 + $0x234] sm:$0xf] }
 0x15e   : > { %v1836_v50 = vpop.f32.mrf.mxu1 }
 0x15f   : > { %v1837_v34 = vadd.f32 %v1836_v50, %v1788_v57  ;;  %v1789_v32 = vpop.f32.mrf.mxu0 }
 0x160   : > { %v1790_v27 = vadd.f32 %v1789_v32, %v4941_v0  ;;  %v1885_v5 = vpop.f32.mrf.mxu2  ;;  %v6154_v32 = vld [vmem:[#allocation13_spill] sm:$0xff] }
 0x161   : > { %2031 = vmatmul.bf16.gmra.mxu1 %v4345_v16  ;;  %2129 = vmatmul.bf16.gmra.mxu3 %v4428_v7  ;;  %v1886_v33 = vadd.f32 %v1885_v5, %v1837_v34  ;;  %v3245_v16 = vld [vmem:[%s6026_s2 + $0x238] sm:$0xf0]  ;;  %v5343_v7 = vpack.c.b16 %v4430_v9, %v4386_v39  ;;  %v3659_v9 = vld [vmem:[%s6026_s2 + $0x1a4] sm:$0xf] }
 0x162   : > { %v3248_v0 = vor.u32 %v3677_v12, %v3245_v16 }
 0x164   : > { %v1934_v54 = vpop.f32.mrf.mxu3  ;;  %2213 = vmatpush.bf16.msrb.mxu1 %v3248_v0  ;;  %v6155_v0 = vld [vmem:[#allocation19_spill] sm:$0xff] }
 0x165   : > { %v5339_v1 = vadd.f32 %v1934_v54, %v1886_v33 }
 0x166   : > { %v1838_v56 = vpop.f32.mrf.mxu1 }
 0x167   : > { %v1839_v37 = vadd.f32 %v1838_v56, %v1790_v27  ;;  %v1792_v2 = vpop.f32.mrf.mxu0 }
 0x168   : > { %v1793_v62 = vadd.f32 %v1792_v2, %v4966_v29  ;;  %v1887_v40 = vpop.f32.mrf.mxu2  ;;  %v3173_v29 = vld [vmem:[%s6026_s2 + $0x1a8] sm:$0xf0] }
 0x169   : > { %v1888_v61 = vadd.f32 %v1887_v40, %v1839_v37  ;;  %v3176_v4 = vor.u32 %v3659_v9, %v3173_v29  ;;  %v3657_v40 = vld [vmem:[%s6026_s2 + $0x194] sm:$0xf]  ;;  %v3699_v29 = vld [vmem:[%s6026_s2 + $0x2e4] sm:$0xf] }
 0x16a   : > { %1987 = vmatmul.bf16.gmra.mxu0 %v5343_v7 }
 0x16b   : > { %2165 = vmatpush.bf16.msrb.mxu0 %v3176_v4 }
 0x16c   : > { %v1936_v55 = vpop.f32.mrf.mxu3 }
 0x16d   : > { %v5347_v23 = vadd.f32 %v1936_v55, %v1888_v61  ;;  %2085 = vmatmul.bf16.gmra.mxu2 %v4481_v47  ;;  %v3675_v47 = vld [vmem:[%s6026_s2 + $0x224] sm:$0xf]  ;;  %v3165_v61 = vld [vmem:[%s6026_s2 + $0x198] sm:$0xf0]  ;;  %v3717_v55 = vld [vmem:[%s6026_s2 + $0x374] sm:$0xf] }
 0x16e   : > { %v1841_v3 = vpop.f32.mrf.mxu1 }
 0x16f   : > { %v1842_v59 = vadd.f32 %v1841_v3, %v1793_v62  ;;  %v1794_v63 = vpop.f32.mrf.mxu0  ;;  %v6156_v3 = vld [vmem:[#allocation18_spill] sm:$0xff] }
 0x170   : > { %v1795_v57 = vadd.f32 %v1794_v63, %v4989_v8  ;;  %v1890_v39 = vpop.f32.mrf.mxu2  ;;  %v3229_v63 = vld [vmem:[%s6026_s2 + $0x218] sm:$0xf0] }
 0x171   : > { %2036 = vmatmul.bf16.gmra.mxu1 %v4397_v42  ;;  %2134 = vmatmul.bf16.gmra.mxu3 %v4474_v43  ;;  %v1891_v13 = vadd.f32 %v1890_v39, %v1842_v59  ;;  %v3237_v42 = vld [vmem:[%s6026_s2 + $0x228] sm:$0xf0]  ;;  %v5369_v43 = vpack.c.b16 %v6154_v32, %v4432_v11  ;;  %v3701_v11 = vld [vmem:[%s6026_s2 + $0x2f4] sm:$0xf]  ;;  %v6157_v32 = vld [vmem:[#allocation14_spill] sm:$0xff] }
 0x172   : > { %v3240_v8 = vor.u32 %v3675_v47, %v3237_v42  ;;  %v3715_v42 = vld [vmem:[%s6026_s2 + $0x364] sm:$0xf] }
 0x174   : > { %v1939_v31 = vpop.f32.mrf.mxu3  ;;  %2214 = vmatpush.bf16.msrb.mxu1 %v3240_v8  ;;  %v3397_v8 = vld [vmem:[%s6026_s2 + $0x368] sm:$0xf0] }
 0x175   : > { %v5365_v34 = vadd.f32 %v1939_v31, %v1891_v13  ;;  %v3333_v13 = vld [vmem:[%s6026_s2 + $0x2e8] sm:$0xf0] }
 0x176   : > { %v1843_v50 = vpop.f32.mrf.mxu1  ;;  %v3336_v4 = vor.u32 %v3699_v29, %v3333_v13  ;;  %v3309_v29 = vld [vmem:[%s6026_s2 + $0x2b8] sm:$0xf0] }
 0x177   : > { %v1844_v27 = vadd.f32 %v1843_v50, %v1795_v57  ;;  %v1797_v5 = vpop.f32.mrf.mxu0  ;;  %v3405_v57 = vld [vmem:[%s6026_s2 + $0x378] sm:$0xf0] }
 0x178   : > { %v1798_v38 = vadd.f32 %v1797_v5, %v5041_v22  ;;  %v1892_v28 = vpop.f32.mrf.mxu2  ;;  %v3341_v22 = vld [vmem:[%s6026_s2 + $0x2f8] sm:$0xf0]  ;;  %v3408_v9 = vor.u32 %v3717_v55, %v3405_v57  ;;  %v3711_v55 = vld [vmem:[%s6026_s2 + $0x344] sm:$0xf] }
 0x179   : > { %v1893_v33 = vadd.f32 %v1892_v28, %v1844_v27  ;;  %v3344_v2 = vor.u32 %v3701_v11, %v3341_v22  ;;  %v6158_v27 = vld [vmem:[#allocation16_spill] sm:$0xff]  ;;  %v3389_v22 = vld [vmem:[%s6026_s2 + $0x358] sm:$0xf0] }
 0x17a   : > { %1992 = vmatmul.bf16.gmra.mxu0 %v5369_v43  ;;  %2307 = vmatpush.bf16.msrb.mxu3 %v3408_v9  ;;  %v5419_v5 = vpack.c.b16 %v6158_v27, %v6157_v32  ;;  %v3713_v11 = vld [vmem:[%s6026_s2 + $0x354] sm:$0xf]  ;;  %v6160_v32 = vld [vmem:[#allocation23_spill] sm:$0xff] }
 0x17b   : > { %2258 = vmatpush.bf16.msrb.mxu2 %v3344_v2  ;;  %v3392_v2 = vor.u32 %v3713_v11, %v3389_v22  ;;  %v3693_v9 = vld [vmem:[%s6026_s2 + $0x2b4] sm:$0xf]  ;;  %v3707_v11 = vld [vmem:[%s6026_s2 + $0x324] sm:$0xf]  ;;  %v3365_v22 = vld [vmem:[%s6026_s2 + $0x328] sm:$0xf0] }
 0x17c   : > { %v1941_v53 = vpop.f32.mrf.mxu3 }
 0x17d   : > { %v5373_v16 = vadd.f32 %v1941_v53, %v1893_v33  ;;  %2090 = vmatmul.bf16.gmra.mxu2 %v6155_v0  ;;  %v3697_v53 = vld [vmem:[%s6026_s2 + $0x2d4] sm:$0xf] }
 0x17e   : > { %v1846_v12 = vpop.f32.mrf.mxu1 }
 0x17f   : > { %v1847_v54 = vadd.f32 %v1846_v12, %v1798_v38  ;;  %v1799_v56 = vpop.f32.mrf.mxu0  ;;  %2259 = vmatpush.bf16.msrb.mxu2 %v3336_v4  ;;  %v3400_v38 = vor.u32 %v3715_v42, %v3397_v8  ;;  %v3325_v12 = vld [vmem:[%s6026_s2 + $0x2d8] sm:$0xf0]  ;;  %v3312_v4 = vor.u32 %v3693_v9, %v3309_v29  ;;  %v3655_v42 = vld [vmem:[%s6026_s2 + $0x184] sm:$0xf]  ;;  %v3157_v8 = vld [vmem:[%s6026_s2 + $0x188] sm:$0xf0] }
 0x180   : > { %v1800_v37 = vadd.f32 %v1799_v56, %v5091_v24  ;;  %v1895_v62 = vpop.f32.mrf.mxu2  ;;  %v3168_v24 = vor.u32 %v3657_v40, %v3165_v61  ;;  %v3160_v27 = vor.u32 %v3655_v42, %v3157_v8  ;;  %v3705_v9 = vld [vmem:[%s6026_s2 + $0x314] sm:$0xf]  ;;  %v3357_v29 = vld [vmem:[%s6026_s2 + $0x318] sm:$0xf0] }
 0x181   : > { %2041 = vmatmul.bf16.gmra.mxu1 %v4443_v14  ;;  %2139 = vmatmul.bf16.gmra.mxu3 %v6156_v3  ;;  %v1896_v59 = vadd.f32 %v1895_v62, %v1847_v54  ;;  %v3673_v14 = vld [vmem:[%s6026_s2 + $0x214] sm:$0xf]  ;;  %v3328_v54 = vor.u32 %v3697_v53, %v3325_v12  ;;  %v3317_v62 = vld [vmem:[%s6026_s2 + $0x2c8] sm:$0xf0]  ;;  %v3691_v12 = vld [vmem:[%s6026_s2 + $0x2a4] sm:$0xf] }
 0x182   : > { %v3232_v39 = vor.u32 %v3673_v14, %v3229_v63  ;;  %2166 = vmatpush.bf16.msrb.mxu0 %v3168_v24  ;;  %2308 = vmatpush.bf16.msrb.mxu3 %v3400_v38  ;;  %v3381_v3 = vld [vmem:[%s6026_s2 + $0x348] sm:$0xf0]  ;;  %v6159_v14 = vld [vmem:[#allocation24_spill] sm:$0xff] }
 0x183   : > { %2260 = vmatpush.bf16.msrb.mxu2 %v3328_v54  ;;  %v3384_v63 = vor.u32 %v3711_v55, %v3381_v3  ;;  %v3221_v38 = vld [vmem:[%s6026_s2 + $0x208] sm:$0xf0] }
 0x184   : > { %v1944_v47 = vpop.f32.mrf.mxu3  ;;  %2215 = vmatpush.bf16.msrb.mxu1 %v3232_v39 }
 0x185   : > { %v5415_v50 = vadd.f32 %v1944_v47, %v1896_v59 }
 0x186   : > { %v1848_v31 = vpop.f32.mrf.mxu1  ;;  %2309 = vmatpush.bf16.msrb.mxu3 %v3392_v2  ;;  %2167 = vmatpush.bf16.msrb.mxu0 %v3160_v27 }
 0x187   : > { %v1849_v28 = vadd.f32 %v1848_v31, %v1800_v37  ;;  %v1802_v33 = vpop.f32.mrf.mxu0  ;;  %v3709_v31 = vld [vmem:[%s6026_s2 + $0x334] sm:$0xf] }
 0x188   : > { %v1803_v0 = vadd.f32 %v1802_v33, %v5145_v41  ;;  %v1897_v56 = vpop.f32.mrf.mxu2  ;;  %v3695_v41 = vld [vmem:[%s6026_s2 + $0x2c4] sm:$0xf] }
 0x189   : > { %v1898_v37 = vadd.f32 %v1897_v56, %v1849_v28  ;;  %v3320_v40 = vor.u32 %v3695_v41, %v3317_v62  ;;  %v3373_v28 = vld [vmem:[%s6026_s2 + $0x338] sm:$0xf0] }
 0x18a   : > { %1997 = vmatmul.bf16.gmra.mxu0 %v5419_v5  ;;  %2310 = vmatpush.bf16.msrb.mxu3 %v3384_v63  ;;  %v3376_v53 = vor.u32 %v3709_v31, %v3373_v28  ;;  %v6161_v41 = vld [vmem:[#allocation17_spill] sm:$0xff]  ;;  %v3703_v31 = vld [vmem:[%s6026_s2 + $0x304] sm:$0xf] }
 0x18b   : > { %2261 = vmatpush.bf16.msrb.mxu2 %v3320_v40  ;;  %v6162_v62 = vld [vmem:[#allocation21_spill] sm:$0xff] }
 0x18c   : > { %v1946_v61 = vpop.f32.mrf.mxu3  ;;  %v5493_v40 = vpack.c.b16 %v6162_v62, %v6161_v41 }
 0x18d   : > { %v5447_v24 = vadd.f32 %v1946_v61, %v1898_v37  ;;  %2095 = vmatmul.bf16.gmra.mxu2 %v6159_v14  ;;  %v3368_v61 = vor.u32 %v3707_v11, %v3365_v22  ;;  %v3293_v14 = vld [vmem:[%s6026_s2 + $0x298] sm:$0xf0] }
 0x18e   : > { %v1851_v59 = vpop.f32.mrf.mxu1  ;;  %2311 = vmatpush.bf16.msrb.mxu3 %v3376_v53 }
 0x18f   : > { %v1852_v57 = vadd.f32 %v1851_v59, %v1803_v0  ;;  %v1804_v39 = vpop.f32.mrf.mxu0  ;;  %2262 = vmatpush.bf16.msrb.mxu2 %v3312_v4  ;;  %v3301_v0 = vld [vmem:[%s6026_s2 + $0x2a8] sm:$0xf0]  ;;  %v3689_v59 = vld [vmem:[%s6026_s2 + $0x294] sm:$0xf]  ;;  %v3360_v4 = vor.u32 %v3705_v9, %v3357_v29 }
 0x190   : > { %v1805_v13 = vadd.f32 %v1804_v39, %v5191_v26  ;;  %v1900_v47 = vpop.f32.mrf.mxu2  ;;  %v3304_v54 = vor.u32 %v3691_v12, %v3301_v0  ;;  %v3733_v0 = vld [vmem:[%s6026_s2 + $0x3f4] sm:$0xf] }
 0x191   : > { %2046 = vmatmul.bf16.gmra.mxu1 %v4489_v51  ;;  %2144 = vmatmul.bf16.gmra.mxu3 %v6160_v32  ;;  %v1901_v26 = vadd.f32 %v1900_v47, %v1852_v57  ;;  %v3671_v51 = vld [vmem:[%s6026_s2 + $0x204] sm:$0xf]  ;;  %v3296_v57 = vor.u32 %v3689_v59, %v3293_v14  ;;  %v3285_v47 = vld [vmem:[%s6026_s2 + $0x288] sm:$0xf0] }
 0x192   : > { %v3224_v33 = vor.u32 %v3671_v51, %v3221_v38  ;;  %2312 = vmatpush.bf16.msrb.mxu3 %v3368_v61  ;;  %v3349_v32 = vld [vmem:[%s6026_s2 + $0x308] sm:$0xf0]  ;;  %v6163_v51 = vld [vmem:[#allocation28_spill] sm:$0xff] }
 0x193   : > { %2263 = vmatpush.bf16.msrb.mxu2 %v3304_v54  ;;  %v3352_v38 = vor.u32 %v3703_v31, %v3349_v32  ;;  %v3469_v54 = vld [vmem:[%s6026_s2 + $0x3f8] sm:$0xf0]  ;;  %v3461_v32 = vld [vmem:[%s6026_s2 + $0x3e8] sm:$0xf0] }
 0x194   : > { %v1949_v56 = vpop.f32.mrf.mxu3  ;;  %2216 = vmatpush.bf16.msrb.mxu1 %v3224_v33  ;;  %v3472_v22 = vor.u32 %v3733_v0, %v3469_v54 }
 0x195   : > { %v5489_v2 = vadd.f32 %v1949_v56, %v1901_v26  ;;  %v6164_v56 = vld [vmem:[#allocation26_spill] sm:$0xff] }
 0x196   : > { %v1853_v37 = vpop.f32.mrf.mxu1  ;;  %2313 = vmatpush.bf16.msrb.mxu3 %v3360_v4  ;;  %2356 = vmatpush.bf16.msra.mxu0 %v3472_v22 }
 0x197   : > { %v1854_v55 = vadd.f32 %v1853_v37, %v1805_v13  ;;  %v1807_v3 = vpop.f32.mrf.mxu0  ;;  %2264 = vmatpush.bf16.msrb.mxu2 %v3296_v57 }
 0x198   : > { %v1808_v63 = vadd.f32 %v1807_v3, %v5218_v6  ;;  %v1902_v39 = vpop.f32.mrf.mxu2  ;;  %v3687_v6 = vld [vmem:[%s6026_s2 + $0x284] sm:$0xf]  ;;  %v6166_v3 = vld [vmem:[#allocation27_spill] sm:$0xff] }
 0x199   : > { %v1903_v13 = vadd.f32 %v1902_v39, %v1854_v55  ;;  %v3288_v42 = vor.u32 %v3687_v6, %v3285_v47  ;;  %v6165_v55 = vld [vmem:[#allocation22_spill] sm:$0xff]  ;;  %v6167_v6 = vld [vmem:[#allocation31_spill] sm:$0xff] }
 0x19a   : > { %2002 = vmatmul.bf16.gmra.mxu0 %v5493_v40  ;;  %2314 = vmatpush.bf16.msrb.mxu3 %v3352_v38  ;;  %v5543_v59 = vpack.c.b16 %v6166_v3, %v6165_v55  ;;  %v6170_v3 = vld [vmem:[#allocation35_spill] sm:$0xff] }
 0x19b   : > { %2265 = vmatpush.bf16.msrb.mxu2 %v3288_v42 }
 0x19c   : > { %v1951_v8 = vpop.f32.mrf.mxu3 }
 0x19d   : > { %v5521_v27 = vadd.f32 %v1951_v8, %v1903_v13  ;;  %2100 = vmatmul.bf16.gmra.mxu2 %v6163_v51 }
 0x19e   : > { %v1856_v26 = vpop.f32.mrf.mxu1 }
 0x19f   : > { %v1857_v28 = vadd.f32 %v1856_v26, %v1808_v63  ;;  %v1809_v33 = vpop.f32.mrf.mxu0  ;;  %v6168_v26 = vld [vmem:[#allocation30_spill] sm:$0xff] }
 0x1a0   : > { %v1810_v53 = vadd.f32 %v1809_v33, %v5237_v60  ;;  %v1905_v12 = vpop.f32.mrf.mxu2  ;;  %v3749_v60 = vld [vmem:[%s6026_s2 + $0x474] sm:$0xf] }
 0x1a1   : > { %2051 = vmatmul.bf16.gmra.mxu1 %v4532_v35  ;;  %2149 = vmatmul.bf16.gmra.mxu3 %v6164_v56  ;;  %v1906_v11 = vadd.f32 %v1905_v12, %v1857_v28  ;;  %v3533_v35 = vld [vmem:[%s6026_s2 + $0x478] sm:$0xf0]  ;;  %v3747_v28 = vld [vmem:[%s6026_s2 + $0x464] sm:$0xf] }
 0x1a2   : > { %v3536_v37 = vor.u32 %v3749_v60, %v3533_v35  ;;  %v6169_v60 = vld [vmem:[#allocation10_spill] sm:$0xff] }
 0x1a3   : > { %v3841_v35 = vld [vmem:[%s6027_s3] sm:$0x3] }
 0x1a4   : > { %v1954_v41 = vpop.f32.mrf.mxu3  ;;  %2405 = vmatpush.bf16.msra.mxu1 %v3536_v37  ;;  %v5572_v37 = vperm.slane %v3841_v35, 1 }
 0x1a5   : > { %v5539_v61 = vadd.f32 %v1954_v41, %v1906_v11 }
 0x1a6   : > { %v1858_v62 = vpop.f32.mrf.mxu1 }
 0x1a7   : > { %v1859_v14 = vadd.f32 %v1858_v62, %v1810_v53  ;;  %v1812_v63 = vpop.f32.mrf.mxu0 }
 0x1a8   : > { %v1813_v57 = vadd.f32 %v1812_v63, %v5261_v18  ;;  %v1907_v39 = vpop.f32.mrf.mxu2  ;;  %v3731_v18 = vld [vmem:[%s6026_s2 + $0x3e4] sm:$0xf] }
 0x1a9   : > { %v1908_v9 = vadd.f32 %v1907_v39, %v1859_v14  ;;  %v3464_v38 = vor.u32 %v3731_v18, %v3461_v32 }
 0x1aa   : > { %2007 = vmatmul.bf16.gmra.mxu0 %v5543_v59 }
 0x1ab   : > { %2357 = vmatpush.bf16.msra.mxu0 %v3464_v38 }
 0x1ac   : > { %v1956_v29 = vpop.f32.mrf.mxu3 }
 0x1ad   : > { %v5547_v4 = vadd.f32 %v1956_v29, %v1908_v9  ;;  %2105 = vmatmul.bf16.gmra.mxu2 %v6167_v6  ;;  %v3729_v9 = vld [vmem:[%s6026_s2 + $0x3d4] sm:$0xf]  ;;  %v3453_v29 = vld [vmem:[%s6026_s2 + $0x3d8] sm:$0xf0]  ;;  %v6172_v6 = vld [vmem:[#allocation34_spill] sm:$0xff] }
 0x1ae   : > { %v1861_v13 = vpop.f32.mrf.mxu1 }
 0x1af   : > { %v1862_v47 = vadd.f32 %v1861_v13, %v1813_v57  ;;  %v1814_v42 = vpop.f32.mrf.mxu0  ;;  %v6171_v57 = vld [vmem:[#allocation33_spill] sm:$0xff] }
 0x1b0   : > { %v1815_v8 = vadd.f32 %v1814_v42, %v5269_v49  ;;  %v1910_v31 = vpop.f32.mrf.mxu2 }
 0x1b1   : > { %2056 = vmatmul.bf16.gmra.mxu1 %v4638_v20  ;;  %2154 = vmatmul.bf16.gmra.mxu3 %v6168_v26  ;;  %v1911_v51 = vadd.f32 %v1910_v31, %v1862_v47  ;;  %v3525_v20 = vld [vmem:[%s6026_s2 + $0x468] sm:$0xf0]  ;;  %v3517_v31 = vld [vmem:[%s6026_s2 + $0x458] sm:$0xf0] }
 0x1b2   : > { %v3528_v49 = vor.u32 %v3747_v28, %v3525_v20 }
 0x1b4   : > { %v1959_v33 = vpop.f32.mrf.mxu3  ;;  %2406 = vmatpush.bf16.msra.mxu1 %v3528_v49 }
 0x1b5   : > { %v5565_v12 = vadd.f32 %v1959_v33, %v1911_v51 }
 0x1b6   : > { %v1863_v53 = vpop.f32.mrf.mxu1 }
 0x1b7   : > { %v1864_v0 = vadd.f32 %v1863_v53, %v1815_v8  ;;  %v1973_v54 = vpop.f32.mrf.mxu0  ;;  %v3456_v8 = vor.u32 %v3729_v9, %v3453_v29  ;;  %v3509_v29 = vld [vmem:[%s6026_s2 + $0x448] sm:$0xf0] }
 0x1b8   : > { %v1974_v56 = vadd.f32 %v1973_v54, %v5287_v48  ;;  %v1912_v11 = vpop.f32.mrf.mxu2 }
 0x1b9   : > { %v1913_v22 = vadd.f32 %v1912_v11, %v1864_v0  ;;  %2358 = vmatpush.bf16.msra.mxu0 %v3456_v8  ;;  %v6173_v0 = vld [vmem:[#allocation11_spill] sm:$0xff] }
 0x1ba   : > { %2168 = vmatmul.bf16.vlgmr.msrb.gmra.mxu0 %v6169_v60  ;;  %v2454_v13 = vmax.f32 %v1974_v56, 0.0 }
 0x1bc   : > { %v1961_v41 = vpop.f32.mrf.mxu3 }
 0x1bd   : > { %v5574_v62 = vadd.f32 %v1961_v41, %v1913_v22  ;;  %2266 = vmatmul.bf16.vlgmr.msrb.gmra.mxu2 %v6170_v3  ;;  %v6174_v22 = vld [vmem:[#allocation39_spill] sm:$0xff] }
 0x1be   : > { %v2022_v55 = vpop.f32.mrf.mxu1 }
 0x1bf   : > { %v1975_v14 = vpop.f32.mrf.mxu0  ;;  %v2023_v63 = vadd.f32 %v2022_v55, %v5572_v37  ;;  %v6175_v55 = vld [vmem:[#allocation37_spill] sm:$0xff] }
 0x1c0   : > { %v1976_v48 = vadd.f32 %v1975_v14, %v5295_v30  ;;  %v2071_v39 = vpop.f32.mrf.mxu2  ;;  %v3745_v30 = vld [vmem:[%s6026_s2 + $0x454] sm:$0xf]  ;;  %v3445_v14 = vld [vmem:[%s6026_s2 + $0x3c8] sm:$0xf0] }
 0x1c1   : > { %2217 = vmatmul.bf16.vlgmr.msrb.gmra.mxu1 %v6171_v57  ;;  %2315 = vmatmul.bf16.vlgmr.msrb.gmra.mxu3 %v6172_v6  ;;  %v2072_v47 = vadd.f32 %v2071_v39, %v2023_v63  ;;  %v3520_v18 = vor.u32 %v3745_v30, %v3517_v31 }
 0x1c2   : > { %v2456_v42 = vmax.f32 %v1976_v48, 0.0  ;;  %v6176_v48 = vld [vmem:[#allocation38_spill] sm:$0xff] }
 0x1c3   : > { %2407 = vmatpush.bf16.msra.mxu1 %v3520_v18 }
 0x1c4   : > { %v5593_v32 = vpack.c.bf16 %v2456_v42, %v2454_v13  ;;  %v2120_v26 = vpop.f32.mrf.mxu3 }
 0x1c5   : > { %v5595_v38 = vadd.f32 %v2120_v26, %v2072_v47 }
 0x1c6   : > { %v2024_v51 = vpop.f32.mrf.mxu1 }
 0x1c7   : > { %v1978_v28 = vpop.f32.mrf.mxu0  ;;  %v2025_v20 = vadd.f32 %v2024_v51, %v5572_v37 }
 0x1c8   : > { %v1979_v49 = vadd.f32 %v1978_v28, %v5313_v17  ;;  %v2073_v33 = vpop.f32.mrf.mxu2  ;;  %v3727_v17 = vld [vmem:[%s6026_s2 + $0x3c4] sm:$0xf]  ;;  %v6177_v28 = vld [vmem:[#allocation12_spill] sm:$0xff] }
 0x1c9   : > { %v2074_v53 = vadd.f32 %v2073_v33, %v2025_v20  ;;  %v3448_v9 = vor.u32 %v3727_v17, %v3445_v14 }
 0x1ca   : > { %2173 = vmatmul.bf16.gmra.mxu0 %v6173_v0  ;;  %v2458_v63 = vmax.f32 %v1979_v49, 0.0 }
 0x1cb   : > { %2359 = vmatpush.bf16.msra.mxu0 %v3448_v9 }
 0x1cc   : > { %v2122_v54 = vpop.f32.mrf.mxu3 }
 0x1cd   : > { %v5600_v11 = vadd.f32 %v2122_v54, %v2074_v53  ;;  %2271 = vmatmul.bf16.gmra.mxu2 %v6174_v22  ;;  %v6178_v53 = vld [vmem:[#allocation43_spill] sm:$0xff]  ;;  %v6179_v22 = vld [vmem:[#allocation41_spill] sm:$0xff] }
 0x1ce   : > { %v2027_v56 = vpop.f32.mrf.mxu1 }
 0x1cf   : > { %v1980_v60 = vpop.f32.mrf.mxu0  ;;  %v2028_v35 = vadd.f32 %v2027_v56, %v5572_v37 }
 0x1d0   : > { %v1981_v41 = vadd.f32 %v1980_v60, %v5321_v44  ;;  %v2076_v3 = vpop.f32.mrf.mxu2  ;;  %v3743_v44 = vld [vmem:[%s6026_s2 + $0x444] sm:$0xf] }
 0x1d1   : > { %2222 = vmatmul.bf16.gmra.mxu1 %v6175_v55  ;;  %2320 = vmatmul.bf16.gmra.mxu3 %v6176_v48  ;;  %v2077_v57 = vadd.f32 %v2076_v3, %v2028_v35  ;;  %v3512_v13 = vor.u32 %v3743_v44, %v3509_v29  ;;  %v3437_v35 = vld [vmem:[%s6026_s2 + $0x3b8] sm:$0xf0]  ;;  %v6180_v55 = vld [vmem:[#allocation42_spill] sm:$0xff] }
 0x1d2   : > { %v2460_v39 = vmax.f32 %v1981_v41, 0.0 }
 0x1d3   : > { %2408 = vmatpush.bf16.msra.mxu1 %v3512_v13 }
 0x1d4   : > { %v5619_v6 = vpack.c.bf16 %v2460_v39, %v2458_v63  ;;  %v2125_v47 = vpop.f32.mrf.mxu3  ;;  %v3501_v63 = vld [vmem:[%s6026_s2 + $0x438] sm:$0xf0] }
 0x1d5   : > { %v5621_v8 = vadd.f32 %v2125_v47, %v2077_v57 }
 0x1d6   : > { %v2029_v42 = vpop.f32.mrf.mxu1 }
 0x1d7   : > { %v1983_v30 = vpop.f32.mrf.mxu0  ;;  %v2030_v31 = vadd.f32 %v2029_v42, %v5572_v37 }
 0x1d8   : > { %v1984_v18 = vadd.f32 %v1983_v30, %v5339_v1  ;;  %v2078_v26 = vpop.f32.mrf.mxu2  ;;  %v3725_v1 = vld [vmem:[%s6026_s2 + $0x3b4] sm:$0xf] }
 0x1d9   : > { %v2079_v51 = vadd.f32 %v2078_v26, %v2030_v31  ;;  %v3440_v14 = vor.u32 %v3725_v1, %v3437_v35  ;;  %v6181_v31 = vld [vmem:[#allocation15_spill] sm:$0xff] }
 0x1da   : > { %2178 = vmatmul.bf16.gmra.mxu0 %v6177_v28  ;;  %v2462_v41 = vmax.f32 %v1984_v18, 0.0 }
 0x1db   : > { %2360 = vmatpush.bf16.msra.mxu0 %v3440_v14 }
 0x1dc   : > { %v2127_v20 = vpop.f32.mrf.mxu3 }
 0x1dd   : > { %v5626_v33 = vadd.f32 %v2127_v20, %v2079_v51  ;;  %2276 = vmatmul.bf16.gmra.mxu2 %v6178_v53 }
 0x1de   : > { %v2032_v49 = vpop.f32.mrf.mxu1 }
 0x1df   : > { %v1985_v0 = vpop.f32.mrf.mxu0  ;;  %v2033_v54 = vadd.f32 %v2032_v49, %v5572_v37 }
 0x1e0   : > { %v1986_v56 = vadd.f32 %v1985_v0, %v5347_v23  ;;  %v2081_v60 = vpop.f32.mrf.mxu2  ;;  %v3741_v23 = vld [vmem:[%s6026_s2 + $0x434] sm:$0xf]  ;;  %v3429_v0 = vld [vmem:[%s6026_s2 + $0x3a8] sm:$0xf0] }
 0x1e1   : > { %2227 = vmatmul.bf16.gmra.mxu1 %v6179_v22  ;;  %2325 = vmatmul.bf16.gmra.mxu3 %v6180_v55  ;;  %v2082_v3 = vadd.f32 %v2081_v60, %v2033_v54  ;;  %v3504_v48 = vor.u32 %v3741_v23, %v3501_v63 }
 0x1e2   : > { %v2464_v17 = vmax.f32 %v1986_v56, 0.0  ;;  %v6182_v56 = vld [vmem:[#allocation45_spill] sm:$0xff] }
 0x1e3   : > { %2409 = vmatpush.bf16.msra.mxu1 %v3504_v48 }
 0x1e4   : > { %v5645_v57 = vpack.c.bf16 %v2464_v17, %v2462_v41  ;;  %v2130_v39 = vpop.f32.mrf.mxu3 }
 0x1e5   : > { %v5647_v44 = vadd.f32 %v2130_v39, %v2082_v3  ;;  %v6183_v39 = vld [vmem:[#allocation20_spill] sm:$0xff] }
 0x1e6   : > { %v2034_v9 = vpop.f32.mrf.mxu1 }
 0x1e7   : > { %v1988_v29 = vpop.f32.mrf.mxu0  ;;  %v2035_v13 = vadd.f32 %v2034_v9, %v5572_v37 }
 0x1e8   : > { %v1989_v47 = vadd.f32 %v1988_v29, %v5365_v34  ;;  %v2083_v42 = vpop.f32.mrf.mxu2  ;;  %v3723_v34 = vld [vmem:[%s6026_s2 + $0x3a4] sm:$0xf] }
 0x1e9   : > { %v2084_v30 = vadd.f32 %v2083_v42, %v2035_v13  ;;  %v3432_v60 = vor.u32 %v3723_v34, %v3429_v0 }
 0x1ea   : > { %2183 = vmatmul.bf16.gmra.mxu0 %v6181_v31  ;;  %v2466_v54 = vmax.f32 %v1989_v47, 0.0  ;;  %v6184_v47 = vld [vmem:[#allocation49_spill] sm:$0xff] }
 0x1eb   : > { %2361 = vmatpush.bf16.msra.mxu0 %v3432_v60 }
 0x1ec   : > { %v2132_v18 = vpop.f32.mrf.mxu3 }
 0x1ed   : > { %v5652_v51 = vadd.f32 %v2132_v18, %v2084_v30  ;;  %2281 = vmatmul.bf16.gmra.mxu2 %v4944_v46  ;;  %v3758_v18 = vld [vmem:[%s6028_s4 + $0x38] sm:$0xff] }
 0x1ee   : > { %v2037_v26 = vpop.f32.mrf.mxu1  ;;  %2634 = vmatpush.bf16.msra.mxu2 %v3758_v18  ;;  %v6189_v18 = vld [vmem:[#allocation51_spill] sm:$0xff] }
 0x1ef   : > { %v1990_v28 = vpop.f32.mrf.mxu0  ;;  %v2038_v20 = vadd.f32 %v2037_v26, %v5572_v37 }
 0x1f0   : > { %v1991_v49 = vadd.f32 %v1990_v28, %v5373_v16  ;;  %v2086_v53 = vpop.f32.mrf.mxu2  ;;  %v3739_v16 = vld [vmem:[%s6026_s2 + $0x424] sm:$0xf]  ;;  %v3721_v28 = vld [vmem:[%s6026_s2 + $0x394] sm:$0xf] }
 0x1f1   : > { %2232 = vmatmul.bf16.gmra.mxu1 %v4932_v15  ;;  %2330 = vmatmul.bf16.gmra.mxu3 %v6182_v56  ;;  %v2087_v46 = vadd.f32 %v2086_v53, %v2038_v20  ;;  %v3493_v15 = vld [vmem:[%s6026_s2 + $0x428] sm:$0xf0]  ;;  %v3421_v20 = vld [vmem:[%s6026_s2 + $0x398] sm:$0xf0]  ;;  %v6186_v53 = vld [vmem:[#allocation48_spill] sm:$0xff] }
 0x1f2   : > { %v2468_v22 = vmax.f32 %v1991_v49, 0.0  ;;  %v3496_v1 = vor.u32 %v3739_v16, %v3493_v15  ;;  %v3424_v0 = vor.u32 %v3721_v28, %v3421_v20  ;;  %v3485_v56 = vld [vmem:[%s6026_s2 + $0x418] sm:$0xf0]  ;;  %v3413_v28 = vld [vmem:[%s6026_s2 + $0x388] sm:$0xf0] }
 0x1f4   : > { %v5671_v35 = vpack.c.bf16 %v2468_v22, %v2466_v54  ;;  %v2135_v41 = vpop.f32.mrf.mxu3  ;;  %2410 = vmatpush.bf16.msra.mxu1 %v3496_v1  ;;  %v3737_v54 = vld [vmem:[%s6026_s2 + $0x414] sm:$0xf]  ;;  %2362 = vmatpush.bf16.msra.mxu0 %v3424_v0  ;;  %v3477_v0 = vld [vmem:[%s6026_s2 + $0x408] sm:$0xf0] }
 0x1f5   : > { %v5673_v3 = vadd.f32 %v2135_v41, %v2087_v46  ;;  %v3488_v46 = vor.u32 %v3737_v54, %v3485_v56  ;;  %v3757_v22 = vld [vmem:[%s6028_s4 + $0x30] sm:$0xff] }
 0x1f6   : > { %v2039_v55 = vpop.f32.mrf.mxu1  ;;  %2635 = vmatpush.bf16.msra.mxu2 %v3757_v22  ;;  %v3753_v56 = vld [vmem:[%s6028_s4 + $0x10] sm:$0xff] }
 0x1f7   : > { %v1993_v17 = vpop.f32.mrf.mxu0  ;;  %v2040_v14 = vadd.f32 %v2039_v55, %v5572_v37  ;;  %v3756_v55 = vld [vmem:[%s6028_s4 + $0x28] sm:$0xff] }
 0x1f8   : > { %v1994_v23 = vadd.f32 %v1993_v17, %v5415_v50  ;;  %v2088_v63 = vpop.f32.mrf.mxu2  ;;  %v6185_v50 = vld [vmem:[#allocation47_spill] sm:$0xff]  ;;  %2411 = vmatpush.bf16.msra.mxu1 %v3488_v46 }
 0x1f9   : > { %v2089_v48 = vadd.f32 %v2088_v63, %v2040_v14 }
 0x1fa   : > { %2188 = vmatmul.bf16.gmra.mxu0 %v6183_v39  ;;  %v2470_v49 = vmax.f32 %v1994_v23, 0.0  ;;  %2636 = vmatpush.bf16.msra.mxu2 %v3756_v55  ;;  %v3755_v39 = vld [vmem:[%s6028_s4 + $0x20] sm:$0xff]  ;;  %v3752_v55 = vld [vmem:[%s6028_s4 + $0x8] sm:$0xff] }
 0x1fc   : > { %v2137_v9 = vpop.f32.mrf.mxu3 }
 0x1fd   : > { %v5678_v13 = vadd.f32 %v2137_v9, %v2089_v48  ;;  %2286 = vmatmul.bf16.gmra.mxu2 %v6184_v47  ;;  %v6187_v48 = vld [vmem:[#allocation25_spill] sm:$0xff] }
 0x1fe   : > { %v2042_v29 = vpop.f32.mrf.mxu1  ;;  %v6188_v47 = vld [vmem:[#allocation53_spill] sm:$0xff]  ;;  %2637 = vmatpush.bf16.msra.mxu2 %v3755_v39 }
 0x1ff   : > { %v1995_v42 = vpop.f32.mrf.mxu0  ;;  %v2043_v30 = vadd.f32 %v2042_v29, %v5572_v37  ;;  %v6191_v39 = vld [vmem:[#allocation29_spill] sm:$0xff] }
 0x200   : > { %v1996_v31 = vadd.f32 %v1995_v42, %v5447_v24  ;;  %v2091_v26 = vpop.f32.mrf.mxu2 }
 0x201   : > { %2237 = vmatmul.bf16.gmra.mxu1 %v6185_v50  ;;  %2335 = vmatmul.bf16.gmra.mxu3 %v6186_v53  ;;  %v2092_v34 = vadd.f32 %v2091_v26, %v2043_v30  ;;  %v3719_v26 = vld [vmem:[%s6026_s2 + $0x384] sm:$0xf] }
 0x202   : > { %v2472_v24 = vmax.f32 %v1996_v31, 0.0  ;;  %v3754_v31 = vld [vmem:[%s6028_s4 + $0x18] sm:$0xff] }
 0x203   : > { %2638 = vmatpush.bf16.msra.mxu2 %v3754_v31  ;;  %v6192_v31 = vld [vmem:[#allocation55_spill] sm:$0xff] }
 0x204   : > { %v5703_v60 = vpack.c.bf16 %v2472_v24, %v2470_v49  ;;  %v2140_v16 = vpop.f32.mrf.mxu3  ;;  %v6190_v49 = vld [vmem:[#allocation52_spill] sm:$0xff]  ;;  %v3735_v24 = vld [vmem:[%s6026_s2 + $0x404] sm:$0xf] }
 0x205   : > { %v5705_v1 = vadd.f32 %v2140_v16, %v2092_v34  ;;  %v3416_v34 = vor.u32 %v3719_v26, %v3413_v28  ;;  %v3480_v54 = vor.u32 %v3735_v24, %v3477_v0  ;;  %v6193_v26 = vld [vmem:[#allocation56_spill] sm:$0xff] }
 0x206   : > { %v2044_v15 = vpop.f32.mrf.mxu1 }
 0x207   : > { %v1998_v41 = vpop.f32.mrf.mxu0  ;;  %v2045_v17 = vadd.f32 %v2044_v15, %v5572_v37  ;;  %2363 = vmatpush.bf16.msra.mxu0 %v3416_v34  ;;  %2412 = vmatpush.bf16.msra.mxu1 %v3480_v54 }
 0x208   : > { %v1999_v14 = vadd.f32 %v1998_v41, %v5489_v2  ;;  %v2093_v23 = vpop.f32.mrf.mxu2  ;;  %2639 = vmatpush.bf16.msra.mxu2 %v3753_v56  ;;  %v6194_v56 = vld [vmem:[#allocation32_spill] sm:$0xff] }
 0x209   : > { %v5712_v63 = vadd.f32 %v2093_v23, %v2045_v17 }
 0x20a   : > { %2193 = vmatmul.bf16.gmra.mxu0 %v6187_v48  ;;  %v2474_v20 = vmax.f32 %v1999_v14, 0.0 }
 0x20c   : > { %v5718_v9 = vpop.f32.mrf.mxu3  ;;  %2640 = vmatpush.bf16.msra.mxu2 %v3752_v55  ;;  %v3766_v55 = vld [vmem:[%s6028_s4 + $0x78] sm:$0xff] }
 0x20d   : > { %2291 = vmatmul.bf16.gmra.mxu2 %v6188_v47  ;;  %2683 = vmatpush.bf16.msra.mxu3 %v3766_v55 }
 0x20e   : > { %v2047_v29 = vpop.f32.mrf.mxu1 }
 0x20f   : > { %v2000_v42 = vpop.f32.mrf.mxu0  ;;  %v2048_v30 = vadd.f32 %v2047_v29, %v5572_v37  ;;  %v3751_v29 = vld [vmem:[%s6028_s4] sm:$0xff] }
 0x210   : > { %v2001_v2 = vadd.f32 %v2000_v42, %v5521_v27  ;;  %v2096_v50 = vpop.f32.mrf.mxu2  ;;  %2641 = vmatpush.bf16.msra.mxu2 %v3751_v29 }
 0x211   : > { %2242 = vmatmul.bf16.gmra.mxu1 %v6189_v18  ;;  %2340 = vmatmul.bf16.gmra.mxu3 %v6190_v49  ;;  %v2097_v53 = vadd.f32 %v2096_v50, %v2048_v30 }
 0x212   : > { %v2476_v27 = vmax.f32 %v2001_v2, 0.0 }
 0x214   : > { %v5743_v46 = vpack.c.bf16 %v2476_v27, %v2474_v20  ;;  %v2145_v22 = vpop.f32.mrf.mxu3 }
 0x215   : > { %v5745_v15 = vadd.f32 %v2145_v22, %v2097_v53 }
 0x216   : > { %v2049_v16 = vpop.f32.mrf.mxu1 }
 0x217   : > { %v2003_v41 = vpop.f32.mrf.mxu0  ;;  %v2050_v17 = vadd.f32 %v2049_v16, %v5572_v37 }
 0x218   : > { %v2004_v14 = vadd.f32 %v2003_v41, %v5539_v61  ;;  %v2098_v23 = vpop.f32.mrf.mxu2 }
 0x219   : > { %v5752_v48 = vadd.f32 %v2098_v23, %v2050_v17 }
 0x21a   : > { %2198 = vmatmul.bf16.gmra.mxu0 %v6191_v39  ;;  %v2478_v50 = vmax.f32 %v2004_v14, 0.0 }
 0x21c   : > { %v5758_v47 = vpop.f32.mrf.mxu3 }
 0x21d   : > { %2296 = vmatmul.bf16.gmra.mxu2 %v5195_v45 }
 0x21e   : > { %v2052_v42 = vpop.f32.mrf.mxu1 }
 0x21f   : > { %v2005_v30 = vpop.f32.mrf.mxu0  ;;  %v2053_v2 = vadd.f32 %v2052_v42, %v5572_v37 }
 0x220   : > { %v2006_v61 = vadd.f32 %v2005_v30, %v5547_v4  ;;  %v2101_v18 = vpop.f32.mrf.mxu2 }
 0x221   : > { %2247 = vmatmul.bf16.gmra.mxu1 %v6192_v31  ;;  %2345 = vmatmul.bf16.gmra.mxu3 %v6193_v26  ;;  %v2102_v28 = vadd.f32 %v2101_v18, %v2053_v2 }
 0x222   : > { %v2480_v20 = vmax.f32 %v2006_v61, 0.0 }
 0x224   : > { %v5765_v49 = vpack.c.bf16 %v2480_v20, %v2478_v50  ;;  %v2150_v53 = vpop.f32.mrf.mxu3  ;;  %v6195_v50 = vld [vmem:[#allocation36_spill] sm:$0xff] }
 0x225   : > { %v5767_v34 = vadd.f32 %v2150_v53, %v2102_v28  ;;  %v3765_v20 = vld [vmem:[%s6028_s4 + $0x70] sm:$0xff] }
 0x226   : > { %v2054_v27 = vpop.f32.mrf.mxu1  ;;  %2684 = vmatpush.bf16.msra.mxu3 %v3765_v20  ;;  %v6198_v20 = vld [vmem:[#allocation46_spill] sm:$0xff] }
 0x227   : > { %v2008_v45 = vpop.f32.mrf.mxu0  ;;  %v2055_v24 = vadd.f32 %v2054_v27, %v5572_v37 }
 0x228   : > { %v2009_v0 = vadd.f32 %v2008_v45, %v5565_v12  ;;  %v2103_v4 = vpop.f32.mrf.mxu2 }
 0x229   : > { %v5771_v54 = vadd.f32 %v2103_v4, %v2055_v24 }
 0x22a   : > { %2203 = vmatmul.bf16.gmra.mxu0 %v6194_v56  ;;  %v2482_v23 = vmax.f32 %v2009_v0, 0.0  ;;  %v6196_v56 = vld [vmem:[#allocation40_spill] sm:$0xff] }
 0x22c   : > { %v5774_v22 = vpop.f32.mrf.mxu3 }
 0x22d   : > { %2301 = vmatmul.bf16.gmra.mxu2 %v5240_v19 }
 0x22e   : > { %v2057_v16 = vpop.f32.mrf.mxu1 }
 0x22f   : > { %v2010_v41 = vpop.f32.mrf.mxu0  ;;  %v2058_v17 = vadd.f32 %v2057_v16, %v5572_v37 }
 0x230   : > { %v2011_v14 = vadd.f32 %v2010_v41, %v5574_v62  ;;  %v2106_v12 = vpop.f32.mrf.mxu2 }
 0x231   : > { %2252 = vmatmul.bf16.gmra.mxu1 %v5226_v25  ;;  %2350 = vmatmul.bf16.gmra.mxu3 %v5235_v52  ;;  %v2107_v39 = vadd.f32 %v2106_v12, %v2058_v17 }
 0x232   : > { %v2484_v29 = vmax.f32 %v2011_v14, 0.0 }
 0x234   : > { %v5784_v42 = vpack.c.bf16 %v2484_v29, %v2482_v23  ;;  %v2155_v19 = vpop.f32.mrf.mxu3 }
 0x235   : > { %v5786_v2 = vadd.f32 %v2155_v19, %v2107_v39  ;;  %v6197_v19 = vld [vmem:[#allocation44_spill] sm:$0xff] }
 0x236   : > { %v2059_v30 = vpop.f32.mrf.mxu1 }
 0x237   : > { %v2169_v61 = vpop.f32.mrf.mxu0  ;;  %v2060_v31 = vadd.f32 %v2059_v30, %v5572_v37 }
 0x238   : > { %v2170_v62 = vadd.f32 %v2169_v61, %v5595_v38  ;;  %v2108_v18 = vpop.f32.mrf.mxu2 }
 0x239   : > { %v5790_v25 = vadd.f32 %v2108_v18, %v2060_v31 }
 0x23a   : > { %2364 = vmatmul.bf16.vlgmr.msra.gmra.mxu0 %v6195_v50 }
 0x23d   : > { %2642 = vmatmul.bf16.vlgmr.msra.gmra.mxu2 %v5593_v32 }
 0x23e   : > { %v2218_v26 = vpop.f32.mrf.mxu1 }
 0x23f   : > { %v2219_v52 = vadd.f32 %v2218_v26, %v2170_v62  ;;  %v2171_v28 = vpop.f32.mrf.mxu0 }
 0x240   : > { %v2172_v53 = vadd.f32 %v2171_v28, %v5600_v11  ;;  %v2267_v37 = vpop.f32.mrf.mxu2 }
 0x241   : > { %2413 = vmatmul.bf16.vlgmr.msra.gmra.mxu1 %v5265_v58  ;;  %v5799_v38 = vadd.f32 %v2267_v37, %v2219_v52  ;;  %v3764_v58 = vld [vmem:[%s6028_s4 + $0x68] sm:$0xff] }
 0x242   : > { %2685 = vmatpush.bf16.msra.mxu3 %v3764_v58 }
 0x246   : > { %v2220_v27 = vpop.f32.mrf.mxu1 }
 0x247   : > { %v2221_v45 = vadd.f32 %v2220_v27, %v2172_v53  ;;  %v2174_v24 = vpop.f32.mrf.mxu0 }
 0x248   : > { %v2175_v0 = vadd.f32 %v2174_v24, %v5621_v8  ;;  %v2269_v32 = vpop.f32.mrf.mxu2 }
 0x249   : > { %v5802_v4 = vadd.f32 %v2269_v32, %v2221_v45 }
 0x24a   : > { %2369 = vmatmul.bf16.gmra.mxu0 %v6196_v56 }
 0x24d   : > { %2647 = vmatmul.bf16.gmra.mxu2 %v5619_v6 }
 0x24e   : > { %v2223_v16 = vpop.f32.mrf.mxu1 }
 0x24f   : > { %v2224_v11 = vadd.f32 %v2223_v16, %v2175_v0  ;;  %v2176_v41 = vpop.f32.mrf.mxu0 }
 0x250   : > { %v2177_v55 = vadd.f32 %v2176_v41, %v5626_v33  ;;  %v2272_v17 = vpop.f32.mrf.mxu2  ;;  %v2143_v41 = vadd.f32 %v5718_v9, %v5712_v63  ;;  %v6200_v9 = vld [vmem:[#allocation54_spill] sm:$0xff] }
 0x251   : > { %2418 = vmatmul.bf16.gmra.mxu1 %v5291_v10  ;;  %v5811_v8 = vadd.f32 %v2272_v17, %v2224_v11  ;;  %v3763_v10 = vld [vmem:[%s6028_s4 + $0x60] sm:$0xff] }
 0x252   : > { %2686 = vmatpush.bf16.msra.mxu3 %v3763_v10  ;;  %v6199_v11 = vld [vmem:[#allocation50_spill] sm:$0xff] }
 0x256   : > { %v2225_v14 = vpop.f32.mrf.mxu1 }
 0x257   : > { %v2226_v12 = vadd.f32 %v2225_v14, %v2177_v55  ;;  %v2179_v23 = vpop.f32.mrf.mxu0  ;;  %v3761_v55 = vld [vmem:[%s6028_s4 + $0x50] sm:$0xff] }
 0x258   : > { %v2180_v39 = vadd.f32 %v2179_v23, %v5647_v44  ;;  %v2274_v6 = vpop.f32.mrf.mxu2  ;;  %v2148_v23 = vadd.f32 %v5758_v47, %v5752_v48  ;;  %v6201_v47 = vld [vmem:[#allocation57_spill] sm:$0xff] }
 0x259   : > { %v5814_v29 = vadd.f32 %v2274_v6, %v2226_v12 }
 0x25a   : > { %2374 = vmatmul.bf16.gmra.mxu0 %v6197_v19 }
 0x25d   : > { %2652 = vmatmul.bf16.gmra.mxu2 %v5645_v57 }
 0x25e   : > { %v2228_v30 = vpop.f32.mrf.mxu1 }
 0x25f   : > { %v2229_v33 = vadd.f32 %v2228_v30, %v2180_v39  ;;  %v2181_v61 = vpop.f32.mrf.mxu0 }
 0x260   : > { %v2182_v31 = vadd.f32 %v2181_v61, %v5652_v51  ;;  %v2277_v62 = vpop.f32.mrf.mxu2 }
 0x261   : > { %2423 = vmatmul.bf16.gmra.mxu1 %v5317_v36  ;;  %v5823_v44 = vadd.f32 %v2277_v62, %v2229_v33  ;;  %v3762_v36 = vld [vmem:[%s6028_s4 + $0x58] sm:$0xff] }
 0x262   : > { %2687 = vmatpush.bf16.msra.mxu3 %v3762_v36 }
 0x266   : > { %v2230_v18 = vpop.f32.mrf.mxu1  ;;  %2688 = vmatpush.bf16.msra.mxu3 %v3761_v55 }
 0x267   : > { %v2231_v50 = vadd.f32 %v2230_v18, %v2182_v31  ;;  %v2184_v26 = vpop.f32.mrf.mxu0 }
 0x268   : > { %v2185_v52 = vadd.f32 %v2184_v26, %v5673_v3  ;;  %v2279_v57 = vpop.f32.mrf.mxu2  ;;  %v3759_v26 = vld [vmem:[%s6028_s4 + $0x40] sm:$0xff] }
 0x269   : > { %v5826_v28 = vadd.f32 %v2279_v57, %v2231_v50 }
 0x26a   : > { %2379 = vmatmul.bf16.gmra.mxu0 %v6198_v20 }
 0x26d   : > { %2657 = vmatmul.bf16.gmra.mxu2 %v5671_v35 }
 0x26e   : > { %v2233_v53 = vpop.f32.mrf.mxu1 }
 0x26f   : > { %v2234_v51 = vadd.f32 %v2233_v53, %v2185_v52  ;;  %v2186_v37 = vpop.f32.mrf.mxu0 }
 0x270   : > { %v2187_v27 = vadd.f32 %v2186_v37, %v5678_v13  ;;  %v2282_v45 = vpop.f32.mrf.mxu2 }
 0x271   : > { %2428 = vmatmul.bf16.gmra.mxu1 %v5343_v7  ;;  %v5835_v3 = vadd.f32 %v2282_v45, %v2234_v51 }
 0x276   : > { %v2235_v24 = vpop.f32.mrf.mxu1 }
 0x277   : > { %v2236_v0 = vadd.f32 %v2235_v24, %v2187_v27  ;;  %v2189_v32 = vpop.f32.mrf.mxu0 }
 0x278   : > { %v2190_v56 = vadd.f32 %v2189_v32, %v5705_v1  ;;  %v2284_v35 = vpop.f32.mrf.mxu2 }
 0x279   : > { %v5838_v16 = vadd.f32 %v2284_v35, %v2236_v0 }
 0x27a   : > { %2384 = vmatmul.bf16.gmra.mxu0 %v6199_v11 }
 0x27d   : > { %2662 = vmatmul.bf16.gmra.mxu2 %v5703_v60  ;;  %v2157_v60 = vpop.f32.mrf.mxu3 }
 0x27e   : > { %v2238_v13 = vpop.f32.mrf.mxu1 }
 0x27f   : > { %v5844_v7 = vadd.f32 %v2238_v13, %v2190_v56  ;;  %v2191_v58 = vpop.f32.mrf.mxu0 }
 0x280   : > { %v2192_v17 = vadd.f32 %v2191_v58, %v2143_v41 }
 0x281   : > { %2433 = vmatmul.bf16.gmra.mxu1 %v5369_v43  ;;  %v3760_v43 = vld [vmem:[%s6028_s4 + $0x48] sm:$0xff] }
 0x282   : > { %2689 = vmatpush.bf16.msra.mxu3 %v3760_v43 }
 0x285   : > { %v2316_v33 = vpop.f32.mrf.mxu3 }
 0x286   : > { %v2240_v1 = vpop.f32.mrf.mxu1  ;;  %2690 = vmatpush.bf16.msra.mxu3 %v3759_v26 }
 0x287   : > { %v5850_v14 = vadd.f32 %v2240_v1, %v2192_v17  ;;  %v2194_v12 = vpop.f32.mrf.mxu0 }
 0x288   : > { %v2195_v63 = vadd.f32 %v2194_v12, %v5745_v15 }
 0x28a   : > { %2389 = vmatmul.bf16.gmra.mxu0 %v6200_v9 }
 0x28d   : > { %2667 = vmatmul.bf16.gmra.mxu2 %v5743_v46  ;;  %v2153_v46 = vadd.f32 %v5774_v22, %v5771_v54  ;;  %v2318_v50 = vpop.f32.mrf.mxu3  ;;  %v2158_v22 = vadd.f32 %v2157_v60, %v5790_v25 }
 0x28e   : > { %v2243_v39 = vpop.f32.mrf.mxu1  ;;  %v2319_v25 = vadd.f32 %v2318_v50, %v5802_v4 }
 0x28f   : > { %v5857_v6 = vadd.f32 %v2243_v39, %v2195_v63  ;;  %v2196_v19 = vpop.f32.mrf.mxu0 }
 0x290   : > { %v2197_v30 = vadd.f32 %v2196_v19, %v2148_v23 }
 0x291   : > { %2438 = vmatmul.bf16.gmra.mxu1 %v5419_v5 }
 0x296   : > { %v2245_v15 = vpop.f32.mrf.mxu1 }
 0x297   : > { %v5863_v61 = vadd.f32 %v2245_v15, %v2197_v30  ;;  %v2199_v10 = vpop.f32.mrf.mxu0 }
 0x298   : > { %v2200_v48 = vadd.f32 %v2199_v10, %v5767_v34  ;;  %v2287_v10 = vpop.f32.mrf.mxu2 }
 0x29a   : > { %2394 = vmatmul.bf16.gmra.mxu0 %v6201_v47 }
 0x29d   : > { %2672 = vmatmul.bf16.gmra.mxu2 %v5765_v49  ;;  %v2321_v49 = vpop.f32.mrf.mxu3 }
 0x29e   : > { %v2248_v31 = vpop.f32.mrf.mxu1  ;;  %v2322_v1 = vadd.f32 %v2321_v49, %v5811_v8 }
 0x29f   : > { %v5870_v62 = vadd.f32 %v2248_v31, %v2200_v48  ;;  %v2201_v18 = vpop.f32.mrf.mxu0 }
 0x2a0   : > { %v2202_v5 = vadd.f32 %v2201_v18, %v2153_v46 }
 0x2a1   : > { %2443 = vmatmul.bf16.gmra.mxu1 %v5493_v40 }
 0x2a5   : > { %v2323_v37 = vpop.f32.mrf.mxu3 }
 0x2a6   : > { %v2250_v34 = vpop.f32.mrf.mxu1 }
 0x2a7   : > { %v5876_v52 = vadd.f32 %v2250_v34, %v2202_v5  ;;  %v2204_v57 = vpop.f32.mrf.mxu0 }
 0x2a8   : > { %v2205_v54 = vadd.f32 %v2204_v57, %v5786_v2  ;;  %v2289_v57 = vpop.f32.mrf.mxu2 }
 0x2aa   : > { %2399 = vmatmul.bf16.gmra.mxu0 %v5244_v21  ;;  %v2317_v21 = vadd.f32 %v2316_v33, %v5799_v38  ;;  %v2324_v38 = vadd.f32 %v2323_v37, %v5814_v29 }
 0x2ad   : > { %2677 = vmatmul.bf16.gmra.mxu2 %v5784_v42  ;;  %v2326_v24 = vpop.f32.mrf.mxu3 }
 0x2ae   : > { %v2253_v20 = vpop.f32.mrf.mxu1  ;;  %v2327_v47 = vadd.f32 %v2326_v24, %v5823_v44 }
 0x2af   : > { %v5882_v40 = vadd.f32 %v2253_v20, %v2205_v54  ;;  %v2206_v53 = vpop.f32.mrf.mxu0 }
 0x2b0   : > { %v2207_v51 = vadd.f32 %v2206_v53, %v2158_v22 }
 0x2b1   : > { %2448 = vmatmul.bf16.gmra.mxu1 %v5543_v59 }
 0x2b5   : > { %v2328_v13 = vpop.f32.mrf.mxu3 }
 0x2b6   : > { %v2255_v36 = vpop.f32.mrf.mxu1  ;;  %v2329_v46 = vadd.f32 %v2328_v13, %v5826_v28 }
 0x2b7   : > { %v5885_v27 = vadd.f32 %v2255_v36, %v2207_v51  ;;  %v2365_v45 = vpop.f32.mrf.mxu0  ;;  %v2292_v36 = vpop.f32.mrf.mxu2 }
 0x2b8   : > { %v2366_v32 = vadd.f32 %v2365_v45, %v2317_v21 }
 0x2bd   : > { %v2331_v9 = vpop.f32.mrf.mxu3 }
 0x2be   : > { %v2414_v2 = vpop.f32.mrf.mxu1  ;;  %v2332_v53 = vadd.f32 %v2331_v9, %v5835_v3  ;;  %v2290_v3 = vadd.f32 %v2289_v57, %v5850_v14 }
 0x2bf   : > { %v2367_v0 = vpop.f32.mrf.mxu0  ;;  %v2415_v56 = vadd.f32 %v2414_v2, %v2366_v32 }
 0x2c0   : > { %v2368_v42 = vadd.f32 %v2367_v0, %v2319_v25 }
 0x2c1   : > { %v2455_v59 = vmax.f32 %v2415_v56, 0.0 }
 0x2c5   : > { %v2333_v33 = vpop.f32.mrf.mxu3 }
 0x2c6   : > { %v2416_v35 = vpop.f32.mrf.mxu1  ;;  %v2334_v44 = vadd.f32 %v2333_v33, %v5838_v16 }
 0x2c7   : > { %v2417_v11 = vadd.f32 %v2416_v35, %v2368_v42  ;;  %v2370_v41 = vpop.f32.mrf.mxu0  ;;  %v2288_v42 = vadd.f32 %v2287_v10, %v5844_v7 }
 0x2c8   : > { %v2371_v63 = vadd.f32 %v2370_v41, %v2322_v1 }
 0x2c9   : > { %v2457_v58 = vmax.f32 %v2417_v11, 0.0  ;;  %v2294_v11 = vpop.f32.mrf.mxu2 }
 0x2ca   : > { %v2295_v14 = vadd.f32 %v2294_v11, %v5863_v61 }
 0x2cb   : > { %v2487_v55 = vpack.c.bf16 %v2457_v58, %v2455_v59 }
 0x2cd   : > { %2691 = vmatmul.bf16.vlgmr.msra.gmra.mxu3 %v2487_v55  ;;  %v2336_v50 = vpop.f32.mrf.mxu3 }
 0x2ce   : > { %v2419_v17 = vpop.f32.mrf.mxu1  ;;  %v2337_v16 = vadd.f32 %v2336_v50, %v2288_v42 }
 0x2cf   : > { %v2372_v12 = vpop.f32.mrf.mxu0  ;;  %v2420_v60 = vadd.f32 %v2419_v17, %v2371_v63 }
 0x2d0   : > { %v2373_v4 = vadd.f32 %v2372_v12, %v2324_v38 }
 0x2d1   : > { %v2459_v43 = vmax.f32 %v2420_v60, 0.0  ;;  %v2297_v12 = vpop.f32.mrf.mxu2  ;;  %v2293_v60 = vadd.f32 %v2292_v36, %v5857_v6 }
 0x2d2   : > { %v2298_v50 = vadd.f32 %v2297_v12, %v5870_v62 }
 0x2d5   : > { %v2338_v37 = vpop.f32.mrf.mxu3 }
 0x2d6   : > { %v2421_v23 = vpop.f32.mrf.mxu1  ;;  %v2339_v59 = vadd.f32 %v2338_v37, %v2290_v3 }
 0x2d7   : > { %v2422_v39 = vadd.f32 %v2421_v23, %v2373_v4  ;;  %v2375_v19 = vpop.f32.mrf.mxu0 }
 0x2d8   : > { %v2376_v29 = vadd.f32 %v2375_v19, %v2327_v47 }
 0x2d9   : > { %v2461_v30 = vmax.f32 %v2422_v39, 0.0 }
 0x2db   : > { %v2489_v15 = vpack.c.bf16 %v2461_v30, %v2459_v43 }
 0x2dd   : > { %2696 = vmatmul.bf16.gmra.mxu3 %v2489_v15  ;;  %v2341_v56 = vpop.f32.mrf.mxu3  ;;  %v2299_v15 = vpop.f32.mrf.mxu2 }
 0x2de   : > { %v2424_v48 = vpop.f32.mrf.mxu1  ;;  %v2342_v19 = vadd.f32 %v2341_v56, %v2293_v60 }
 0x2df   : > { %v2377_v8 = vpop.f32.mrf.mxu0  ;;  %v2425_v18 = vadd.f32 %v2424_v48, %v2376_v29 }
 0x2e0   : > { %v2378_v31 = vadd.f32 %v2377_v8, %v2329_v46 }
 0x2e1   : > { %v2463_v54 = vmax.f32 %v2425_v18, 0.0 }
 0x2e5   : > { %v2343_v17 = vpop.f32.mrf.mxu3  ;;  %v2302_v6 = vpop.f32.mrf.mxu2 }
 0x2e6   : > { %v2426_v5 = vpop.f32.mrf.mxu1  ;;  %v2344_v33 = vadd.f32 %v2343_v17, %v2295_v14  ;;  %v2303_v62 = vadd.f32 %v2302_v6, %v5882_v40  ;;  %v3844_v14 = vld [vmem:[%s4280_s30 + $0x10] sm:$0xff]  ;;  %v3846_v6 = vld [vmem:[%s4280_s30 + $0x20] sm:$0xff] }
 0x2e7   : > { %v2427_v26 = vadd.f32 %v2426_v5, %v2378_v31  ;;  %v2380_v34 = vpop.f32.mrf.mxu0 }
 0x2e8   : > { %v2381_v28 = vadd.f32 %v2380_v34, %v2332_v53 }
 0x2e9   : > { %v2465_v49 = vmax.f32 %v2427_v26, 0.0  ;;  %v2300_v26 = vadd.f32 %v2299_v15, %v5876_v52 }
 0x2eb   : > { %v2491_v22 = vpack.c.bf16 %v2465_v49, %v2463_v54 }
 0x2ed   : > { %2701 = vmatmul.bf16.gmra.mxu3 %v2491_v22  ;;  %v2346_v43 = vpop.f32.mrf.mxu3 }
 0x2ee   : > { %v2429_v20 = vpop.f32.mrf.mxu1  ;;  %v2347_v57 = vadd.f32 %v2346_v43, %v2298_v50  ;;  %v2756_v50 = vrot.slane %v3846_v6, 4 }
 0x2ef   : > { %v2382_v51 = vpop.f32.mrf.mxu0  ;;  %v2430_v2 = vadd.f32 %v2429_v20, %v2381_v28 }
 0x2f0   : > { %v2383_v45 = vadd.f32 %v2382_v51, %v2334_v44  ;;  %v2304_v51 = vpop.f32.mrf.mxu2 }
 0x2f1   : > { %v2467_v25 = vmax.f32 %v2430_v2, 0.0  ;;  %v2305_v52 = vadd.f32 %v2304_v51, %v5885_v27 }
 0x2f5   : > { %v2348_v31 = vpop.f32.mrf.mxu3 }
 0x2f6   : > { %v2431_v21 = vpop.f32.mrf.mxu1  ;;  %v2349_v49 = vadd.f32 %v2348_v31, %v2300_v26 }
 0x2f7   : > { %v2432_v24 = vadd.f32 %v2431_v21, %v2383_v45  ;;  %v2385_v0 = vpop.f32.mrf.mxu0 }
 0x2f8   : > { %v2386_v58 = vadd.f32 %v2385_v0, %v2337_v16  ;;  %v2643_v0 = vpop.f32.mrf.mxu2 }
 0x2f9   : > { %v2469_v32 = vmax.f32 %v2432_v24, 0.0 }
 0x2fb   : > { %v2493_v35 = vpack.c.bf16 %v2469_v32, %v2467_v25 }
 0x2fd   : > { %2706 = vmatmul.bf16.gmra.mxu3 %v2493_v35  ;;  %v2351_v20 = vpop.f32.mrf.mxu3 }
 0x2fe   : > { %v2434_v41 = vpop.f32.mrf.mxu1  ;;  %v2352_v32 = vadd.f32 %v2351_v20, %v2303_v62 }
 0x2ff   : > { %v2387_v13 = vpop.f32.mrf.mxu0  ;;  %v2435_v1 = vadd.f32 %v2434_v41, %v2386_v58 }
 0x300   : > { %v2388_v55 = vadd.f32 %v2387_v13, %v2339_v59  ;;  %v2645_v40 = vpop.f32.mrf.mxu2 }
 0x301   : > { %v2471_v4 = vmax.f32 %v2435_v1, 0.0  ;;  %v3842_v1 = vld [vmem:[%s4280_s30] sm:$0xff] }
 0x302   : > { %v2749_v12 = vrot.slane %v3842_v1, 4 }
 0x305   : > { %v2353_v24 = vpop.f32.mrf.mxu3 }
 0x306   : > { %v2436_v38 = vpop.f32.mrf.mxu1  ;;  %v2354_v56 = vadd.f32 %v2353_v24, %v2305_v52 }
 0x307   : > { %v2437_v63 = vadd.f32 %v2436_v38, %v2388_v55  ;;  %v2390_v9 = vpop.f32.mrf.mxu0  ;;  %v5906_v55 = vld [vmem:[%s6029_s5] ss:$0 sm:$0xff]  ;;  %v3843_v38 = vld [vmem:[%s4280_s30 + $0x8] sm:$0xff] }
 0x308   : > { %v2391_v10 = vadd.f32 %v2390_v9, %v2342_v19  ;;  %v2648_v58 = vpop.f32.mrf.mxu2  ;;  %v2644_v9 = vadd.f32 %v5906_v55, %v2643_v0  ;;  %v2646_v43 = vadd.f32 %v5906_v55, %v2645_v40 }
 0x309   : > { %v2473_v7 = vmax.f32 %v2437_v63, 0.0  ;;  %v2750_v63 = vrot.slane %v3843_v38, 4 }
 0x30b   : > { %v2495_v23 = vpack.c.bf16 %v2473_v7, %v2471_v4  ;;  %v2751_v7 = vsel %vm2748_vm7, %v2749_v12, %v2750_v63  ;;  %v3851_v12 = vld [vmem:[%s4280_s30 + $0x48] sm:$0xff] }
 0x30c   : > { %v2766_v38 = vrot.slane %v3851_v12, 4 }
 0x30d   : > { %2711 = vmatmul.bf16.gmra.mxu3 %v2495_v23 }
 0x30e   : > { %v2439_v39 = vpop.f32.mrf.mxu1 }
 0x30f   : > { %v2392_v30 = vpop.f32.mrf.mxu0  ;;  %v2440_v47 = vadd.f32 %v2439_v39, %v2391_v10  ;;  %v2752_v39 = vrot.slane %v3844_v14, 4  ;;  %v3852_v14 = vld [vmem:[%s4280_s30 + $0x50] sm:$0xff] }
 0x310   : > { %v2393_v48 = vadd.f32 %v2392_v30, %v2344_v33  ;;  %v2650_v17 = vpop.f32.mrf.mxu2 }
 0x311   : > { %v2475_v18 = vmax.f32 %v2440_v47, 0.0  ;;  %v2753_v15 = vsel %vm2748_vm7, %v2750_v63, %v2752_v39 }
 0x316   : > { %v2441_v8 = vpop.f32.mrf.mxu1 }
 0x317   : > { %v2442_v46 = vadd.f32 %v2441_v8, %v2393_v48  ;;  %v2395_v29 = vpop.f32.mrf.mxu0  ;;  %v3845_v48 = vld [vmem:[%s4280_s30 + $0x18] sm:$0xff]  ;;  %v2649_v8 = vadd.f32 %v5906_v55, %v2648_v58 }
 0x318   : > { %v2396_v22 = vadd.f32 %v2395_v29, %v2347_v57  ;;  %v2653_v19 = vpop.f32.mrf.mxu2  ;;  %v2754_v47 = vrot.slane %v3845_v48, 4  ;;  %v3853_v48 = vld [vmem:[%s4280_s30 + $0x58] sm:$0xff] }
 0x319   : > { %v2477_v5 = vmax.f32 %v2442_v46, 0.0 }
 0x31a   : > { %v2755_v31 = vsel %vm2748_vm7, %v2752_v39, %v2754_v47  ;;  %v2768_v39 = vrot.slane %v3852_v14, 4 }
 0x31b   : > { %v2497_v61 = vpack.c.bf16 %v2477_v5, %v2475_v18 }
 0x31d   : > { %2716 = vmatmul.bf16.gmra.mxu3 %v2497_v61  ;;  %v2651_v61 = vadd.f32 %v5906_v55, %v2650_v17 }
 0x31e   : > { %v2444_v34 = vpop.f32.mrf.mxu1 }
 0x31f   : > { %v2397_v54 = vpop.f32.mrf.mxu0  ;;  %v2445_v44 = vadd.f32 %v2444_v34, %v2396_v22  ;;  %v2757_v34 = vsel %vm2748_vm7, %v2754_v47, %v2756_v50  ;;  %v3847_v22 = vld [vmem:[%s4280_s30 + $0x28] sm:$0xff]  ;;  %v2770_v47 = vrot.slane %v3853_v48, 4 }
 0x320   : > { %v2398_v53 = vadd.f32 %v2397_v54, %v2349_v49  ;;  %v2655_v46 = vpop.f32.mrf.mxu2  ;;  %v2758_v20 = vrot.slane %v3847_v22, 4 }
 0x321   : > { %v2479_v45 = vmax.f32 %v2445_v44, 0.0  ;;  %v2656_v62 = vadd.f32 %v5906_v55, %v2655_v46 }
 0x322   : > { %v2759_v44 = vsel %vm2748_vm7, %v2756_v50, %v2758_v20 }
 0x326   : > { %v2446_v37 = vpop.f32.mrf.mxu1 }
 0x327   : > { %v2447_v28 = vadd.f32 %v2446_v37, %v2398_v53  ;;  %v2400_v36 = vpop.f32.mrf.mxu0  ;;  %v2654_v53 = vadd.f32 %v5906_v55, %v2653_v19 }
 0x328   : > { %v2401_v35 = vadd.f32 %v2400_v36, %v2352_v32  ;;  %v2658_v54 = vpop.f32.mrf.mxu2 }
 0x329   : > { %v2481_v2 = vmax.f32 %v2447_v28, 0.0 }
 0x32b   : > { %v2499_v21 = vpack.c.bf16 %v2481_v2, %v2479_v45  ;;  %v3848_v45 = vld [vmem:[%s4280_s30 + $0x30] sm:$0xff] }
 0x32c   : > { %v2760_v2 = vrot.slane %v3848_v45, 4 }
 0x32d   : > { %2721 = vmatmul.bf16.gmra.mxu3 %v2499_v21 }
 0x32e   : > { %v2449_v25 = vpop.f32.mrf.mxu1  ;;  %v2761_v52 = vsel %vm2748_vm7, %v2758_v20, %v2760_v2 }
 0x32f   : > { %v2402_v42 = vpop.f32.mrf.mxu0  ;;  %v2450_v3 = vadd.f32 %v2449_v25, %v2401_v35  ;;  %v3849_v25 = vld [vmem:[%s4280_s30 + $0x38] sm:$0xff] }
 0x330   : > { %v2403_v11 = vadd.f32 %v2402_v42, %v2354_v56  ;;  %v2660_v36 = vpop.f32.mrf.mxu2  ;;  %v2762_v32 = vrot.slane %v3849_v25, 4  ;;  %v2659_v56 = vadd.f32 %v5906_v55, %v2658_v54  ;;  %v3857_v25 = vld [vmem:[%s4280_s30 + $0x78] sm:$0xff] }
 0x331   : > { %v2483_v13 = vmax.f32 %v2450_v3, 0.0 }
 0x336   : > { %v2451_v41 = vpop.f32.mrf.mxu1 }
 0x337   : > { %v2452_v16 = vadd.f32 %v2451_v41, %v2403_v11  ;;  %v2763_v11 = vsel %vm2748_vm7, %v2760_v2, %v2762_v32 }
 0x338   : > { %v2663_v42 = vpop.f32.mrf.mxu2 }
 0x339   : > { %v2485_v59 = vmax.f32 %v2452_v16, 0.0  ;;  %v3850_v16 = vld [vmem:[%s4280_s30 + $0x40] sm:$0xff]  ;;  %v2664_v63 = vadd.f32 %v5906_v55, %v2663_v42 }
 0x33a   : > { %v2764_v40 = vrot.slane %v3850_v16, 4  ;;  %v3858_v16 = vld [vmem:[%s4652_s17] sm:$0xff]  ;;  %s3875_s17 = scalar_lea.hbm %s3874_s20, 128 }
 0x33b   : > { %v2501_v27 = vpack.c.bf16 %v2485_v59, %v2483_v13  ;;  %v2661_v13 = vadd.f32 %v5906_v55, %v2660_v36  ;;  %v3856_v36 = vld [vmem:[%s4280_s30 + $0x70] sm:$0xff]  ;;  %p3876_p1 = scmp.ne.s32.totalorder %s3874_s20, %s3875_s17  ;;  %p3881_p6 = scmp.lt.s32.totalorder %s3879_s12, %s3875_s17 }
 0x33c   : > { %v2765_v58 = vsel %vm2748_vm7, %v2762_v32, %v2764_v40  ;;  %v2776_v45 = vrot.slane %v3856_v36, 4  ;;  %v2778_v32 = vrot.slane %v3857_v25, 4 }
 0x33d   : > { %2726 = vmatmul.bf16.gmra.mxu3 %v2501_v27  ;;  %p3877_p2 = pnand %p3876_p1, %p4043_p3  ;;  %p3882_p7 = por %p3881_p6, %p3880_p5 }
 0x33f   : > { %p3878_p4 = pneg %p3877_p2 }
 0x340   : > { %v2665_v59 = vpop.f32.mrf.mxu2 }
 0x341   : > { %v2666_v19 = vadd.f32 %v5906_v55, %v2665_v59  ;;  %p3883_p9 = pnand %p3882_p7, %p3878_p4 }
 0x350   : > { %v2692_v4 = vpop.f32.mrf.mxu3 }
 0x351   : > { %v2693_v60 = vadd.f32 %v2692_v4, %v2644_v9  ;;  %v2767_v4 = vsel %vm2748_vm7, %v2764_v40, %v2766_v38  ;;  %v2797_v40 = vrot.slane %v3858_v16, 4 }
 0x353   : > { %v2800_v23 = vadd.f32 %v2751_v7, %v2693_v60  ;;  %v2668_v60 = vpop.f32.mrf.mxu2 }
 0x355   : > { %2816 = vst [vmem:[%s5916_s13] sm:$0xff] %v2800_v23 }
 0x358   : > { %v2694_v30 = vpop.f32.mrf.mxu3 }
 0x359   : > { %v2695_v33 = vadd.f32 %v2694_v30, %v2646_v43  ;;  %v2769_v30 = vsel %vm2748_vm7, %v2766_v38, %v2768_v39 }
 0x35b   : > { %v2801_v10 = vadd.f32 %v2753_v15, %v2695_v33 }
 0x35d   : > { %2817 = vst [vmem:[%s5916_s13 + $0x8] sm:$0xff] %v2801_v10  ;;  %v2670_v10 = vpop.f32.mrf.mxu2 }
 0x360   : > { %v2697_v29 = vpop.f32.mrf.mxu3 }
 0x361   : > { %v2698_v18 = vadd.f32 %v2697_v29, %v2649_v8  ;;  %v2669_v8 = vadd.f32 %v5906_v55, %v2668_v60  ;;  %v2771_v29 = vsel %vm2748_vm7, %v2768_v39, %v2770_v47 }
 0x363   : > { %v2802_v5 = vadd.f32 %v2755_v31, %v2698_v18 }
 0x365   : > { %2818 = vst [vmem:[%s5916_s13 + $0x10] sm:$0xff] %v2802_v5  ;;  %v3854_v5 = vld [vmem:[%s4280_s30 + $0x60] sm:$0xff]  ;;  %v2673_v50 = vpop.f32.mrf.mxu2 }
 0x366   : > { %v2772_v6 = vrot.slane %v3854_v5, 4  ;;  %v2674_v20 = vadd.f32 %v5906_v55, %v2673_v50 }
 0x368   : > { %v2699_v26 = vpop.f32.mrf.mxu3 }
 0x369   : > { %v2700_v57 = vadd.f32 %v2699_v26, %v2651_v61  ;;  %v2671_v61 = vadd.f32 %v5906_v55, %v2670_v10 }
 0x36b   : > { %v2803_v49 = vadd.f32 %v2757_v34, %v2700_v57  ;;  %v2773_v34 = vsel %vm2748_vm7, %v2770_v47, %v2772_v6 }
 0x36d   : > { %2819 = vst [vmem:[%s5916_s13 + $0x18] sm:$0xff] %v2803_v49  ;;  %v3855_v49 = vld [vmem:[%s4280_s30 + $0x68] sm:$0xff]  ;;  %s2847_s30 = sshll.u32 %s5916_s13, 4  ;;  %s2848_s30 = int_to_ptr.vmem [resolvable:$true] %s2847_s30 }
 0x36e   : > { %v2774_v22 = vrot.slane %v3855_v49, 4 }
 0x370   : > { %v2702_v51 = vpop.f32.mrf.mxu3 }
 0x371   : > { %v2703_v37 = vadd.f32 %v2702_v51, %v2654_v53  ;;  %v2675_v53 = vpop.f32.mrf.mxu2 }
 0x372   : > { %v2676_v2 = vadd.f32 %v5906_v55, %v2675_v53 }
 0x373   : > { %v2804_v28 = vadd.f32 %v2759_v44, %v2703_v37  ;;  %v2775_v44 = vsel %vm2748_vm7, %v2772_v6, %v2774_v22 }
 0x375   : > { %2820 = vst [vmem:[%s5916_s13 + $0x20] sm:$0xff] %v2804_v28 }
 0x378   : > { %v2704_v21 = vpop.f32.mrf.mxu3 }
 0x379   : > { %v2705_v24 = vadd.f32 %v2704_v21, %v2656_v62  ;;  %v2777_v21 = vsel %vm2748_vm7, %v2774_v22, %v2776_v45 }
 0x37b   : > { %v2805_v0 = vadd.f32 %v2761_v52, %v2705_v24  ;;  %v2678_v24 = vpop.f32.mrf.mxu2 }
 0x37c   : > { %v2679_v42 = vadd.f32 %v5906_v55, %v2678_v24 }
 0x37d   : > { %2821 = vst [vmem:[%s5916_s13 + $0x28] sm:$0xff] %v2805_v0 }
 0x380   : > { %v2707_v35 = vpop.f32.mrf.mxu3 }
 0x381   : > { %v2708_v3 = vadd.f32 %v2707_v35, %v2659_v56  ;;  %v2779_v35 = vsel %vm2748_vm7, %v2776_v45, %v2778_v32 }
 0x383   : > { %v2806_v41 = vadd.f32 %v2763_v11, %v2708_v3 }
 0x385   : > { %2822 = vst [vmem:[%s5916_s13 + $0x30] sm:$0xff] %v2806_v41  ;;  %v2680_v41 = vpop.f32.mrf.mxu2 }
 0x388   : > { %v2709_v27 = vpop.f32.mrf.mxu3 }
 0x389   : > { %v2710_v17 = vadd.f32 %v2709_v27, %v2661_v13  ;;  %v2681_v13 = vadd.f32 %v5906_v55, %v2680_v41  ;;  %v2799_v27 = vsel %vm2748_vm7, %v2778_v32, %v2797_v40 }
 0x38b   : > { %v2807_v1 = vadd.f32 %v2765_v58, %v2710_v17 }
 0x38d   : > { %2823 = vst [vmem:[%s5916_s13 + $0x38] sm:$0xff] %v2807_v1 }
 0x390   : > { %v2712_v9 = vpop.f32.mrf.mxu3 }
 0x391   : > { %v2713_v7 = vadd.f32 %v2712_v9, %v2664_v63 }
 0x393   : > { %v2808_v23 = vadd.f32 %v2767_v4, %v2713_v7 }
 0x395   : > { %2824 = vst [vmem:[%s5916_s13 + $0x40] sm:$0xff] %v2808_v23 }
 0x398   : > { %v2714_v43 = vpop.f32.mrf.mxu3 }
 0x399   : > { %v2715_v15 = vadd.f32 %v2714_v43, %v2666_v19 }
 0x39b   : > { %v2809_v33 = vadd.f32 %v2769_v30, %v2715_v15 }
 0x39d   : > { %2825 = vst [vmem:[%s5916_s13 + $0x48] sm:$0xff] %v2809_v33 }
 0x3a0   : > { %v2717_v46 = vpop.f32.mrf.mxu3 }
 0x3a1   : > { %v2718_v31 = vadd.f32 %v2717_v46, %v2669_v8 }
 0x3a3   : > { %v2810_v18 = vadd.f32 %v2771_v29, %v2718_v31 }
 0x3a5   : > { %2826 = vst [vmem:[%s5916_s13 + $0x50] sm:$0xff] %v2810_v18 }
 0x3a8   : > { %v2719_v26 = vpop.f32.mrf.mxu3 }
 0x3a9   : > { %v2720_v57 = vadd.f32 %v2719_v26, %v2671_v61 }
 0x3ab   : > { %v2811_v54 = vadd.f32 %v2773_v34, %v2720_v57 }
 0x3ad   : > { %2827 = vst [vmem:[%s5916_s13 + $0x58] sm:$0xff] %v2811_v54 }
 0x3b0   : > { %v2722_v51 = vpop.f32.mrf.mxu3 }
 0x3b1   : > { %v2723_v37 = vadd.f32 %v2722_v51, %v2674_v20 }
 0x3b3   : > { %v2812_v28 = vadd.f32 %v2775_v44, %v2723_v37 }
 0x3b5   : > { %2828 = vst [vmem:[%s5916_s13 + $0x60] sm:$0xff] %v2812_v28 }
 0x3b8   : > { %v2724_v62 = vpop.f32.mrf.mxu3 }
 0x3b9   : > { %v2725_v52 = vadd.f32 %v2724_v62, %v2676_v2 }
 0x3bb   : > { %v2813_v0 = vadd.f32 %v2777_v21, %v2725_v52 }
 0x3bd   : > { %2829 = vst [vmem:[%s5916_s13 + $0x68] sm:$0xff] %v2813_v0 }
 0x3c0   : > { %v2727_v56 = vpop.f32.mrf.mxu3 }
 0x3c1   : > { %v2728_v11 = vadd.f32 %v2727_v56, %v2679_v42 }
 0x3c3   : > { %v2814_v3 = vadd.f32 %v2779_v35, %v2728_v11 }
 0x3c5   : > { %2830 = vst [vmem:[%s5916_s13 + $0x70] sm:$0xff] %v2814_v3 }
 0x3c8   : > { %v2729_v59 = vpop.f32.mrf.mxu3 }
 0x3c9   : > { %v2730_v58 = vadd.f32 %v2729_v59, %v2681_v13 }
 0x3cb   : > { %v2815_v17 = vadd.f32 %v2799_v27, %v2730_v58 }
 0x3cd   : > { %2831 = vst [vmem:[%s5916_s13 + $0x78] sm:$0xff] %v2815_v17 }
 0x3ce   : > { %3886 = shalt.err (!%p3883_p9)
}
 0x3cf   : > { %s3955_s16 = smov 128   ;;  %s3956_s13 = smov 8  }
 0x3d0   : > { %3767 = dma.vmem_to_hbm [thread:$0]  (%p4043_p3), %s2848_s30, 2048, %s2850_s18, %s2833_s19, %s3955_s16, %s3955_s16, %s3956_s13  }
 0x3d1 PF: > { %p3773_p10 = scmp.ge.s32.totalorder %s3953_s28, 2  ;;  %s2864_s14 = sand.u32 1, %s3925_s21  }
 0x3d2   : > { %s2865_s26 = scalar_lea.sflag [#allocation3], %s2864_s14 }
 0x3d3   : > { %p3770_p11 = pnand %p3773_p10, %p4052_p8 }
 0x3d5   : > { %p3771_p12 = pneg %p3770_p11 }
 0x3d7   : > { %3920 = dma.done.wait (%p3771_p12), %s2865_s26, 2048  }
 0x3d8   : > { %3922 = vsyncadd (%p3771_p12), %s2865_s26, 4294965248  ;;  %s19_s28 = sadd.s32 1, %s3953_s28   ;;  %s6202_s24 = sld [smem:[#allocation9_spill]] }
 0x3d9   : > { %p16_p13 = scmp.ge.s32.totalorder %s19_s28, 6   ;;  %s6203_s10 = sld [smem:[#allocation5_spill]] }
 0x3da   : > { %s6204_s25 = sld [smem:[#allocation6_spill]]  ;;  %s6207_s21 = smov %s3929_s22 }
 0x3db   : > { %s6205_s26 = sld [smem:[#allocation7_spill]]  ;;  %s6208_s22 = smov %s3933_s23 }
 0x3dc   : > { %s6206_s27 = sld [smem:[#allocation8_spill]]  ;;  %18 = sbr.rel (!%p16_p13) target bundleno = 5 (0x5), region = 82 }
 0x3de   : > { %s6209_s23 = smov %s6202_s24 }
 0x3df   : > { %s6210_s24 = smov %s6203_s10 }
 0x3e1   :  { %2871 = vsyncpa [#allocation3], 1 }
 0x3e2   :  { %2873 = vsyncpa [#allocation3 + $0x1], 1 }

// kernel: _ffn_apply.1
= control target key start
LH: loop header
LB: loop body
LE: loop exit
PB: predicated region body
PF: predicated region fallthrough
CT: control target
= control target key end

     0   :  { %11 = vsyncpa [#allocation3], 0  ;;  %s6024_s0 = inlined_call_operand.vmem [shape: f32[2,256,128], index: 0, kind: input, shape index: {}]   ;;  %s6025_s1 = inlined_call_operand.vmem [shape: f32[2,2,8,128], index: 1, kind: input, shape index: {}]   ;;  %s6026_s2 = inlined_call_operand.vmem [shape: bf16[1152,256], index: 2, kind: input, shape index: {}]   ;;  %s6027_s3 = inlined_call_operand.vmem [shape: f32[1,256], index: 3, kind: input, shape index: {}]   ;;  %s6028_s4 = inlined_call_operand.vmem [shape: bf16[256,128], index: 4, kind: input, shape index: {}]   ;;  %s6029_s5 = inlined_call_operand.vmem [shape: f32[1,128], index: 5, kind: input, shape index: {}]   ;;  %s6030_s6 = inlined_call_operand.hbm [shape: f32[2,256,128], index: 6, kind: output, shape index: {}]  }
   0x1   :  { %13 = vsyncpa [#allocation3 + $0x1], 0  ;;  %s3992_s21 = smov 0   ;;  %s3994_s22 = smov 0  }
   0x2   :  { %s3996_s23 = smov 0   ;;  %s3998_s24 = smov 0  }
   0x3   :  { %s4000_s25 = smov 0   ;;  %s4002_s26 = smov 0  }
   0x4   :  { %s4004_s27 = smov 0   ;;  %s4006_s28 = smov 0  }
   0x5 LB: > { %6089 = sst [smem:[#allocation5_spill]] %s3945_s26  ;;  %s2950_s29 = sadd.s32 4294967295, %s3953_s28   ;;  %s3953_s28 = sphi %s4006_s28, %s19_s28   ;;  %s3949_s27 = sphi %s4004_s27, %s6206_s27   ;;  %s3945_s26 = sphi %s4002_s26, %s6205_s26   ;;  %s3941_s25 = sphi %s4000_s25, %s6204_s25   ;;  %s3937_s24 = sphi %s3998_s24, %s6210_s24   ;;  %s3933_s23 = sphi %s3996_s23, %s6209_s23   ;;  %s3929_s22 = sphi %s3994_s22, %s6208_s22   ;;  %s3925_s21 = sphi %s3992_s21, %s6207_s21  }
   0x6   : > { %6090 = sst [smem:[#allocation6_spill]] %s3949_s27  ;;  %s2951_s30 = sadd.s32 4294967294, %s3953_s28  }
   0x7   : > { %s28_s7 = sadd.s32 1, %s3945_s26  ;;  %s31_s8 = sadd.s32 1, %s3949_s27 }
   0x8   : > { %p29_p0 = scmp.ge.s32.totalorder %s28_s7, 2  ;;  %p190_p1 = scmp.ne.s32.totalorder %s3933_s23, %s3929_s22 }
   0x9   : > { %p191_p2 = scmp.eq.s32.totalorder %s2950_s29, 3  ;;  %p196_p5 = scmp.ne.s32.totalorder %s3929_s22, %s3925_s21 }
   0xa   : > { %s6212_s7 = smov (%p29_p0, %s28_s7), 0  ;;  %s6214_s8 = smov (!%p29_p0, %s31_s8), %s3949_s27 }
   0xb   : > { %6091 = sst [smem:[#allocation7_spill]] %s6212_s7  ;;  %s176_s9 = ssub.s32 %s3945_s26, %s6212_s7 }
   0xc   : > { %p4043_p3 = por %p191_p2, %p190_p1  ;;  %p33_p4 = scmp.ge.s32.totalorder %s6214_s8, 2 }
   0xd   : > { %p197_p6 = scmp.eq.s32.totalorder %s2951_s30, 3  ;;  %p2954_p7 = scmp.ge.s32.totalorder %s3953_s28, 1 }
   0xe   : > { %s6216_s8 = smov (%p33_p4, %s6214_s8), 0  ;;  %p251_p9 = scmp.lt.s32.totalorder %s3953_s28, 5 }
   0xf   : > { %6093 = sst [smem:[#allocation8_spill]] %s6216_s8  ;;  %p4052_p8 = por %p197_p6, %p196_p5 }
  0x10   : > { %s175_s12 = ssub.s32 %s3949_s27, %s6216_s8  ;;  %s180_s13 = sadd.s32 1, %s3933_s23 }
  0x11   : > { %s177_s14 = sor.u32 %s176_s9, %s175_s12  ;;  %p252_p10 = pnand %p2954_p7, %p251_p9 }
  0x12   : > { %p178_p11 = scmp.eq.s32.totalorder %s177_s14, 0 }
  0x13   : > { %255 = sbr.rel (%p252_p10) target bundleno = 977 (0x3d1), region = 44 }
  0x14   : > { %s4061_s15 = scalar_select %p178_p11, %s3933_s23, %s180_s13  }
  0x16   : > { %6095 = sst [smem:[#allocation9_spill]] %s4061_s15 }
  0x18   : > { %v3019_v0 = vld [vmem:[%s6026_s2 + $0x70] sm:$0xf]  ;;  %v3622_v1 = vld [vmem:[%s6026_s2 + $0x74] sm:$0xf0]  ;;  %v3011_v11 = vld [vmem:[%s6026_s2 + $0x60] sm:$0xf] }
  0x19   : > { %v3083_v2 = vld [vmem:[%s6026_s2 + $0xf0] sm:$0xf]  ;;  %v3020_v3 = vor.u32 %v3622_v1, %v3019_v0  ;;  %v3638_v4 = vld [vmem:[%s6026_s2 + $0xf4] sm:$0xf0]  ;;  %v3620_v13 = vld [vmem:[%s6026_s2 + $0x64] sm:$0xf0] }
  0x1a   : > { %v3147_v5 = vld [vmem:[%s6026_s2 + $0x170] sm:$0xf]  ;;  %v3654_v6 = vld [vmem:[%s6026_s2 + $0x174] sm:$0xf0]  ;;  %v3084_v7 = vor.u32 %v3638_v4, %v3083_v2  ;;  %v3075_v14 = vld [vmem:[%s6026_s2 + $0xe0] sm:$0xf]  ;;  %v3012_v16 = vor.u32 %v3620_v13, %v3011_v11 }
  0x1b   : > { %v3148_v8 = vor.u32 %v3654_v6, %v3147_v5  ;;  %v3211_v9 = vld [vmem:[%s6026_s2 + $0x1f0] sm:$0xf]  ;;  %v3670_v10 = vld [vmem:[%s6026_s2 + $0x1f4] sm:$0xf0]  ;;  %1572 = vmatpush.bf16.msra.mxu0 %v3020_v3  ;;  %v3636_v15 = vld [vmem:[%s6026_s2 + $0xe4] sm:$0xf0] }
  0x1c   : > { %v3212_v12 = vor.u32 %v3670_v10, %v3211_v9  ;;  %1621 = vmatpush.bf16.msra.mxu1 %v3084_v7  ;;  %v3076_v17 = vor.u32 %v3636_v15, %v3075_v14  ;;  %v3139_v18 = vld [vmem:[%s6026_s2 + $0x160] sm:$0xf]  ;;  %v3652_v19 = vld [vmem:[%s6026_s2 + $0x164] sm:$0xf0]  ;;  %v3003_v23 = vld [vmem:[%s6026_s2 + $0x50] sm:$0xf] }
  0x1d   : > { %1670 = vmatpush.bf16.msra.mxu2 %v3148_v8  ;;  %v3203_v20 = vld [vmem:[%s6026_s2 + $0x1e0] sm:$0xf]  ;;  %v3140_v21 = vor.u32 %v3652_v19, %v3139_v18  ;;  %v3668_v22 = vld [vmem:[%s6026_s2 + $0x1e4] sm:$0xf0]  ;;  %v3618_v24 = vld [vmem:[%s6026_s2 + $0x54] sm:$0xf0] }
  0x1e   : > { %1719 = vmatpush.bf16.msra.mxu3 %v3212_v12  ;;  %v3204_v25 = vor.u32 %v3668_v22, %v3203_v20  ;;  %v3067_v26 = vld [vmem:[%s6026_s2 + $0xd0] sm:$0xf]  ;;  %v3634_v27 = vld [vmem:[%s6026_s2 + $0xd4] sm:$0xf0]  ;;  %v3004_v29 = vor.u32 %v3618_v24, %v3003_v23  ;;  %v2995_v35 = vld [vmem:[%s6026_s2 + $0x40] sm:$0xf] }
  0x1f   : > { %v3131_v28 = vld [vmem:[%s6026_s2 + $0x150] sm:$0xf]  ;;  %1573 = vmatpush.bf16.msra.mxu0 %v3012_v16  ;;  %v3650_v30 = vld [vmem:[%s6026_s2 + $0x154] sm:$0xf0]  ;;  %v3068_v33 = vor.u32 %v3634_v27, %v3067_v26  ;;  %v3616_v36 = vld [vmem:[%s6026_s2 + $0x44] sm:$0xf0] }
  0x20   : > { %v3195_v31 = vld [vmem:[%s6026_s2 + $0x1d0] sm:$0xf]  ;;  %v3666_v32 = vld [vmem:[%s6026_s2 + $0x1d4] sm:$0xf0]  ;;  %1622 = vmatpush.bf16.msra.mxu1 %v3076_v17  ;;  %v3132_v34 = vor.u32 %v3650_v30, %v3131_v28  ;;  %v3059_v37 = vld [vmem:[%s6026_s2 + $0xc0] sm:$0xf]  ;;  %v2996_v44 = vor.u32 %v3616_v36, %v2995_v35 }
  0x21   : > { %1671 = vmatpush.bf16.msra.mxu2 %v3140_v21  ;;  %v3196_v38 = vor.u32 %v3666_v32, %v3195_v31  ;;  %v3632_v39 = vld [vmem:[%s6026_s2 + $0xc4] sm:$0xf0]  ;;  %v3123_v40 = vld [vmem:[%s6026_s2 + $0x140] sm:$0xf]  ;;  %v2987_v47 = vld [vmem:[%s6026_s2 + $0x30] sm:$0xf] }
  0x22   : > { %1720 = vmatpush.bf16.msra.mxu3 %v3204_v25  ;;  %v3648_v41 = vld [vmem:[%s6026_s2 + $0x144] sm:$0xf0]  ;;  %v3187_v42 = vld [vmem:[%s6026_s2 + $0x1c0] sm:$0xf]  ;;  %v3060_v45 = vor.u32 %v3632_v39, %v3059_v37  ;;  %v3614_v48 = vld [vmem:[%s6026_s2 + $0x34] sm:$0xf0] }
  0x23   : > { %v3664_v43 = vld [vmem:[%s6026_s2 + $0x1c4] sm:$0xf0]  ;;  %1574 = vmatpush.bf16.msra.mxu0 %v3004_v29  ;;  %v3124_v46 = vor.u32 %v3648_v41, %v3123_v40  ;;  %v3051_v49 = vld [vmem:[%s6026_s2 + $0xb0] sm:$0xf]  ;;  %v3630_v51 = vld [vmem:[%s6026_s2 + $0xb4] sm:$0xf0]  ;;  %v2988_v56 = vor.u32 %v3614_v48, %v2987_v47 }
  0x24   : > { %1623 = vmatpush.bf16.msra.mxu1 %v3068_v33  ;;  %v3188_v50 = vor.u32 %v3664_v43, %v3187_v42  ;;  %v3115_v52 = vld [vmem:[%s6026_s2 + $0x130] sm:$0xf]  ;;  %v3646_v53 = vld [vmem:[%s6026_s2 + $0x134] sm:$0xf0]  ;;  %v3052_v57 = vor.u32 %v3630_v51, %v3051_v49  ;;  %v2979_v59 = vld [vmem:[%s6026_s2 + $0x20] sm:$0xf] }
  0x25   : > { %1672 = vmatpush.bf16.msra.mxu2 %v3132_v34  ;;  %v3179_v54 = vld [vmem:[%s6026_s2 + $0x1b0] sm:$0xf]  ;;  %v3662_v55 = vld [vmem:[%s6026_s2 + $0x1b4] sm:$0xf0]  ;;  %v3116_v58 = vor.u32 %v3646_v53, %v3115_v52  ;;  %v3612_v60 = vld [vmem:[%s6026_s2 + $0x24] sm:$0xf0] }
  0x26   : > { %1721 = vmatpush.bf16.msra.mxu3 %v3196_v38  ;;  %v3043_v61 = vld [vmem:[%s6026_s2 + $0xa0] sm:$0xf]  ;;  %v3180_v62 = vor.u32 %v3662_v55, %v3179_v54  ;;  %v3628_v63 = vld [vmem:[%s6026_s2 + $0xa4] sm:$0xf0]  ;;  %v2980_v4 = vor.u32 %v3612_v60, %v2979_v59  ;;  %v2971_v5 = vld [vmem:[%s6026_s2 + $0x10] sm:$0xf] }
  0x27   : > { %1575 = vmatpush.bf16.msra.mxu0 %v2996_v44  ;;  %v3107_v0 = vld [vmem:[%s6026_s2 + $0x120] sm:$0xf]  ;;  %v3644_v1 = vld [vmem:[%s6026_s2 + $0x124] sm:$0xf0]  ;;  %v3610_v6 = vld [vmem:[%s6026_s2 + $0x14] sm:$0xf0]  ;;  %v3044_v8 = vor.u32 %v3628_v63, %v3043_v61 }
  0x28   : > { %1624 = vmatpush.bf16.msra.mxu1 %v3060_v45  ;;  %v3171_v2 = vld [vmem:[%s6026_s2 + $0x1a0] sm:$0xf]  ;;  %v3660_v3 = vld [vmem:[%s6026_s2 + $0x1a4] sm:$0xf0]  ;;  %v3035_v7 = vld [vmem:[%s6026_s2 + $0x90] sm:$0xf]  ;;  %v3108_v9 = vor.u32 %v3644_v1, %v3107_v0  ;;  %v2972_v18 = vor.u32 %v3610_v6, %v2971_v5 }
  0x29   : > { %1673 = vmatpush.bf16.msra.mxu2 %v3124_v46  ;;  %v3626_v10 = vld [vmem:[%s6026_s2 + $0x94] sm:$0xf0]  ;;  %v3099_v11 = vld [vmem:[%s6026_s2 + $0x110] sm:$0xf]  ;;  %v3172_v13 = vor.u32 %v3660_v3, %v3171_v2  ;;  %s4232_s18 = sshll.u32 %s3937_s24, 4  ;;  %p294_p12 = scmp.lt.s32.totalorder %s3941_s25, 1 }
  0x2a   : > { %1722 = vmatpush.bf16.msra.mxu3 %v3188_v50  ;;  %v3642_v12 = vld [vmem:[%s6026_s2 + $0x114] sm:$0xf0]  ;;  %v3163_v14 = vld [vmem:[%s6026_s2 + $0x190] sm:$0xf]  ;;  %v2963_v16 = vld [vmem:[%s6026_s2] sm:$0xf]  ;;  %v3036_v21 = vor.u32 %v3626_v10, %v3035_v7 }
  0x2b   : > { %1576 = vmatpush.bf16.msra.mxu0 %v2988_v56  ;;  %v3658_v15 = vld [vmem:[%s6026_s2 + $0x194] sm:$0xf0]  ;;  %v3608_v17 = vld [vmem:[%s6026_s2 + $0x4] sm:$0xf0]  ;;  %p296_p13 = scmp.lt.s32.totalorder %s4232_s18, 31  ;;  %v3100_v22 = vor.u32 %v3642_v12, %v3099_v11  ;;  %vm474_vm0 = vcmask 1046528  }
  0x2c   : > { %1625 = vmatpush.bf16.msra.mxu1 %v3052_v57  ;;  %v3027_v19 = vld [vmem:[%s6026_s2 + $0x80] sm:$0xf]  ;;  %v3624_v20 = vld [vmem:[%s6026_s2 + $0x84] sm:$0xf0]  ;;  %s4249_s16 = scalar_select %p294_p12, %s3941_s25, 1  ;;  %v3164_v25 = vor.u32 %v3658_v15, %v3163_v14  ;;  %v2964_v30 = vor.u32 %v3608_v17, %v2963_v16  ;;  %vm546_vm3 = vcmask 1045504  }
  0x2d   : > { %1674 = vmatpush.bf16.msra.mxu2 %v3116_v58  ;;  %v3091_v23 = vld [vmem:[%s6026_s2 + $0x100] sm:$0xf]  ;;  %v3640_v24 = vld [vmem:[%s6026_s2 + $0x104] sm:$0xf0]  ;;  %s297_s30 = scalar_select %p296_p13, %s4232_s18, 31  ;;  %v3028_v33 = vor.u32 %v3624_v20, %v3027_v19  ;;  %vm616_vm4 = vcmask 1044480  }
  0x2e   : > { %1723 = vmatpush.bf16.msra.mxu3 %v3180_v62  ;;  %v3155_v26 = vld [vmem:[%s6026_s2 + $0x180] sm:$0xf]  ;;  %s2957_s13 = sshll.u32 %s4249_s16, 5  ;;  %v3656_v27 = vld [vmem:[%s6026_s2 + $0x184] sm:$0xf0]  ;;  %v3092_v34 = vor.u32 %v3640_v24, %v3091_v23  ;;  %p305_p0 = scmp.lt.s32.totalorder %s3937_s24, 1 }
  0x2f   : > { %1577 = vmatpush.bf16.msra.mxu0 %v2980_v4  ;;  %s299_s7 = sadd.s32 %s2957_s13, %s297_s30  ;;  %v3275_v28 = vld [vmem:[%s6026_s2 + $0x270] sm:$0xf]  ;;  %v3686_v29 = vld [vmem:[%s6026_s2 + $0x274] sm:$0xf0]  ;;  %v3267_v35 = vld [vmem:[%s6026_s2 + $0x260] sm:$0xf]  ;;  %v3156_v37 = vor.u32 %v3656_v27, %v3155_v26 }
  0x30   : > { %1626 = vmatpush.bf16.msra.mxu1 %v3044_v8  ;;  %s2958_s29 = sshll.u32 %s299_s7, 3  ;;  %v3339_v31 = vld [vmem:[%s6026_s2 + $0x2f0] sm:$0xf]  ;;  %v3702_v32 = vld [vmem:[%s6026_s2 + $0x2f4] sm:$0xf0]  ;;  %v3276_v41 = vor.u32 %v3686_v29, %v3275_v28  ;;  %s6218_s24 = smov (!%p305_p0, %s3937_s24), 1 }
  0x31   : > { %1675 = vmatpush.bf16.msra.mxu2 %v3108_v9  ;;  %s4280_s30 = scalar_lea.vmem %s6024_s0, %s2958_s29  ;;  %v3684_v36 = vld [vmem:[%s6026_s2 + $0x264] sm:$0xf0]  ;;  %v3340_v46 = vor.u32 %v3702_v32, %v3339_v31  ;;  %v3331_v50 = vld [vmem:[%s6026_s2 + $0x2e0] sm:$0xf]  ;;  %vm397_vm1 = vsmask.f32 7424 }
  0x32   : > { %1724 = vmatpush.bf16.msra.mxu3 %v3172_v13  ;;  %v312_v38 = vld [vmem:[%s4280_s30] sm:$0xff]  ;;  %v313_v39 = vld [vmem:[%s4280_s30 + $0x8] sm:$0xff]  ;;  %v314_v40 = vld [vmem:[%s4280_s30 + $0x10] sm:$0xff]  ;;  %v3268_v58 = vor.u32 %v3684_v36, %v3267_v35  ;;  %vm500_vm2 = vsmask.f32 6400  ;;  %s2959_s20 = sshll.u32 %s4249_s16, 1 }
  0x33   : > { %1578 = vmatpush.bf16.msra.mxu0 %v2972_v18  ;;  %v329_v42 = vpack.c.bf16 %v312_v38, %v312_v38  ;;  %v330_v43 = vpack.c.bf16 %v313_v39, %v313_v39  ;;  %v315_v44 = vld [vmem:[%s4280_s30 + $0x18] sm:$0xff]  ;;  %v331_v45 = vpack.c.bf16 %v314_v40, %v314_v40  ;;  %v316_v47 = vld [vmem:[%s4280_s30 + $0x20] sm:$0xff]  ;;  %v317_v48 = vld [vmem:[%s4280_s30 + $0x28] sm:$0xff]  ;;  %s308_s16 = sadd.s32 %s2959_s20, %s6218_s24  ;;  %vm572_vm5 = vsmask.f32 5376  ;;  %s3603_s14 = sshll.u32 %s3941_s25, 5 }
  0x34   : > { %1627 = vmatpush.bf16.msra.mxu1 %v3036_v21  ;;  %v332_v49 = vpack.c.bf16 %v315_v44, %v315_v44  ;;  %v3700_v51 = vld [vmem:[%s6026_s2 + $0x2e4] sm:$0xf0]  ;;  %v333_v55 = vpack.c.bf16 %v316_v47, %v316_v47  ;;  %v334_v57 = vpack.c.bf16 %v317_v48, %v317_v48  ;;  %v3259_v19 = vld [vmem:[%s6026_s2 + $0x250] sm:$0xf]  ;;  %v3682_v20 = vld [vmem:[%s6026_s2 + $0x254] sm:$0xf0]  ;;  %s2844_s26 = sadd.s32 %s3603_s14, %s4232_s18 }
  0x35   : > { %1676 = vmatpush.bf16.msra.mxu2 %v3100_v22  ;;  %v362_v52 = vunpack.c.l.b16 %v329_v42  ;;  %v4300_v53 = vunpack.c.l.b16 %v330_v43  ;;  %v4302_v54 = vunpack.c.l.b16 %v331_v45  ;;  %v3332_v60 = vor.u32 %v3700_v51, %v3331_v50  ;;  %v3323_v22 = vld [vmem:[%s6026_s2 + $0x2d0] sm:$0xf]  ;;  %v3698_v26 = vld [vmem:[%s6026_s2 + $0x2d4] sm:$0xf0]  ;;  %v3251_v43 = vld [vmem:[%s6026_s2 + $0x240] sm:$0xf] }
  0x36   : > { %1725 = vmatpush.bf16.msra.mxu3 %v3164_v25  ;;  %v4304_v56 = vunpack.c.l.b16 %v332_v49  ;;  %v4321_v1 = vunpack.c.l.b16 %v333_v55  ;;  %v4330_v5 = vunpack.c.l.b16 %v334_v57  ;;  %v3260_v21 = vor.u32 %v3682_v20, %v3259_v19  ;;  %v318_v25 = vld [vmem:[%s4280_s30 + $0x30] sm:$0xff]  ;;  %v319_v27 = vld [vmem:[%s4280_s30 + $0x38] sm:$0xff]  ;;  %v3680_v44 = vld [vmem:[%s6026_s2 + $0x244] sm:$0xf0]  ;;  %s2960_s24 = sshll.u32 %s308_s16, 3  ;;  %s290_s16 = sand.u32 1, %s3929_s22  }
  0x37   : > { %1579 = vmatpush.bf16.msra.mxu0 %v2964_v30  ;;  %v4307_v59 = vpack.c.b16 %v4300_v53, %v362_v52  ;;  %v3324_v28 = vor.u32 %v3698_v26, %v3323_v22  ;;  %v335_v29 = vpack.c.bf16 %v318_v25, %v318_v25  ;;  %v3252_v45 = vor.u32 %v3680_v44, %v3251_v43  ;;  %v3696_v47 = vld [vmem:[%s6026_s2 + $0x2c4] sm:$0xf0]  ;;  %v320_v51 = vld [vmem:[%s4280_s30 + $0x40] sm:$0xff]  ;;  %v3678_v19 = vld [vmem:[%s6026_s2 + $0x234] sm:$0xf0]  ;;  %s4652_s17 = scalar_lea.vmem %s6025_s1, %s2960_s24  ;;  %s2955_s8 = sshll.u32 %s290_s16, 7 }
  0x38   : > { %1628 = vmatpush.bf16.msra.mxu1 %v3028_v33  ;;  %v4311_v61 = vpack.c.b16 %v4304_v56, %v4302_v54  ;;  %v4345_v16 = vpack.c.b16 %v4330_v5, %v4321_v1  ;;  %v336_v33 = vpack.c.bf16 %v319_v27, %v319_v27  ;;  %v321_v52 = vld [vmem:[%s4280_s30 + $0x48] sm:$0xff]  ;;  %v3694_v22 = vld [vmem:[%s6026_s2 + $0x2b4] sm:$0xf0]  ;;  %vm642_vm6 = vsmask.f32 4352  ;;  %s5916_s13 = scalar_lea.vmem [#allocation2], %s2955_s8 }
  0x39   : > { %1677 = vmatpush.bf16.msra.mxu2 %v3092_v34  ;;  %v4315_v62 = vshrl.u32 %v4307_v59, 16  ;;  %v4318_v63 = vshll.u32 %v4307_v59, 16  ;;  %v475_v0 = vrot.slane %v4307_v59, 1  ;;  %v4384_v38 = vunpack.c.l.b16 %v335_v29  ;;  %v323_v29 = vld [vmem:[%s4280_s30 + $0x58] sm:$0xff]  ;;  %s3604_s24 = sshll.u32 %s2844_s26, 3  ;;  %s2833_s19 = scalar_lea.sflag [#allocation3], %s290_s16 }
  0x3a   : > { %1726 = vmatpush.bf16.msra.mxu3 %v3156_v37  ;;  %1580 = vmatmul.bf16.vlgmr.msra.gmra.mxu0 %v4307_v59  ;;  %v4324_v2 = vshll.u32 %v4311_v61, 16  ;;  %v476_v3 = vrot.slane %v4311_v61, 1  ;;  %v4328_v4 = vshrl.u32 %v4311_v61, 16  ;;  %v4365_v23 = vshll.u32 %v4345_v16, 16  ;;  %s2846_s25 = scalar_lea.hbm %s6030_s6, %s3604_s24  ;;  %s3879_s12 = scalar_lea.hbm %s6030_s6, 512 }
  0x3b   : > { %1768 = vmatpush.bf16.msrb.mxu0 %v3276_v41  ;;  %v403_v6 = vrot.slane %v4318_v63, 1  ;;  %v501_v7 = vrot.slane %v4315_v62, 1  ;;  %v502_v8 = vrot.slane %v4318_v63, 2  ;;  %v4368_v24 = vshrl.u32 %v4345_v16, 16  ;;  %s2849_s18 = sshll.u32 %s2846_s25, 4  ;;  %s2850_s18 = int_to_ptr.hbm [resolvable:$true] %s2849_s18 }
  0x3c   : > { %1817 = vmatpush.bf16.msrb.mxu1 %v3340_v46  ;;  %v408_v9 = vrot.slane %v4324_v2, 1  ;;  %v4337_v10 = vsel %vm474_vm0, %v475_v0, %v476_v3  ;;  %v504_v11 = vrot.slane %v4328_v4, 1  ;;  %v505_v12 = vrot.slane %v4324_v2, 2  ;;  %v3315_v46 = vld [vmem:[%s6026_s2 + $0x2c0] sm:$0xf]  ;;  %s3873_s20 = sshra.s32 %s2850_s18, 4  ;;  %s3874_s20 = int_to_ptr.hbm [resolvable:$true] %s3873_s20 }
  0x3d   : > { %v404_v13 = vor.u32 %v403_v6, %v4315_v62  ;;  %1678 = vmatmul.bf16.vlgmr.msra.gmra.mxu2 %v4337_v10  ;;  %v503_v14 = vor.u32 %v502_v8, %v501_v7  ;;  %v478_v30 = vrot.slane %v4345_v16, 1  ;;  %v508_v31 = vrot.slane %v4368_v24, 1  ;;  %p3880_p5 = scmp.lt.s32.totalorder %s3874_s20, %s6030_s6 }
  0x3e   : > { %v506_v15 = vor.u32 %v505_v12, %v504_v11  ;;  %v509_v32 = vrot.slane %v4365_v23, 2  ;;  %v412_v34 = vor.u32 %v4328_v4, %v408_v9  ;;  %v416_v35 = vrot.slane %v4365_v23, 1 }
  0x3f   : > { %1769 = vmatpush.bf16.msrb.mxu0 %v3268_v58  ;;  %v4348_v17 = vsel %vm397_vm1, %v404_v13, %v408_v9  ;;  %v4382_v36 = vsel %vm474_vm0, %v476_v3, %v478_v30  ;;  %v4386_v39 = vunpack.c.l.b16 %v336_v33  ;;  %v3316_v50 = vor.u32 %v3696_v47, %v3315_v46 }
  0x40   : > { %1818 = vmatpush.bf16.msrb.mxu1 %v3332_v60  ;;  %v4352_v18 = vsel %vm500_vm2, %v503_v14, %v506_v15  ;;  %v510_v37 = vor.u32 %v509_v32, %v508_v31  ;;  %v4389_v40 = vsel %vm397_vm1, %v412_v34, %v416_v35  ;;  %v337_v60 = vpack.c.bf16 %v320_v51, %v320_v51 }
  0x41   : > { %1629 = vmatmul.bf16.vlgmr.msra.gmra.mxu1 %v4348_v17  ;;  %6096 = vst [vmem:[#allocation10_spill] sm:$0xff] %v4352_v18  ;;  %1727 = vmatmul.bf16.vlgmr.msra.gmra.mxu3 %v4352_v18  ;;  %v4397_v42 = vpack.c.b16 %v4386_v39, %v4384_v38  ;;  %v338_v0 = vpack.c.bf16 %v321_v52, %v321_v52  ;;  %v324_v52 = vld [vmem:[%s4280_s30 + $0x60] sm:$0xff]  ;;  %vm2748_vm7 = vcmask 1043456  }
  0x42   : > { %v4393_v41 = vsel %vm500_vm2, %v506_v15, %v510_v37  ;;  %v420_v3 = vor.u32 %v4368_v24, %v416_v35  ;;  %v4430_v9 = vunpack.c.l.b16 %v337_v60  ;;  %v3243_v15 = vld [vmem:[%s6026_s2 + $0x230] sm:$0xf]  ;;  %v340_v34 = vpack.c.bf16 %v323_v29, %v323_v29 }
  0x43   : > { %1770 = vmatpush.bf16.msrb.mxu0 %v3260_v21  ;;  %6097 = vst [vmem:[#allocation11_spill] sm:$0xff] %v4393_v41  ;;  %v4414_v48 = vshll.u32 %v4397_v42, 16  ;;  %v4417_v49 = vshrl.u32 %v4397_v42, 16  ;;  %v480_v55 = vrot.slane %v4397_v42, 1  ;;  %v4432_v11 = vunpack.c.l.b16 %v338_v0  ;;  %v3307_v21 = vld [vmem:[%s6026_s2 + $0x2b0] sm:$0xf] }
  0x44   : > { %1819 = vmatpush.bf16.msrb.mxu1 %v3324_v28  ;;  %v3244_v20 = vor.u32 %v3678_v19, %v3243_v15  ;;  %v3308_v27 = vor.u32 %v3694_v22, %v3307_v21  ;;  %v322_v28 = vld [vmem:[%s4280_s30 + $0x50] sm:$0xff]  ;;  %v4478_v46 = vunpack.c.l.b16 %v340_v34  ;;  %v3299_v0 = vld [vmem:[%s6026_s2 + $0x2a0] sm:$0xf]  ;;  %v341_v19 = vpack.c.bf16 %v324_v52, %v324_v52 }
  0x45   : > { %v512_v57 = vrot.slane %v4417_v49, 1  ;;  %v513_v58 = vrot.slane %v4414_v48, 2  ;;  %v424_v6 = vrot.slane %v4414_v48, 1  ;;  %v4428_v7 = vsel %vm474_vm0, %v478_v30, %v480_v55 }
  0x46   : > { %v4443_v14 = vpack.c.b16 %v4432_v11, %v4430_v9  ;;  %v339_v33 = vpack.c.bf16 %v322_v28, %v322_v28  ;;  %6100 = vst [vmem:[#allocation14_spill] sm:$0xff] %v4478_v46  ;;  %v4516_v28 = vunpack.c.l.b16 %v341_v19  ;;  %v3467_v19 = vld [vmem:[%s6026_s2 + $0x3f0] sm:$0xf] }
  0x47   : > { %1771 = vmatpush.bf16.msrb.mxu0 %v3252_v45  ;;  %v514_v8 = vor.u32 %v513_v58, %v512_v57  ;;  %v4435_v12 = vsel %vm397_vm1, %v420_v3, %v424_v6  ;;  %v428_v35 = vor.u32 %v4417_v49, %v424_v6  ;;  %v3235_v57 = vld [vmem:[%s6026_s2 + $0x220] sm:$0xf]  ;;  %v3676_v58 = vld [vmem:[%s6026_s2 + $0x224] sm:$0xf0] }
  0x48   : > { %1820 = vmatpush.bf16.msrb.mxu1 %v3316_v50  ;;  %v4460_v25 = vshll.u32 %v4443_v14, 16  ;;  %v4463_v26 = vshrl.u32 %v4443_v14, 16  ;;  %v482_v30 = vrot.slane %v4443_v14, 1  ;;  %v4476_v45 = vunpack.c.l.b16 %v339_v33  ;;  %v3692_v3 = vld [vmem:[%s6026_s2 + $0x2a4] sm:$0xf0]  ;;  %6102 = vst [vmem:[#allocation16_spill] sm:$0xff] %v4516_v28 }
  0x49   : > { %v4439_v13 = vsel %vm500_vm2, %v510_v37, %v514_v8  ;;  %v3236_v60 = vor.u32 %v3676_v58, %v3235_v57  ;;  %v3300_v15 = vor.u32 %v3692_v3, %v3299_v0  ;;  %v327_v0 = vld [vmem:[%s4280_s30 + $0x78] sm:$0xff] }
  0x4a   : > { %1585 = vmatmul.bf16.gmra.mxu0 %v4311_v61  ;;  %6098 = vst [vmem:[#allocation12_spill] sm:$0xff] %v4439_v13  ;;  %v516_v31 = vrot.slane %v4463_v26, 1  ;;  %v517_v32 = vrot.slane %v4460_v25, 2  ;;  %v432_v37 = vrot.slane %v4460_v25, 1  ;;  %v4474_v43 = vsel %vm474_vm0, %v480_v55, %v482_v30  ;;  %v325_v55 = vld [vmem:[%s4280_s30 + $0x68] sm:$0xff] }
  0x4b   : > { %1772 = vmatpush.bf16.msrb.mxu0 %v3244_v20  ;;  %6099 = vst [vmem:[#allocation13_spill] sm:$0xff] %v4476_v45  ;;  %v4489_v51 = vpack.c.b16 %v4478_v46, %v4476_v45  ;;  %v342_v20 = vpack.c.bf16 %v325_v55, %v325_v55  ;;  %v3718_v55 = vld [vmem:[%s6026_s2 + $0x374] sm:$0xf0] }
  0x4c   : > { %1821 = vmatpush.bf16.msrb.mxu1 %v3308_v27  ;;  %v518_v44 = vor.u32 %v517_v32, %v516_v31  ;;  %v4481_v47 = vsel %vm397_vm1, %v428_v35, %v432_v37  ;;  %v436_v31 = vor.u32 %v4463_v26, %v432_v37 }
  0x4d   : > { %1683 = vmatmul.bf16.gmra.mxu2 %v4382_v36  ;;  %v4508_v6 = vshll.u32 %v4489_v51, 16  ;;  %v6035_v21 = vrot.slane %v4489_v51, 1  ;;  %v4518_v29 = vunpack.c.l.b16 %v342_v20 }
  0x4e   : > { %v4485_v50 = vsel %vm500_vm2, %v514_v8, %v518_v44  ;;  %v4511_v8 = vshrl.u32 %v4489_v51, 16 }
  0x4f   : > { %6101 = vst [vmem:[#allocation15_spill] sm:$0xff] %v4485_v50  ;;  %1773 = vmatpush.bf16.msrb.mxu0 %v3236_v60  ;;  %v521_v27 = vrot.slane %v4508_v6, 2  ;;  %v440_v32 = vrot.slane %v4508_v6, 1  ;;  %v4526_v33 = vsel %vm474_vm0, %v482_v30, %v6035_v21  ;;  %v4532_v35 = vpack.c.b16 %v4518_v29, %v4516_v28  ;;  %v3403_v30 = vld [vmem:[%s6026_s2 + $0x370] sm:$0xf] }
  0x50   : > { %1822 = vmatpush.bf16.msrb.mxu1 %v3300_v15  ;;  %v520_v22 = vrot.slane %v4511_v8, 1  ;;  %6103 = vst [vmem:[#allocation17_spill] sm:$0xff] %v4518_v29  ;;  %v326_v60 = vld [vmem:[%s4280_s30 + $0x70] sm:$0xff]  ;;  %v3404_v3 = vor.u32 %v3718_v55, %v3403_v30  ;;  %v3674_v15 = vld [vmem:[%s6026_s2 + $0x214] sm:$0xf0] }
  0x51   : > { %1634 = vmatmul.bf16.gmra.mxu1 %v4389_v40  ;;  %1732 = vmatmul.bf16.gmra.mxu3 %v4393_v41  ;;  %6104 = vst [vmem:[#allocation18_spill] sm:$0xff] %v4526_v33  ;;  %v4535_v52 = vsel %vm397_vm1, %v436_v31, %v440_v32  ;;  %v4549_v57 = vshll.u32 %v4532_v35, 16  ;;  %v4552_v58 = vshrl.u32 %v4532_v35, 16  ;;  %v3734_v31 = vld [vmem:[%s6026_s2 + $0x3f4] sm:$0xf0] }
  0x52   : > { %v4528_v34 = vor.u32 %v521_v27, %v520_v22  ;;  %6105 = vst [vmem:[#allocation19_spill] sm:$0xff] %v4535_v52  ;;  %1866 = vmatpush.bf16.msrb.mxu2 %v3404_v3  ;;  %v3291_v22 = vld [vmem:[%s6026_s2 + $0x290] sm:$0xf]  ;;  %v3690_v27 = vld [vmem:[%s6026_s2 + $0x294] sm:$0xf0]  ;;  %v3468_v55 = vor.u32 %v3734_v31, %v3467_v19  ;;  %v343_v31 = vpack.c.bf16 %v326_v60, %v326_v60 }
  0x53   : > { %v3292_v30 = vor.u32 %v3690_v27, %v3291_v22  ;;  %v3395_v3 = vld [vmem:[%s6026_s2 + $0x360] sm:$0xf]  ;;  %v3732_v22 = vld [vmem:[%s6026_s2 + $0x3e4] sm:$0xf0]  ;;  %v3387_v19 = vld [vmem:[%s6026_s2 + $0x350] sm:$0xf] }
  0x54   : > { %v4540_v37 = vsel %vm500_vm2, %v518_v44, %v4528_v34  ;;  %v3227_v44 = vld [vmem:[%s6026_s2 + $0x210] sm:$0xf]  ;;  %v3714_v27 = vld [vmem:[%s6026_s2 + $0x354] sm:$0xf0]  ;;  %1915 = vmatpush.bf16.msrb.mxu3 %v3468_v55  ;;  %v524_v60 = vrot.slane %v4552_v58, 1  ;;  %v4614_v55 = vunpack.c.l.b16 %v343_v31 }
  0x55   : > { %6106 = vst [vmem:[#allocation20_spill] sm:$0xff] %v4540_v37  ;;  %v3228_v20 = vor.u32 %v3674_v15, %v3227_v44  ;;  %v3716_v44 = vld [vmem:[%s6026_s2 + $0x364] sm:$0xf0]  ;;  %v3459_v15 = vld [vmem:[%s6026_s2 + $0x3e0] sm:$0xf]  ;;  %1823 = vmatpush.bf16.msrb.mxu1 %v3292_v30 }
  0x56   : > { %v3396_v21 = vor.u32 %v3716_v44, %v3395_v3  ;;  %v3451_v3 = vld [vmem:[%s6026_s2 + $0x3d0] sm:$0xf]  ;;  %v3730_v44 = vld [vmem:[%s6026_s2 + $0x3d4] sm:$0xf0]  ;;  %v3712_v30 = vld [vmem:[%s6026_s2 + $0x344] sm:$0xf0] }
  0x57   : > { %1774 = vmatpush.bf16.msrb.mxu0 %v3228_v20  ;;  %v3388_v20 = vor.u32 %v3714_v27, %v3387_v19  ;;  %6107 = vst [vmem:[#allocation21_spill] sm:$0xff] %v4614_v55  ;;  %v444_v19 = vor.u32 %v4511_v8, %v440_v32  ;;  %v448_v27 = vrot.slane %v4549_v57, 1  ;;  %v3728_v31 = vld [vmem:[%s6026_s2 + $0x3c4] sm:$0xf0] }
  0x58   : > { %1867 = vmatpush.bf16.msrb.mxu2 %v3396_v21  ;;  %v3379_v21 = vld [vmem:[%s6026_s2 + $0x340] sm:$0xf] }
  0x59   : > { %v3380_v32 = vor.u32 %v3712_v30, %v3379_v21  ;;  %v4641_v18 = vsel %vm397_vm1, %v444_v19, %v448_v27  ;;  %v3219_v30 = vld [vmem:[%s6026_s2 + $0x200] sm:$0xf] }
  0x5a   : > { %1590 = vmatmul.bf16.gmra.mxu0 %v4345_v16  ;;  %6112 = vst [vmem:[#allocation24_spill] sm:$0xff] %v4641_v18  ;;  %v328_v19 = vld [vmem:[%s4652_s17] sm:$0xff] }
  0x5c   : > { %1868 = vmatpush.bf16.msrb.mxu2 %v3388_v20 }
  0x5d   : > { %1688 = vmatmul.bf16.gmra.mxu2 %v4428_v7 }
  0x60   : > { %1869 = vmatpush.bf16.msrb.mxu2 %v3380_v32  ;;  %v3435_v32 = vld [vmem:[%s6026_s2 + $0x3b0] sm:$0xf] }
  0x61   : > { %1639 = vmatmul.bf16.gmra.mxu1 %v4435_v12  ;;  %1737 = vmatmul.bf16.gmra.mxu3 %v4439_v13  ;;  %v3443_v13 = vld [vmem:[%s6026_s2 + $0x3c0] sm:$0xf] }
  0x62   : > { %v3444_v41 = vor.u32 %v3728_v31, %v3443_v13  ;;  %v3371_v13 = vld [vmem:[%s6026_s2 + $0x330] sm:$0xf] }
  0x6a   : > { %1595 = vmatmul.bf16.gmra.mxu0 %v4397_v42 }
  0x6d   : > { %1693 = vmatmul.bf16.gmra.mxu2 %v4474_v43 }
  0x71   : > { %1644 = vmatmul.bf16.gmra.mxu1 %v4481_v47  ;;  %1742 = vmatmul.bf16.gmra.mxu3 %v4485_v50  ;;  %v3460_v50 = vor.u32 %v3732_v22, %v3459_v15  ;;  %v3452_v22 = vor.u32 %v3730_v44, %v3451_v3 }
  0x73   : > { %1916 = vmatpush.bf16.msrb.mxu3 %v3460_v50  ;;  %v6110_v50 = vrot.slane %v4489_v51, 1 }
  0x77   : > { %1917 = vmatpush.bf16.msrb.mxu3 %v3452_v22  ;;  %v3672_v22 = vld [vmem:[%s6026_s2 + $0x204] sm:$0xf0] }
  0x78   : > { %v3220_v31 = vor.u32 %v3672_v22, %v3219_v30  ;;  %v3363_v30 = vld [vmem:[%s6026_s2 + $0x320] sm:$0xf]  ;;  %v3708_v22 = vld [vmem:[%s6026_s2 + $0x324] sm:$0xf0] }
  0x7a   : > { %1600 = vmatmul.bf16.gmra.mxu0 %v4443_v14 }
  0x7b   : > { %1918 = vmatpush.bf16.msrb.mxu3 %v3444_v41  ;;  %v3688_v41 = vld [vmem:[%s6026_s2 + $0x284] sm:$0xf0]  ;;  %1775 = vmatpush.bf16.msrb.mxu0 %v3220_v31 }
  0x7d   : > { %1698 = vmatmul.bf16.gmra.mxu2 %v4526_v33 }
  0x81   : > { %1649 = vmatmul.bf16.gmra.mxu1 %v4535_v52  ;;  %1747 = vmatmul.bf16.gmra.mxu3 %v4540_v37  ;;  %v344_v37 = vpack.c.bf16 %v327_v0, %v327_v0  ;;  %v525_v0 = vrot.slane %v4549_v57, 2 }
  0x83   : > { %v4616_v15 = vunpack.c.l.b16 %v344_v37  ;;  %v6109_v37 = vrot.slane %v4532_v35, 1  ;;  %v4634_v44 = vor.u32 %v525_v0, %v524_v60  ;;  %v3710_v60 = vld [vmem:[%s6026_s2 + $0x334] sm:$0xf0] }
  0x84   : > { %v3372_v0 = vor.u32 %v3710_v60, %v3371_v13  ;;  %v3726_v60 = vld [vmem:[%s6026_s2 + $0x3b4] sm:$0xf0] }
  0x85   : > { %6108 = vst [vmem:[#allocation22_spill] sm:$0xff] %v4616_v15  ;;  %v4632_v3 = vsel %vm474_vm0, %v6110_v50, %v6109_v37  ;;  %v4638_v20 = vpack.c.b16 %v4616_v15, %v4614_v55  ;;  %v4647_v37 = vsel %vm500_vm2, %v4528_v34, %v4634_v44  ;;  %v3283_v50 = vld [vmem:[%s6026_s2 + $0x280] sm:$0xf]  ;;  %v3364_v15 = vor.u32 %v3708_v22, %v3363_v30  ;;  %v3706_v55 = vld [vmem:[%s6026_s2 + $0x314] sm:$0xf0] }
  0x86   : > { %6111 = vst [vmem:[#allocation23_spill] sm:$0xff] %v4632_v3  ;;  %1870 = vmatpush.bf16.msrb.mxu2 %v3372_v0  ;;  %v3284_v13 = vor.u32 %v3688_v41, %v3283_v50  ;;  %v3427_v0 = vld [vmem:[%s6026_s2 + $0x3a0] sm:$0xf]  ;;  %v3724_v50 = vld [vmem:[%s6026_s2 + $0x3a4] sm:$0xf0]  ;;  %v345_v22 = vpack.c.bf16 %v328_v19, %v328_v19  ;;  %v6114_v19 = vrot.slane %v4532_v35, 1 }
  0x87   : > { %6113 = vst [vmem:[#allocation25_spill] sm:$0xff] %v4647_v37  ;;  %v4662_v34 = vshll.u32 %v4638_v20, 16  ;;  %v4665_v21 = vshrl.u32 %v4638_v20, 16  ;;  %v3355_v41 = vld [vmem:[%s6026_s2 + $0x310] sm:$0xf]  ;;  %v488_v31 = vrot.slane %v4638_v20, 1 }
  0x88   : > { %1824 = vmatpush.bf16.msrb.mxu1 %v3284_v13  ;;  %v3356_v29 = vor.u32 %v3706_v55, %v3355_v41  ;;  %v3722_v13 = vld [vmem:[%s6026_s2 + $0x394] sm:$0xf0]  ;;  %v4722_v41 = vunpack.c.l.b16 %v345_v22  ;;  %v3531_v22 = vld [vmem:[%s6026_s2 + $0x470] sm:$0xf] }
  0x89   : > { %v529_v30 = vrot.slane %v4662_v34, 2  ;;  %v4720_v55 = vsel %vm474_vm0, %v6114_v19, %v488_v31 }
  0x8a   : > { %1605 = vmatmul.bf16.gmra.mxu0 %v4489_v51  ;;  %1871 = vmatpush.bf16.msrb.mxu2 %v3364_v15  ;;  %6115 = vst [vmem:[#allocation26_spill] sm:$0xff] %v4720_v55 }
  0x8b   : > { %6116 = vst [vmem:[#allocation27_spill] sm:$0xff] %v4722_v41 }
  0x8d   : > { %1703 = vmatmul.bf16.gmra.mxu2 %v4632_v3  ;;  %v3419_v3 = vld [vmem:[%s6026_s2 + $0x390] sm:$0xf] }
  0x8e   : > { %1872 = vmatpush.bf16.msrb.mxu2 %v3356_v29 }
  0x91   : > { %1654 = vmatmul.bf16.gmra.mxu1 %v4641_v18  ;;  %1752 = vmatmul.bf16.gmra.mxu3 %v4647_v37  ;;  %v3436_v37 = vor.u32 %v3726_v60, %v3435_v32  ;;  %v3428_v32 = vor.u32 %v3724_v50, %v3427_v0  ;;  %v528_v60 = vrot.slane %v4665_v21, 1  ;;  %v456_v0 = vrot.slane %v4662_v34, 1  ;;  %v3347_v18 = vld [vmem:[%s6026_s2 + $0x300] sm:$0xf] }
  0x92   : > { %v3420_v50 = vor.u32 %v3722_v13, %v3419_v3  ;;  %v3411_v3 = vld [vmem:[%s6026_s2 + $0x380] sm:$0xf]  ;;  %v3750_v13 = vld [vmem:[%s6026_s2 + $0x474] sm:$0xf0] }
  0x93   : > { %1919 = vmatpush.bf16.msrb.mxu3 %v3436_v37  ;;  %v452_v37 = vor.u32 %v4552_v58, %v448_v27  ;;  %v530_v15 = vor.u32 %v529_v30, %v528_v60  ;;  %v3704_v27 = vld [vmem:[%s6026_s2 + $0x304] sm:$0xf0] }
  0x94   : > { %v3348_v28 = vor.u32 %v3704_v27, %v3347_v18  ;;  %v4746_v18 = vpack.c.b16 %v4722_v41, %v4722_v41 }
  0x95   : > { %v4737_v60 = vsel %vm397_vm1, %v452_v37, %v456_v0  ;;  %v4742_v29 = vsel %vm500_vm2, %v4634_v44, %v530_v15  ;;  %v3532_v44 = vor.u32 %v3750_v13, %v3531_v22  ;;  %v3621_v37 = vld [vmem:[%s6026_s2 + $0x74] sm:$0xf]  ;;  %v460_v13 = vor.u32 %v4665_v21, %v456_v0  ;;  %v846_v0 = vld [vmem:[%s6027_s3] sm:$0x3] }
  0x96   : > { %6117 = vst [vmem:[#allocation28_spill] sm:$0xff] %v4737_v60  ;;  %1873 = vmatpush.bf16.msrb.mxu2 %v3348_v28  ;;  %v3021_v28 = vld [vmem:[%s6026_s2 + $0x78] sm:$0xf0]  ;;  %v4766_v19 = vshrl.u32 %v4746_v18, 16 }
  0x97   : > { %1920 = vmatpush.bf16.msrb.mxu3 %v3428_v32  ;;  %v3720_v32 = vld [vmem:[%s6026_s2 + $0x384] sm:$0xf0]  ;;  %6118 = vst [vmem:[#allocation29_spill] sm:$0xff] %v4742_v29  ;;  %v3024_v27 = vor.u32 %v3621_v37, %v3021_v28  ;;  %1964 = vmatpush.bf16.msra.mxu0 %v3532_v44  ;;  %v547_v37 = vrot.slane %v4307_v59, 2  ;;  %v3619_v28 = vld [vmem:[%s6026_s2 + $0x64] sm:$0xf] }
  0x98   : > { %v3412_v30 = vor.u32 %v3720_v32, %v3411_v3  ;;  %v490_v3 = vrot.slane %v4746_v18, 1  ;;  %v534_v32 = vrot.slane %v4766_v19, 1 }
  0x99   : > { %2013 = vmatpush.bf16.msra.mxu1 %v3024_v27  ;;  %v3013_v27 = vld [vmem:[%s6026_s2 + $0x68] sm:$0xf0] }
  0x9a   : > { %1610 = vmatmul.bf16.gmra.mxu0 %v4532_v35  ;;  %v4775_v41 = vsel %vm474_vm0, %v488_v31, %v490_v3  ;;  %v3523_v31 = vld [vmem:[%s6026_s2 + $0x460] sm:$0xf]  ;;  %v3016_v3 = vor.u32 %v3619_v28, %v3013_v27  ;;  %v646_v27 = vrot.slane %v4328_v4, 3 }
  0x9b   : > { %1921 = vmatpush.bf16.msrb.mxu3 %v3420_v50  ;;  %v4763_v50 = vshll.u32 %v4746_v18, 16  ;;  %6119 = vst [vmem:[#allocation30_spill] sm:$0xff] %v4775_v41 }
  0x9d   : > { %1708 = vmatmul.bf16.gmra.mxu2 %v4720_v55  ;;  %v535_v22 = vrot.slane %v4763_v50, 2  ;;  %2014 = vmatpush.bf16.msra.mxu1 %v3016_v3 }
  0x9f   : > { %1922 = vmatpush.bf16.msrb.mxu3 %v3412_v30  ;;  %v536_v55 = vor.u32 %v535_v22, %v534_v32  ;;  %v4803_v32 = vperm.slane %v846_v0, 0  ;;  %v573_v22 = vrot.slane %v4315_v62, 2  ;;  %v643_v0 = vrot.slane %v4315_v62, 3 }
  0xa1   : > { %1659 = vmatmul.bf16.gmra.mxu1 %v4737_v60  ;;  %1757 = vmatmul.bf16.gmra.mxu3 %v4742_v29  ;;  %v464_v29 = vrot.slane %v4763_v50, 1  ;;  %v4782_v44 = vsel %vm500_vm2, %v530_v15, %v536_v55  ;;  %v548_v55 = vrot.slane %v4311_v61, 2  ;;  %v647_v60 = vrot.slane %v4324_v2, 4 }
  0xa2   : > { %6121 = vst [vmem:[#allocation32_spill] sm:$0xff] %v4782_v44 }
  0xa3   : > { %v4778_v30 = vsel %vm397_vm1, %v460_v13, %v464_v29  ;;  %v3748_v29 = vld [vmem:[%s6026_s2 + $0x464] sm:$0xf0]  ;;  %v574_v13 = vrot.slane %v4318_v63, 3  ;;  %v648_v45 = vor.u32 %v647_v60, %v646_v27  ;;  %v3746_v60 = vld [vmem:[%s6026_s2 + $0x454] sm:$0xf0] }
  0xa4   : > { %6120 = vst [vmem:[#allocation31_spill] sm:$0xff] %v4778_v30  ;;  %v3524_v15 = vor.u32 %v3748_v29, %v3523_v31  ;;  %v4809_v31 = vsel %vm546_vm3, %v547_v37, %v548_v55  ;;  %v577_v29 = vrot.slane %v4324_v2, 3 }
  0xa5   : > { %6122 = vst [vmem:[#allocation33_spill] sm:$0xff] %v4809_v31  ;;  %v575_v37 = vor.u32 %v574_v13, %v573_v22 }
  0xa6   : > { %1965 = vmatpush.bf16.msra.mxu0 %v3524_v15  ;;  %v644_v15 = vrot.slane %v4318_v63, 4 }
  0xa8   : > { %v645_v52 = vor.u32 %v644_v15, %v643_v0  ;;  %v550_v0 = vrot.slane %v4345_v16, 2 }
  0xaa   : > { %1615 = vmatmul.bf16.gmra.mxu0 %v4638_v20 }
  0xad   : > { %1713 = vmatmul.bf16.gmra.mxu2 %v4775_v41  ;;  %v617_v41 = vrot.slane %v4307_v59, 3 }
  0xb1   : > { %1664 = vmatmul.bf16.gmra.mxu1 %v4778_v30  ;;  %1762 = vmatmul.bf16.gmra.mxu3 %v4782_v44  ;;  %v576_v44 = vrot.slane %v4328_v4, 2  ;;  %v618_v30 = vrot.slane %v4311_v61, 3  ;;  %v4828_v4 = vsel %vm642_vm6, %v645_v52, %v648_v45  ;;  %v3005_v52 = vld [vmem:[%s6026_s2 + $0x58] sm:$0xf0] }
  0xb2   : > { %6125 = vst [vmem:[#allocation36_spill] sm:$0xff] %v4828_v4 }
  0xb3   : > { %v578_v3 = vor.u32 %v577_v29, %v576_v44  ;;  %v4821_v33 = vsel %vm616_vm4, %v617_v41, %v618_v30  ;;  %v3515_v41 = vld [vmem:[%s6026_s2 + $0x450] sm:$0xf] }
  0xb4   : > { %6123 = vst [vmem:[#allocation34_spill] sm:$0xff] %v4821_v33  ;;  %v3516_v29 = vor.u32 %v3746_v60, %v3515_v41  ;;  %v620_v41 = vrot.slane %v4345_v16, 3 }
  0xb5   : > { %v4824_v63 = vsel %vm572_vm5, %v575_v37, %v578_v3 }
  0xb6   : > { %6124 = vst [vmem:[#allocation35_spill] sm:$0xff] %v4824_v63  ;;  %1966 = vmatpush.bf16.msra.mxu0 %v3516_v29  ;;  %v651_v29 = vrot.slane %v4365_v23, 4 }
  0xb7   : > { %v1581_v28 = vpop.f32.mrf.mxu0 }
  0xb8   : > { %v1582_v46 = vadd.f32 %v1581_v28, %v4803_v32 }
  0xba   : > { %1776 = vmatmul.bf16.vlgmr.msrb.gmra.mxu0 %v4809_v31 }
  0xbd   : > { %1874 = vmatmul.bf16.vlgmr.msrb.gmra.mxu2 %v4821_v33  ;;  %v4852_v33 = vsel %vm546_vm3, %v548_v55, %v550_v0 }
  0xbe   : > { %v1630_v62 = vpop.f32.mrf.mxu1  ;;  %6126 = vst [vmem:[#allocation37_spill] sm:$0xff] %v4852_v33 }
  0xbf   : > { %v1631_v2 = vadd.f32 %v1630_v62, %v1582_v46  ;;  %v1583_v22 = vpop.f32.mrf.mxu0  ;;  %v3617_v46 = vld [vmem:[%s6026_s2 + $0x54] sm:$0xf] }
  0xc0   : > { %v1679_v44 = vpop.f32.mrf.mxu2  ;;  %v1584_v28 = vadd.f32 %v1583_v22, %v4803_v32  ;;  %v3008_v15 = vor.u32 %v3617_v46, %v3005_v52  ;;  %v650_v22 = vrot.slane %v4368_v24, 3 }
  0xc1   : > { %1825 = vmatmul.bf16.vlgmr.msrb.gmra.mxu1 %v4824_v63  ;;  %1923 = vmatmul.bf16.vlgmr.msrb.gmra.mxu3 %v4828_v4  ;;  %v1680_v13 = vadd.f32 %v1679_v44, %v1631_v2  ;;  %v580_v2 = vrot.slane %v4368_v24, 2  ;;  %v581_v44 = vrot.slane %v4365_v23, 3 }
  0xc2   : > { %2015 = vmatpush.bf16.msra.mxu1 %v3008_v15  ;;  %v652_v31 = vor.u32 %v651_v29, %v650_v22  ;;  %v2997_v22 = vld [vmem:[%s6026_s2 + $0x48] sm:$0xf0] }
  0xc4   : > { %v1728_v27 = vpop.f32.mrf.mxu3  ;;  %v4868_v24 = vsel %vm642_vm6, %v648_v45, %v652_v31  ;;  %v3615_v45 = vld [vmem:[%s6026_s2 + $0x44] sm:$0xf] }
  0xc5   : > { %v4846_v62 = vadd.f32 %v1728_v27, %v1680_v13  ;;  %v582_v13 = vor.u32 %v581_v44, %v580_v2  ;;  %v4859_v27 = vsel %vm616_vm4, %v618_v30, %v620_v41  ;;  %6129 = vst [vmem:[#allocation40_spill] sm:$0xff] %v4868_v24  ;;  %v3507_v30 = vld [vmem:[%s6026_s2 + $0x440] sm:$0xf]  ;;  %v3744_v44 = vld [vmem:[%s6026_s2 + $0x444] sm:$0xf0] }
  0xc6   : > { %v1632_v37 = vpop.f32.mrf.mxu1  ;;  %6127 = vst [vmem:[#allocation38_spill] sm:$0xff] %v4859_v27 }
  0xc7   : > { %v1633_v60 = vadd.f32 %v1632_v37, %v1584_v28  ;;  %v1586_v4 = vpop.f32.mrf.mxu0  ;;  %v4864_v55 = vsel %vm572_vm5, %v578_v3, %v582_v13 }
  0xc8   : > { %v1681_v46 = vpop.f32.mrf.mxu2  ;;  %v1587_v15 = vadd.f32 %v1586_v4, %v4803_v32  ;;  %6128 = vst [vmem:[#allocation39_spill] sm:$0xff] %v4864_v55 }
  0xc9   : > { %v1682_v52 = vadd.f32 %v1681_v46, %v1633_v60  ;;  %v3508_v60 = vor.u32 %v3744_v44, %v3507_v30  ;;  %v552_v46 = vrot.slane %v4397_v42, 2  ;;  %v622_v30 = vrot.slane %v4397_v42, 3 }
  0xca   : > { %1781 = vmatmul.bf16.gmra.mxu0 %v4852_v33 }
  0xcb   : > { %1967 = vmatpush.bf16.msra.mxu0 %v3508_v60  ;;  %v655_v60 = vrot.slane %v4414_v48, 4 }
  0xcc   : > { %v1730_v28 = vpop.f32.mrf.mxu3 }
  0xcd   : > { %v4861_v63 = vadd.f32 %v1730_v28, %v1682_v52  ;;  %1879 = vmatmul.bf16.gmra.mxu2 %v4859_v27  ;;  %v3000_v52 = vor.u32 %v3615_v45, %v2997_v22  ;;  %v4892_v27 = vsel %vm546_vm3, %v550_v0, %v552_v46 }
  0xce   : > { %v1635_v37 = vpop.f32.mrf.mxu1  ;;  %6130 = vst [vmem:[#allocation41_spill] sm:$0xff] %v4892_v27 }
  0xcf   : > { %v1636_v23 = vadd.f32 %v1635_v37, %v1587_v15  ;;  %v1588_v2 = vpop.f32.mrf.mxu0  ;;  %2016 = vmatpush.bf16.msra.mxu1 %v3000_v52 }
  0xd0   : > { %v1684_v4 = vpop.f32.mrf.mxu2  ;;  %v1589_v29 = vadd.f32 %v1588_v2, %v4803_v32  ;;  %v654_v2 = vrot.slane %v4417_v49, 3 }
  0xd1   : > { %1830 = vmatmul.bf16.gmra.mxu1 %v4864_v55  ;;  %1928 = vmatmul.bf16.gmra.mxu3 %v4868_v24  ;;  %v1685_v3 = vadd.f32 %v1684_v4, %v1636_v23  ;;  %v584_v23 = vrot.slane %v4417_v49, 2  ;;  %v585_v4 = vrot.slane %v4414_v48, 3 }
  0xd2   : > { %v656_v33 = vor.u32 %v655_v60, %v654_v2  ;;  %v2989_v2 = vld [vmem:[%s6026_s2 + $0x38] sm:$0xf0] }
  0xd4   : > { %v1733_v15 = vpop.f32.mrf.mxu3  ;;  %v4908_v49 = vsel %vm642_vm6, %v652_v31, %v656_v33  ;;  %v3613_v31 = vld [vmem:[%s6026_s2 + $0x34] sm:$0xf] }
  0xd5   : > { %v4886_v37 = vadd.f32 %v1733_v15, %v1685_v3  ;;  %v586_v3 = vor.u32 %v585_v4, %v584_v23  ;;  %v4899_v15 = vsel %vm616_vm4, %v620_v41, %v622_v30  ;;  %6133 = vst [vmem:[#allocation44_spill] sm:$0xff] %v4908_v49  ;;  %v3499_v41 = vld [vmem:[%s6026_s2 + $0x430] sm:$0xf]  ;;  %v3742_v4 = vld [vmem:[%s6026_s2 + $0x434] sm:$0xf0] }
  0xd6   : > { %v1637_v28 = vpop.f32.mrf.mxu1  ;;  %6131 = vst [vmem:[#allocation42_spill] sm:$0xff] %v4899_v15 }
  0xd7   : > { %v1638_v44 = vadd.f32 %v1637_v28, %v1589_v29  ;;  %v1591_v24 = vpop.f32.mrf.mxu0  ;;  %v4904_v0 = vsel %vm572_vm5, %v582_v13, %v586_v3 }
  0xd8   : > { %v1686_v45 = vpop.f32.mrf.mxu2  ;;  %v1592_v52 = vadd.f32 %v1591_v24, %v4803_v32  ;;  %6132 = vst [vmem:[#allocation43_spill] sm:$0xff] %v4904_v0 }
  0xd9   : > { %v1687_v22 = vadd.f32 %v1686_v45, %v1638_v44  ;;  %v3500_v44 = vor.u32 %v3742_v4, %v3499_v41  ;;  %v554_v45 = vrot.slane %v4443_v14, 2  ;;  %v624_v41 = vrot.slane %v4443_v14, 3 }
  0xda   : > { %1786 = vmatmul.bf16.gmra.mxu0 %v4892_v27 }
  0xdb   : > { %1968 = vmatpush.bf16.msra.mxu0 %v3500_v44  ;;  %v659_v44 = vrot.slane %v4460_v25, 4 }
  0xdc   : > { %v1735_v29 = vpop.f32.mrf.mxu3 }
  0xdd   : > { %v4901_v55 = vadd.f32 %v1735_v29, %v1687_v22  ;;  %1884 = vmatmul.bf16.gmra.mxu2 %v4899_v15  ;;  %v2992_v22 = vor.u32 %v3613_v31, %v2989_v2  ;;  %v4932_v15 = vsel %vm546_vm3, %v552_v46, %v554_v45 }
  0xde   : > { %v1640_v28 = vpop.f32.mrf.mxu1 }
  0xdf   : > { %v1641_v48 = vadd.f32 %v1640_v28, %v1592_v52  ;;  %v1593_v23 = vpop.f32.mrf.mxu0  ;;  %2017 = vmatpush.bf16.msra.mxu1 %v2992_v22 }
  0xe0   : > { %v1689_v24 = vpop.f32.mrf.mxu2  ;;  %v1594_v60 = vadd.f32 %v1593_v23, %v4803_v32  ;;  %v658_v23 = vrot.slane %v4463_v26, 3 }
  0xe1   : > { %1835 = vmatmul.bf16.gmra.mxu1 %v4904_v0  ;;  %1933 = vmatmul.bf16.gmra.mxu3 %v4908_v49  ;;  %v1690_v13 = vadd.f32 %v1689_v24, %v1641_v48  ;;  %v588_v48 = vrot.slane %v4463_v26, 2  ;;  %v589_v24 = vrot.slane %v4460_v25, 3 }
  0xe2   : > { %v660_v27 = vor.u32 %v659_v44, %v658_v23  ;;  %v2981_v23 = vld [vmem:[%s6026_s2 + $0x28] sm:$0xf0] }
  0xe4   : > { %v1738_v52 = vpop.f32.mrf.mxu3  ;;  %v4948_v26 = vsel %vm642_vm6, %v656_v33, %v660_v27  ;;  %v3611_v33 = vld [vmem:[%s6026_s2 + $0x24] sm:$0xf] }
  0xe5   : > { %v4926_v28 = vadd.f32 %v1738_v52, %v1690_v13  ;;  %v590_v13 = vor.u32 %v589_v24, %v588_v48  ;;  %v4939_v52 = vsel %vm616_vm4, %v622_v30, %v624_v41  ;;  %6135 = vst [vmem:[#allocation46_spill] sm:$0xff] %v4948_v26  ;;  %v3491_v30 = vld [vmem:[%s6026_s2 + $0x420] sm:$0xf]  ;;  %v3740_v24 = vld [vmem:[%s6026_s2 + $0x424] sm:$0xf0] }
  0xe6   : > { %v1642_v29 = vpop.f32.mrf.mxu1  ;;  %6134 = vst [vmem:[#allocation45_spill] sm:$0xff] %v4939_v52 }
  0xe7   : > { %v1643_v4 = vadd.f32 %v1642_v29, %v1594_v60  ;;  %v1596_v49 = vpop.f32.mrf.mxu0  ;;  %v4944_v46 = vsel %vm572_vm5, %v586_v3, %v590_v13 }
  0xe8   : > { %v1691_v31 = vpop.f32.mrf.mxu2  ;;  %v1597_v22 = vadd.f32 %v1596_v49, %v4803_v32 }
  0xe9   : > { %v1692_v2 = vadd.f32 %v1691_v31, %v1643_v4  ;;  %v3492_v4 = vor.u32 %v3740_v24, %v3491_v30  ;;  %v6072_v31 = vrot.slane %v4489_v51, 2  ;;  %v6073_v30 = vrot.slane %v4489_v51, 3 }
  0xea   : > { %1791 = vmatmul.bf16.gmra.mxu0 %v4932_v15 }
  0xeb   : > { %1969 = vmatpush.bf16.msra.mxu0 %v3492_v4  ;;  %v662_v4 = vrot.slane %v4511_v8, 3 }
  0xec   : > { %v1740_v60 = vpop.f32.mrf.mxu3 }
  0xed   : > { %v4941_v0 = vadd.f32 %v1740_v60, %v1692_v2  ;;  %1889 = vmatmul.bf16.gmra.mxu2 %v4939_v52  ;;  %v2984_v2 = vor.u32 %v3611_v33, %v2981_v23  ;;  %v663_v33 = vrot.slane %v4508_v6, 4  ;;  %v667_v52 = vrot.slane %v4549_v57, 4 }
  0xee   : > { %v1645_v29 = vpop.f32.mrf.mxu1 }
  0xef   : > { %v1646_v25 = vadd.f32 %v1645_v29, %v1597_v22  ;;  %v1598_v48 = vpop.f32.mrf.mxu0  ;;  %2018 = vmatpush.bf16.msra.mxu1 %v2984_v2 }
  0xf0   : > { %v1694_v49 = vpop.f32.mrf.mxu2  ;;  %v1599_v44 = vadd.f32 %v1598_v48, %v4803_v32  ;;  %v4974_v48 = vsel %vm546_vm3, %v554_v45, %v6072_v31 }
  0xf1   : > { %1840 = vmatmul.bf16.gmra.mxu1 %v4944_v46  ;;  %1938 = vmatmul.bf16.gmra.mxu3 %v4948_v26  ;;  %v1695_v3 = vadd.f32 %v1694_v49, %v1646_v25  ;;  %v592_v25 = vrot.slane %v4511_v8, 2  ;;  %v593_v49 = vrot.slane %v4508_v6, 3  ;;  %6136 = vst [vmem:[#allocation47_spill] sm:$0xff] %v4974_v48 }
  0xf3   : > { %v4979_v2 = vor.u32 %v593_v49, %v592_v25 }
  0xf4   : > { %v1743_v22 = vpop.f32.mrf.mxu3 }
  0xf5   : > { %v4966_v29 = vadd.f32 %v1743_v22, %v1695_v3  ;;  %v4993_v6 = vsel %vm572_vm5, %v590_v13, %v4979_v2 }
  0xf6   : > { %v1647_v60 = vpop.f32.mrf.mxu1  ;;  %6138 = vst [vmem:[#allocation49_spill] sm:$0xff] %v4993_v6 }
  0xf7   : > { %v1648_v24 = vadd.f32 %v1647_v60, %v1599_v44  ;;  %v1601_v26 = vpop.f32.mrf.mxu0  ;;  %v4985_v44 = vsel %vm616_vm4, %v624_v41, %v6073_v30  ;;  %v4987_v60 = vor.u32 %v663_v33, %v662_v4  ;;  %v3637_v41 = vld [vmem:[%s6026_s2 + $0xf4] sm:$0xf]  ;;  %v6080_v30 = vrot.slane %v4532_v35, 2 }
  0xf8   : > { %v1696_v23 = vpop.f32.mrf.mxu2  ;;  %v1602_v22 = vadd.f32 %v1601_v26, %v4803_v32  ;;  %6137 = vst [vmem:[#allocation48_spill] sm:$0xff] %v4985_v44  ;;  %v3653_v33 = vld [vmem:[%s6026_s2 + $0x174] sm:$0xf] }
  0xf9   : > { %v1697_v3 = vadd.f32 %v1696_v23, %v1648_v24  ;;  %v4998_v26 = vsel %vm642_vm6, %v660_v27, %v4987_v60  ;;  %v3085_v24 = vld [vmem:[%s6026_s2 + $0xf8] sm:$0xf0]  ;;  %v3738_v27 = vld [vmem:[%s6026_s2 + $0x414] sm:$0xf0] }
  0xfa   : > { %1796 = vmatmul.bf16.gmra.mxu0 %v4974_v48  ;;  %6139 = vst [vmem:[#allocation50_spill] sm:$0xff] %v4998_v26  ;;  %v3088_v4 = vor.u32 %v3637_v41, %v3085_v24  ;;  %v3149_v41 = vld [vmem:[%s6026_s2 + $0x178] sm:$0xf0]  ;;  %v596_v48 = vrot.slane %v4552_v58, 2 }
  0xfc   : > { %v1745_v45 = vpop.f32.mrf.mxu3  ;;  %2062 = vmatpush.bf16.msra.mxu2 %v3088_v4  ;;  %v3141_v4 = vld [vmem:[%s6026_s2 + $0x168] sm:$0xf0] }
  0xfd   : > { %v4989_v8 = vadd.f32 %v1745_v45, %v1697_v3  ;;  %1894 = vmatmul.bf16.gmra.mxu2 %v4985_v44  ;;  %v2973_v45 = vld [vmem:[%s6026_s2 + $0x18] sm:$0xf0] }
  0xfe   : > { %v1650_v31 = vpop.f32.mrf.mxu1 }
  0xff   : > { %v1651_v25 = vadd.f32 %v1650_v31, %v1602_v22  ;;  %v1603_v49 = vpop.f32.mrf.mxu0  ;;  %v3483_v31 = vld [vmem:[%s6026_s2 + $0x410] sm:$0xf]  ;;  %v3609_v22 = vld [vmem:[%s6026_s2 + $0x14] sm:$0xf] }
 0x100   : > { %v1699_v13 = vpop.f32.mrf.mxu2  ;;  %v3484_v3 = vor.u32 %v3738_v27, %v3483_v31  ;;  %v1604_v24 = vadd.f32 %v1603_v49, %v4803_v32  ;;  %v3077_v31 = vld [vmem:[%s6026_s2 + $0xe8] sm:$0xf0]  ;;  %v3651_v49 = vld [vmem:[%s6026_s2 + $0x164] sm:$0xf] }
 0x101   : > { %1845 = vmatmul.bf16.gmra.mxu1 %v4993_v6  ;;  %1943 = vmatmul.bf16.gmra.mxu3 %v4998_v26  ;;  %v1700_v23 = vadd.f32 %v1699_v13, %v1651_v25  ;;  %v2976_v26 = vor.u32 %v3609_v22, %v2973_v45  ;;  %v3152_v25 = vor.u32 %v3653_v33, %v3149_v41  ;;  %v3635_v13 = vld [vmem:[%s6026_s2 + $0xe4] sm:$0xf]  ;;  %v597_v45 = vrot.slane %v4549_v57, 3  ;;  %v3133_v57 = vld [vmem:[%s6026_s2 + $0x158] sm:$0xf0] }
 0x102   : > { %1970 = vmatpush.bf16.msra.mxu0 %v3484_v3  ;;  %v3080_v27 = vor.u32 %v3635_v13, %v3077_v31  ;;  %v6079_v3 = vrot.slane %v4532_v35, 3  ;;  %v3144_v41 = vor.u32 %v3651_v49, %v3141_v4  ;;  %v666_v6 = vrot.slane %v4552_v58, 3  ;;  %v3649_v4 = vld [vmem:[%s6026_s2 + $0x154] sm:$0xf] }
 0x103   : > { %2019 = vmatpush.bf16.msra.mxu1 %v2976_v26  ;;  %2111 = vmatpush.bf16.msra.mxu3 %v3152_v25  ;;  %v6140_v26 = vrot.slane %v4489_v51, 2 }
 0x104   : > { %v1748_v44 = vpop.f32.mrf.mxu3  ;;  %2063 = vmatpush.bf16.msra.mxu2 %v3080_v27  ;;  %v5067_v27 = vor.u32 %v597_v45, %v596_v48  ;;  %v3061_v48 = vld [vmem:[%s6026_s2 + $0xc8] sm:$0xf0] }
 0x105   : > { %v5041_v22 = vadd.f32 %v1748_v44, %v1700_v23  ;;  %v5050_v25 = vsel %vm546_vm3, %v6140_v26, %v6080_v30  ;;  %v3633_v44 = vld [vmem:[%s6026_s2 + $0xd4] sm:$0xf]  ;;  %v3069_v23 = vld [vmem:[%s6026_s2 + $0xd8] sm:$0xf0] }
 0x106   : > { %v1652_v33 = vpop.f32.mrf.mxu1  ;;  %6141 = vst [vmem:[#allocation51_spill] sm:$0xff] %v5050_v25 }
 0x107   : > { %v1653_v13 = vadd.f32 %v1652_v33, %v1604_v24  ;;  %v1606_v31 = vpop.f32.mrf.mxu0  ;;  %v3072_v24 = vor.u32 %v3633_v44, %v3069_v23  ;;  %2112 = vmatpush.bf16.msra.mxu3 %v3144_v41  ;;  %v3136_v33 = vor.u32 %v3649_v4, %v3133_v57  ;;  %v6142_v41 = vrot.slane %v4489_v51, 3 }
 0x108   : > { %v1701_v49 = vpop.f32.mrf.mxu2  ;;  %v1607_v26 = vadd.f32 %v1606_v31, %v4803_v32  ;;  %v5077_v23 = vor.u32 %v667_v52, %v666_v6  ;;  %v3125_v52 = vld [vmem:[%s6026_s2 + $0x148] sm:$0xf0]  ;;  %v5096_v4 = vsel %vm572_vm5, %v4979_v2, %v5067_v27  ;;  %v3053_v2 = vld [vmem:[%s6026_s2 + $0xb8] sm:$0xf0] }
 0x109   : > { %v1702_v58 = vadd.f32 %v1701_v49, %v1653_v13  ;;  %v5075_v44 = vsel %vm616_vm4, %v6142_v41, %v6079_v3  ;;  %2064 = vmatpush.bf16.msra.mxu2 %v3072_v24  ;;  %v3631_v13 = vld [vmem:[%s6026_s2 + $0xc4] sm:$0xf]  ;;  %6144 = vst [vmem:[#allocation53_spill] sm:$0xff] %v5096_v4 }
 0x10a   : > { %1801 = vmatmul.bf16.gmra.mxu0 %v5050_v25  ;;  %6143 = vst [vmem:[#allocation52_spill] sm:$0xff] %v5075_v44  ;;  %v3064_v45 = vor.u32 %v3631_v13, %v3061_v48  ;;  %v3647_v49 = vld [vmem:[%s6026_s2 + $0x144] sm:$0xf]  ;;  %v5102_v41 = vsel %vm642_vm6, %v4987_v60, %v5077_v23  ;;  %v3475_v60 = vld [vmem:[%s6026_s2 + $0x400] sm:$0xf] }
 0x10b   : > { %2113 = vmatpush.bf16.msra.mxu3 %v3136_v33  ;;  %v3128_v57 = vor.u32 %v3647_v49, %v3125_v52  ;;  %6145 = vst [vmem:[#allocation54_spill] sm:$0xff] %v5102_v41 }
 0x10c   : > { %v1750_v31 = vpop.f32.mrf.mxu3 }
 0x10d   : > { %v5091_v24 = vadd.f32 %v1750_v31, %v1702_v58  ;;  %1899 = vmatmul.bf16.gmra.mxu2 %v5075_v44  ;;  %v3629_v58 = vld [vmem:[%s6026_s2 + $0xb4] sm:$0xf]  ;;  %v601_v44 = vrot.slane %v4662_v34, 3 }
 0x10e   : > { %v1655_v6 = vpop.f32.mrf.mxu1  ;;  %2065 = vmatpush.bf16.msra.mxu2 %v3064_v45  ;;  %v3056_v48 = vor.u32 %v3629_v58, %v3053_v2  ;;  %v3736_v45 = vld [vmem:[%s6026_s2 + $0x404] sm:$0xf0]  ;;  %v3645_v58 = vld [vmem:[%s6026_s2 + $0x134] sm:$0xf] }
 0x10f   : > { %v1656_v33 = vadd.f32 %v1655_v6, %v1607_v26  ;;  %v1608_v13 = vpop.f32.mrf.mxu0  ;;  %2114 = vmatpush.bf16.msra.mxu3 %v3128_v57  ;;  %v3476_v52 = vor.u32 %v3736_v45, %v3475_v60  ;;  %v3607_v6 = vld [vmem:[%s6026_s2 + $0x4] sm:$0xf]  ;;  %v2965_v57 = vld [vmem:[%s6026_s2 + $0x8] sm:$0xf0] }
 0x110   : > { %v1704_v31 = vpop.f32.mrf.mxu2  ;;  %v1609_v2 = vadd.f32 %v1608_v13, %v4803_v32  ;;  %v2968_v3 = vor.u32 %v3607_v6, %v2965_v57  ;;  %v3045_v60 = vld [vmem:[%s6026_s2 + $0xa8] sm:$0xf0]  ;;  %v600_v13 = vrot.slane %v4665_v21, 2 }
 0x111   : > { %1850 = vmatmul.bf16.gmra.mxu1 %v5096_v4  ;;  %1948 = vmatmul.bf16.gmra.mxu3 %v5102_v41  ;;  %v1705_v49 = vadd.f32 %v1704_v31, %v1656_v33  ;;  %v3117_v33 = vld [vmem:[%s6026_s2 + $0x138] sm:$0xf0]  ;;  %v3627_v31 = vld [vmem:[%s6026_s2 + $0xa4] sm:$0xf]  ;;  %v3109_v6 = vld [vmem:[%s6026_s2 + $0x128] sm:$0xf0] }
 0x112   : > { %2066 = vmatpush.bf16.msra.mxu2 %v3056_v48  ;;  %1971 = vmatpush.bf16.msra.mxu0 %v3476_v52  ;;  %v3120_v45 = vor.u32 %v3645_v58, %v3117_v33  ;;  %v3048_v30 = vor.u32 %v3627_v31, %v3045_v60  ;;  %v3643_v48 = vld [vmem:[%s6026_s2 + $0x124] sm:$0xf]  ;;  %v6085_v52 = vrot.slane %v4638_v20, 3  ;;  %v6147_v60 = vrot.slane %v4532_v35, 2 }
 0x113   : > { %2020 = vmatpush.bf16.msra.mxu1 %v2968_v3  ;;  %v3112_v58 = vor.u32 %v3643_v48, %v3109_v6  ;;  %v6146_v3 = vrot.slane %v4638_v20, 2  ;;  %v670_v4 = vrot.slane %v4665_v21, 3  ;;  %v3641_v6 = vld [vmem:[%s6026_s2 + $0x114] sm:$0xf]  ;;  %v3101_v21 = vld [vmem:[%s6026_s2 + $0x118] sm:$0xf0] }
 0x114   : > { %v1753_v26 = vpop.f32.mrf.mxu3  ;;  %2115 = vmatpush.bf16.msra.mxu3 %v3120_v45 }
 0x115   : > { %v5145_v41 = vadd.f32 %v1753_v26, %v1705_v49  ;;  %v5154_v25 = vsel %vm546_vm3, %v6147_v60, %v6146_v3  ;;  %v671_v26 = vrot.slane %v4662_v34, 4  ;;  %v3625_v49 = vld [vmem:[%s6026_s2 + $0x94] sm:$0xf]  ;;  %v6149_v60 = vrot.slane %v4532_v35, 3 }
 0x116   : > { %v1657_v57 = vpop.f32.mrf.mxu1  ;;  %6148 = vst [vmem:[#allocation55_spill] sm:$0xff] %v5154_v25  ;;  %2067 = vmatpush.bf16.msra.mxu2 %v3048_v30  ;;  %v602_v30 = vor.u32 %v601_v44, %v600_v13  ;;  %v3029_v44 = vld [vmem:[%s6026_s2 + $0x88] sm:$0xf0] }
 0x117   : > { %v1658_v33 = vadd.f32 %v1657_v57, %v1609_v2  ;;  %v1611_v31 = vpop.f32.mrf.mxu0  ;;  %v3037_v2 = vld [vmem:[%s6026_s2 + $0x98] sm:$0xf0]  ;;  %v3104_v57 = vor.u32 %v3641_v6, %v3101_v21 }
 0x118   : > { %v3040_v45 = vor.u32 %v3625_v49, %v3037_v2  ;;  %v1706_v48 = vpop.f32.mrf.mxu2  ;;  %2116 = vmatpush.bf16.msra.mxu3 %v3112_v58  ;;  %v1612_v3 = vadd.f32 %v1611_v31, %v4803_v32  ;;  %v5177_v49 = vsel %vm616_vm4, %v6149_v60, %v6085_v52  ;;  %v672_v2 = vor.u32 %v671_v26, %v670_v4  ;;  %v3639_v31 = vld [vmem:[%s6026_s2 + $0x104] sm:$0xf] }
 0x119   : > { %v1707_v34 = vadd.f32 %v1706_v48, %v1658_v33  ;;  %6150 = vst [vmem:[#allocation56_spill] sm:$0xff] %v5177_v49  ;;  %v3623_v33 = vld [vmem:[%s6026_s2 + $0x84] sm:$0xf]  ;;  %v3093_v48 = vld [vmem:[%s6026_s2 + $0x108] sm:$0xf0] }
 0x11a   : > { %1806 = vmatmul.bf16.gmra.mxu0 %v5154_v25  ;;  %2068 = vmatpush.bf16.msra.mxu2 %v3040_v45  ;;  %v3032_v13 = vor.u32 %v3623_v33, %v3029_v44  ;;  %v5195_v45 = vsel %vm572_vm5, %v5067_v27, %v602_v30  ;;  %v5200_v21 = vsel %vm642_vm6, %v5077_v23, %v672_v2  ;;  %v3213_v27 = vld [vmem:[%s6026_s2 + $0x1f8] sm:$0xf0]  ;;  %v3685_v23 = vld [vmem:[%s6026_s2 + $0x274] sm:$0xf] }
 0x11b   : > { %6151 = vst [vmem:[#allocation57_spill] sm:$0xff] %v5200_v21  ;;  %v3096_v33 = vor.u32 %v3639_v31, %v3093_v48  ;;  %v562_v31 = vrot.slane %v4746_v18, 2 }
 0x11c   : > { %v1755_v58 = vpop.f32.mrf.mxu3  ;;  %2117 = vmatpush.bf16.msra.mxu3 %v3104_v57 }
 0x11d   : > { %v5191_v26 = vadd.f32 %v1755_v58, %v1707_v34  ;;  %1904 = vmatmul.bf16.gmra.mxu2 %v5177_v49  ;;  %v3669_v34 = vld [vmem:[%s6026_s2 + $0x1f4] sm:$0xf] }
 0x11e   : > { %v1660_v4 = vpop.f32.mrf.mxu1  ;;  %2069 = vmatpush.bf16.msra.mxu2 %v3032_v13  ;;  %v3277_v13 = vld [vmem:[%s6026_s2 + $0x278] sm:$0xf0] }
 0x11f   : > { %v1661_v6 = vadd.f32 %v1660_v4, %v1612_v3  ;;  %v1613_v60 = vpop.f32.mrf.mxu0  ;;  %v3216_v3 = vor.u32 %v3669_v34, %v3213_v27  ;;  %v3280_v48 = vor.u32 %v3685_v23, %v3277_v13  ;;  %v605_v34 = vrot.slane %v4763_v50, 3 }
 0x120   : > { %v1709_v44 = vpop.f32.mrf.mxu2  ;;  %v1614_v58 = vadd.f32 %v1613_v60, %v4803_v32  ;;  %2118 = vmatpush.bf16.msra.mxu3 %v3096_v33  ;;  %v632_v27 = vrot.slane %v4746_v18, 3  ;;  %v6152_v60 = vrot.slane %v4638_v20, 2  ;;  %v674_v33 = vrot.slane %v4766_v19, 3 }
 0x121   : > { %1855 = vmatmul.bf16.gmra.mxu1 %v5195_v45  ;;  %1953 = vmatmul.bf16.gmra.mxu3 %v5200_v21  ;;  %v1710_v57 = vadd.f32 %v1709_v44, %v1661_v6  ;;  %v604_v44 = vrot.slane %v4766_v19, 2  ;;  %v6153_v18 = vrot.slane %v4638_v20, 3 }
 0x122   : > { %2160 = vmatpush.bf16.msrb.mxu0 %v3216_v3  ;;  %2209 = vmatpush.bf16.msrb.mxu1 %v3280_v48  ;;  %v5226_v25 = vsel %vm546_vm3, %v6152_v60, %v562_v31  ;;  %v675_v3 = vrot.slane %v4763_v50, 4 }
 0x123   : > { %v606_v13 = vor.u32 %v605_v34, %v604_v44  ;;  %v3667_v34 = vld [vmem:[%s6026_s2 + $0x1e4] sm:$0xf] }
 0x124   : > { %v1758_v4 = vpop.f32.mrf.mxu3 }
 0x125   : > { %v5218_v6 = vadd.f32 %v1758_v4, %v1710_v57  ;;  %v5240_v19 = vsel %vm572_vm5, %v602_v30, %v606_v13 }
 0x126   : > { %v1662_v52 = vpop.f32.mrf.mxu1 }
 0x127   : > { %v1663_v21 = vadd.f32 %v1662_v52, %v1614_v58  ;;  %v1616_v49 = vpop.f32.mrf.mxu0  ;;  %v5235_v52 = vsel %vm616_vm4, %v6153_v18, %v632_v27  ;;  %v676_v58 = vor.u32 %v675_v3, %v674_v33  ;;  %v3205_v27 = vld [vmem:[%s6026_s2 + $0x1e8] sm:$0xf0] }
 0x128   : > { %v1711_v23 = vpop.f32.mrf.mxu2  ;;  %v1617_v48 = vadd.f32 %v1616_v49, %v4803_v32  ;;  %v3208_v33 = vor.u32 %v3667_v34, %v3205_v27  ;;  %v3269_v3 = vld [vmem:[%s6026_s2 + $0x268] sm:$0xf0] }
 0x129   : > { %v1712_v57 = vadd.f32 %v1711_v23, %v1663_v21  ;;  %v5244_v21 = vsel %vm642_vm6, %v672_v2, %v676_v58  ;;  %v3683_v2 = vld [vmem:[%s6026_s2 + $0x264] sm:$0xf]  ;;  %v5265_v58 = vpack.c.b16 %v4302_v54, %v4300_v53  ;;  %v3665_v54 = vld [vmem:[%s6026_s2 + $0x1d4] sm:$0xf] }
 0x12a   : > { %1811 = vmatmul.bf16.gmra.mxu0 %v5226_v25 }
 0x12b   : > { %2161 = vmatpush.bf16.msrb.mxu0 %v3208_v33 }
 0x12c   : > { %v1760_v4 = vpop.f32.mrf.mxu3 }
 0x12d   : > { %v5237_v60 = vadd.f32 %v1760_v4, %v1712_v57  ;;  %1909 = vmatmul.bf16.gmra.mxu2 %v5235_v52  ;;  %v3272_v57 = vor.u32 %v3683_v2, %v3269_v3 }
 0x12e   : > { %v1665_v31 = vpop.f32.mrf.mxu1 }
 0x12f   : > { %v1666_v50 = vadd.f32 %v1665_v31, %v1617_v48  ;;  %v1618_v49 = vpop.f32.mrf.mxu0  ;;  %2210 = vmatpush.bf16.msrb.mxu1 %v3272_v57 }
 0x130   : > { %v1714_v44 = vpop.f32.mrf.mxu2  ;;  %v1619_v23 = vadd.f32 %v1618_v49, %v4803_v32 }
 0x131   : > { %1860 = vmatmul.bf16.gmra.mxu1 %v5240_v19  ;;  %1958 = vmatmul.bf16.gmra.mxu3 %v5244_v21  ;;  %v1715_v30 = vadd.f32 %v1714_v44, %v1666_v50 }
 0x134   : > { %v1763_v13 = vpop.f32.mrf.mxu3 }
 0x135   : > { %v5261_v18 = vadd.f32 %v1763_v13, %v1715_v30 }
 0x136   : > { %v1667_v48 = vpop.f32.mrf.mxu1 }
 0x137   : > { %v1668_v4 = vadd.f32 %v1667_v48, %v1619_v23  ;;  %v1777_v31 = vpop.f32.mrf.mxu0 }
 0x138   : > { %v1778_v50 = vadd.f32 %v1777_v31, %v4846_v62  ;;  %v1716_v44 = vpop.f32.mrf.mxu2  ;;  %v3197_v62 = vld [vmem:[%s6026_s2 + $0x1d8] sm:$0xf0] }
 0x139   : > { %v1717_v34 = vadd.f32 %v1716_v44, %v1668_v4  ;;  %v3200_v23 = vor.u32 %v3665_v54, %v3197_v62 }
 0x13a   : > { %1972 = vmatmul.bf16.vlgmr.msra.gmra.mxu0 %v5265_v58 }
 0x13b   : > { %2162 = vmatpush.bf16.msrb.mxu0 %v3200_v23 }
 0x13c   : > { %v1765_v32 = vpop.f32.mrf.mxu3 }
 0x13d   : > { %v5269_v49 = vadd.f32 %v1765_v32, %v1717_v34  ;;  %2070 = vmatmul.bf16.vlgmr.msra.gmra.mxu2 %v4348_v17  ;;  %v3681_v17 = vld [vmem:[%s6026_s2 + $0x254] sm:$0xf] }
 0x13e   : > { %v1826_v27 = vpop.f32.mrf.mxu1 }
 0x13f   : > { %v1827_v30 = vadd.f32 %v1826_v27, %v1778_v50  ;;  %v1779_v33 = vpop.f32.mrf.mxu0 }
 0x140   : > { %v1780_v2 = vadd.f32 %v1779_v33, %v4861_v63  ;;  %v1875_v53 = vpop.f32.mrf.mxu2 }
 0x141   : > { %2021 = vmatmul.bf16.vlgmr.msra.gmra.mxu1 %v4307_v59  ;;  %2119 = vmatmul.bf16.vlgmr.msra.gmra.mxu3 %v4337_v10  ;;  %v1876_v3 = vadd.f32 %v1875_v53, %v1827_v30  ;;  %v3261_v59 = vld [vmem:[%s6026_s2 + $0x258] sm:$0xf0]  ;;  %v5291_v10 = vpack.c.b16 %v4321_v1, %v4304_v56  ;;  %v3663_v1 = vld [vmem:[%s6026_s2 + $0x1c4] sm:$0xf] }
 0x142   : > { %v3264_v63 = vor.u32 %v3681_v17, %v3261_v59 }
 0x144   : > { %v1924_v57 = vpop.f32.mrf.mxu3  ;;  %2211 = vmatpush.bf16.msrb.mxu1 %v3264_v63 }
 0x145   : > { %v5287_v48 = vadd.f32 %v1924_v57, %v1876_v3 }
 0x146   : > { %v1828_v13 = vpop.f32.mrf.mxu1 }
 0x147   : > { %v1829_v4 = vadd.f32 %v1828_v13, %v1780_v2  ;;  %v1782_v31 = vpop.f32.mrf.mxu0 }
 0x148   : > { %v1783_v50 = vadd.f32 %v1782_v31, %v4886_v37  ;;  %v1877_v44 = vpop.f32.mrf.mxu2  ;;  %v3189_v37 = vld [vmem:[%s6026_s2 + $0x1c8] sm:$0xf0] }
 0x149   : > { %v1878_v34 = vadd.f32 %v1877_v44, %v1829_v4  ;;  %v3192_v62 = vor.u32 %v3663_v1, %v3189_v37 }
 0x14a   : > { %1977 = vmatmul.bf16.gmra.mxu0 %v5291_v10 }
 0x14b   : > { %2163 = vmatpush.bf16.msrb.mxu0 %v3192_v62 }
 0x14c   : > { %v1926_v32 = vpop.f32.mrf.mxu3 }
 0x14d   : > { %v5295_v30 = vadd.f32 %v1926_v32, %v1878_v34  ;;  %2075 = vmatmul.bf16.gmra.mxu2 %v4389_v40  ;;  %v3679_v40 = vld [vmem:[%s6026_s2 + $0x244] sm:$0xf] }
 0x14e   : > { %v1831_v27 = vpop.f32.mrf.mxu1 }
 0x14f   : > { %v1832_v33 = vadd.f32 %v1831_v27, %v1783_v50  ;;  %v1784_v53 = vpop.f32.mrf.mxu0 }
 0x150   : > { %v1785_v54 = vadd.f32 %v1784_v53, %v4901_v55  ;;  %v1880_v56 = vpop.f32.mrf.mxu2 }
 0x151   : > { %2026 = vmatmul.bf16.gmra.mxu1 %v4311_v61  ;;  %2124 = vmatmul.bf16.gmra.mxu3 %v4382_v36  ;;  %v1881_v2 = vadd.f32 %v1880_v56, %v1832_v33  ;;  %v3253_v61 = vld [vmem:[%s6026_s2 + $0x248] sm:$0xf0]  ;;  %v5317_v36 = vpack.c.b16 %v4384_v38, %v4330_v5  ;;  %v3661_v38 = vld [vmem:[%s6026_s2 + $0x1b4] sm:$0xf] }
 0x152   : > { %v3256_v55 = vor.u32 %v3679_v40, %v3253_v61 }
 0x154   : > { %v1929_v3 = vpop.f32.mrf.mxu3  ;;  %2212 = vmatpush.bf16.msrb.mxu1 %v3256_v55 }
 0x155   : > { %v5313_v17 = vadd.f32 %v1929_v3, %v1881_v2 }
 0x156   : > { %v1833_v23 = vpop.f32.mrf.mxu1 }
 0x157   : > { %v1834_v59 = vadd.f32 %v1833_v23, %v1785_v54  ;;  %v1787_v63 = vpop.f32.mrf.mxu0 }
 0x158   : > { %v1788_v57 = vadd.f32 %v1787_v63, %v4926_v28  ;;  %v1882_v13 = vpop.f32.mrf.mxu2  ;;  %v3181_v28 = vld [vmem:[%s6026_s2 + $0x1b8] sm:$0xf0] }
 0x159   : > { %v1883_v4 = vadd.f32 %v1882_v13, %v1834_v59  ;;  %v3184_v53 = vor.u32 %v3661_v38, %v3181_v28 }
 0x15a   : > { %1982 = vmatmul.bf16.gmra.mxu0 %v5317_v36 }
 0x15b   : > { %2164 = vmatpush.bf16.msrb.mxu0 %v3184_v53 }
 0x15c   : > { %v1931_v31 = vpop.f32.mrf.mxu3 }
 0x15d   : > { %v5321_v44 = vadd.f32 %v1931_v31, %v1883_v4  ;;  %2080 = vmatmul.bf16.gmra.mxu2 %v4435_v12  ;;  %v3677_v12 = vld [vmem:[%s6026_s2 + $0x234] sm:$0xf] }
 0x15e   : > { %v1836_v50 = vpop.f32.mrf.mxu1 }
 0x15f   : > { %v1837_v34 = vadd.f32 %v1836_v50, %v1788_v57  ;;  %v1789_v32 = vpop.f32.mrf.mxu0 }
 0x160   : > { %v1790_v27 = vadd.f32 %v1789_v32, %v4941_v0  ;;  %v1885_v5 = vpop.f32.mrf.mxu2  ;;  %v6154_v32 = vld [vmem:[#allocation13_spill] sm:$0xff] }
 0x161   : > { %2031 = vmatmul.bf16.gmra.mxu1 %v4345_v16  ;;  %2129 = vmatmul.bf16.gmra.mxu3 %v4428_v7  ;;  %v1886_v33 = vadd.f32 %v1885_v5, %v1837_v34  ;;  %v3245_v16 = vld [vmem:[%s6026_s2 + $0x238] sm:$0xf0]  ;;  %v5343_v7 = vpack.c.b16 %v4430_v9, %v4386_v39  ;;  %v3659_v9 = vld [vmem:[%s6026_s2 + $0x1a4] sm:$0xf] }
 0x162   : > { %v3248_v0 = vor.u32 %v3677_v12, %v3245_v16 }
 0x164   : > { %v1934_v54 = vpop.f32.mrf.mxu3  ;;  %2213 = vmatpush.bf16.msrb.mxu1 %v3248_v0  ;;  %v6155_v0 = vld [vmem:[#allocation19_spill] sm:$0xff] }
 0x165   : > { %v5339_v1 = vadd.f32 %v1934_v54, %v1886_v33 }
 0x166   : > { %v1838_v56 = vpop.f32.mrf.mxu1 }
 0x167   : > { %v1839_v37 = vadd.f32 %v1838_v56, %v1790_v27  ;;  %v1792_v2 = vpop.f32.mrf.mxu0 }
 0x168   : > { %v1793_v62 = vadd.f32 %v1792_v2, %v4966_v29  ;;  %v1887_v40 = vpop.f32.mrf.mxu2  ;;  %v3173_v29 = vld [vmem:[%s6026_s2 + $0x1a8] sm:$0xf0] }
 0x169   : > { %v1888_v61 = vadd.f32 %v1887_v40, %v1839_v37  ;;  %v3176_v4 = vor.u32 %v3659_v9, %v3173_v29  ;;  %v3657_v40 = vld [vmem:[%s6026_s2 + $0x194] sm:$0xf]  ;;  %v3699_v29 = vld [vmem:[%s6026_s2 + $0x2e4] sm:$0xf] }
 0x16a   : > { %1987 = vmatmul.bf16.gmra.mxu0 %v5343_v7 }
 0x16b   : > { %2165 = vmatpush.bf16.msrb.mxu0 %v3176_v4 }
 0x16c   : > { %v1936_v55 = vpop.f32.mrf.mxu3 }
 0x16d   : > { %v5347_v23 = vadd.f32 %v1936_v55, %v1888_v61  ;;  %2085 = vmatmul.bf16.gmra.mxu2 %v4481_v47  ;;  %v3675_v47 = vld [vmem:[%s6026_s2 + $0x224] sm:$0xf]  ;;  %v3165_v61 = vld [vmem:[%s6026_s2 + $0x198] sm:$0xf0]  ;;  %v3717_v55 = vld [vmem:[%s6026_s2 + $0x374] sm:$0xf] }
 0x16e   : > { %v1841_v3 = vpop.f32.mrf.mxu1 }
 0x16f   : > { %v1842_v59 = vadd.f32 %v1841_v3, %v1793_v62  ;;  %v1794_v63 = vpop.f32.mrf.mxu0  ;;  %v6156_v3 = vld [vmem:[#allocation18_spill] sm:$0xff] }
 0x170   : > { %v1795_v57 = vadd.f32 %v1794_v63, %v4989_v8  ;;  %v1890_v39 = vpop.f32.mrf.mxu2  ;;  %v3229_v63 = vld [vmem:[%s6026_s2 + $0x218] sm:$0xf0] }
 0x171   : > { %2036 = vmatmul.bf16.gmra.mxu1 %v4397_v42  ;;  %2134 = vmatmul.bf16.gmra.mxu3 %v4474_v43  ;;  %v1891_v13 = vadd.f32 %v1890_v39, %v1842_v59  ;;  %v3237_v42 = vld [vmem:[%s6026_s2 + $0x228] sm:$0xf0]  ;;  %v5369_v43 = vpack.c.b16 %v6154_v32, %v4432_v11  ;;  %v3701_v11 = vld [vmem:[%s6026_s2 + $0x2f4] sm:$0xf]  ;;  %v6157_v32 = vld [vmem:[#allocation14_spill] sm:$0xff] }
 0x172   : > { %v3240_v8 = vor.u32 %v3675_v47, %v3237_v42  ;;  %v3715_v42 = vld [vmem:[%s6026_s2 + $0x364] sm:$0xf] }
 0x174   : > { %v1939_v31 = vpop.f32.mrf.mxu3  ;;  %2214 = vmatpush.bf16.msrb.mxu1 %v3240_v8  ;;  %v3397_v8 = vld [vmem:[%s6026_s2 + $0x368] sm:$0xf0] }
 0x175   : > { %v5365_v34 = vadd.f32 %v1939_v31, %v1891_v13  ;;  %v3333_v13 = vld [vmem:[%s6026_s2 + $0x2e8] sm:$0xf0] }
 0x176   : > { %v1843_v50 = vpop.f32.mrf.mxu1  ;;  %v3336_v4 = vor.u32 %v3699_v29, %v3333_v13  ;;  %v3309_v29 = vld [vmem:[%s6026_s2 + $0x2b8] sm:$0xf0] }
 0x177   : > { %v1844_v27 = vadd.f32 %v1843_v50, %v1795_v57  ;;  %v1797_v5 = vpop.f32.mrf.mxu0  ;;  %v3405_v57 = vld [vmem:[%s6026_s2 + $0x378] sm:$0xf0] }
 0x178   : > { %v1798_v38 = vadd.f32 %v1797_v5, %v5041_v22  ;;  %v1892_v28 = vpop.f32.mrf.mxu2  ;;  %v3341_v22 = vld [vmem:[%s6026_s2 + $0x2f8] sm:$0xf0]  ;;  %v3408_v9 = vor.u32 %v3717_v55, %v3405_v57  ;;  %v3711_v55 = vld [vmem:[%s6026_s2 + $0x344] sm:$0xf] }
 0x179   : > { %v1893_v33 = vadd.f32 %v1892_v28, %v1844_v27  ;;  %v3344_v2 = vor.u32 %v3701_v11, %v3341_v22  ;;  %v6158_v27 = vld [vmem:[#allocation16_spill] sm:$0xff]  ;;  %v3389_v22 = vld [vmem:[%s6026_s2 + $0x358] sm:$0xf0] }
 0x17a   : > { %1992 = vmatmul.bf16.gmra.mxu0 %v5369_v43  ;;  %2307 = vmatpush.bf16.msrb.mxu3 %v3408_v9  ;;  %v5419_v5 = vpack.c.b16 %v6158_v27, %v6157_v32  ;;  %v3713_v11 = vld [vmem:[%s6026_s2 + $0x354] sm:$0xf]  ;;  %v6160_v32 = vld [vmem:[#allocation23_spill] sm:$0xff] }
 0x17b   : > { %2258 = vmatpush.bf16.msrb.mxu2 %v3344_v2  ;;  %v3392_v2 = vor.u32 %v3713_v11, %v3389_v22  ;;  %v3693_v9 = vld [vmem:[%s6026_s2 + $0x2b4] sm:$0xf]  ;;  %v3707_v11 = vld [vmem:[%s6026_s2 + $0x324] sm:$0xf]  ;;  %v3365_v22 = vld [vmem:[%s6026_s2 + $0x328] sm:$0xf0] }
 0x17c   : > { %v1941_v53 = vpop.f32.mrf.mxu3 }
 0x17d   : > { %v5373_v16 = vadd.f32 %v1941_v53, %v1893_v33  ;;  %2090 = vmatmul.bf16.gmra.mxu2 %v6155_v0  ;;  %v3697_v53 = vld [vmem:[%s6026_s2 + $0x2d4] sm:$0xf] }
 0x17e   : > { %v1846_v12 = vpop.f32.mrf.mxu1 }
 0x17f   : > { %v1847_v54 = vadd.f32 %v1846_v12, %v1798_v38  ;;  %v1799_v56 = vpop.f32.mrf.mxu0  ;;  %2259 = vmatpush.bf16.msrb.mxu2 %v3336_v4  ;;  %v3400_v38 = vor.u32 %v3715_v42, %v3397_v8  ;;  %v3325_v12 = vld [vmem:[%s6026_s2 + $0x2d8] sm:$0xf0]  ;;  %v3312_v4 = vor.u32 %v3693_v9, %v3309_v29  ;;  %v3655_v42 = vld [vmem:[%s6026_s2 + $0x184] sm:$0xf]  ;;  %v3157_v8 = vld [vmem:[%s6026_s2 + $0x188] sm:$0xf0] }
 0x180   : > { %v1800_v37 = vadd.f32 %v1799_v56, %v5091_v24  ;;  %v1895_v62 = vpop.f32.mrf.mxu2  ;;  %v3168_v24 = vor.u32 %v3657_v40, %v3165_v61  ;;  %v3160_v27 = vor.u32 %v3655_v42, %v3157_v8  ;;  %v3705_v9 = vld [vmem:[%s6026_s2 + $0x314] sm:$0xf]  ;;  %v3357_v29 = vld [vmem:[%s6026_s2 + $0x318] sm:$0xf0] }
 0x181   : > { %2041 = vmatmul.bf16.gmra.mxu1 %v4443_v14  ;;  %2139 = vmatmul.bf16.gmra.mxu3 %v6156_v3  ;;  %v1896_v59 = vadd.f32 %v1895_v62, %v1847_v54  ;;  %v3673_v14 = vld [vmem:[%s6026_s2 + $0x214] sm:$0xf]  ;;  %v3328_v54 = vor.u32 %v3697_v53, %v3325_v12  ;;  %v3317_v62 = vld [vmem:[%s6026_s2 + $0x2c8] sm:$0xf0]  ;;  %v3691_v12 = vld [vmem:[%s6026_s2 + $0x2a4] sm:$0xf] }
 0x182   : > { %v3232_v39 = vor.u32 %v3673_v14, %v3229_v63  ;;  %2166 = vmatpush.bf16.msrb.mxu0 %v3168_v24  ;;  %2308 = vmatpush.bf16.msrb.mxu3 %v3400_v38  ;;  %v3381_v3 = vld [vmem:[%s6026_s2 + $0x348] sm:$0xf0]  ;;  %v6159_v14 = vld [vmem:[#allocation24_spill] sm:$0xff] }
 0x183   : > { %2260 = vmatpush.bf16.msrb.mxu2 %v3328_v54  ;;  %v3384_v63 = vor.u32 %v3711_v55, %v3381_v3  ;;  %v3221_v38 = vld [vmem:[%s6026_s2 + $0x208] sm:$0xf0] }
 0x184   : > { %v1944_v47 = vpop.f32.mrf.mxu3  ;;  %2215 = vmatpush.bf16.msrb.mxu1 %v3232_v39 }
 0x185   : > { %v5415_v50 = vadd.f32 %v1944_v47, %v1896_v59 }
 0x186   : > { %v1848_v31 = vpop.f32.mrf.mxu1  ;;  %2309 = vmatpush.bf16.msrb.mxu3 %v3392_v2  ;;  %2167 = vmatpush.bf16.msrb.mxu0 %v3160_v27 }
 0x187   : > { %v1849_v28 = vadd.f32 %v1848_v31, %v1800_v37  ;;  %v1802_v33 = vpop.f32.mrf.mxu0  ;;  %v3709_v31 = vld [vmem:[%s6026_s2 + $0x334] sm:$0xf] }
 0x188   : > { %v1803_v0 = vadd.f32 %v1802_v33, %v5145_v41  ;;  %v1897_v56 = vpop.f32.mrf.mxu2  ;;  %v3695_v41 = vld [vmem:[%s6026_s2 + $0x2c4] sm:$0xf] }
 0x189   : > { %v1898_v37 = vadd.f32 %v1897_v56, %v1849_v28  ;;  %v3320_v40 = vor.u32 %v3695_v41, %v3317_v62  ;;  %v3373_v28 = vld [vmem:[%s6026_s2 + $0x338] sm:$0xf0] }
 0x18a   : > { %1997 = vmatmul.bf16.gmra.mxu0 %v5419_v5  ;;  %2310 = vmatpush.bf16.msrb.mxu3 %v3384_v63  ;;  %v3376_v53 = vor.u32 %v3709_v31, %v3373_v28  ;;  %v6161_v41 = vld [vmem:[#allocation17_spill] sm:$0xff]  ;;  %v3703_v31 = vld [vmem:[%s6026_s2 + $0x304] sm:$0xf] }
 0x18b   : > { %2261 = vmatpush.bf16.msrb.mxu2 %v3320_v40  ;;  %v6162_v62 = vld [vmem:[#allocation21_spill] sm:$0xff] }
 0x18c   : > { %v1946_v61 = vpop.f32.mrf.mxu3  ;;  %v5493_v40 = vpack.c.b16 %v6162_v62, %v6161_v41 }
 0x18d   : > { %v5447_v24 = vadd.f32 %v1946_v61, %v1898_v37  ;;  %2095 = vmatmul.bf16.gmra.mxu2 %v6159_v14  ;;  %v3368_v61 = vor.u32 %v3707_v11, %v3365_v22  ;;  %v3293_v14 = vld [vmem:[%s6026_s2 + $0x298] sm:$0xf0] }
 0x18e   : > { %v1851_v59 = vpop.f32.mrf.mxu1  ;;  %2311 = vmatpush.bf16.msrb.mxu3 %v3376_v53 }
 0x18f   : > { %v1852_v57 = vadd.f32 %v1851_v59, %v1803_v0  ;;  %v1804_v39 = vpop.f32.mrf.mxu0  ;;  %2262 = vmatpush.bf16.msrb.mxu2 %v3312_v4  ;;  %v3301_v0 = vld [vmem:[%s6026_s2 + $0x2a8] sm:$0xf0]  ;;  %v3689_v59 = vld [vmem:[%s6026_s2 + $0x294] sm:$0xf]  ;;  %v3360_v4 = vor.u32 %v3705_v9, %v3357_v29 }
 0x190   : > { %v1805_v13 = vadd.f32 %v1804_v39, %v5191_v26  ;;  %v1900_v47 = vpop.f32.mrf.mxu2  ;;  %v3304_v54 = vor.u32 %v3691_v12, %v3301_v0  ;;  %v3733_v0 = vld [vmem:[%s6026_s2 + $0x3f4] sm:$0xf] }
 0x191   : > { %2046 = vmatmul.bf16.gmra.mxu1 %v4489_v51  ;;  %2144 = vmatmul.bf16.gmra.mxu3 %v6160_v32  ;;  %v1901_v26 = vadd.f32 %v1900_v47, %v1852_v57  ;;  %v3671_v51 = vld [vmem:[%s6026_s2 + $0x204] sm:$0xf]  ;;  %v3296_v57 = vor.u32 %v3689_v59, %v3293_v14  ;;  %v3285_v47 = vld [vmem:[%s6026_s2 + $0x288] sm:$0xf0] }
 0x192   : > { %v3224_v33 = vor.u32 %v3671_v51, %v3221_v38  ;;  %2312 = vmatpush.bf16.msrb.mxu3 %v3368_v61  ;;  %v3349_v32 = vld [vmem:[%s6026_s2 + $0x308] sm:$0xf0]  ;;  %v6163_v51 = vld [vmem:[#allocation28_spill] sm:$0xff] }
 0x193   : > { %2263 = vmatpush.bf16.msrb.mxu2 %v3304_v54  ;;  %v3352_v38 = vor.u32 %v3703_v31, %v3349_v32  ;;  %v3469_v54 = vld [vmem:[%s6026_s2 + $0x3f8] sm:$0xf0]  ;;  %v3461_v32 = vld [vmem:[%s6026_s2 + $0x3e8] sm:$0xf0] }
 0x194   : > { %v1949_v56 = vpop.f32.mrf.mxu3  ;;  %2216 = vmatpush.bf16.msrb.mxu1 %v3224_v33  ;;  %v3472_v22 = vor.u32 %v3733_v0, %v3469_v54 }
 0x195   : > { %v5489_v2 = vadd.f32 %v1949_v56, %v1901_v26  ;;  %v6164_v56 = vld [vmem:[#allocation26_spill] sm:$0xff] }
 0x196   : > { %v1853_v37 = vpop.f32.mrf.mxu1  ;;  %2313 = vmatpush.bf16.msrb.mxu3 %v3360_v4  ;;  %2356 = vmatpush.bf16.msra.mxu0 %v3472_v22 }
 0x197   : > { %v1854_v55 = vadd.f32 %v1853_v37, %v1805_v13  ;;  %v1807_v3 = vpop.f32.mrf.mxu0  ;;  %2264 = vmatpush.bf16.msrb.mxu2 %v3296_v57 }
 0x198   : > { %v1808_v63 = vadd.f32 %v1807_v3, %v5218_v6  ;;  %v1902_v39 = vpop.f32.mrf.mxu2  ;;  %v3687_v6 = vld [vmem:[%s6026_s2 + $0x284] sm:$0xf]  ;;  %v6166_v3 = vld [vmem:[#allocation27_spill] sm:$0xff] }
 0x199   : > { %v1903_v13 = vadd.f32 %v1902_v39, %v1854_v55  ;;  %v3288_v42 = vor.u32 %v3687_v6, %v3285_v47  ;;  %v6165_v55 = vld [vmem:[#allocation22_spill] sm:$0xff]  ;;  %v6167_v6 = vld [vmem:[#allocation31_spill] sm:$0xff] }
 0x19a   : > { %2002 = vmatmul.bf16.gmra.mxu0 %v5493_v40  ;;  %2314 = vmatpush.bf16.msrb.mxu3 %v3352_v38  ;;  %v5543_v59 = vpack.c.b16 %v6166_v3, %v6165_v55  ;;  %v6170_v3 = vld [vmem:[#allocation35_spill] sm:$0xff] }
 0x19b   : > { %2265 = vmatpush.bf16.msrb.mxu2 %v3288_v42 }
 0x19c   : > { %v1951_v8 = vpop.f32.mrf.mxu3 }
 0x19d   : > { %v5521_v27 = vadd.f32 %v1951_v8, %v1903_v13  ;;  %2100 = vmatmul.bf16.gmra.mxu2 %v6163_v51 }
 0x19e   : > { %v1856_v26 = vpop.f32.mrf.mxu1 }
 0x19f   : > { %v1857_v28 = vadd.f32 %v1856_v26, %v1808_v63  ;;  %v1809_v33 = vpop.f32.mrf.mxu0  ;;  %v6168_v26 = vld [vmem:[#allocation30_spill] sm:$0xff] }
 0x1a0   : > { %v1810_v53 = vadd.f32 %v1809_v33, %v5237_v60  ;;  %v1905_v12 = vpop.f32.mrf.mxu2  ;;  %v3749_v60 = vld [vmem:[%s6026_s2 + $0x474] sm:$0xf] }
 0x1a1   : > { %2051 = vmatmul.bf16.gmra.mxu1 %v4532_v35  ;;  %2149 = vmatmul.bf16.gmra.mxu3 %v6164_v56  ;;  %v1906_v11 = vadd.f32 %v1905_v12, %v1857_v28  ;;  %v3533_v35 = vld [vmem:[%s6026_s2 + $0x478] sm:$0xf0]  ;;  %v3747_v28 = vld [vmem:[%s6026_s2 + $0x464] sm:$0xf] }
 0x1a2   : > { %v3536_v37 = vor.u32 %v3749_v60, %v3533_v35  ;;  %v6169_v60 = vld [vmem:[#allocation10_spill] sm:$0xff] }
 0x1a3   : > { %v3841_v35 = vld [vmem:[%s6027_s3] sm:$0x3] }
 0x1a4   : > { %v1954_v41 = vpop.f32.mrf.mxu3  ;;  %2405 = vmatpush.bf16.msra.mxu1 %v3536_v37  ;;  %v5572_v37 = vperm.slane %v3841_v35, 1 }
 0x1a5   : > { %v5539_v61 = vadd.f32 %v1954_v41, %v1906_v11 }
 0x1a6   : > { %v1858_v62 = vpop.f32.mrf.mxu1 }
 0x1a7   : > { %v1859_v14 = vadd.f32 %v1858_v62, %v1810_v53  ;;  %v1812_v63 = vpop.f32.mrf.mxu0 }
 0x1a8   : > { %v1813_v57 = vadd.f32 %v1812_v63, %v5261_v18  ;;  %v1907_v39 = vpop.f32.mrf.mxu2  ;;  %v3731_v18 = vld [vmem:[%s6026_s2 + $0x3e4] sm:$0xf] }
 0x1a9   : > { %v1908_v9 = vadd.f32 %v1907_v39, %v1859_v14  ;;  %v3464_v38 = vor.u32 %v3731_v18, %v3461_v32 }
 0x1aa   : > { %2007 = vmatmul.bf16.gmra.mxu0 %v5543_v59 }
 0x1ab   : > { %2357 = vmatpush.bf16.msra.mxu0 %v3464_v38 }
 0x1ac   : > { %v1956_v29 = vpop.f32.mrf.mxu3 }
 0x1ad   : > { %v5547_v4 = vadd.f32 %v1956_v29, %v1908_v9  ;;  %2105 = vmatmul.bf16.gmra.mxu2 %v6167_v6  ;;  %v3729_v9 = vld [vmem:[%s6026_s2 + $0x3d4] sm:$0xf]  ;;  %v3453_v29 = vld [vmem:[%s6026_s2 + $0x3d8] sm:$0xf0]  ;;  %v6172_v6 = vld [vmem:[#allocation34_spill] sm:$0xff] }
 0x1ae   : > { %v1861_v13 = vpop.f32.mrf.mxu1 }
 0x1af   : > { %v1862_v47 = vadd.f32 %v1861_v13, %v1813_v57  ;;  %v1814_v42 = vpop.f32.mrf.mxu0  ;;  %v6171_v57 = vld [vmem:[#allocation33_spill] sm:$0xff] }
 0x1b0   : > { %v1815_v8 = vadd.f32 %v1814_v42, %v5269_v49  ;;  %v1910_v31 = vpop.f32.mrf.mxu2 }
 0x1b1   : > { %2056 = vmatmul.bf16.gmra.mxu1 %v4638_v20  ;;  %2154 = vmatmul.bf16.gmra.mxu3 %v6168_v26  ;;  %v1911_v51 = vadd.f32 %v1910_v31, %v1862_v47  ;;  %v3525_v20 = vld [vmem:[%s6026_s2 + $0x468] sm:$0xf0]  ;;  %v3517_v31 = vld [vmem:[%s6026_s2 + $0x458] sm:$0xf0] }
 0x1b2   : > { %v3528_v49 = vor.u32 %v3747_v28, %v3525_v20 }
 0x1b4   : > { %v1959_v33 = vpop.f32.mrf.mxu3  ;;  %2406 = vmatpush.bf16.msra.mxu1 %v3528_v49 }
 0x1b5   : > { %v5565_v12 = vadd.f32 %v1959_v33, %v1911_v51 }
 0x1b6   : > { %v1863_v53 = vpop.f32.mrf.mxu1 }
 0x1b7   : > { %v1864_v0 = vadd.f32 %v1863_v53, %v1815_v8  ;;  %v1973_v54 = vpop.f32.mrf.mxu0  ;;  %v3456_v8 = vor.u32 %v3729_v9, %v3453_v29  ;;  %v3509_v29 = vld [vmem:[%s6026_s2 + $0x448] sm:$0xf0] }
 0x1b8   : > { %v1974_v56 = vadd.f32 %v1973_v54, %v5287_v48  ;;  %v1912_v11 = vpop.f32.mrf.mxu2 }
 0x1b9   : > { %v1913_v22 = vadd.f32 %v1912_v11, %v1864_v0  ;;  %2358 = vmatpush.bf16.msra.mxu0 %v3456_v8  ;;  %v6173_v0 = vld [vmem:[#allocation11_spill] sm:$0xff] }
 0x1ba   : > { %2168 = vmatmul.bf16.vlgmr.msrb.gmra.mxu0 %v6169_v60  ;;  %v2454_v13 = vmax.f32 %v1974_v56, 0.0 }
 0x1bc   : > { %v1961_v41 = vpop.f32.mrf.mxu3 }
 0x1bd   : > { %v5574_v62 = vadd.f32 %v1961_v41, %v1913_v22  ;;  %2266 = vmatmul.bf16.vlgmr.msrb.gmra.mxu2 %v6170_v3  ;;  %v6174_v22 = vld [vmem:[#allocation39_spill] sm:$0xff] }
 0x1be   : > { %v2022_v55 = vpop.f32.mrf.mxu1 }
 0x1bf   : > { %v1975_v14 = vpop.f32.mrf.mxu0  ;;  %v2023_v63 = vadd.f32 %v2022_v55, %v5572_v37  ;;  %v6175_v55 = vld [vmem:[#allocation37_spill] sm:$0xff] }
 0x1c0   : > { %v1976_v48 = vadd.f32 %v1975_v14, %v5295_v30  ;;  %v2071_v39 = vpop.f32.mrf.mxu2  ;;  %v3745_v30 = vld [vmem:[%s6026_s2 + $0x454] sm:$0xf]  ;;  %v3445_v14 = vld [vmem:[%s6026_s2 + $0x3c8] sm:$0xf0] }
 0x1c1   : > { %2217 = vmatmul.bf16.vlgmr.msrb.gmra.mxu1 %v6171_v57  ;;  %2315 = vmatmul.bf16.vlgmr.msrb.gmra.mxu3 %v6172_v6  ;;  %v2072_v47 = vadd.f32 %v2071_v39, %v2023_v63  ;;  %v3520_v18 = vor.u32 %v3745_v30, %v3517_v31 }
 0x1c2   : > { %v2456_v42 = vmax.f32 %v1976_v48, 0.0  ;;  %v6176_v48 = vld [vmem:[#allocation38_spill] sm:$0xff] }
 0x1c3   : > { %2407 = vmatpush.bf16.msra.mxu1 %v3520_v18 }
 0x1c4   : > { %v5593_v32 = vpack.c.bf16 %v2456_v42, %v2454_v13  ;;  %v2120_v26 = vpop.f32.mrf.mxu3 }
 0x1c5   : > { %v5595_v38 = vadd.f32 %v2120_v26, %v2072_v47 }
 0x1c6   : > { %v2024_v51 = vpop.f32.mrf.mxu1 }
 0x1c7   : > { %v1978_v28 = vpop.f32.mrf.mxu0  ;;  %v2025_v20 = vadd.f32 %v2024_v51, %v5572_v37 }
 0x1c8   : > { %v1979_v49 = vadd.f32 %v1978_v28, %v5313_v17  ;;  %v2073_v33 = vpop.f32.mrf.mxu2  ;;  %v3727_v17 = vld [vmem:[%s6026_s2 + $0x3c4] sm:$0xf]  ;;  %v6177_v28 = vld [vmem:[#allocation12_spill] sm:$0xff] }
 0x1c9   : > { %v2074_v53 = vadd.f32 %v2073_v33, %v2025_v20  ;;  %v3448_v9 = vor.u32 %v3727_v17, %v3445_v14 }
 0x1ca   : > { %2173 = vmatmul.bf16.gmra.mxu0 %v6173_v0  ;;  %v2458_v63 = vmax.f32 %v1979_v49, 0.0 }
 0x1cb   : > { %2359 = vmatpush.bf16.msra.mxu0 %v3448_v9 }
 0x1cc   : > { %v2122_v54 = vpop.f32.mrf.mxu3 }
 0x1cd   : > { %v5600_v11 = vadd.f32 %v2122_v54, %v2074_v53  ;;  %2271 = vmatmul.bf16.gmra.mxu2 %v6174_v22  ;;  %v6178_v53 = vld [vmem:[#allocation43_spill] sm:$0xff]  ;;  %v6179_v22 = vld [vmem:[#allocation41_spill] sm:$0xff] }
 0x1ce   : > { %v2027_v56 = vpop.f32.mrf.mxu1 }
 0x1cf   : > { %v1980_v60 = vpop.f32.mrf.mxu0  ;;  %v2028_v35 = vadd.f32 %v2027_v56, %v5572_v37 }
 0x1d0   : > { %v1981_v41 = vadd.f32 %v1980_v60, %v5321_v44  ;;  %v2076_v3 = vpop.f32.mrf.mxu2  ;;  %v3743_v44 = vld [vmem:[%s6026_s2 + $0x444] sm:$0xf] }
 0x1d1   : > { %2222 = vmatmul.bf16.gmra.mxu1 %v6175_v55  ;;  %2320 = vmatmul.bf16.gmra.mxu3 %v6176_v48  ;;  %v2077_v57 = vadd.f32 %v2076_v3, %v2028_v35  ;;  %v3512_v13 = vor.u32 %v3743_v44, %v3509_v29  ;;  %v3437_v35 = vld [vmem:[%s6026_s2 + $0x3b8] sm:$0xf0]  ;;  %v6180_v55 = vld [vmem:[#allocation42_spill] sm:$0xff] }
 0x1d2   : > { %v2460_v39 = vmax.f32 %v1981_v41, 0.0 }
 0x1d3   : > { %2408 = vmatpush.bf16.msra.mxu1 %v3512_v13 }
 0x1d4   : > { %v5619_v6 = vpack.c.bf16 %v2460_v39, %v2458_v63  ;;  %v2125_v47 = vpop.f32.mrf.mxu3  ;;  %v3501_v63 = vld [vmem:[%s6026_s2 + $0x438] sm:$0xf0] }
 0x1d5   : > { %v5621_v8 = vadd.f32 %v2125_v47, %v2077_v57 }
 0x1d6   : > { %v2029_v42 = vpop.f32.mrf.mxu1 }
 0x1d7   : > { %v1983_v30 = vpop.f32.mrf.mxu0  ;;  %v2030_v31 = vadd.f32 %v2029_v42, %v5572_v37 }
 0x1d8   : > { %v1984_v18 = vadd.f32 %v1983_v30, %v5339_v1  ;;  %v2078_v26 = vpop.f32.mrf.mxu2  ;;  %v3725_v1 = vld [vmem:[%s6026_s2 + $0x3b4] sm:$0xf] }
 0x1d9   : > { %v2079_v51 = vadd.f32 %v2078_v26, %v2030_v31  ;;  %v3440_v14 = vor.u32 %v3725_v1, %v3437_v35  ;;  %v6181_v31 = vld [vmem:[#allocation15_spill] sm:$0xff] }
 0x1da   : > { %2178 = vmatmul.bf16.gmra.mxu0 %v6177_v28  ;;  %v2462_v41 = vmax.f32 %v1984_v18, 0.0 }
 0x1db   : > { %2360 = vmatpush.bf16.msra.mxu0 %v3440_v14 }
 0x1dc   : > { %v2127_v20 = vpop.f32.mrf.mxu3 }
 0x1dd   : > { %v5626_v33 = vadd.f32 %v2127_v20, %v2079_v51  ;;  %2276 = vmatmul.bf16.gmra.mxu2 %v6178_v53 }
 0x1de   : > { %v2032_v49 = vpop.f32.mrf.mxu1 }
 0x1df   : > { %v1985_v0 = vpop.f32.mrf.mxu0  ;;  %v2033_v54 = vadd.f32 %v2032_v49, %v5572_v37 }
 0x1e0   : > { %v1986_v56 = vadd.f32 %v1985_v0, %v5347_v23  ;;  %v2081_v60 = vpop.f32.mrf.mxu2  ;;  %v3741_v23 = vld [vmem:[%s6026_s2 + $0x434] sm:$0xf]  ;;  %v3429_v0 = vld [vmem:[%s6026_s2 + $0x3a8] sm:$0xf0] }
 0x1e1   : > { %2227 = vmatmul.bf16.gmra.mxu1 %v6179_v22  ;;  %2325 = vmatmul.bf16.gmra.mxu3 %v6180_v55  ;;  %v2082_v3 = vadd.f32 %v2081_v60, %v2033_v54  ;;  %v3504_v48 = vor.u32 %v3741_v23, %v3501_v63 }
 0x1e2   : > { %v2464_v17 = vmax.f32 %v1986_v56, 0.0  ;;  %v6182_v56 = vld [vmem:[#allocation45_spill] sm:$0xff] }
 0x1e3   : > { %2409 = vmatpush.bf16.msra.mxu1 %v3504_v48 }
 0x1e4   : > { %v5645_v57 = vpack.c.bf16 %v2464_v17, %v2462_v41  ;;  %v2130_v39 = vpop.f32.mrf.mxu3 }
 0x1e5   : > { %v5647_v44 = vadd.f32 %v2130_v39, %v2082_v3  ;;  %v6183_v39 = vld [vmem:[#allocation20_spill] sm:$0xff] }
 0x1e6   : > { %v2034_v9 = vpop.f32.mrf.mxu1 }
 0x1e7   : > { %v1988_v29 = vpop.f32.mrf.mxu0  ;;  %v2035_v13 = vadd.f32 %v2034_v9, %v5572_v37 }
 0x1e8   : > { %v1989_v47 = vadd.f32 %v1988_v29, %v5365_v34  ;;  %v2083_v42 = vpop.f32.mrf.mxu2  ;;  %v3723_v34 = vld [vmem:[%s6026_s2 + $0x3a4] sm:$0xf] }
 0x1e9   : > { %v2084_v30 = vadd.f32 %v2083_v42, %v2035_v13  ;;  %v3432_v60 = vor.u32 %v3723_v34, %v3429_v0 }
 0x1ea   : > { %2183 = vmatmul.bf16.gmra.mxu0 %v6181_v31  ;;  %v2466_v54 = vmax.f32 %v1989_v47, 0.0  ;;  %v6184_v47 = vld [vmem:[#allocation49_spill] sm:$0xff] }
 0x1eb   : > { %2361 = vmatpush.bf16.msra.mxu0 %v3432_v60 }
 0x1ec   : > { %v2132_v18 = vpop.f32.mrf.mxu3 }
 0x1ed   : > { %v5652_v51 = vadd.f32 %v2132_v18, %v2084_v30  ;;  %2281 = vmatmul.bf16.gmra.mxu2 %v4944_v46  ;;  %v3758_v18 = vld [vmem:[%s6028_s4 + $0x38] sm:$0xff] }
 0x1ee   : > { %v2037_v26 = vpop.f32.mrf.mxu1  ;;  %2634 = vmatpush.bf16.msra.mxu2 %v3758_v18  ;;  %v6189_v18 = vld [vmem:[#allocation51_spill] sm:$0xff] }
 0x1ef   : > { %v1990_v28 = vpop.f32.mrf.mxu0  ;;  %v2038_v20 = vadd.f32 %v2037_v26, %v5572_v37 }
 0x1f0   : > { %v1991_v49 = vadd.f32 %v1990_v28, %v5373_v16  ;;  %v2086_v53 = vpop.f32.mrf.mxu2  ;;  %v3739_v16 = vld [vmem:[%s6026_s2 + $0x424] sm:$0xf]  ;;  %v3721_v28 = vld [vmem:[%s6026_s2 + $0x394] sm:$0xf] }
 0x1f1   : > { %2232 = vmatmul.bf16.gmra.mxu1 %v4932_v15  ;;  %2330 = vmatmul.bf16.gmra.mxu3 %v6182_v56  ;;  %v2087_v46 = vadd.f32 %v2086_v53, %v2038_v20  ;;  %v3493_v15 = vld [vmem:[%s6026_s2 + $0x428] sm:$0xf0]  ;;  %v3421_v20 = vld [vmem:[%s6026_s2 + $0x398] sm:$0xf0]  ;;  %v6186_v53 = vld [vmem:[#allocation48_spill] sm:$0xff] }
 0x1f2   : > { %v2468_v22 = vmax.f32 %v1991_v49, 0.0  ;;  %v3496_v1 = vor.u32 %v3739_v16, %v3493_v15  ;;  %v3424_v0 = vor.u32 %v3721_v28, %v3421_v20  ;;  %v3485_v56 = vld [vmem:[%s6026_s2 + $0x418] sm:$0xf0]  ;;  %v3413_v28 = vld [vmem:[%s6026_s2 + $0x388] sm:$0xf0] }
 0x1f4   : > { %v5671_v35 = vpack.c.bf16 %v2468_v22, %v2466_v54  ;;  %v2135_v41 = vpop.f32.mrf.mxu3  ;;  %2410 = vmatpush.bf16.msra.mxu1 %v3496_v1  ;;  %v3737_v54 = vld [vmem:[%s6026_s2 + $0x414] sm:$0xf]  ;;  %2362 = vmatpush.bf16.msra.mxu0 %v3424_v0  ;;  %v3477_v0 = vld [vmem:[%s6026_s2 + $0x408] sm:$0xf0] }
 0x1f5   : > { %v5673_v3 = vadd.f32 %v2135_v41, %v2087_v46  ;;  %v3488_v46 = vor.u32 %v3737_v54, %v3485_v56  ;;  %v3757_v22 = vld [vmem:[%s6028_s4 + $0x30] sm:$0xff] }
 0x1f6   : > { %v2039_v55 = vpop.f32.mrf.mxu1  ;;  %2635 = vmatpush.bf16.msra.mxu2 %v3757_v22  ;;  %v3753_v56 = vld [vmem:[%s6028_s4 + $0x10] sm:$0xff] }
 0x1f7   : > { %v1993_v17 = vpop.f32.mrf.mxu0  ;;  %v2040_v14 = vadd.f32 %v2039_v55, %v5572_v37  ;;  %v3756_v55 = vld [vmem:[%s6028_s4 + $0x28] sm:$0xff] }
 0x1f8   : > { %v1994_v23 = vadd.f32 %v1993_v17, %v5415_v50  ;;  %v2088_v63 = vpop.f32.mrf.mxu2  ;;  %v6185_v50 = vld [vmem:[#allocation47_spill] sm:$0xff]  ;;  %2411 = vmatpush.bf16.msra.mxu1 %v3488_v46 }
 0x1f9   : > { %v2089_v48 = vadd.f32 %v2088_v63, %v2040_v14 }
 0x1fa   : > { %2188 = vmatmul.bf16.gmra.mxu0 %v6183_v39  ;;  %v2470_v49 = vmax.f32 %v1994_v23, 0.0  ;;  %2636 = vmatpush.bf16.msra.mxu2 %v3756_v55  ;;  %v3755_v39 = vld [vmem:[%s6028_s4 + $0x20] sm:$0xff]  ;;  %v3752_v55 = vld [vmem:[%s6028_s4 + $0x8] sm:$0xff] }
 0x1fc   : > { %v2137_v9 = vpop.f32.mrf.mxu3 }
 0x1fd   : > { %v5678_v13 = vadd.f32 %v2137_v9, %v2089_v48  ;;  %2286 = vmatmul.bf16.gmra.mxu2 %v6184_v47  ;;  %v6187_v48 = vld [vmem:[#allocation25_spill] sm:$0xff] }
 0x1fe   : > { %v2042_v29 = vpop.f32.mrf.mxu1  ;;  %v6188_v47 = vld [vmem:[#allocation53_spill] sm:$0xff]  ;;  %2637 = vmatpush.bf16.msra.mxu2 %v3755_v39 }
 0x1ff   : > { %v1995_v42 = vpop.f32.mrf.mxu0  ;;  %v2043_v30 = vadd.f32 %v2042_v29, %v5572_v37  ;;  %v6191_v39 = vld [vmem:[#allocation29_spill] sm:$0xff] }
 0x200   : > { %v1996_v31 = vadd.f32 %v1995_v42, %v5447_v24  ;;  %v2091_v26 = vpop.f32.mrf.mxu2 }
 0x201   : > { %2237 = vmatmul.bf16.gmra.mxu1 %v6185_v50  ;;  %2335 = vmatmul.bf16.gmra.mxu3 %v6186_v53  ;;  %v2092_v34 = vadd.f32 %v2091_v26, %v2043_v30  ;;  %v3719_v26 = vld [vmem:[%s6026_s2 + $0x384] sm:$0xf] }
 0x202   : > { %v2472_v24 = vmax.f32 %v1996_v31, 0.0  ;;  %v3754_v31 = vld [vmem:[%s6028_s4 + $0x18] sm:$0xff] }
 0x203   : > { %2638 = vmatpush.bf16.msra.mxu2 %v3754_v31  ;;  %v6192_v31 = vld [vmem:[#allocation55_spill] sm:$0xff] }
 0x204   : > { %v5703_v60 = vpack.c.bf16 %v2472_v24, %v2470_v49  ;;  %v2140_v16 = vpop.f32.mrf.mxu3  ;;  %v6190_v49 = vld [vmem:[#allocation52_spill] sm:$0xff]  ;;  %v3735_v24 = vld [vmem:[%s6026_s2 + $0x404] sm:$0xf] }
 0x205   : > { %v5705_v1 = vadd.f32 %v2140_v16, %v2092_v34  ;;  %v3416_v34 = vor.u32 %v3719_v26, %v3413_v28  ;;  %v3480_v54 = vor.u32 %v3735_v24, %v3477_v0  ;;  %v6193_v26 = vld [vmem:[#allocation56_spill] sm:$0xff] }
 0x206   : > { %v2044_v15 = vpop.f32.mrf.mxu1 }
 0x207   : > { %v1998_v41 = vpop.f32.mrf.mxu0  ;;  %v2045_v17 = vadd.f32 %v2044_v15, %v5572_v37  ;;  %2363 = vmatpush.bf16.msra.mxu0 %v3416_v34  ;;  %2412 = vmatpush.bf16.msra.mxu1 %v3480_v54 }
 0x208   : > { %v1999_v14 = vadd.f32 %v1998_v41, %v5489_v2  ;;  %v2093_v23 = vpop.f32.mrf.mxu2  ;;  %2639 = vmatpush.bf16.msra.mxu2 %v3753_v56  ;;  %v6194_v56 = vld [vmem:[#allocation32_spill] sm:$0xff] }
 0x209   : > { %v5712_v63 = vadd.f32 %v2093_v23, %v2045_v17 }
 0x20a   : > { %2193 = vmatmul.bf16.gmra.mxu0 %v6187_v48  ;;  %v2474_v20 = vmax.f32 %v1999_v14, 0.0 }
 0x20c   : > { %v5718_v9 = vpop.f32.mrf.mxu3  ;;  %2640 = vmatpush.bf16.msra.mxu2 %v3752_v55  ;;  %v3766_v55 = vld [vmem:[%s6028_s4 + $0x78] sm:$0xff] }
 0x20d   : > { %2291 = vmatmul.bf16.gmra.mxu2 %v6188_v47  ;;  %2683 = vmatpush.bf16.msra.mxu3 %v3766_v55 }
 0x20e   : > { %v2047_v29 = vpop.f32.mrf.mxu1 }
 0x20f   : > { %v2000_v42 = vpop.f32.mrf.mxu0  ;;  %v2048_v30 = vadd.f32 %v2047_v29, %v5572_v37  ;;  %v3751_v29 = vld [vmem:[%s6028_s4] sm:$0xff] }
 0x210   : > { %v2001_v2 = vadd.f32 %v2000_v42, %v5521_v27  ;;  %v2096_v50 = vpop.f32.mrf.mxu2  ;;  %2641 = vmatpush.bf16.msra.mxu2 %v3751_v29 }
 0x211   : > { %2242 = vmatmul.bf16.gmra.mxu1 %v6189_v18  ;;  %2340 = vmatmul.bf16.gmra.mxu3 %v6190_v49  ;;  %v2097_v53 = vadd.f32 %v2096_v50, %v2048_v30 }
 0x212   : > { %v2476_v27 = vmax.f32 %v2001_v2, 0.0 }
 0x214   : > { %v5743_v46 = vpack.c.bf16 %v2476_v27, %v2474_v20  ;;  %v2145_v22 = vpop.f32.mrf.mxu3 }
 0x215   : > { %v5745_v15 = vadd.f32 %v2145_v22, %v2097_v53 }
 0x216   : > { %v2049_v16 = vpop.f32.mrf.mxu1 }
 0x217   : > { %v2003_v41 = vpop.f32.mrf.mxu0  ;;  %v2050_v17 = vadd.f32 %v2049_v16, %v5572_v37 }
 0x218   : > { %v2004_v14 = vadd.f32 %v2003_v41, %v5539_v61  ;;  %v2098_v23 = vpop.f32.mrf.mxu2 }
 0x219   : > { %v5752_v48 = vadd.f32 %v2098_v23, %v2050_v17 }
 0x21a   : > { %2198 = vmatmul.bf16.gmra.mxu0 %v6191_v39  ;;  %v2478_v50 = vmax.f32 %v2004_v14, 0.0 }
 0x21c   : > { %v5758_v47 = vpop.f32.mrf.mxu3 }
 0x21d   : > { %2296 = vmatmul.bf16.gmra.mxu2 %v5195_v45 }
 0x21e   : > { %v2052_v42 = vpop.f32.mrf.mxu1 }
 0x21f   : > { %v2005_v30 = vpop.f32.mrf.mxu0  ;;  %v2053_v2 = vadd.f32 %v2052_v42, %v5572_v37 }
 0x220   : > { %v2006_v61 = vadd.f32 %v2005_v30, %v5547_v4  ;;  %v2101_v18 = vpop.f32.mrf.mxu2 }
 0x221   : > { %2247 = vmatmul.bf16.gmra.mxu1 %v6192_v31  ;;  %2345 = vmatmul.bf16.gmra.mxu3 %v6193_v26  ;;  %v2102_v28 = vadd.f32 %v2101_v18, %v2053_v2 }
 0x222   : > { %v2480_v20 = vmax.f32 %v2006_v61, 0.0 }
 0x224   : > { %v5765_v49 = vpack.c.bf16 %v2480_v20, %v2478_v50  ;;  %v2150_v53 = vpop.f32.mrf.mxu3  ;;  %v6195_v50 = vld [vmem:[#allocation36_spill] sm:$0xff] }
 0x225   : > { %v5767_v34 = vadd.f32 %v2150_v53, %v2102_v28  ;;  %v3765_v20 = vld [vmem:[%s6028_s4 + $0x70] sm:$0xff] }
 0x226   : > { %v2054_v27 = vpop.f32.mrf.mxu1  ;;  %2684 = vmatpush.bf16.msra.mxu3 %v3765_v20  ;;  %v6198_v20 = vld [vmem:[#allocation46_spill] sm:$0xff] }
 0x227   : > { %v2008_v45 = vpop.f32.mrf.mxu0  ;;  %v2055_v24 = vadd.f32 %v2054_v27, %v5572_v37 }
 0x228   : > { %v2009_v0 = vadd.f32 %v2008_v45, %v5565_v12  ;;  %v2103_v4 = vpop.f32.mrf.mxu2 }
 0x229   : > { %v5771_v54 = vadd.f32 %v2103_v4, %v2055_v24 }
 0x22a   : > { %2203 = vmatmul.bf16.gmra.mxu0 %v6194_v56  ;;  %v2482_v23 = vmax.f32 %v2009_v0, 0.0  ;;  %v6196_v56 = vld [vmem:[#allocation40_spill] sm:$0xff] }
 0x22c   : > { %v5774_v22 = vpop.f32.mrf.mxu3 }
 0x22d   : > { %2301 = vmatmul.bf16.gmra.mxu2 %v5240_v19 }
 0x22e   : > { %v2057_v16 = vpop.f32.mrf.mxu1 }
 0x22f   : > { %v2010_v41 = vpop.f32.mrf.mxu0  ;;  %v2058_v17 = vadd.f32 %v2057_v16, %v5572_v37 }
 0x230   : > { %v2011_v14 = vadd.f32 %v2010_v41, %v5574_v62  ;;  %v2106_v12 = vpop.f32.mrf.mxu2 }
 0x231   : > { %2252 = vmatmul.bf16.gmra.mxu1 %v5226_v25  ;;  %2350 = vmatmul.bf16.gmra.mxu3 %v5235_v52  ;;  %v2107_v39 = vadd.f32 %v2106_v12, %v2058_v17 }
 0x232   : > { %v2484_v29 = vmax.f32 %v2011_v14, 0.0 }
 0x234   : > { %v5784_v42 = vpack.c.bf16 %v2484_v29, %v2482_v23  ;;  %v2155_v19 = vpop.f32.mrf.mxu3 }
 0x235   : > { %v5786_v2 = vadd.f32 %v2155_v19, %v2107_v39  ;;  %v6197_v19 = vld [vmem:[#allocation44_spill] sm:$0xff] }
 0x236   : > { %v2059_v30 = vpop.f32.mrf.mxu1 }
 0x237   : > { %v2169_v61 = vpop.f32.mrf.mxu0  ;;  %v2060_v31 = vadd.f32 %v2059_v30, %v5572_v37 }
 0x238   : > { %v2170_v62 = vadd.f32 %v2169_v61, %v5595_v38  ;;  %v2108_v18 = vpop.f32.mrf.mxu2 }
 0x239   : > { %v5790_v25 = vadd.f32 %v2108_v18, %v2060_v31 }
 0x23a   : > { %2364 = vmatmul.bf16.vlgmr.msra.gmra.mxu0 %v6195_v50 }
 0x23d   : > { %2642 = vmatmul.bf16.vlgmr.msra.gmra.mxu2 %v5593_v32 }
 0x23e   : > { %v2218_v26 = vpop.f32.mrf.mxu1 }
 0x23f   : > { %v2219_v52 = vadd.f32 %v2218_v26, %v2170_v62  ;;  %v2171_v28 = vpop.f32.mrf.mxu0 }
 0x240   : > { %v2172_v53 = vadd.f32 %v2171_v28, %v5600_v11  ;;  %v2267_v37 = vpop.f32.mrf.mxu2 }
 0x241   : > { %2413 = vmatmul.bf16.vlgmr.msra.gmra.mxu1 %v5265_v58  ;;  %v5799_v38 = vadd.f32 %v2267_v37, %v2219_v52  ;;  %v3764_v58 = vld [vmem:[%s6028_s4 + $0x68] sm:$0xff] }
 0x242   : > { %2685 = vmatpush.bf16.msra.mxu3 %v3764_v58 }
 0x246   : > { %v2220_v27 = vpop.f32.mrf.mxu1 }
 0x247   : > { %v2221_v45 = vadd.f32 %v2220_v27, %v2172_v53  ;;  %v2174_v24 = vpop.f32.mrf.mxu0 }
 0x248   : > { %v2175_v0 = vadd.f32 %v2174_v24, %v5621_v8  ;;  %v2269_v32 = vpop.f32.mrf.mxu2 }
 0x249   : > { %v5802_v4 = vadd.f32 %v2269_v32, %v2221_v45 }
 0x24a   : > { %2369 = vmatmul.bf16.gmra.mxu0 %v6196_v56 }
 0x24d   : > { %2647 = vmatmul.bf16.gmra.mxu2 %v5619_v6 }
 0x24e   : > { %v2223_v16 = vpop.f32.mrf.mxu1 }
 0x24f   : > { %v2224_v11 = vadd.f32 %v2223_v16, %v2175_v0  ;;  %v2176_v41 = vpop.f32.mrf.mxu0 }
 0x250   : > { %v2177_v55 = vadd.f32 %v2176_v41, %v5626_v33  ;;  %v2272_v17 = vpop.f32.mrf.mxu2  ;;  %v2143_v41 = vadd.f32 %v5718_v9, %v5712_v63  ;;  %v6200_v9 = vld [vmem:[#allocation54_spill] sm:$0xff] }
 0x251   : > { %2418 = vmatmul.bf16.gmra.mxu1 %v5291_v10  ;;  %v5811_v8 = vadd.f32 %v2272_v17, %v2224_v11  ;;  %v3763_v10 = vld [vmem:[%s6028_s4 + $0x60] sm:$0xff] }
 0x252   : > { %2686 = vmatpush.bf16.msra.mxu3 %v3763_v10  ;;  %v6199_v11 = vld [vmem:[#allocation50_spill] sm:$0xff] }
 0x256   : > { %v2225_v14 = vpop.f32.mrf.mxu1 }
 0x257   : > { %v2226_v12 = vadd.f32 %v2225_v14, %v2177_v55  ;;  %v2179_v23 = vpop.f32.mrf.mxu0  ;;  %v3761_v55 = vld [vmem:[%s6028_s4 + $0x50] sm:$0xff] }
 0x258   : > { %v2180_v39 = vadd.f32 %v2179_v23, %v5647_v44  ;;  %v2274_v6 = vpop.f32.mrf.mxu2  ;;  %v2148_v23 = vadd.f32 %v5758_v47, %v5752_v48  ;;  %v6201_v47 = vld [vmem:[#allocation57_spill] sm:$0xff] }
 0x259   : > { %v5814_v29 = vadd.f32 %v2274_v6, %v2226_v12 }
 0x25a   : > { %2374 = vmatmul.bf16.gmra.mxu0 %v6197_v19 }
 0x25d   : > { %2652 = vmatmul.bf16.gmra.mxu2 %v5645_v57 }
 0x25e   : > { %v2228_v30 = vpop.f32.mrf.mxu1 }
 0x25f   : > { %v2229_v33 = vadd.f32 %v2228_v30, %v2180_v39  ;;  %v2181_v61 = vpop.f32.mrf.mxu0 }
 0x260   : > { %v2182_v31 = vadd.f32 %v2181_v61, %v5652_v51  ;;  %v2277_v62 = vpop.f32.mrf.mxu2 }
 0x261   : > { %2423 = vmatmul.bf16.gmra.mxu1 %v5317_v36  ;;  %v5823_v44 = vadd.f32 %v2277_v62, %v2229_v33  ;;  %v3762_v36 = vld [vmem:[%s6028_s4 + $0x58] sm:$0xff] }
 0x262   : > { %2687 = vmatpush.bf16.msra.mxu3 %v3762_v36 }
 0x266   : > { %v2230_v18 = vpop.f32.mrf.mxu1  ;;  %2688 = vmatpush.bf16.msra.mxu3 %v3761_v55 }
 0x267   : > { %v2231_v50 = vadd.f32 %v2230_v18, %v2182_v31  ;;  %v2184_v26 = vpop.f32.mrf.mxu0 }
 0x268   : > { %v2185_v52 = vadd.f32 %v2184_v26, %v5673_v3  ;;  %v2279_v57 = vpop.f32.mrf.mxu2  ;;  %v3759_v26 = vld [vmem:[%s6028_s4 + $0x40] sm:$0xff] }
 0x269   : > { %v5826_v28 = vadd.f32 %v2279_v57, %v2231_v50 }
 0x26a   : > { %2379 = vmatmul.bf16.gmra.mxu0 %v6198_v20 }
 0x26d   : > { %2657 = vmatmul.bf16.gmra.mxu2 %v5671_v35 }
 0x26e   : > { %v2233_v53 = vpop.f32.mrf.mxu1 }
 0x26f   : > { %v2234_v51 = vadd.f32 %v2233_v53, %v2185_v52  ;;  %v2186_v37 = vpop.f32.mrf.mxu0 }
 0x270   : > { %v2187_v27 = vadd.f32 %v2186_v37, %v5678_v13  ;;  %v2282_v45 = vpop.f32.mrf.mxu2 }
 0x271   : > { %2428 = vmatmul.bf16.gmra.mxu1 %v5343_v7  ;;  %v5835_v3 = vadd.f32 %v2282_v45, %v2234_v51 }
 0x276   : > { %v2235_v24 = vpop.f32.mrf.mxu1 }
 0x277   : > { %v2236_v0 = vadd.f32 %v2235_v24, %v2187_v27  ;;  %v2189_v32 = vpop.f32.mrf.mxu0 }
 0x278   : > { %v2190_v56 = vadd.f32 %v2189_v32, %v5705_v1  ;;  %v2284_v35 = vpop.f32.mrf.mxu2 }
 0x279   : > { %v5838_v16 = vadd.f32 %v2284_v35, %v2236_v0 }
 0x27a   : > { %2384 = vmatmul.bf16.gmra.mxu0 %v6199_v11 }
 0x27d   : > { %2662 = vmatmul.bf16.gmra.mxu2 %v5703_v60  ;;  %v2157_v60 = vpop.f32.mrf.mxu3 }
 0x27e   : > { %v2238_v13 = vpop.f32.mrf.mxu1 }
 0x27f   : > { %v5844_v7 = vadd.f32 %v2238_v13, %v2190_v56  ;;  %v2191_v58 = vpop.f32.mrf.mxu0 }
 0x280   : > { %v2192_v17 = vadd.f32 %v2191_v58, %v2143_v41 }
 0x281   : > { %2433 = vmatmul.bf16.gmra.mxu1 %v5369_v43  ;;  %v3760_v43 = vld [vmem:[%s6028_s4 + $0x48] sm:$0xff] }
 0x282   : > { %2689 = vmatpush.bf16.msra.mxu3 %v3760_v43 }
 0x285   : > { %v2316_v33 = vpop.f32.mrf.mxu3 }
 0x286   : > { %v2240_v1 = vpop.f32.mrf.mxu1  ;;  %2690 = vmatpush.bf16.msra.mxu3 %v3759_v26 }
 0x287   : > { %v5850_v14 = vadd.f32 %v2240_v1, %v2192_v17  ;;  %v2194_v12 = vpop.f32.mrf.mxu0 }
 0x288   : > { %v2195_v63 = vadd.f32 %v2194_v12, %v5745_v15 }
 0x28a   : > { %2389 = vmatmul.bf16.gmra.mxu0 %v6200_v9 }
 0x28d   : > { %2667 = vmatmul.bf16.gmra.mxu2 %v5743_v46  ;;  %v2153_v46 = vadd.f32 %v5774_v22, %v5771_v54  ;;  %v2318_v50 = vpop.f32.mrf.mxu3  ;;  %v2158_v22 = vadd.f32 %v2157_v60, %v5790_v25 }
 0x28e   : > { %v2243_v39 = vpop.f32.mrf.mxu1  ;;  %v2319_v25 = vadd.f32 %v2318_v50, %v5802_v4 }
 0x28f   : > { %v5857_v6 = vadd.f32 %v2243_v39, %v2195_v63  ;;  %v2196_v19 = vpop.f32.mrf.mxu0 }
 0x290   : > { %v2197_v30 = vadd.f32 %v2196_v19, %v2148_v23 }
 0x291   : > { %2438 = vmatmul.bf16.gmra.mxu1 %v5419_v5 }
 0x296   : > { %v2245_v15 = vpop.f32.mrf.mxu1 }
 0x297   : > { %v5863_v61 = vadd.f32 %v2245_v15, %v2197_v30  ;;  %v2199_v10 = vpop.f32.mrf.mxu0 }
 0x298   : > { %v2200_v48 = vadd.f32 %v2199_v10, %v5767_v34  ;;  %v2287_v10 = vpop.f32.mrf.mxu2 }
 0x29a   : > { %2394 = vmatmul.bf16.gmra.mxu0 %v6201_v47 }
 0x29d   : > { %2672 = vmatmul.bf16.gmra.mxu2 %v5765_v49  ;;  %v2321_v49 = vpop.f32.mrf.mxu3 }
 0x29e   : > { %v2248_v31 = vpop.f32.mrf.mxu1  ;;  %v2322_v1 = vadd.f32 %v2321_v49, %v5811_v8 }
 0x29f   : > { %v5870_v62 = vadd.f32 %v2248_v31, %v2200_v48  ;;  %v2201_v18 = vpop.f32.mrf.mxu0 }
 0x2a0   : > { %v2202_v5 = vadd.f32 %v2201_v18, %v2153_v46 }
 0x2a1   : > { %2443 = vmatmul.bf16.gmra.mxu1 %v5493_v40 }
 0x2a5   : > { %v2323_v37 = vpop.f32.mrf.mxu3 }
 0x2a6   : > { %v2250_v34 = vpop.f32.mrf.mxu1 }
 0x2a7   : > { %v5876_v52 = vadd.f32 %v2250_v34, %v2202_v5  ;;  %v2204_v57 = vpop.f32.mrf.mxu0 }
 0x2a8   : > { %v2205_v54 = vadd.f32 %v2204_v57, %v5786_v2  ;;  %v2289_v57 = vpop.f32.mrf.mxu2 }
 0x2aa   : > { %2399 = vmatmul.bf16.gmra.mxu0 %v5244_v21  ;;  %v2317_v21 = vadd.f32 %v2316_v33, %v5799_v38  ;;  %v2324_v38 = vadd.f32 %v2323_v37, %v5814_v29 }
 0x2ad   : > { %2677 = vmatmul.bf16.gmra.mxu2 %v5784_v42  ;;  %v2326_v24 = vpop.f32.mrf.mxu3 }
 0x2ae   : > { %v2253_v20 = vpop.f32.mrf.mxu1  ;;  %v2327_v47 = vadd.f32 %v2326_v24, %v5823_v44 }
 0x2af   : > { %v5882_v40 = vadd.f32 %v2253_v20, %v2205_v54  ;;  %v2206_v53 = vpop.f32.mrf.mxu0 }
 0x2b0   : > { %v2207_v51 = vadd.f32 %v2206_v53, %v2158_v22 }
 0x2b1   : > { %2448 = vmatmul.bf16.gmra.mxu1 %v5543_v59 }
 0x2b5   : > { %v2328_v13 = vpop.f32.mrf.mxu3 }
 0x2b6   : > { %v2255_v36 = vpop.f32.mrf.mxu1  ;;  %v2329_v46 = vadd.f32 %v2328_v13, %v5826_v28 }
 0x2b7   : > { %v5885_v27 = vadd.f32 %v2255_v36, %v2207_v51  ;;  %v2365_v45 = vpop.f32.mrf.mxu0  ;;  %v2292_v36 = vpop.f32.mrf.mxu2 }
 0x2b8   : > { %v2366_v32 = vadd.f32 %v2365_v45, %v2317_v21 }
 0x2bd   : > { %v2331_v9 = vpop.f32.mrf.mxu3 }
 0x2be   : > { %v2414_v2 = vpop.f32.mrf.mxu1  ;;  %v2332_v53 = vadd.f32 %v2331_v9, %v5835_v3  ;;  %v2290_v3 = vadd.f32 %v2289_v57, %v5850_v14 }
 0x2bf   : > { %v2367_v0 = vpop.f32.mrf.mxu0  ;;  %v2415_v56 = vadd.f32 %v2414_v2, %v2366_v32 }
 0x2c0   : > { %v2368_v42 = vadd.f32 %v2367_v0, %v2319_v25 }
 0x2c1   : > { %v2455_v59 = vmax.f32 %v2415_v56, 0.0 }
 0x2c5   : > { %v2333_v33 = vpop.f32.mrf.mxu3 }
 0x2c6   : > { %v2416_v35 = vpop.f32.mrf.mxu1  ;;  %v2334_v44 = vadd.f32 %v2333_v33, %v5838_v16 }
 0x2c7   : > { %v2417_v11 = vadd.f32 %v2416_v35, %v2368_v42  ;;  %v2370_v41 = vpop.f32.mrf.mxu0  ;;  %v2288_v42 = vadd.f32 %v2287_v10, %v5844_v7 }
 0x2c8   : > { %v2371_v63 = vadd.f32 %v2370_v41, %v2322_v1 }
 0x2c9   : > { %v2457_v58 = vmax.f32 %v2417_v11, 0.0  ;;  %v2294_v11 = vpop.f32.mrf.mxu2 }
 0x2ca   : > { %v2295_v14 = vadd.f32 %v2294_v11, %v5863_v61 }
 0x2cb   : > { %v2487_v55 = vpack.c.bf16 %v2457_v58, %v2455_v59 }
 0x2cd   : > { %2691 = vmatmul.bf16.vlgmr.msra.gmra.mxu3 %v2487_v55  ;;  %v2336_v50 = vpop.f32.mrf.mxu3 }
 0x2ce   : > { %v2419_v17 = vpop.f32.mrf.mxu1  ;;  %v2337_v16 = vadd.f32 %v2336_v50, %v2288_v42 }
 0x2cf   : > { %v2372_v12 = vpop.f32.mrf.mxu0  ;;  %v2420_v60 = vadd.f32 %v2419_v17, %v2371_v63 }
 0x2d0   : > { %v2373_v4 = vadd.f32 %v2372_v12, %v2324_v38 }
 0x2d1   : > { %v2459_v43 = vmax.f32 %v2420_v60, 0.0  ;;  %v2297_v12 = vpop.f32.mrf.mxu2  ;;  %v2293_v60 = vadd.f32 %v2292_v36, %v5857_v6 }
 0x2d2   : > { %v2298_v50 = vadd.f32 %v2297_v12, %v5870_v62 }
 0x2d5   : > { %v2338_v37 = vpop.f32.mrf.mxu3 }
 0x2d6   : > { %v2421_v23 = vpop.f32.mrf.mxu1  ;;  %v2339_v59 = vadd.f32 %v2338_v37, %v2290_v3 }
 0x2d7   : > { %v2422_v39 = vadd.f32 %v2421_v23, %v2373_v4  ;;  %v2375_v19 = vpop.f32.mrf.mxu0 }
 0x2d8   : > { %v2376_v29 = vadd.f32 %v2375_v19, %v2327_v47 }
 0x2d9   : > { %v2461_v30 = vmax.f32 %v2422_v39, 0.0 }
 0x2db   : > { %v2489_v15 = vpack.c.bf16 %v2461_v30, %v2459_v43 }
 0x2dd   : > { %2696 = vmatmul.bf16.gmra.mxu3 %v2489_v15  ;;  %v2341_v56 = vpop.f32.mrf.mxu3  ;;  %v2299_v15 = vpop.f32.mrf.mxu2 }
 0x2de   : > { %v2424_v48 = vpop.f32.mrf.mxu1  ;;  %v2342_v19 = vadd.f32 %v2341_v56, %v2293_v60 }
 0x2df   : > { %v2377_v8 = vpop.f32.mrf.mxu0  ;;  %v2425_v18 = vadd.f32 %v2424_v48, %v2376_v29 }
 0x2e0   : > { %v2378_v31 = vadd.f32 %v2377_v8, %v2329_v46 }
 0x2e1   : > { %v2463_v54 = vmax.f32 %v2425_v18, 0.0 }
 0x2e5   : > { %v2343_v17 = vpop.f32.mrf.mxu3  ;;  %v2302_v6 = vpop.f32.mrf.mxu2 }
 0x2e6   : > { %v2426_v5 = vpop.f32.mrf.mxu1  ;;  %v2344_v33 = vadd.f32 %v2343_v17, %v2295_v14  ;;  %v2303_v62 = vadd.f32 %v2302_v6, %v5882_v40  ;;  %v3844_v14 = vld [vmem:[%s4280_s30 + $0x10] sm:$0xff]  ;;  %v3846_v6 = vld [vmem:[%s4280_s30 + $0x20] sm:$0xff] }
 0x2e7   : > { %v2427_v26 = vadd.f32 %v2426_v5, %v2378_v31  ;;  %v2380_v34 = vpop.f32.mrf.mxu0 }
 0x2e8   : > { %v2381_v28 = vadd.f32 %v2380_v34, %v2332_v53 }
 0x2e9   : > { %v2465_v49 = vmax.f32 %v2427_v26, 0.0  ;;  %v2300_v26 = vadd.f32 %v2299_v15, %v5876_v52 }
 0x2eb   : > { %v2491_v22 = vpack.c.bf16 %v2465_v49, %v2463_v54 }
 0x2ed   : > { %2701 = vmatmul.bf16.gmra.mxu3 %v2491_v22  ;;  %v2346_v43 = vpop.f32.mrf.mxu3 }
 0x2ee   : > { %v2429_v20 = vpop.f32.mrf.mxu1  ;;  %v2347_v57 = vadd.f32 %v2346_v43, %v2298_v50  ;;  %v2756_v50 = vrot.slane %v3846_v6, 4 }
 0x2ef   : > { %v2382_v51 = vpop.f32.mrf.mxu0  ;;  %v2430_v2 = vadd.f32 %v2429_v20, %v2381_v28 }
 0x2f0   : > { %v2383_v45 = vadd.f32 %v2382_v51, %v2334_v44  ;;  %v2304_v51 = vpop.f32.mrf.mxu2 }
 0x2f1   : > { %v2467_v25 = vmax.f32 %v2430_v2, 0.0  ;;  %v2305_v52 = vadd.f32 %v2304_v51, %v5885_v27 }
 0x2f5   : > { %v2348_v31 = vpop.f32.mrf.mxu3 }
 0x2f6   : > { %v2431_v21 = vpop.f32.mrf.mxu1  ;;  %v2349_v49 = vadd.f32 %v2348_v31, %v2300_v26 }
 0x2f7   : > { %v2432_v24 = vadd.f32 %v2431_v21, %v2383_v45  ;;  %v2385_v0 = vpop.f32.mrf.mxu0 }
 0x2f8   : > { %v2386_v58 = vadd.f32 %v2385_v0, %v2337_v16  ;;  %v2643_v0 = vpop.f32.mrf.mxu2 }
 0x2f9   : > { %v2469_v32 = vmax.f32 %v2432_v24, 0.0 }
 0x2fb   : > { %v2493_v35 = vpack.c.bf16 %v2469_v32, %v2467_v25 }
 0x2fd   : > { %2706 = vmatmul.bf16.gmra.mxu3 %v2493_v35  ;;  %v2351_v20 = vpop.f32.mrf.mxu3 }
 0x2fe   : > { %v2434_v41 = vpop.f32.mrf.mxu1  ;;  %v2352_v32 = vadd.f32 %v2351_v20, %v2303_v62 }
 0x2ff   : > { %v2387_v13 = vpop.f32.mrf.mxu0  ;;  %v2435_v1 = vadd.f32 %v2434_v41, %v2386_v58 }
 0x300   : > { %v2388_v55 = vadd.f32 %v2387_v13, %v2339_v59  ;;  %v2645_v40 = vpop.f32.mrf.mxu2 }
 0x301   : > { %v2471_v4 = vmax.f32 %v2435_v1, 0.0  ;;  %v3842_v1 = vld [vmem:[%s4280_s30] sm:$0xff] }
 0x302   : > { %v2749_v12 = vrot.slane %v3842_v1, 4 }
 0x305   : > { %v2353_v24 = vpop.f32.mrf.mxu3 }
 0x306   : > { %v2436_v38 = vpop.f32.mrf.mxu1  ;;  %v2354_v56 = vadd.f32 %v2353_v24, %v2305_v52 }
 0x307   : > { %v2437_v63 = vadd.f32 %v2436_v38, %v2388_v55  ;;  %v2390_v9 = vpop.f32.mrf.mxu0  ;;  %v5906_v55 = vld [vmem:[%s6029_s5] ss:$0 sm:$0xff]  ;;  %v3843_v38 = vld [vmem:[%s4280_s30 + $0x8] sm:$0xff] }
 0x308   : > { %v2391_v10 = vadd.f32 %v2390_v9, %v2342_v19  ;;  %v2648_v58 = vpop.f32.mrf.mxu2  ;;  %v2644_v9 = vadd.f32 %v5906_v55, %v2643_v0  ;;  %v2646_v43 = vadd.f32 %v5906_v55, %v2645_v40 }
 0x309   : > { %v2473_v7 = vmax.f32 %v2437_v63, 0.0  ;;  %v2750_v63 = vrot.slane %v3843_v38, 4 }
 0x30b   : > { %v2495_v23 = vpack.c.bf16 %v2473_v7, %v2471_v4  ;;  %v2751_v7 = vsel %vm2748_vm7, %v2749_v12, %v2750_v63  ;;  %v3851_v12 = vld [vmem:[%s4280_s30 + $0x48] sm:$0xff] }
 0x30c   : > { %v2766_v38 = vrot.slane %v3851_v12, 4 }
 0x30d   : > { %2711 = vmatmul.bf16.gmra.mxu3 %v2495_v23 }
 0x30e   : > { %v2439_v39 = vpop.f32.mrf.mxu1 }
 0x30f   : > { %v2392_v30 = vpop.f32.mrf.mxu0  ;;  %v2440_v47 = vadd.f32 %v2439_v39, %v2391_v10  ;;  %v2752_v39 = vrot.slane %v3844_v14, 4  ;;  %v3852_v14 = vld [vmem:[%s4280_s30 + $0x50] sm:$0xff] }
 0x310   : > { %v2393_v48 = vadd.f32 %v2392_v30, %v2344_v33  ;;  %v2650_v17 = vpop.f32.mrf.mxu2 }
 0x311   : > { %v2475_v18 = vmax.f32 %v2440_v47, 0.0  ;;  %v2753_v15 = vsel %vm2748_vm7, %v2750_v63, %v2752_v39 }
 0x316   : > { %v2441_v8 = vpop.f32.mrf.mxu1 }
 0x317   : > { %v2442_v46 = vadd.f32 %v2441_v8, %v2393_v48  ;;  %v2395_v29 = vpop.f32.mrf.mxu0  ;;  %v3845_v48 = vld [vmem:[%s4280_s30 + $0x18] sm:$0xff]  ;;  %v2649_v8 = vadd.f32 %v5906_v55, %v2648_v58 }
 0x318   : > { %v2396_v22 = vadd.f32 %v2395_v29, %v2347_v57  ;;  %v2653_v19 = vpop.f32.mrf.mxu2  ;;  %v2754_v47 = vrot.slane %v3845_v48, 4  ;;  %v3853_v48 = vld [vmem:[%s4280_s30 + $0x58] sm:$0xff] }
 0x319   : > { %v2477_v5 = vmax.f32 %v2442_v46, 0.0 }
 0x31a   : > { %v2755_v31 = vsel %vm2748_vm7, %v2752_v39, %v2754_v47  ;;  %v2768_v39 = vrot.slane %v3852_v14, 4 }
 0x31b   : > { %v2497_v61 = vpack.c.bf16 %v2477_v5, %v2475_v18 }
 0x31d   : > { %2716 = vmatmul.bf16.gmra.mxu3 %v2497_v61  ;;  %v2651_v61 = vadd.f32 %v5906_v55, %v2650_v17 }
 0x31e   : > { %v2444_v34 = vpop.f32.mrf.mxu1 }
 0x31f   : > { %v2397_v54 = vpop.f32.mrf.mxu0  ;;  %v2445_v44 = vadd.f32 %v2444_v34, %v2396_v22  ;;  %v2757_v34 = vsel %vm2748_vm7, %v2754_v47, %v2756_v50  ;;  %v3847_v22 = vld [vmem:[%s4280_s30 + $0x28] sm:$0xff]  ;;  %v2770_v47 = vrot.slane %v3853_v48, 4 }
 0x320   : > { %v2398_v53 = vadd.f32 %v2397_v54, %v2349_v49  ;;  %v2655_v46 = vpop.f32.mrf.mxu2  ;;  %v2758_v20 = vrot.slane %v3847_v22, 4 }
 0x321   : > { %v2479_v45 = vmax.f32 %v2445_v44, 0.0  ;;  %v2656_v62 = vadd.f32 %v5906_v55, %v2655_v46 }
 0x322   : > { %v2759_v44 = vsel %vm2748_vm7, %v2756_v50, %v2758_v20 }
 0x326   : > { %v2446_v37 = vpop.f32.mrf.mxu1 }
 0x327   : > { %v2447_v28 = vadd.f32 %v2446_v37, %v2398_v53  ;;  %v2400_v36 = vpop.f32.mrf.mxu0  ;;  %v2654_v53 = vadd.f32 %v5906_v55, %v2653_v19 }
 0x328   : > { %v2401_v35 = vadd.f32 %v2400_v36, %v2352_v32  ;;  %v2658_v54 = vpop.f32.mrf.mxu2 }
 0x329   : > { %v2481_v2 = vmax.f32 %v2447_v28, 0.0 }
 0x32b   : > { %v2499_v21 = vpack.c.bf16 %v2481_v2, %v2479_v45  ;;  %v3848_v45 = vld [vmem:[%s4280_s30 + $0x30] sm:$0xff] }
 0x32c   : > { %v2760_v2 = vrot.slane %v3848_v45, 4 }
 0x32d   : > { %2721 = vmatmul.bf16.gmra.mxu3 %v2499_v21 }
 0x32e   : > { %v2449_v25 = vpop.f32.mrf.mxu1  ;;  %v2761_v52 = vsel %vm2748_vm7, %v2758_v20, %v2760_v2 }
 0x32f   : > { %v2402_v42 = vpop.f32.mrf.mxu0  ;;  %v2450_v3 = vadd.f32 %v2449_v25, %v2401_v35  ;;  %v3849_v25 = vld [vmem:[%s4280_s30 + $0x38] sm:$0xff] }
 0x330   : > { %v2403_v11 = vadd.f32 %v2402_v42, %v2354_v56  ;;  %v2660_v36 = vpop.f32.mrf.mxu2  ;;  %v2762_v32 = vrot.slane %v3849_v25, 4  ;;  %v2659_v56 = vadd.f32 %v5906_v55, %v2658_v54  ;;  %v3857_v25 = vld [vmem:[%s4280_s30 + $0x78] sm:$0xff] }
 0x331   : > { %v2483_v13 = vmax.f32 %v2450_v3, 0.0 }
 0x336   : > { %v2451_v41 = vpop.f32.mrf.mxu1 }
 0x337   : > { %v2452_v16 = vadd.f32 %v2451_v41, %v2403_v11  ;;  %v2763_v11 = vsel %vm2748_vm7, %v2760_v2, %v2762_v32 }
 0x338   : > { %v2663_v42 = vpop.f32.mrf.mxu2 }
 0x339   : > { %v2485_v59 = vmax.f32 %v2452_v16, 0.0  ;;  %v3850_v16 = vld [vmem:[%s4280_s30 + $0x40] sm:$0xff]  ;;  %v2664_v63 = vadd.f32 %v5906_v55, %v2663_v42 }
 0x33a   : > { %v2764_v40 = vrot.slane %v3850_v16, 4  ;;  %v3858_v16 = vld [vmem:[%s4652_s17] sm:$0xff]  ;;  %s3875_s17 = scalar_lea.hbm %s3874_s20, 128 }
 0x33b   : > { %v2501_v27 = vpack.c.bf16 %v2485_v59, %v2483_v13  ;;  %v2661_v13 = vadd.f32 %v5906_v55, %v2660_v36  ;;  %v3856_v36 = vld [vmem:[%s4280_s30 + $0x70] sm:$0xff]  ;;  %p3876_p1 = scmp.ne.s32.totalorder %s3874_s20, %s3875_s17  ;;  %p3881_p6 = scmp.lt.s32.totalorder %s3879_s12, %s3875_s17 }
 0x33c   : > { %v2765_v58 = vsel %vm2748_vm7, %v2762_v32, %v2764_v40  ;;  %v2776_v45 = vrot.slane %v3856_v36, 4  ;;  %v2778_v32 = vrot.slane %v3857_v25, 4 }
 0x33d   : > { %2726 = vmatmul.bf16.gmra.mxu3 %v2501_v27  ;;  %p3877_p2 = pnand %p3876_p1, %p4043_p3  ;;  %p3882_p7 = por %p3881_p6, %p3880_p5 }
 0x33f   : > { %p3878_p4 = pneg %p3877_p2 }
 0x340   : > { %v2665_v59 = vpop.f32.mrf.mxu2 }
 0x341   : > { %v2666_v19 = vadd.f32 %v5906_v55, %v2665_v59  ;;  %p3883_p9 = pnand %p3882_p7, %p3878_p4 }
 0x350   : > { %v2692_v4 = vpop.f32.mrf.mxu3 }
 0x351   : > { %v2693_v60 = vadd.f32 %v2692_v4, %v2644_v9  ;;  %v2767_v4 = vsel %vm2748_vm7, %v2764_v40, %v2766_v38  ;;  %v2797_v40 = vrot.slane %v3858_v16, 4 }
 0x353   : > { %v2800_v23 = vadd.f32 %v2751_v7, %v2693_v60  ;;  %v2668_v60 = vpop.f32.mrf.mxu2 }
 0x355   : > { %2816 = vst [vmem:[%s5916_s13] sm:$0xff] %v2800_v23 }
 0x358   : > { %v2694_v30 = vpop.f32.mrf.mxu3 }
 0x359   : > { %v2695_v33 = vadd.f32 %v2694_v30, %v2646_v43  ;;  %v2769_v30 = vsel %vm2748_vm7, %v2766_v38, %v2768_v39 }
 0x35b   : > { %v2801_v10 = vadd.f32 %v2753_v15, %v2695_v33 }
 0x35d   : > { %2817 = vst [vmem:[%s5916_s13 + $0x8] sm:$0xff] %v2801_v10  ;;  %v2670_v10 = vpop.f32.mrf.mxu2 }
 0x360   : > { %v2697_v29 = vpop.f32.mrf.mxu3 }
 0x361   : > { %v2698_v18 = vadd.f32 %v2697_v29, %v2649_v8  ;;  %v2669_v8 = vadd.f32 %v5906_v55, %v2668_v60  ;;  %v2771_v29 = vsel %vm2748_vm7, %v2768_v39, %v2770_v47 }
 0x363   : > { %v2802_v5 = vadd.f32 %v2755_v31, %v2698_v18 }
 0x365   : > { %2818 = vst [vmem:[%s5916_s13 + $0x10] sm:$0xff] %v2802_v5  ;;  %v3854_v5 = vld [vmem:[%s4280_s30 + $0x60] sm:$0xff]  ;;  %v2673_v50 = vpop.f32.mrf.mxu2 }
 0x366   : > { %v2772_v6 = vrot.slane %v3854_v5, 4  ;;  %v2674_v20 = vadd.f32 %v5906_v55, %v2673_v50 }
 0x368   : > { %v2699_v26 = vpop.f32.mrf.mxu3 }
 0x369   : > { %v2700_v57 = vadd.f32 %v2699_v26, %v2651_v61  ;;  %v2671_v61 = vadd.f32 %v5906_v55, %v2670_v10 }
 0x36b   : > { %v2803_v49 = vadd.f32 %v2757_v34, %v2700_v57  ;;  %v2773_v34 = vsel %vm2748_vm7, %v2770_v47, %v2772_v6 }
 0x36d   : > { %2819 = vst [vmem:[%s5916_s13 + $0x18] sm:$0xff] %v2803_v49  ;;  %v3855_v49 = vld [vmem:[%s4280_s30 + $0x68] sm:$0xff]  ;;  %s2847_s30 = sshll.u32 %s5916_s13, 4  ;;  %s2848_s30 = int_to_ptr.vmem [resolvable:$true] %s2847_s30 }
 0x36e   : > { %v2774_v22 = vrot.slane %v3855_v49, 4 }
 0x370   : > { %v2702_v51 = vpop.f32.mrf.mxu3 }
 0x371   : > { %v2703_v37 = vadd.f32 %v2702_v51, %v2654_v53  ;;  %v2675_v53 = vpop.f32.mrf.mxu2 }
 0x372   : > { %v2676_v2 = vadd.f32 %v5906_v55, %v2675_v53 }
 0x373   : > { %v2804_v28 = vadd.f32 %v2759_v44, %v2703_v37  ;;  %v2775_v44 = vsel %vm2748_vm7, %v2772_v6, %v2774_v22 }
 0x375   : > { %2820 = vst [vmem:[%s5916_s13 + $0x20] sm:$0xff] %v2804_v28 }
 0x378   : > { %v2704_v21 = vpop.f32.mrf.mxu3 }
 0x379   : > { %v2705_v24 = vadd.f32 %v2704_v21, %v2656_v62  ;;  %v2777_v21 = vsel %vm2748_vm7, %v2774_v22, %v2776_v45 }
 0x37b   : > { %v2805_v0 = vadd.f32 %v2761_v52, %v2705_v24  ;;  %v2678_v24 = vpop.f32.mrf.mxu2 }
 0x37c   : > { %v2679_v42 = vadd.f32 %v5906_v55, %v2678_v24 }
 0x37d   : > { %2821 = vst [vmem:[%s5916_s13 + $0x28] sm:$0xff] %v2805_v0 }
 0x380   : > { %v2707_v35 = vpop.f32.mrf.mxu3 }
 0x381   : > { %v2708_v3 = vadd.f32 %v2707_v35, %v2659_v56  ;;  %v2779_v35 = vsel %vm2748_vm7, %v2776_v45, %v2778_v32 }
 0x383   : > { %v2806_v41 = vadd.f32 %v2763_v11, %v2708_v3 }
 0x385   : > { %2822 = vst [vmem:[%s5916_s13 + $0x30] sm:$0xff] %v2806_v41  ;;  %v2680_v41 = vpop.f32.mrf.mxu2 }
 0x388   : > { %v2709_v27 = vpop.f32.mrf.mxu3 }
 0x389   : > { %v2710_v17 = vadd.f32 %v2709_v27, %v2661_v13  ;;  %v2681_v13 = vadd.f32 %v5906_v55, %v2680_v41  ;;  %v2799_v27 = vsel %vm2748_vm7, %v2778_v32, %v2797_v40 }
 0x38b   : > { %v2807_v1 = vadd.f32 %v2765_v58, %v2710_v17 }
 0x38d   : > { %2823 = vst [vmem:[%s5916_s13 + $0x38] sm:$0xff] %v2807_v1 }
 0x390   : > { %v2712_v9 = vpop.f32.mrf.mxu3 }
 0x391   : > { %v2713_v7 = vadd.f32 %v2712_v9, %v2664_v63 }
 0x393   : > { %v2808_v23 = vadd.f32 %v2767_v4, %v2713_v7 }
 0x395   : > { %2824 = vst [vmem:[%s5916_s13 + $0x40] sm:$0xff] %v2808_v23 }
 0x398   : > { %v2714_v43 = vpop.f32.mrf.mxu3 }
 0x399   : > { %v2715_v15 = vadd.f32 %v2714_v43, %v2666_v19 }
 0x39b   : > { %v2809_v33 = vadd.f32 %v2769_v30, %v2715_v15 }
 0x39d   : > { %2825 = vst [vmem:[%s5916_s13 + $0x48] sm:$0xff] %v2809_v33 }
 0x3a0   : > { %v2717_v46 = vpop.f32.mrf.mxu3 }
 0x3a1   : > { %v2718_v31 = vadd.f32 %v2717_v46, %v2669_v8 }
 0x3a3   : > { %v2810_v18 = vadd.f32 %v2771_v29, %v2718_v31 }
 0x3a5   : > { %2826 = vst [vmem:[%s5916_s13 + $0x50] sm:$0xff] %v2810_v18 }
 0x3a8   : > { %v2719_v26 = vpop.f32.mrf.mxu3 }
 0x3a9   : > { %v2720_v57 = vadd.f32 %v2719_v26, %v2671_v61 }
 0x3ab   : > { %v2811_v54 = vadd.f32 %v2773_v34, %v2720_v57 }
 0x3ad   : > { %2827 = vst [vmem:[%s5916_s13 + $0x58] sm:$0xff] %v2811_v54 }
 0x3b0   : > { %v2722_v51 = vpop.f32.mrf.mxu3 }
 0x3b1   : > { %v2723_v37 = vadd.f32 %v2722_v51, %v2674_v20 }
 0x3b3   : > { %v2812_v28 = vadd.f32 %v2775_v44, %v2723_v37 }
 0x3b5   : > { %2828 = vst [vmem:[%s5916_s13 + $0x60] sm:$0xff] %v2812_v28 }
 0x3b8   : > { %v2724_v62 = vpop.f32.mrf.mxu3 }
 0x3b9   : > { %v2725_v52 = vadd.f32 %v2724_v62, %v2676_v2 }
 0x3bb   : > { %v2813_v0 = vadd.f32 %v2777_v21, %v2725_v52 }
 0x3bd   : > { %2829 = vst [vmem:[%s5916_s13 + $0x68] sm:$0xff] %v2813_v0 }
 0x3c0   : > { %v2727_v56 = vpop.f32.mrf.mxu3 }
 0x3c1   : > { %v2728_v11 = vadd.f32 %v2727_v56, %v2679_v42 }
 0x3c3   : > { %v2814_v3 = vadd.f32 %v2779_v35, %v2728_v11 }
 0x3c5   : > { %2830 = vst [vmem:[%s5916_s13 + $0x70] sm:$0xff] %v2814_v3 }
 0x3c8   : > { %v2729_v59 = vpop.f32.mrf.mxu3 }
 0x3c9   : > { %v2730_v58 = vadd.f32 %v2729_v59, %v2681_v13 }
 0x3cb   : > { %v2815_v17 = vadd.f32 %v2799_v27, %v2730_v58 }
 0x3cd   : > { %2831 = vst [vmem:[%s5916_s13 + $0x78] sm:$0xff] %v2815_v17 }
 0x3ce   : > { %3886 = shalt.err (!%p3883_p9)
}
 0x3cf   : > { %s3955_s16 = smov 128   ;;  %s3956_s13 = smov 8  }
 0x3d0   : > { %3767 = dma.vmem_to_hbm [thread:$0]  (%p4043_p3), %s2848_s30, 2048, %s2850_s18, %s2833_s19, %s3955_s16, %s3955_s16, %s3956_s13  }
 0x3d1 PF: > { %p3773_p10 = scmp.ge.s32.totalorder %s3953_s28, 2  ;;  %s2864_s14 = sand.u32 1, %s3925_s21  }
 0x3d2   : > { %s2865_s26 = scalar_lea.sflag [#allocation3], %s2864_s14 }
 0x3d3   : > { %p3770_p11 = pnand %p3773_p10, %p4052_p8 }
 0x3d5   : > { %p3771_p12 = pneg %p3770_p11 }
 0x3d7   : > { %3920 = dma.done.wait (%p3771_p12), %s2865_s26, 2048  }
 0x3d8   : > { %3922 = vsyncadd (%p3771_p12), %s2865_s26, 4294965248  ;;  %s19_s28 = sadd.s32 1, %s3953_s28   ;;  %s6202_s24 = sld [smem:[#allocation9_spill]] }
 0x3d9   : > { %p16_p13 = scmp.ge.s32.totalorder %s19_s28, 6   ;;  %s6203_s10 = sld [smem:[#allocation5_spill]] }
 0x3da   : > { %s6204_s25 = sld [smem:[#allocation6_spill]]  ;;  %s6207_s21 = smov %s3929_s22 }
 0x3db   : > { %s6205_s26 = sld [smem:[#allocation7_spill]]  ;;  %s6208_s22 = smov %s3933_s23 }
 0x3dc   : > { %s6206_s27 = sld [smem:[#allocation8_spill]]  ;;  %18 = sbr.rel (!%p16_p13) target bundleno = 5 (0x5), region = 82 }
 0x3de   : > { %s6209_s23 = smov %s6202_s24 }
 0x3df   : > { %s6210_s24 = smov %s6203_s10 }
 0x3e1   :  { %2871 = vsyncpa [#allocation3], 1 }
 0x3e2   :  { %2873 = vsyncpa [#allocation3 + $0x1], 1 }

</bundles_post_ra>
